<compile_context>
chip_gen: v5e
topology: v5e:2x2
jax: 0.10.0
libtpu: 0.0.40
codegen_flags: <defaults>
</compile_context>

<pallas_src>
import jax
import jax.numpy as jnp
from jax import lax
from jax.experimental import pallas as pl
from jax.experimental.pallas import tpu as pltpu

_LANE = 128   # lanes per vreg
_SUB = 8      # f32 sublane rows per vreg


def _scan_kernel(w_ref, xs_ref, out_ref):
    """Bidirectional recurrence along the leading (scan) axis.

    w_ref  : (C, C)  SMEM    original module weight (NOT transposed)
    xs_ref : (L, C, 8, TM)   VMEM input slab; channel c is a dense (8, TM)
                             tile whose 8*TM entries are all M positions.
    out_ref: (2, L, C, 8, TM)  out[0] = forward scan, out[1] = backward scan
        fwd[0]   = x[0];    fwd[i] = x[i] + mix(fwd[i-1])
        bwd[L-1] = x[L-1];  bwd[i] = x[i] + mix(bwd[i+1])
        mix(s)[c] = sum_d weight[d, c] * s[d]    (matches torch.mm(prev, W))
    """
    L, C = xs_ref.shape[0], xs_ref.shape[1]

    # Hoist the C*C weight scalars out of the scan loop (SMEM scalar reads,
    # splatted by the multiplies below — no materialized weight tiles).
    w = [[w_ref[d, c] for d in range(C)] for c in range(C)]   # w[c][d] = W[d, c]

    def mix(state, c):
        acc = state[0] * w[c][0]
        for d in range(1, C):
            acc = acc + state[d] * w[c][d]
        return acc

    x0 = xs_ref[0]
    xL = xs_ref[L - 1]
    first = [x0[c] for c in range(C)]
    last = [xL[c] for c in range(C)]
    for c in range(C):
        out_ref[0, 0, c] = first[c]
        out_ref[1, L - 1, c] = last[c]

    def body(i, carry):
        cf, cb = carry
        j = L - 1 - i
        xi = xs_ref[i]                       # (C, 8, TM)
        xj = xs_ref[j]
        # Two independent dependence chains (fwd & bwd) interleaved for ILP;
        # all per-step work is pure VPU scalar-coefficient MACs.
        nf = [xi[c] + mix(cf, c) for c in range(C)]
        nb = [xj[c] + mix(cb, c) for c in range(C)]
        for c in range(C):
            out_ref[0, i, c] = nf[c]
            out_ref[1, j, c] = nb[c]
        return nf, nb

    trip = L - 1
    if trip > 0:
        unroll = trip if trip <= 16 else 8
        lax.fori_loop(1, L, body, (first, last), unroll=unroll)


def _vmem_budget_limit():
    """Generation-aware (physical VMEM, live-footprint budget, scoped limit)."""
    cap = None
    try:
        info = pltpu.get_tpu_info()
        cap = getattr(info, "vmem_capacity_bytes", None)
    except Exception:
        cap = None
    if not cap:
        cap = 64 * 1024 * 1024                       # conservative: v7x per-TC
    if cap >= 128 * 1024 * 1024:                     # v5e / v6e
        return cap, 56 * 1024 * 1024, 96 * 1024 * 1024
    return cap, 36 * 1024 * 1024, 48 * 1024 * 1024   # 64 MiB parts: keep headroom


def _choose_tile(S, C, ml_needed, budget):
    """Pick the lane tile TM (multiple of 128).

    Exact double-buffered live footprint per lane column (sublane dim is
    exactly 8, so no hidden padding): 2 bufs * (1 in + 2 out dirs) * S*C*8*4B.
    TM is also capped for vreg pressure: the two live carries hold 2*C*(8*TM)
    f32 across the unrolled scan loop; keep them <= ~16 vregs.
    """
    bytes_per_lane = 2 * (1 + 2) * S * C * _SUB * 4
    vmem_cap = (budget // bytes_per_lane) // _LANE * _LANE
    vreg_cap = max(_LANE, (1024 // max(C, 1)) // _LANE * _LANE)
    need_cap = pl.cdiv(ml_needed, _LANE) * _LANE     # don't tile past the data
    tm = min(512, vreg_cap, need_cap)
    if vmem_cap >= _LANE:
        tm = min(tm, vmem_cap)
    tm = max(tm, _LANE)
    return tm, bytes_per_lane


def recurrent_prop(data_nchw, weight):
    """Pallas port of RecurrentProp.forward.  NCHW in -> (N, 4C, H, W) out."""
    N, C, H, W = data_nchw.shape
    assert C == weight.shape[0], f"{C} vs {weight.shape[0]}"
    # The PyTorch module's reshape (N*W, C) -> (N, H, C) requires H == W.
    assert H == W, "module's reshape requires H == W"
    S = H
    M = N * S

    x = data_nchw.astype(jnp.float32)
    wgt = jnp.asarray(weight, jnp.float32)           # (C, C), used as in torch.mm

    cap, budget, limit = _vmem_budget_limit()
    ml_needed = pl.cdiv(M, _SUB)                      # lanes needed (8 M-rows each)
    tm, bytes_per_lane = _choose_tile(S, C, ml_needed, budget)
    ml_total = pl.cdiv(ml_needed, tm) * tm            # pad M up to a multiple of tm
    mp = _SUB * ml_total

    footprint = bytes_per_lane * tm
    if footprint + (4 << 20) > limit:                 # floor tile still too big
        limit = max(limit, min(int(cap * 0.85), footprint + (8 << 20)))

    # Scan slabs, stacked on a leading "orientation" axis:
    #   xs[0, w, c, n*H + h] = x[n, c, h, w]   (scan along W)
    #   xs[1, h, c, n*W + w] = x[n, c, h, w]   (scan along H)
    xs_w = jnp.transpose(x, (3, 1, 0, 2)).reshape(W, C, M)
    xs_h = jnp.transpose(x, (2, 1, 0, 3)).reshape(H, C, M)
    xs = jnp.stack((xs_w, xs_h), axis=0)              # (2, S, C, M)
    if mp != M:
        xs = jnp.pad(xs, ((0, 0), (0, 0), (0, 0), (0, mp - M)))
    # Split M over (8 sublanes, ml_total lanes) so every channel tile is dense.
    xs = xs.reshape(2, S, C, _SUB, ml_total)

    grid = (2, ml_total // tm)                        # (orientation, M-lane tiles)

    out = pl.pallas_call(
        _scan_kernel,
        out_shape=jax.ShapeDtypeStruct((4, S, C, _SUB, ml_total), jnp.float32),
        grid=grid,
        in_specs=[
            pl.BlockSpec(memory_space=pltpu.MemorySpace.SMEM),            # weight
            pl.BlockSpec((None, S, C, _SUB, tm), lambda o, m: (o, 0, 0, 0, m)),
        ],
        out_specs=pl.BlockSpec((2, S, C, _SUB, tm), lambda o, m: (o, 0, 0, 0, m)),
        compiler_params=pltpu.CompilerParams(
            dimension_semantics=("parallel", "parallel"),
            vmem_limit_bytes=int(limit),
        ),
    )(wgt, xs)

    # out rows: 0=left->right, 1=right->left, 2=top->bottom, 3=bottom->top
    out = out.reshape(4, S, C, mp)
    if mp != M:
        out = out[..., :M]                            # fuses with the transposes
    out5 = out.reshape(4, S, C, N, S)
    # W-scans: [d, w, c, n, h] -> (n, d, c, h, w) -> (N, 2C, H, W)
    wpart = jnp.transpose(out5[0:2], (3, 0, 2, 4, 1)).reshape(N, 2 * C, H, W)
    # H-scans: [d, h, c, n, w] -> (n, d, c, h, w) -> (N, 2C, H, W)
    hpart = jnp.transpose(out5[2:4], (3, 0, 2, 1, 4)).reshape(N, 2 * C, H, W)
    return jnp.concatenate((wpart, hpart), axis=1)    # (N, 4C, H, W)


def _reference(data, weight):
    """Pure-JAX replica of the PyTorch forward, for correctness checking."""
    N, C, H, W = data.shape
    mix_h = lambda s: jnp.einsum("nch,cd->ndh", s, weight)  # (N,C,H) slabs
    mix_w = lambda s: jnp.einsum("ncw,cd->ndw", s, weight)  # (N,C,W) slabs

    o0 = [data[:, :, :, 0]]
    for x in range(1, W):
        o0.append(data[:, :, :, x] + mix_h(o0[-1]))
    o0 = jnp.stack(o0, axis=-1)

    o1 = [data[:, :, :, W - 1]]
    for x in range(W - 2, -1, -1):
        o1.append(data[:, :, :, x] + mix_h(o1[-1]))
    o1 = jnp.stack(o1[::-1], axis=-1)

    o2 = [data[:, :, 0, :]]
    for y in range(1, H):
        o2.append(data[:, :, y, :] + mix_w(o2[-1]))
    o2 = jnp.stack(o2, axis=2)

    o3 = [data[:, :, H - 1, :]]
    for y in range(H - 2, -1, -1):
        o3.append(data[:, :, y, :] + mix_w(o3[-1]))
    o3 = jnp.stack(o3[::-1], axis=2)

    return jnp.concatenate((o0, o1, o2, o3), axis=1)


if __name__ == "__main__":
    N, C, H, W = 2, 4, 16, 16
    key = jax.random.PRNGKey(0)
    kd, kw = jax.random.split(key)
    data = jax.random.normal(kd, (N, C, H, W), dtype=jnp.float32)
    # Module __init__ uses eye(C); perturb it so the channel mixing is really
    # exercised (a pure identity would hide any channel-orientation bug).
    weight = jnp.eye(C, dtype=jnp.float32) + 0.1 * jax.random.normal(
        kw, (C, C), dtype=jnp.float32)

    out = jax.block_until_ready(jax.jit(recurrent_prop)(data, weight))
    assert out.shape == (N, 4 * C, H, W), out.shape

    ref = _reference(data, weight)
    rel_err = float(jnp.max(jnp.abs(out - ref)) / (jnp.max(jnp.abs(ref)) + 1e-6))
    assert rel_err < 1e-4, rel_err

    print("KERNEL_OK")
</pallas_src>

<mosaic_0001>
module attributes {stable_mosaic.version = 11 : i64} {
  func.func @_scan_kernel(%arg0: i32, %arg1: i32, %arg2: memref<4x4xf32, #tpu.memory_space<smem>>, %arg3: memref<1x16x4x8x128xf32, #tpu.memory_space<vmem>>, %arg4: memref<2x16x4x8x128xf32, #tpu.memory_space<vmem>>) attributes {dimension_semantics = [#tpu.dimension_semantics<parallel>, #tpu.dimension_semantics<parallel>], iteration_bounds = array<i64: 2, 1>, scalar_prefetch = 0 : i64, scratch_operands = 0 : i64, tpu.core_type = #tpu.core_type<tc>, window_params = [{transform_indices = @transform_0, window_bounds = array<i64: 4, 4>}, {transform_indices = @transform_1, window_bounds = array<i64: 1, 16, 4, 8, 128>}, {transform_indices = @transform_2, window_bounds = array<i64: 2, 16, 4, 8, 128>}]} {
    %c0 = arith.constant 0 : index
    %c0_0 = arith.constant 0 : index
    %0 = memref.load %arg2[%c0, %c0_0] : memref<4x4xf32, #tpu.memory_space<smem>>
    %c1 = arith.constant 1 : index
    %c0_1 = arith.constant 0 : index
    %1 = memref.load %arg2[%c1, %c0_1] : memref<4x4xf32, #tpu.memory_space<smem>>
    %c2 = arith.constant 2 : index
    %c0_2 = arith.constant 0 : index
    %2 = memref.load %arg2[%c2, %c0_2] : memref<4x4xf32, #tpu.memory_space<smem>>
    %c3 = arith.constant 3 : index
    %c0_3 = arith.constant 0 : index
    %3 = memref.load %arg2[%c3, %c0_3] : memref<4x4xf32, #tpu.memory_space<smem>>
    %c0_4 = arith.constant 0 : index
    %c1_5 = arith.constant 1 : index
    %4 = memref.load %arg2[%c0_4, %c1_5] : memref<4x4xf32, #tpu.memory_space<smem>>
    %c1_6 = arith.constant 1 : index
    %c1_7 = arith.constant 1 : index
    %5 = memref.load %arg2[%c1_6, %c1_7] : memref<4x4xf32, #tpu.memory_space<smem>>
    %c2_8 = arith.constant 2 : index
    %c1_9 = arith.constant 1 : index
    %6 = memref.load %arg2[%c2_8, %c1_9] : memref<4x4xf32, #tpu.memory_space<smem>>
    %c3_10 = arith.constant 3 : index
    %c1_11 = arith.constant 1 : index
    %7 = memref.load %arg2[%c3_10, %c1_11] : memref<4x4xf32, #tpu.memory_space<smem>>
    %c0_12 = arith.constant 0 : index
    %c2_13 = arith.constant 2 : index
    %8 = memref.load %arg2[%c0_12, %c2_13] : memref<4x4xf32, #tpu.memory_space<smem>>
    %c1_14 = arith.constant 1 : index
    %c2_15 = arith.constant 2 : index
    %9 = memref.load %arg2[%c1_14, %c2_15] : memref<4x4xf32, #tpu.memory_space<smem>>
    %c2_16 = arith.constant 2 : index
    %c2_17 = arith.constant 2 : index
    %10 = memref.load %arg2[%c2_16, %c2_17] : memref<4x4xf32, #tpu.memory_space<smem>>
    %c3_18 = arith.constant 3 : index
    %c2_19 = arith.constant 2 : index
    %11 = memref.load %arg2[%c3_18, %c2_19] : memref<4x4xf32, #tpu.memory_space<smem>>
    %c0_20 = arith.constant 0 : index
    %c3_21 = arith.constant 3 : index
    %12 = memref.load %arg2[%c0_20, %c3_21] : memref<4x4xf32, #tpu.memory_space<smem>>
    %c1_22 = arith.constant 1 : index
    %c3_23 = arith.constant 3 : index
    %13 = memref.load %arg2[%c1_22, %c3_23] : memref<4x4xf32, #tpu.memory_space<smem>>
    %c2_24 = arith.constant 2 : index
    %c3_25 = arith.constant 3 : index
    %14 = memref.load %arg2[%c2_24, %c3_25] : memref<4x4xf32, #tpu.memory_space<smem>>
    %c3_26 = arith.constant 3 : index
    %c3_27 = arith.constant 3 : index
    %15 = memref.load %arg2[%c3_26, %c3_27] : memref<4x4xf32, #tpu.memory_space<smem>>
    %c0_28 = arith.constant 0 : index
    %c0_29 = arith.constant 0 : index
    %c0_30 = arith.constant 0 : index
    %c0_31 = arith.constant 0 : index
    %c0_32 = arith.constant 0 : index
    %16 = vector.load %arg3[%c0_28, %c0_29, %c0_30, %c0_31, %c0_32] : memref<1x16x4x8x128xf32, #tpu.memory_space<vmem>>, vector<1x1x4x8x128xf32>
    %17 = vector.shape_cast %16 : vector<1x1x4x8x128xf32> to vector<4x8x128xf32>
    %c0_33 = arith.constant 0 : index
    %c15 = arith.constant 15 : index
    %c0_34 = arith.constant 0 : index
    %c0_35 = arith.constant 0 : index
    %c0_36 = arith.constant 0 : index
    %18 = vector.load %arg3[%c0_33, %c15, %c0_34, %c0_35, %c0_36] : memref<1x16x4x8x128xf32, #tpu.memory_space<vmem>>, vector<1x1x4x8x128xf32>
    %19 = vector.shape_cast %18 : vector<1x1x4x8x128xf32> to vector<4x8x128xf32>
    %20 = vector.extract_strided_slice %17 {offsets = [0, 0, 0], sizes = [1, 8, 128], strides = [1, 1, 1]} : vector<4x8x128xf32> to vector<1x8x128xf32>
    %21 = vector.shape_cast %20 : vector<1x8x128xf32> to vector<8x128xf32>
    %22 = vector.extract_strided_slice %17 {offsets = [1, 0, 0], sizes = [1, 8, 128], strides = [1, 1, 1]} : vector<4x8x128xf32> to vector<1x8x128xf32>
    %23 = vector.shape_cast %22 : vector<1x8x128xf32> to vector<8x128xf32>
    %24 = vector.extract_strided_slice %17 {offsets = [2, 0, 0], sizes = [1, 8, 128], strides = [1, 1, 1]} : vector<4x8x128xf32> to vector<1x8x128xf32>
    %25 = vector.shape_cast %24 : vector<1x8x128xf32> to vector<8x128xf32>
    %26 = vector.extract_strided_slice %17 {offsets = [3, 0, 0], sizes = [1, 8, 128], strides = [1, 1, 1]} : vector<4x8x128xf32> to vector<1x8x128xf32>
    %27 = vector.shape_cast %26 : vector<1x8x128xf32> to vector<8x128xf32>
    %28 = vector.extract_strided_slice %19 {offsets = [0, 0, 0], sizes = [1, 8, 128], strides = [1, 1, 1]} : vector<4x8x128xf32> to vector<1x8x128xf32>
    %29 = vector.shape_cast %28 : vector<1x8x128xf32> to vector<8x128xf32>
    %30 = vector.extract_strided_slice %19 {offsets = [1, 0, 0], sizes = [1, 8, 128], strides = [1, 1, 1]} : vector<4x8x128xf32> to vector<1x8x128xf32>
    %31 = vector.shape_cast %30 : vector<1x8x128xf32> to vector<8x128xf32>
    %32 = vector.extract_strided_slice %19 {offsets = [2, 0, 0], sizes = [1, 8, 128], strides = [1, 1, 1]} : vector<4x8x128xf32> to vector<1x8x128xf32>
    %33 = vector.shape_cast %32 : vector<1x8x128xf32> to vector<8x128xf32>
    %34 = vector.extract_strided_slice %19 {offsets = [3, 0, 0], sizes = [1, 8, 128], strides = [1, 1, 1]} : vector<4x8x128xf32> to vector<1x8x128xf32>
    %35 = vector.shape_cast %34 : vector<1x8x128xf32> to vector<8x128xf32>
    %c0_37 = arith.constant 0 : index
    %c0_38 = arith.constant 0 : index
    %c0_39 = arith.constant 0 : index
    %c0_40 = arith.constant 0 : index
    %c0_41 = arith.constant 0 : index
    %36 = vector.load %arg4[%c0_37, %c0_38, %c0_39, %c0_40, %c0_41] : memref<2x16x4x8x128xf32, #tpu.memory_space<vmem>>, vector<1x1x1x8x128xf32>
    %37 = vector.shape_cast %36 : vector<1x1x1x8x128xf32> to vector<8x128xf32>
    %38 = vector.shape_cast %21 : vector<8x128xf32> to vector<1x1x1x8x128xf32>
    tpu.vector_store %arg4[%c0_37, %c0_38, %c0_39, %c0_40, %c0_41], %38 {strides = array<i32>} : memref<2x16x4x8x128xf32, #tpu.memory_space<vmem>>, vector<1x1x1x8x128xf32>,
    %c1_42 = arith.constant 1 : index
    %c15_43 = arith.constant 15 : index
    %c0_44 = arith.constant 0 : index
    %c0_45 = arith.constant 0 : index
    %c0_46 = arith.constant 0 : index
    %39 = vector.load %arg4[%c1_42, %c15_43, %c0_44, %c0_45, %c0_46] : memref<2x16x4x8x128xf32, #tpu.memory_space<vmem>>, vector<1x1x1x8x128xf32>
    %40 = vector.shape_cast %39 : vector<1x1x1x8x128xf32> to vector<8x128xf32>
    %41 = vector.shape_cast %29 : vector<8x128xf32> to vector<1x1x1x8x128xf32>
    tpu.vector_store %arg4[%c1_42, %c15_43, %c0_44, %c0_45, %c0_46], %41 {strides = array<i32>} : memref<2x16x4x8x128xf32, #tpu.memory_space<vmem>>, vector<1x1x1x8x128xf32>,
    %c0_47 = arith.constant 0 : index
    %c0_48 = arith.constant 0 : index
    %c1_49 = arith.constant 1 : index
    %c0_50 = arith.constant 0 : index
    %c0_51 = arith.constant 0 : index
    %42 = vector.load %arg4[%c0_47, %c0_48, %c1_49, %c0_50, %c0_51] : memref<2x16x4x8x128xf32, #tpu.memory_space<vmem>>, vector<1x1x1x8x128xf32>
    %43 = vector.shape_cast %42 : vector<1x1x1x8x128xf32> to vector<8x128xf32>
    %44 = vector.shape_cast %23 : vector<8x128xf32> to vector<1x1x1x8x128xf32>
    tpu.vector_store %arg4[%c0_47, %c0_48, %c1_49, %c0_50, %c0_51], %44 {strides = array<i32>} : memref<2x16x4x8x128xf32, #tpu.memory_space<vmem>>, vector<1x1x1x8x128xf32>,
    %c1_52 = arith.constant 1 : index
    %c15_53 = arith.constant 15 : index
    %c1_54 = arith.constant 1 : index
    %c0_55 = arith.constant 0 : index
    %c0_56 = arith.constant 0 : index
    %45 = vector.load %arg4[%c1_52, %c15_53, %c1_54, %c0_55, %c0_56] : memref<2x16x4x8x128xf32, #tpu.memory_space<vmem>>, vector<1x1x1x8x128xf32>
    %46 = vector.shape_cast %45 : vector<1x1x1x8x128xf32> to vector<8x128xf32>
    %47 = vector.shape_cast %31 : vector<8x128xf32> to vector<1x1x1x8x128xf32>
    tpu.vector_store %arg4[%c1_52, %c15_53, %c1_54, %c0_55, %c0_56], %47 {strides = array<i32>} : memref<2x16x4x8x128xf32, #tpu.memory_space<vmem>>, vector<1x1x1x8x128xf32>,
    %c0_57 = arith.constant 0 : index
    %c0_58 = arith.constant 0 : index
    %c2_59 = arith.constant 2 : index
    %c0_60 = arith.constant 0 : index
    %c0_61 = arith.constant 0 : index
    %48 = vector.load %arg4[%c0_57, %c0_58, %c2_59, %c0_60, %c0_61] : memref<2x16x4x8x128xf32, #tpu.memory_space<vmem>>, vector<1x1x1x8x128xf32>
    %49 = vector.shape_cast %48 : vector<1x1x1x8x128xf32> to vector<8x128xf32>
    %50 = vector.shape_cast %25 : vector<8x128xf32> to vector<1x1x1x8x128xf32>
    tpu.vector_store %arg4[%c0_57, %c0_58, %c2_59, %c0_60, %c0_61], %50 {strides = array<i32>} : memref<2x16x4x8x128xf32, #tpu.memory_space<vmem>>, vector<1x1x1x8x128xf32>,
    %c1_62 = arith.constant 1 : index
    %c15_63 = arith.constant 15 : index
    %c2_64 = arith.constant 2 : index
    %c0_65 = arith.constant 0 : index
    %c0_66 = arith.constant 0 : index
    %51 = vector.load %arg4[%c1_62, %c15_63, %c2_64, %c0_65, %c0_66] : memref<2x16x4x8x128xf32, #tpu.memory_space<vmem>>, vector<1x1x1x8x128xf32>
    %52 = vector.shape_cast %51 : vector<1x1x1x8x128xf32> to vector<8x128xf32>
    %53 = vector.shape_cast %33 : vector<8x128xf32> to vector<1x1x1x8x128xf32>
    tpu.vector_store %arg4[%c1_62, %c15_63, %c2_64, %c0_65, %c0_66], %53 {strides = array<i32>} : memref<2x16x4x8x128xf32, #tpu.memory_space<vmem>>, vector<1x1x1x8x128xf32>,
    %c0_67 = arith.constant 0 : index
    %c0_68 = arith.constant 0 : index
    %c3_69 = arith.constant 3 : index
    %c0_70 = arith.constant 0 : index
    %c0_71 = arith.constant 0 : index
    %54 = vector.load %arg4[%c0_67, %c0_68, %c3_69, %c0_70, %c0_71] : memref<2x16x4x8x128xf32, #tpu.memory_space<vmem>>, vector<1x1x1x8x128xf32>
    %55 = vector.shape_cast %54 : vector<1x1x1x8x128xf32> to vector<8x128xf32>
    %56 = vector.shape_cast %27 : vector<8x128xf32> to vector<1x1x1x8x128xf32>
    tpu.vector_store %arg4[%c0_67, %c0_68, %c3_69, %c0_70, %c0_71], %56 {strides = array<i32>} : memref<2x16x4x8x128xf32, #tpu.memory_space<vmem>>, vector<1x1x1x8x128xf32>,
    %c1_72 = arith.constant 1 : index
    %c15_73 = arith.constant 15 : index
    %c3_74 = arith.constant 3 : index
    %c0_75 = arith.constant 0 : index
    %c0_76 = arith.constant 0 : index
    %57 = vector.load %arg4[%c1_72, %c15_73, %c3_74, %c0_75, %c0_76] : memref<2x16x4x8x128xf32, #tpu.memory_space<vmem>>, vector<1x1x1x8x128xf32>
    %58 = vector.shape_cast %57 : vector<1x1x1x8x128xf32> to vector<8x128xf32>
    %59 = vector.shape_cast %35 : vector<8x128xf32> to vector<1x1x1x8x128xf32>
    tpu.vector_store %arg4[%c1_72, %c15_73, %c3_74, %c0_75, %c0_76], %59 {strides = array<i32>} : memref<2x16x4x8x128xf32, #tpu.memory_space<vmem>>, vector<1x1x1x8x128xf32>,
    %c1_i32 = arith.constant 1 : i32
    %c15_i32 = arith.constant 15 : i32
    %60 = arith.subi %c15_i32, %c1_i32 : i32
    %c0_77 = arith.constant 0 : index
    %61 = arith.index_cast %c1_i32 : i32 to index
    %c0_78 = arith.constant 0 : index
    %c0_79 = arith.constant 0 : index
    %c0_80 = arith.constant 0 : index
    %62 = vector.load %arg3[%c0_77, %61, %c0_78, %c0_79, %c0_80] : memref<1x16x4x8x128xf32, #tpu.memory_space<vmem>>, vector<1x1x4x8x128xf32>
    %63 = vector.shape_cast %62 : vector<1x1x4x8x128xf32> to vector<4x8x128xf32>
    %c0_81 = arith.constant 0 : index
    %64 = arith.index_cast %60 : i32 to index
    %c0_82 = arith.constant 0 : index
    %c0_83 = arith.constant 0 : index
    %c0_84 = arith.constant 0 : index
    %65 = vector.load %arg3[%c0_81, %64, %c0_82, %c0_83, %c0_84] : memref<1x16x4x8x128xf32, #tpu.memory_space<vmem>>, vector<1x1x4x8x128xf32>
    %66 = vector.shape_cast %65 : vector<1x1x4x8x128xf32> to vector<4x8x128xf32>
    %67 = vector.extract_strided_slice %63 {offsets = [0, 0, 0], sizes = [1, 8, 128], strides = [1, 1, 1]} : vector<4x8x128xf32> to vector<1x8x128xf32>
    %68 = vector.shape_cast %67 : vector<1x8x128xf32> to vector<8x128xf32>
    %69 = vector.broadcast %0 : f32 to vector<8x128xf32>
    %70 = arith.mulf %21, %69 : vector<8x128xf32>
    %71 = vector.broadcast %1 : f32 to vector<8x128xf32>
    %72 = arith.mulf %23, %71 : vector<8x128xf32>
    %73 = arith.addf %70, %72 : vector<8x128xf32>
    %74 = vector.broadcast %2 : f32 to vector<8x128xf32>
    %75 = arith.mulf %25, %74 : vector<8x128xf32>
    %76 = arith.addf %73, %75 : vector<8x128xf32>
    %77 = vector.broadcast %3 : f32 to vector<8x128xf32>
    %78 = arith.mulf %27, %77 : vector<8x128xf32>
    %79 = arith.addf %76, %78 : vector<8x128xf32>
    %80 = arith.addf %68, %79 : vector<8x128xf32>
    %81 = vector.extract_strided_slice %63 {offsets = [1, 0, 0], sizes = [1, 8, 128], strides = [1, 1, 1]} : vector<4x8x128xf32> to vector<1x8x128xf32>
    %82 = vector.shape_cast %81 : vector<1x8x128xf32> to vector<8x128xf32>
    %83 = vector.broadcast %4 : f32 to vector<8x128xf32>
    %84 = arith.mulf %21, %83 : vector<8x128xf32>
    %85 = vector.broadcast %5 : f32 to vector<8x128xf32>
    %86 = arith.mulf %23, %85 : vector<8x128xf32>
    %87 = arith.addf %84, %86 : vector<8x128xf32>
    %88 = vector.broadcast %6 : f32 to vector<8x128xf32>
    %89 = arith.mulf %25, %88 : vector<8x128xf32>
    %90 = arith.addf %87, %89 : vector<8x128xf32>
    %91 = vector.broadcast %7 : f32 to vector<8x128xf32>
    %92 = arith.mulf %27, %91 : vector<8x128xf32>
    %93 = arith.addf %90, %92 : vector<8x128xf32>
    %94 = arith.addf %82, %93 : vector<8x128xf32>
    %95 = vector.extract_strided_slice %63 {offsets = [2, 0, 0], sizes = [1, 8, 128], strides = [1, 1, 1]} : vector<4x8x128xf32> to vector<1x8x128xf32>
    %96 = vector.shape_cast %95 : vector<1x8x128xf32> to vector<8x128xf32>
    %97 = vector.broadcast %8 : f32 to vector<8x128xf32>
    %98 = arith.mulf %21, %97 : vector<8x128xf32>
    %99 = vector.broadcast %9 : f32 to vector<8x128xf32>
    %100 = arith.mulf %23, %99 : vector<8x128xf32>
    %101 = arith.addf %98, %100 : vector<8x128xf32>
    %102 = vector.broadcast %10 : f32 to vector<8x128xf32>
    %103 = arith.mulf %25, %102 : vector<8x128xf32>
    %104 = arith.addf %101, %103 : vector<8x128xf32>
    %105 = vector.broadcast %11 : f32 to vector<8x128xf32>
    %106 = arith.mulf %27, %105 : vector<8x128xf32>
    %107 = arith.addf %104, %106 : vector<8x128xf32>
    %108 = arith.addf %96, %107 : vector<8x128xf32>
    %109 = vector.extract_strided_slice %63 {offsets = [3, 0, 0], sizes = [1, 8, 128], strides = [1, 1, 1]} : vector<4x8x128xf32> to vector<1x8x128xf32>
    %110 = vector.shape_cast %109 : vector<1x8x128xf32> to vector<8x128xf32>
    %111 = vector.broadcast %12 : f32 to vector<8x128xf32>
    %112 = arith.mulf %21, %111 : vector<8x128xf32>
    %113 = vector.broadcast %13 : f32 to vector<8x128xf32>
    %114 = arith.mulf %23, %113 : vector<8x128xf32>
    %115 = arith.addf %112, %114 : vector<8x128xf32>
    %116 = vector.broadcast %14 : f32 to vector<8x128xf32>
    %117 = arith.mulf %25, %116 : vector<8x128xf32>
    %118 = arith.addf %115, %117 : vector<8x128xf32>
    %119 = vector.broadcast %15 : f32 to vector<8x128xf32>
    %120 = arith.mulf %27, %119 : vector<8x128xf32>
    %121 = arith.addf %118, %120 : vector<8x128xf32>
    %122 = arith.addf %110, %121 : vector<8x128xf32>
    %123 = vector.extract_strided_slice %66 {offsets = [0, 0, 0], sizes = [1, 8, 128], strides = [1, 1, 1]} : vector<4x8x128xf32> to vector<1x8x128xf32>
    %124 = vector.shape_cast %123 : vector<1x8x128xf32> to vector<8x128xf32>
    %125 = vector.broadcast %0 : f32 to vector<8x128xf32>
    %126 = arith.mulf %29, %125 : vector<8x128xf32>
    %127 = vector.broadcast %1 : f32 to vector<8x128xf32>
    %128 = arith.mulf %31, %127 : vector<8x128xf32>
    %129 = arith.addf %126, %128 : vector<8x128xf32>
    %130 = vector.broadcast %2 : f32 to vector<8x128xf32>
    %131 = arith.mulf %33, %130 : vector<8x128xf32>
    %132 = arith.addf %129, %131 : vector<8x128xf32>
    %133 = vector.broadcast %3 : f32 to vector<8x128xf32>
    %134 = arith.mulf %35, %133 : vector<8x128xf32>
    %135 = arith.addf %132, %134 : vector<8x128xf32>
    %136 = arith.addf %124, %135 : vector<8x128xf32>
    %137 = vector.extract_strided_slice %66 {offsets = [1, 0, 0], sizes = [1, 8, 128], strides = [1, 1, 1]} : vector<4x8x128xf32> to vector<1x8x128xf32>
    %138 = vector.shape_cast %137 : vector<1x8x128xf32> to vector<8x128xf32>
    %139 = vector.broadcast %4 : f32 to vector<8x128xf32>
    %140 = arith.mulf %29, %139 : vector<8x128xf32>
    %141 = vector.broadcast %5 : f32 to vector<8x128xf32>
    %142 = arith.mulf %31, %141 : vector<8x128xf32>
    %143 = arith.addf %140, %142 : vector<8x128xf32>
    %144 = vector.broadcast %6 : f32 to vector<8x128xf32>
    %145 = arith.mulf %33, %144 : vector<8x128xf32>
    %146 = arith.addf %143, %145 : vector<8x128xf32>
    %147 = vector.broadcast %7 : f32 to vector<8x128xf32>
    %148 = arith.mulf %35, %147 : vector<8x128xf32>
    %149 = arith.addf %146, %148 : vector<8x128xf32>
    %150 = arith.addf %138, %149 : vector<8x128xf32>
    %151 = vector.extract_strided_slice %66 {offsets = [2, 0, 0], sizes = [1, 8, 128], strides = [1, 1, 1]} : vector<4x8x128xf32> to vector<1x8x128xf32>
    %152 = vector.shape_cast %151 : vector<1x8x128xf32> to vector<8x128xf32>
    %153 = vector.broadcast %8 : f32 to vector<8x128xf32>
    %154 = arith.mulf %29, %153 : vector<8x128xf32>
    %155 = vector.broadcast %9 : f32 to vector<8x128xf32>
    %156 = arith.mulf %31, %155 : vector<8x128xf32>
    %157 = arith.addf %154, %156 : vector<8x128xf32>
    %158 = vector.broadcast %10 : f32 to vector<8x128xf32>
    %159 = arith.mulf %33, %158 : vector<8x128xf32>
    %160 = arith.addf %157, %159 : vector<8x128xf32>
    %161 = vector.broadcast %11 : f32 to vector<8x128xf32>
    %162 = arith.mulf %35, %161 : vector<8x128xf32>
    %163 = arith.addf %160, %162 : vector<8x128xf32>
    %164 = arith.addf %152, %163 : vector<8x128xf32>
    %165 = vector.extract_strided_slice %66 {offsets = [3, 0, 0], sizes = [1, 8, 128], strides = [1, 1, 1]} : vector<4x8x128xf32> to vector<1x8x128xf32>
    %166 = vector.shape_cast %165 : vector<1x8x128xf32> to vector<8x128xf32>
    %167 = vector.broadcast %12 : f32 to vector<8x128xf32>
    %168 = arith.mulf %29, %167 : vector<8x128xf32>
    %169 = vector.broadcast %13 : f32 to vector<8x128xf32>
    %170 = arith.mulf %31, %169 : vector<8x128xf32>
    %171 = arith.addf %168, %170 : vector<8x128xf32>
    %172 = vector.broadcast %14 : f32 to vector<8x128xf32>
    %173 = arith.mulf %33, %172 : vector<8x128xf32>
    %174 = arith.addf %171, %173 : vector<8x128xf32>
    %175 = vector.broadcast %15 : f32 to vector<8x128xf32>
    %176 = arith.mulf %35, %175 : vector<8x128xf32>
    %177 = arith.addf %174, %176 : vector<8x128xf32>
    %178 = arith.addf %166, %177 : vector<8x128xf32>
    %c0_85 = arith.constant 0 : index
    %179 = arith.index_cast %c1_i32 : i32 to index
    %c0_86 = arith.constant 0 : index
    %c0_87 = arith.constant 0 : index
    %c0_88 = arith.constant 0 : index
    %180 = vector.load %arg4[%c0_85, %179, %c0_86, %c0_87, %c0_88] : memref<2x16x4x8x128xf32, #tpu.memory_space<vmem>>, vector<1x1x1x8x128xf32>
    %181 = vector.shape_cast %180 : vector<1x1x1x8x128xf32> to vector<8x128xf32>
    %182 = vector.shape_cast %80 : vector<8x128xf32> to vector<1x1x1x8x128xf32>
    tpu.vector_store %arg4[%c0_85, %179, %c0_86, %c0_87, %c0_88], %182 {strides = array<i32>} : memref<2x16x4x8x128xf32, #tpu.memory_space<vmem>>, vector<1x1x1x8x128xf32>,
    %c1_89 = arith.constant 1 : index
    %183 = arith.index_cast %60 : i32 to index
    %c0_90 = arith.constant 0 : index
    %c0_91 = arith.constant 0 : index
    %c0_92 = arith.constant 0 : index
    %184 = vector.load %arg4[%c1_89, %183, %c0_90, %c0_91, %c0_92] : memref<2x16x4x8x128xf32, #tpu.memory_space<vmem>>, vector<1x1x1x8x128xf32>
    %185 = vector.shape_cast %184 : vector<1x1x1x8x128xf32> to vector<8x128xf32>
    %186 = vector.shape_cast %136 : vector<8x128xf32> to vector<1x1x1x8x128xf32>
    tpu.vector_store %arg4[%c1_89, %183, %c0_90, %c0_91, %c0_92], %186 {strides = array<i32>} : memref<2x16x4x8x128xf32, #tpu.memory_space<vmem>>, vector<1x1x1x8x128xf32>,
    %c0_93 = arith.constant 0 : index
    %187 = arith.index_cast %c1_i32 : i32 to index
    %c1_94 = arith.constant 1 : index
    %c0_95 = arith.constant 0 : index
    %c0_96 = arith.constant 0 : index
    %188 = vector.load %arg4[%c0_93, %187, %c1_94, %c0_95, %c0_96] : memref<2x16x4x8x128xf32, #tpu.memory_space<vmem>>, vector<1x1x1x8x128xf32>
    %189 = vector.shape_cast %188 : vector<1x1x1x8x128xf32> to vector<8x128xf32>
    %190 = vector.shape_cast %94 : vector<8x128xf32> to vector<1x1x1x8x128xf32>
    tpu.vector_store %arg4[%c0_93, %187, %c1_94, %c0_95, %c0_96], %190 {strides = array<i32>} : memref<2x16x4x8x128xf32, #tpu.memory_space<vmem>>, vector<1x1x1x8x128xf32>,
    %c1_97 = arith.constant 1 : index
    %191 = arith.index_cast %60 : i32 to index
    %c1_98 = arith.constant 1 : index
    %c0_99 = arith.constant 0 : index
    %c0_100 = arith.constant 0 : index
    %192 = vector.load %arg4[%c1_97, %191, %c1_98, %c0_99, %c0_100] : memref<2x16x4x8x128xf32, #tpu.memory_space<vmem>>, vector<1x1x1x8x128xf32>
    %193 = vector.shape_cast %192 : vector<1x1x1x8x128xf32> to vector<8x128xf32>
    %194 = vector.shape_cast %150 : vector<8x128xf32> to vector<1x1x1x8x128xf32>
    tpu.vector_store %arg4[%c1_97, %191, %c1_98, %c0_99, %c0_100], %194 {strides = array<i32>} : memref<2x16x4x8x128xf32, #tpu.memory_space<vmem>>, vector<1x1x1x8x128xf32>,
    %c0_101 = arith.constant 0 : index
    %195 = arith.index_cast %c1_i32 : i32 to index
    %c2_102 = arith.constant 2 : index
    %c0_103 = arith.constant 0 : index
    %c0_104 = arith.constant 0 : index
    %196 = vector.load %arg4[%c0_101, %195, %c2_102, %c0_103, %c0_104] : memref<2x16x4x8x128xf32, #tpu.memory_space<vmem>>, vector<1x1x1x8x128xf32>
    %197 = vector.shape_cast %196 : vector<1x1x1x8x128xf32> to vector<8x128xf32>
    %198 = vector.shape_cast %108 : vector<8x128xf32> to vector<1x1x1x8x128xf32>
    tpu.vector_store %arg4[%c0_101, %195, %c2_102, %c0_103, %c0_104], %198 {strides = array<i32>} : memref<2x16x4x8x128xf32, #tpu.memory_space<vmem>>, vector<1x1x1x8x128xf32>,
    %c1_105 = arith.constant 1 : index
    %199 = arith.index_cast %60 : i32 to index
    %c2_106 = arith.constant 2 : index
    %c0_107 = arith.constant 0 : index
    %c0_108 = arith.constant 0 : index
    %200 = vector.load %arg4[%c1_105, %199, %c2_106, %c0_107, %c0_108] : memref<2x16x4x8x128xf32, #tpu.memory_space<vmem>>, vector<1x1x1x8x128xf32>
    %201 = vector.shape_cast %200 : vector<1x1x1x8x128xf32> to vector<8x128xf32>
    %202 = vector.shape_cast %164 : vector<8x128xf32> to vector<1x1x1x8x128xf32>
    tpu.vector_store %arg4[%c1_105, %199, %c2_106, %c0_107, %c0_108], %202 {strides = array<i32>} : memref<2x16x4x8x128xf32, #tpu.memory_space<vmem>>, vector<1x1x1x8x128xf32>,
    %c0_109 = arith.constant 0 : index
    %203 = arith.index_cast %c1_i32 : i32 to index
    %c3_110 = arith.constant 3 : index
    %c0_111 = arith.constant 0 : index
    %c0_112 = arith.constant 0 : index
    %204 = vector.load %arg4[%c0_109, %203, %c3_110, %c0_111, %c0_112] : memref<2x16x4x8x128xf32, #tpu.memory_space<vmem>>, vector<1x1x1x8x128xf32>
    %205 = vector.shape_cast %204 : vector<1x1x1x8x128xf32> to vector<8x128xf32>
    %206 = vector.shape_cast %122 : vector<8x128xf32> to vector<1x1x1x8x128xf32>
    tpu.vector_store %arg4[%c0_109, %203, %c3_110, %c0_111, %c0_112], %206 {strides = array<i32>} : memref<2x16x4x8x128xf32, #tpu.memory_space<vmem>>, vector<1x1x1x8x128xf32>,
    %c1_113 = arith.constant 1 : index
    %207 = arith.index_cast %60 : i32 to index
    %c3_114 = arith.constant 3 : index
    %c0_115 = arith.constant 0 : index
    %c0_116 = arith.constant 0 : index
    %208 = vector.load %arg4[%c1_113, %207, %c3_114, %c0_115, %c0_116] : memref<2x16x4x8x128xf32, #tpu.memory_space<vmem>>, vector<1x1x1x8x128xf32>
    %209 = vector.shape_cast %208 : vector<1x1x1x8x128xf32> to vector<8x128xf32>
    %210 = vector.shape_cast %178 : vector<8x128xf32> to vector<1x1x1x8x128xf32>
    tpu.vector_store %arg4[%c1_113, %207, %c3_114, %c0_115, %c0_116], %210 {strides = array<i32>} : memref<2x16x4x8x128xf32, #tpu.memory_space<vmem>>, vector<1x1x1x8x128xf32>,
    %c2_i32 = arith.constant 2 : i32
    %c15_i32_117 = arith.constant 15 : i32
    %211 = arith.subi %c15_i32_117, %c2_i32 : i32
    %c0_118 = arith.constant 0 : index
    %212 = arith.index_cast %c2_i32 : i32 to index
    %c0_119 = arith.constant 0 : index
    %c0_120 = arith.constant 0 : index
    %c0_121 = arith.constant 0 : index
    %213 = vector.load %arg3[%c0_118, %212, %c0_119, %c0_120, %c0_121] : memref<1x16x4x8x128xf32, #tpu.memory_space<vmem>>, vector<1x1x4x8x128xf32>
    %214 = vector.shape_cast %213 : vector<1x1x4x8x128xf32> to vector<4x8x128xf32>
    %c0_122 = arith.constant 0 : index
    %215 = arith.index_cast %211 : i32 to index
    %c0_123 = arith.constant 0 : index
    %c0_124 = arith.constant 0 : index
    %c0_125 = arith.constant 0 : index
    %216 = vector.load %arg3[%c0_122, %215, %c0_123, %c0_124, %c0_125] : memref<1x16x4x8x128xf32, #tpu.memory_space<vmem>>, vector<1x1x4x8x128xf32>
    %217 = vector.shape_cast %216 : vector<1x1x4x8x128xf32> to vector<4x8x128xf32>
    %218 = vector.extract_strided_slice %214 {offsets = [0, 0, 0], sizes = [1, 8, 128], strides = [1, 1, 1]} : vector<4x8x128xf32> to vector<1x8x128xf32>
    %219 = vector.shape_cast %218 : vector<1x8x128xf32> to vector<8x128xf32>
    %220 = vector.broadcast %0 : f32 to vector<8x128xf32>
    %221 = arith.mulf %80, %220 : vector<8x128xf32>
    %222 = vector.broadcast %1 : f32 to vector<8x128xf32>
    %223 = arith.mulf %94, %222 : vector<8x128xf32>
    %224 = arith.addf %221, %223 : vector<8x128xf32>
    %225 = vector.broadcast %2 : f32 to vector<8x128xf32>
    %226 = arith.mulf %108, %225 : vector<8x128xf32>
    %227 = arith.addf %224, %226 : vector<8x128xf32>
    %228 = vector.broadcast %3 : f32 to vector<8x128xf32>
    %229 = arith.mulf %122, %228 : vector<8x128xf32>
    %230 = arith.addf %227, %229 : vector<8x128xf32>
    %231 = arith.addf %219, %230 : vector<8x128xf32>
    %232 = vector.extract_strided_slice %214 {offsets = [1, 0, 0], sizes = [1, 8, 128], strides = [1, 1, 1]} : vector<4x8x128xf32> to vector<1x8x128xf32>
    %233 = vector.shape_cast %232 : vector<1x8x128xf32> to vector<8x128xf32>
    %234 = vector.broadcast %4 : f32 to vector<8x128xf32>
    %235 = arith.mulf %80, %234 : vector<8x128xf32>
    %236 = vector.broadcast %5 : f32 to vector<8x128xf32>
    %237 = arith.mulf %94, %236 : vector<8x128xf32>
    %238 = arith.addf %235, %237 : vector<8x128xf32>
    %239 = vector.broadcast %6 : f32 to vector<8x128xf32>
    %240 = arith.mulf %108, %239 : vector<8x128xf32>
    %241 = arith.addf %238, %240 : vector<8x128xf32>
    %242 = vector.broadcast %7 : f32 to vector<8x128xf32>
    %243 = arith.mulf %122, %242 : vector<8x128xf32>
    %244 = arith.addf %241, %243 : vector<8x128xf32>
    %245 = arith.addf %233, %244 : vector<8x128xf32>
    %246 = vector.extract_strided_slice %214 {offsets = [2, 0, 0], sizes = [1, 8, 128], strides = [1, 1, 1]} : vector<4x8x128xf32> to vector<1x8x128xf32>
    %247 = vector.shape_cast %246 : vector<1x8x128xf32> to vector<8x128xf32>
    %248 = vector.broadcast %8 : f32 to vector<8x128xf32>
    %249 = arith.mulf %80, %248 : vector<8x128xf32>
    %250 = vector.broadcast %9 : f32 to vector<8x128xf32>
    %251 = arith.mulf %94, %250 : vector<8x128xf32>
    %252 = arith.addf %249, %251 : vector<8x128xf32>
    %253 = vector.broadcast %10 : f32 to vector<8x128xf32>
    %254 = arith.mulf %108, %253 : vector<8x128xf32>
    %255 = arith.addf %252, %254 : vector<8x128xf32>
    %256 = vector.broadcast %11 : f32 to vector<8x128xf32>
    %257 = arith.mulf %122, %256 : vector<8x128xf32>
    %258 = arith.addf %255, %257 : vector<8x128xf32>
    %259 = arith.addf %247, %258 : vector<8x128xf32>
    %260 = vector.extract_strided_slice %214 {offsets = [3, 0, 0], sizes = [1, 8, 128], strides = [1, 1, 1]} : vector<4x8x128xf32> to vector<1x8x128xf32>
    %261 = vector.shape_cast %260 : vector<1x8x128xf32> to vector<8x128xf32>
    %262 = vector.broadcast %12 : f32 to vector<8x128xf32>
    %263 = arith.mulf %80, %262 : vector<8x128xf32>
    %264 = vector.broadcast %13 : f32 to vector<8x128xf32>
    %265 = arith.mulf %94, %264 : vector<8x128xf32>
    %266 = arith.addf %263, %265 : vector<8x128xf32>
    %267 = vector.broadcast %14 : f32 to vector<8x128xf32>
    %268 = arith.mulf %108, %267 : vector<8x128xf32>
    %269 = arith.addf %266, %268 : vector<8x128xf32>
    %270 = vector.broadcast %15 : f32 to vector<8x128xf32>
    %271 = arith.mulf %122, %270 : vector<8x128xf32>
    %272 = arith.addf %269, %271 : vector<8x128xf32>
    %273 = arith.addf %261, %272 : vector<8x128xf32>
    %274 = vector.extract_strided_slice %217 {offsets = [0, 0, 0], sizes = [1, 8, 128], strides = [1, 1, 1]} : vector<4x8x128xf32> to vector<1x8x128xf32>
    %275 = vector.shape_cast %274 : vector<1x8x128xf32> to vector<8x128xf32>
    %276 = vector.broadcast %0 : f32 to vector<8x128xf32>
    %277 = arith.mulf %136, %276 : vector<8x128xf32>
    %278 = vector.broadcast %1 : f32 to vector<8x128xf32>
    %279 = arith.mulf %150, %278 : vector<8x128xf32>
    %280 = arith.addf %277, %279 : vector<8x128xf32>
    %281 = vector.broadcast %2 : f32 to vector<8x128xf32>
    %282 = arith.mulf %164, %281 : vector<8x128xf32>
    %283 = arith.addf %280, %282 : vector<8x128xf32>
    %284 = vector.broadcast %3 : f32 to vector<8x128xf32>
    %285 = arith.mulf %178, %284 : vector<8x128xf32>
    %286 = arith.addf %283, %285 : vector<8x128xf32>
    %287 = arith.addf %275, %286 : vector<8x128xf32>
    %288 = vector.extract_strided_slice %217 {offsets = [1, 0, 0], sizes = [1, 8, 128], strides = [1, 1, 1]} : vector<4x8x128xf32> to vector<1x8x128xf32>
    %289 = vector.shape_cast %288 : vector<1x8x128xf32> to vector<8x128xf32>
    %290 = vector.broadcast %4 : f32 to vector<8x128xf32>
    %291 = arith.mulf %136, %290 : vector<8x128xf32>
    %292 = vector.broadcast %5 : f32 to vector<8x128xf32>
    %293 = arith.mulf %150, %292 : vector<8x128xf32>
    %294 = arith.addf %291, %293 : vector<8x128xf32>
    %295 = vector.broadcast %6 : f32 to vector<8x128xf32>
    %296 = arith.mulf %164, %295 : vector<8x128xf32>
    %297 = arith.addf %294, %296 : vector<8x128xf32>
    %298 = vector.broadcast %7 : f32 to vector<8x128xf32>
    %299 = arith.mulf %178, %298 : vector<8x128xf32>
    %300 = arith.addf %297, %299 : vector<8x128xf32>
    %301 = arith.addf %289, %300 : vector<8x128xf32>
    %302 = vector.extract_strided_slice %217 {offsets = [2, 0, 0], sizes = [1, 8, 128], strides = [1, 1, 1]} : vector<4x8x128xf32> to vector<1x8x128xf32>
    %303 = vector.shape_cast %302 : vector<1x8x128xf32> to vector<8x128xf32>
    %304 = vector.broadcast %8 : f32 to vector<8x128xf32>
    %305 = arith.mulf %136, %304 : vector<8x128xf32>
    %306 = vector.broadcast %9 : f32 to vector<8x128xf32>
    %307 = arith.mulf %150, %306 : vector<8x128xf32>
    %308 = arith.addf %305, %307 : vector<8x128xf32>
    %309 = vector.broadcast %10 : f32 to vector<8x128xf32>
    %310 = arith.mulf %164, %309 : vector<8x128xf32>
    %311 = arith.addf %308, %310 : vector<8x128xf32>
    %312 = vector.broadcast %11 : f32 to vector<8x128xf32>
    %313 = arith.mulf %178, %312 : vector<8x128xf32>
    %314 = arith.addf %311, %313 : vector<8x128xf32>
    %315 = arith.addf %303, %314 : vector<8x128xf32>
    %316 = vector.extract_strided_slice %217 {offsets = [3, 0, 0], sizes = [1, 8, 128], strides = [1, 1, 1]} : vector<4x8x128xf32> to vector<1x8x128xf32>
    %317 = vector.shape_cast %316 : vector<1x8x128xf32> to vector<8x128xf32>
    %318 = vector.broadcast %12 : f32 to vector<8x128xf32>
    %319 = arith.mulf %136, %318 : vector<8x128xf32>
    %320 = vector.broadcast %13 : f32 to vector<8x128xf32>
    %321 = arith.mulf %150, %320 : vector<8x128xf32>
    %322 = arith.addf %319, %321 : vector<8x128xf32>
    %323 = vector.broadcast %14 : f32 to vector<8x128xf32>
    %324 = arith.mulf %164, %323 : vector<8x128xf32>
    %325 = arith.addf %322, %324 : vector<8x128xf32>
    %326 = vector.broadcast %15 : f32 to vector<8x128xf32>
    %327 = arith.mulf %178, %326 : vector<8x128xf32>
    %328 = arith.addf %325, %327 : vector<8x128xf32>
    %329 = arith.addf %317, %328 : vector<8x128xf32>
    %c0_126 = arith.constant 0 : index
    %330 = arith.index_cast %c2_i32 : i32 to index
    %c0_127 = arith.constant 0 : index
    %c0_128 = arith.constant 0 : index
    %c0_129 = arith.constant 0 : index
    %331 = vector.load %arg4[%c0_126, %330, %c0_127, %c0_128, %c0_129] : memref<2x16x4x8x128xf32, #tpu.memory_space<vmem>>, vector<1x1x1x8x128xf32>
    %332 = vector.shape_cast %331 : vector<1x1x1x8x128xf32> to vector<8x128xf32>
    %333 = vector.shape_cast %231 : vector<8x128xf32> to vector<1x1x1x8x128xf32>
    tpu.vector_store %arg4[%c0_126, %330, %c0_127, %c0_128, %c0_129], %333 {strides = array<i32>} : memref<2x16x4x8x128xf32, #tpu.memory_space<vmem>>, vector<1x1x1x8x128xf32>,
    %c1_130 = arith.constant 1 : index
    %334 = arith.index_cast %211 : i32 to index
    %c0_131 = arith.constant 0 : index
    %c0_132 = arith.constant 0 : index
    %c0_133 = arith.constant 0 : index
    %335 = vector.load %arg4[%c1_130, %334, %c0_131, %c0_132, %c0_133] : memref<2x16x4x8x128xf32, #tpu.memory_space<vmem>>, vector<1x1x1x8x128xf32>
    %336 = vector.shape_cast %335 : vector<1x1x1x8x128xf32> to vector<8x128xf32>
    %337 = vector.shape_cast %287 : vector<8x128xf32> to vector<1x1x1x8x128xf32>
    tpu.vector_store %arg4[%c1_130, %334, %c0_131, %c0_132, %c0_133], %337 {strides = array<i32>} : memref<2x16x4x8x128xf32, #tpu.memory_space<vmem>>, vector<1x1x1x8x128xf32>,
    %c0_134 = arith.constant 0 : index
    %338 = arith.index_cast %c2_i32 : i32 to index
    %c1_135 = arith.constant 1 : index
    %c0_136 = arith.constant 0 : index
    %c0_137 = arith.constant 0 : index
    %339 = vector.load %arg4[%c0_134, %338, %c1_135, %c0_136, %c0_137] : memref<2x16x4x8x128xf32, #tpu.memory_space<vmem>>, vector<1x1x1x8x128xf32>
    %340 = vector.shape_cast %339 : vector<1x1x1x8x128xf32> to vector<8x128xf32>
    %341 = vector.shape_cast %245 : vector<8x128xf32> to vector<1x1x1x8x128xf32>
    tpu.vector_store %arg4[%c0_134, %338, %c1_135, %c0_136, %c0_137], %341 {strides = array<i32>} : memref<2x16x4x8x128xf32, #tpu.memory_space<vmem>>, vector<1x1x1x8x128xf32>,
    %c1_138 = arith.constant 1 : index
    %342 = arith.index_cast %211 : i32 to index
    %c1_139 = arith.constant 1 : index
    %c0_140 = arith.constant 0 : index
    %c0_141 = arith.constant 0 : index
    %343 = vector.load %arg4[%c1_138, %342, %c1_139, %c0_140, %c0_141] : memref<2x16x4x8x128xf32, #tpu.memory_space<vmem>>, vector<1x1x1x8x128xf32>
    %344 = vector.shape_cast %343 : vector<1x1x1x8x128xf32> to vector<8x128xf32>
    %345 = vector.shape_cast %301 : vector<8x128xf32> to vector<1x1x1x8x128xf32>
    tpu.vector_store %arg4[%c1_138, %342, %c1_139, %c0_140, %c0_141], %345 {strides = array<i32>} : memref<2x16x4x8x128xf32, #tpu.memory_space<vmem>>, vector<1x1x1x8x128xf32>,
    %c0_142 = arith.constant 0 : index
    %346 = arith.index_cast %c2_i32 : i32 to index
    %c2_143 = arith.constant 2 : index
    %c0_144 = arith.constant 0 : index
    %c0_145 = arith.constant 0 : index
    %347 = vector.load %arg4[%c0_142, %346, %c2_143, %c0_144, %c0_145] : memref<2x16x4x8x128xf32, #tpu.memory_space<vmem>>, vector<1x1x1x8x128xf32>
    %348 = vector.shape_cast %347 : vector<1x1x1x8x128xf32> to vector<8x128xf32>
    %349 = vector.shape_cast %259 : vector<8x128xf32> to vector<1x1x1x8x128xf32>
    tpu.vector_store %arg4[%c0_142, %346, %c2_143, %c0_144, %c0_145], %349 {strides = array<i32>} : memref<2x16x4x8x128xf32, #tpu.memory_space<vmem>>, vector<1x1x1x8x128xf32>,
    %c1_146 = arith.constant 1 : index
    %350 = arith.index_cast %211 : i32 to index
    %c2_147 = arith.constant 2 : index
    %c0_148 = arith.constant 0 : index
    %c0_149 = arith.constant 0 : index
    %351 = vector.load %arg4[%c1_146, %350, %c2_147, %c0_148, %c0_149] : memref<2x16x4x8x128xf32, #tpu.memory_space<vmem>>, vector<1x1x1x8x128xf32>
    %352 = vector.shape_cast %351 : vector<1x1x1x8x128xf32> to vector<8x128xf32>
    %353 = vector.shape_cast %315 : vector<8x128xf32> to vector<1x1x1x8x128xf32>
    tpu.vector_store %arg4[%c1_146, %350, %c2_147, %c0_148, %c0_149], %353 {strides = array<i32>} : memref<2x16x4x8x128xf32, #tpu.memory_space<vmem>>, vector<1x1x1x8x128xf32>,
    %c0_150 = arith.constant 0 : index
    %354 = arith.index_cast %c2_i32 : i32 to index
    %c3_151 = arith.constant 3 : index
    %c0_152 = arith.constant 0 : index
    %c0_153 = arith.constant 0 : index
    %355 = vector.load %arg4[%c0_150, %354, %c3_151, %c0_152, %c0_153] : memref<2x16x4x8x128xf32, #tpu.memory_space<vmem>>, vector<1x1x1x8x128xf32>
    %356 = vector.shape_cast %355 : vector<1x1x1x8x128xf32> to vector<8x128xf32>
    %357 = vector.shape_cast %273 : vector<8x128xf32> to vector<1x1x1x8x128xf32>
    tpu.vector_store %arg4[%c0_150, %354, %c3_151, %c0_152, %c0_153], %357 {strides = array<i32>} : memref<2x16x4x8x128xf32, #tpu.memory_space<vmem>>, vector<1x1x1x8x128xf32>,
    %c1_154 = arith.constant 1 : index
    %358 = arith.index_cast %211 : i32 to index
    %c3_155 = arith.constant 3 : index
    %c0_156 = arith.constant 0 : index
    %c0_157 = arith.constant 0 : index
    %359 = vector.load %arg4[%c1_154, %358, %c3_155, %c0_156, %c0_157] : memref<2x16x4x8x128xf32, #tpu.memory_space<vmem>>, vector<1x1x1x8x128xf32>
    %360 = vector.shape_cast %359 : vector<1x1x1x8x128xf32> to vector<8x128xf32>
    %361 = vector.shape_cast %329 : vector<8x128xf32> to vector<1x1x1x8x128xf32>
    tpu.vector_store %arg4[%c1_154, %358, %c3_155, %c0_156, %c0_157], %361 {strides = array<i32>} : memref<2x16x4x8x128xf32, #tpu.memory_space<vmem>>, vector<1x1x1x8x128xf32>,
    %c3_i32 = arith.constant 3 : i32
    %c15_i32_158 = arith.constant 15 : i32
    %362 = arith.subi %c15_i32_158, %c3_i32 : i32
    %c0_159 = arith.constant 0 : index
    %363 = arith.index_cast %c3_i32 : i32 to index
    %c0_160 = arith.constant 0 : index
    %c0_161 = arith.constant 0 : index
    %c0_162 = arith.constant 0 : index
    %364 = vector.load %arg3[%c0_159, %363, %c0_160, %c0_161, %c0_162] : memref<1x16x4x8x128xf32, #tpu.memory_space<vmem>>, vector<1x1x4x8x128xf32>
    %365 = vector.shape_cast %364 : vector<1x1x4x8x128xf32> to vector<4x8x128xf32>
    %c0_163 = arith.constant 0 : index
    %366 = arith.index_cast %362 : i32 to index
    %c0_164 = arith.constant 0 : index
    %c0_165 = arith.constant 0 : index
    %c0_166 = arith.constant 0 : index
    %367 = vector.load %arg3[%c0_163, %366, %c0_164, %c0_165, %c0_166] : memref<1x16x4x8x128xf32, #tpu.memory_space<vmem>>, vector<1x1x4x8x128xf32>
    %368 = vector.shape_cast %367 : vector<1x1x4x8x128xf32> to vector<4x8x128xf32>
    %369 = vector.extract_strided_slice %365 {offsets = [0, 0, 0], sizes = [1, 8, 128], strides = [1, 1, 1]} : vector<4x8x128xf32> to vector<1x8x128xf32>
    %370 = vector.shape_cast %369 : vector<1x8x128xf32> to vector<8x128xf32>
    %371 = vector.broadcast %0 : f32 to vector<8x128xf32>
    %372 = arith.mulf %231, %371 : vector<8x128xf32>
    %373 = vector.broadcast %1 : f32 to vector<8x128xf32>
    %374 = arith.mulf %245, %373 : vector<8x128xf32>
    %375 = arith.addf %372, %374 : vector<8x128xf32>
    %376 = vector.broadcast %2 : f32 to vector<8x128xf32>
    %377 = arith.mulf %259, %376 : vector<8x128xf32>
    %378 = arith.addf %375, %377 : vector<8x128xf32>
    %379 = vector.broadcast %3 : f32 to vector<8x128xf32>
    %380 = arith.mulf %273, %379 : vector<8x128xf32>
    %381 = arith.addf %378, %380 : vector<8x128xf32>
    %382 = arith.addf %370, %381 : vector<8x128xf32>
    %383 = vector.extract_strided_slice %365 {offsets = [1, 0, 0], sizes = [1, 8, 128], strides = [1, 1, 1]} : vector<4x8x128xf32> to vector<1x8x128xf32>
    %384 = vector.shape_cast %383 : vector<1x8x128xf32> to vector<8x128xf32>
    %385 = vector.broadcast %4 : f32 to vector<8x128xf32>
    %386 = arith.mulf %231, %385 : vector<8x128xf32>
    %387 = vector.broadcast %5 : f32 to vector<8x128xf32>
    %388 = arith.mulf %245, %387 : vector<8x128xf32>
    %389 = arith.addf %386, %388 : vector<8x128xf32>
    %390 = vector.broadcast %6 : f32 to vector<8x128xf32>
    %391 = arith.mulf %259, %390 : vector<8x128xf32>
    %392 = arith.addf %389, %391 : vector<8x128xf32>
    %393 = vector.broadcast %7 : f32 to vector<8x128xf32>
    %394 = arith.mulf %273, %393 : vector<8x128xf32>
    %395 = arith.addf %392, %394 : vector<8x128xf32>
    %396 = arith.addf %384, %395 : vector<8x128xf32>
    %397 = vector.extract_strided_slice %365 {offsets = [2, 0, 0], sizes = [1, 8, 128], strides = [1, 1, 1]} : vector<4x8x128xf32> to vector<1x8x128xf32>
    %398 = vector.shape_cast %397 : vector<1x8x128xf32> to vector<8x128xf32>
    %399 = vector.broadcast %8 : f32 to vector<8x128xf32>
    %400 = arith.mulf %231, %399 : vector<8x128xf32>
    %401 = vector.broadcast %9 : f32 to vector<8x128xf32>
    %402 = arith.mulf %245, %401 : vector<8x128xf32>
    %403 = arith.addf %400, %402 : vector<8x128xf32>
    %404 = vector.broadcast %10 : f32 to vector<8x128xf32>
    %405 = arith.mulf %259, %404 : vector<8x128xf32>
    %406 = arith.addf %403, %405 : vector<8x128xf32>
    %407 = vector.broadcast %11 : f32 to vector<8x128xf32>
    %408 = arith.mulf %273, %407 : vector<8x128xf32>
    %409 = arith.addf %406, %408 : vector<8x128xf32>
    %410 = arith.addf %398, %409 : vector<8x128xf32>
    %411 = vector.extract_strided_slice %365 {offsets = [3, 0, 0], sizes = [1, 8, 128], strides = [1, 1, 1]} : vector<4x8x128xf32> to vector<1x8x128xf32>
    %412 = vector.shape_cast %411 : vector<1x8x128xf32> to vector<8x128xf32>
    %413 = vector.broadcast %12 : f32 to vector<8x128xf32>
    %414 = arith.mulf %231, %413 : vector<8x128xf32>
    %415 = vector.broadcast %13 : f32 to vector<8x128xf32>
    %416 = arith.mulf %245, %415 : vector<8x128xf32>
    %417 = arith.addf %414, %416 : vector<8x128xf32>
    %418 = vector.broadcast %14 : f32 to vector<8x128xf32>
    %419 = arith.mulf %259, %418 : vector<8x128xf32>
    %420 = arith.addf %417, %419 : vector<8x128xf32>
    %421 = vector.broadcast %15 : f32 to vector<8x128xf32>
    %422 = arith.mulf %273, %421 : vector<8x128xf32>
    %423 = arith.addf %420, %422 : vector<8x128xf32>
    %424 = arith.addf %412, %423 : vector<8x128xf32>
    %425 = vector.extract_strided_slice %368 {offsets = [0, 0, 0], sizes = [1, 8, 128], strides = [1, 1, 1]} : vector<4x8x128xf32> to vector<1x8x128xf32>
    %426 = vector.shape_cast %425 : vector<1x8x128xf32> to vector<8x128xf32>
    %427 = vector.broadcast %0 : f32 to vector<8x128xf32>
    %428 = arith.mulf %287, %427 : vector<8x128xf32>
    %429 = vector.broadcast %1 : f32 to vector<8x128xf32>
    %430 = arith.mulf %301, %429 : vector<8x128xf32>
    %431 = arith.addf %428, %430 : vector<8x128xf32>
    %432 = vector.broadcast %2 : f32 to vector<8x128xf32>
    %433 = arith.mulf %315, %432 : vector<8x128xf32>
    %434 = arith.addf %431, %433 : vector<8x128xf32>
    %435 = vector.broadcast %3 : f32 to vector<8x128xf32>
    %436 = arith.mulf %329, %435 : vector<8x128xf32>
    %437 = arith.addf %434, %436 : vector<8x128xf32>
    %438 = arith.addf %426, %437 : vector<8x128xf32>
    %439 = vector.extract_strided_slice %368 {offsets = [1, 0, 0], sizes = [1, 8, 128], strides = [1, 1, 1]} : vector<4x8x128xf32> to vector<1x8x128xf32>
    %440 = vector.shape_cast %439 : vector<1x8x128xf32> to vector<8x128xf32>
    %441 = vector.broadcast %4 : f32 to vector<8x128xf32>
    %442 = arith.mulf %287, %441 : vector<8x128xf32>
    %443 = vector.broadcast %5 : f32 to vector<8x128xf32>
    %444 = arith.mulf %301, %443 : vector<8x128xf32>
    %445 = arith.addf %442, %444 : vector<8x128xf32>
    %446 = vector.broadcast %6 : f32 to vector<8x128xf32>
    %447 = arith.mulf %315, %446 : vector<8x128xf32>
    %448 = arith.addf %445, %447 : vector<8x128xf32>
    %449 = vector.broadcast %7 : f32 to vector<8x128xf32>
    %450 = arith.mulf %329, %449 : vector<8x128xf32>
    %451 = arith.addf %448, %450 : vector<8x128xf32>
    %452 = arith.addf %440, %451 : vector<8x128xf32>
    %453 = vector.extract_strided_slice %368 {offsets = [2, 0, 0], sizes = [1, 8, 128], strides = [1, 1, 1]} : vector<4x8x128xf32> to vector<1x8x128xf32>
    %454 = vector.shape_cast %453 : vector<1x8x128xf32> to vector<8x128xf32>
    %455 = vector.broadcast %8 : f32 to vector<8x128xf32>
    %456 = arith.mulf %287, %455 : vector<8x128xf32>
    %457 = vector.broadcast %9 : f32 to vector<8x128xf32>
    %458 = arith.mulf %301, %457 : vector<8x128xf32>
    %459 = arith.addf %456, %458 : vector<8x128xf32>
    %460 = vector.broadcast %10 : f32 to vector<8x128xf32>
    %461 = arith.mulf %315, %460 : vector<8x128xf32>
    %462 = arith.addf %459, %461 : vector<8x128xf32>
    %463 = vector.broadcast %11 : f32 to vector<8x128xf32>
    %464 = arith.mulf %329, %463 : vector<8x128xf32>
    %465 = arith.addf %462, %464 : vector<8x128xf32>
    %466 = arith.addf %454, %465 : vector<8x128xf32>
    %467 = vector.extract_strided_slice %368 {offsets = [3, 0, 0], sizes = [1, 8, 128], strides = [1, 1, 1]} : vector<4x8x128xf32> to vector<1x8x128xf32>
    %468 = vector.shape_cast %467 : vector<1x8x128xf32> to vector<8x128xf32>
    %469 = vector.broadcast %12 : f32 to vector<8x128xf32>
    %470 = arith.mulf %287, %469 : vector<8x128xf32>
    %471 = vector.broadcast %13 : f32 to vector<8x128xf32>
    %472 = arith.mulf %301, %471 : vector<8x128xf32>
    %473 = arith.addf %470, %472 : vector<8x128xf32>
    %474 = vector.broadcast %14 : f32 to vector<8x128xf32>
    %475 = arith.mulf %315, %474 : vector<8x128xf32>
    %476 = arith.addf %473, %475 : vector<8x128xf32>
    %477 = vector.broadcast %15 : f32 to vector<8x128xf32>
    %478 = arith.mulf %329, %477 : vector<8x128xf32>
    %479 = arith.addf %476, %478 : vector<8x128xf32>
    %480 = arith.addf %468, %479 : vector<8x128xf32>
    %c0_167 = arith.constant 0 : index
    %481 = arith.index_cast %c3_i32 : i32 to index
    %c0_168 = arith.constant 0 : index
    %c0_169 = arith.constant 0 : index
    %c0_170 = arith.constant 0 : index
    %482 = vector.load %arg4[%c0_167, %481, %c0_168, %c0_169, %c0_170] : memref<2x16x4x8x128xf32, #tpu.memory_space<vmem>>, vector<1x1x1x8x128xf32>
    %483 = vector.shape_cast %482 : vector<1x1x1x8x128xf32> to vector<8x128xf32>
    %484 = vector.shape_cast %382 : vector<8x128xf32> to vector<1x1x1x8x128xf32>
    tpu.vector_store %arg4[%c0_167, %481, %c0_168, %c0_169, %c0_170], %484 {strides = array<i32>} : memref<2x16x4x8x128xf32, #tpu.memory_space<vmem>>, vector<1x1x1x8x128xf32>,
    %c1_171 = arith.constant 1 : index
    %485 = arith.index_cast %362 : i32 to index
    %c0_172 = arith.constant 0 : index
    %c0_173 = arith.constant 0 : index
    %c0_174 = arith.constant 0 : index
    %486 = vector.load %arg4[%c1_171, %485, %c0_172, %c0_173, %c0_174] : memref<2x16x4x8x128xf32, #tpu.memory_space<vmem>>, vector<1x1x1x8x128xf32>
    %487 = vector.shape_cast %486 : vector<1x1x1x8x128xf32> to vector<8x128xf32>
    %488 = vector.shape_cast %438 : vector<8x128xf32> to vector<1x1x1x8x128xf32>
    tpu.vector_store %arg4[%c1_171, %485, %c0_172, %c0_173, %c0_174], %488 {strides = array<i32>} : memref<2x16x4x8x128xf32, #tpu.memory_space<vmem>>, vector<1x1x1x8x128xf32>,
    %c0_175 = arith.constant 0 : index
    %489 = arith.index_cast %c3_i32 : i32 to index
    %c1_176 = arith.constant 1 : index
    %c0_177 = arith.constant 0 : index
    %c0_178 = arith.constant 0 : index
    %490 = vector.load %arg4[%c0_175, %489, %c1_176, %c0_177, %c0_178] : memref<2x16x4x8x128xf32, #tpu.memory_space<vmem>>, vector<1x1x1x8x128xf32>
    %491 = vector.shape_cast %490 : vector<1x1x1x8x128xf32> to vector<8x128xf32>
    %492 = vector.shape_cast %396 : vector<8x128xf32> to vector<1x1x1x8x128xf32>
    tpu.vector_store %arg4[%c0_175, %489, %c1_176, %c0_177, %c0_178], %492 {strides = array<i32>} : memref<2x16x4x8x128xf32, #tpu.memory_space<vmem>>, vector<1x1x1x8x128xf32>,
    %c1_179 = arith.constant 1 : index
    %493 = arith.index_cast %362 : i32 to index
    %c1_180 = arith.constant 1 : index
    %c0_181 = arith.constant 0 : index
    %c0_182 = arith.constant 0 : index
    %494 = vector.load %arg4[%c1_179, %493, %c1_180, %c0_181, %c0_182] : memref<2x16x4x8x128xf32, #tpu.memory_space<vmem>>, vector<1x1x1x8x128xf32>
    %495 = vector.shape_cast %494 : vector<1x1x1x8x128xf32> to vector<8x128xf32>
    %496 = vector.shape_cast %452 : vector<8x128xf32> to vector<1x1x1x8x128xf32>
    tpu.vector_store %arg4[%c1_179, %493, %c1_180, %c0_181, %c0_182], %496 {strides = array<i32>} : memref<2x16x4x8x128xf32, #tpu.memory_space<vmem>>, vector<1x1x1x8x128xf32>,
    %c0_183 = arith.constant 0 : index
    %497 = arith.index_cast %c3_i32 : i32 to index
    %c2_184 = arith.constant 2 : index
    %c0_185 = arith.constant 0 : index
    %c0_186 = arith.constant 0 : index
    %498 = vector.load %arg4[%c0_183, %497, %c2_184, %c0_185, %c0_186] : memref<2x16x4x8x128xf32, #tpu.memory_space<vmem>>, vector<1x1x1x8x128xf32>
    %499 = vector.shape_cast %498 : vector<1x1x1x8x128xf32> to vector<8x128xf32>
    %500 = vector.shape_cast %410 : vector<8x128xf32> to vector<1x1x1x8x128xf32>
    tpu.vector_store %arg4[%c0_183, %497, %c2_184, %c0_185, %c0_186], %500 {strides = array<i32>} : memref<2x16x4x8x128xf32, #tpu.memory_space<vmem>>, vector<1x1x1x8x128xf32>,
    %c1_187 = arith.constant 1 : index
    %501 = arith.index_cast %362 : i32 to index
    %c2_188 = arith.constant 2 : index
    %c0_189 = arith.constant 0 : index
    %c0_190 = arith.constant 0 : index
    %502 = vector.load %arg4[%c1_187, %501, %c2_188, %c0_189, %c0_190] : memref<2x16x4x8x128xf32, #tpu.memory_space<vmem>>, vector<1x1x1x8x128xf32>
    %503 = vector.shape_cast %502 : vector<1x1x1x8x128xf32> to vector<8x128xf32>
    %504 = vector.shape_cast %466 : vector<8x128xf32> to vector<1x1x1x8x128xf32>
    tpu.vector_store %arg4[%c1_187, %501, %c2_188, %c0_189, %c0_190], %504 {strides = array<i32>} : memref<2x16x4x8x128xf32, #tpu.memory_space<vmem>>, vector<1x1x1x8x128xf32>,
    %c0_191 = arith.constant 0 : index
    %505 = arith.index_cast %c3_i32 : i32 to index
    %c3_192 = arith.constant 3 : index
    %c0_193 = arith.constant 0 : index
    %c0_194 = arith.constant 0 : index
    %506 = vector.load %arg4[%c0_191, %505, %c3_192, %c0_193, %c0_194] : memref<2x16x4x8x128xf32, #tpu.memory_space<vmem>>, vector<1x1x1x8x128xf32>
    %507 = vector.shape_cast %506 : vector<1x1x1x8x128xf32> to vector<8x128xf32>
    %508 = vector.shape_cast %424 : vector<8x128xf32> to vector<1x1x1x8x128xf32>
    tpu.vector_store %arg4[%c0_191, %505, %c3_192, %c0_193, %c0_194], %508 {strides = array<i32>} : memref<2x16x4x8x128xf32, #tpu.memory_space<vmem>>, vector<1x1x1x8x128xf32>,
    %c1_195 = arith.constant 1 : index
    %509 = arith.index_cast %362 : i32 to index
    %c3_196 = arith.constant 3 : index
    %c0_197 = arith.constant 0 : index
    %c0_198 = arith.constant 0 : index
    %510 = vector.load %arg4[%c1_195, %509, %c3_196, %c0_197, %c0_198] : memref<2x16x4x8x128xf32, #tpu.memory_space<vmem>>, vector<1x1x1x8x128xf32>
    %511 = vector.shape_cast %510 : vector<1x1x1x8x128xf32> to vector<8x128xf32>
    %512 = vector.shape_cast %480 : vector<8x128xf32> to vector<1x1x1x8x128xf32>
    tpu.vector_store %arg4[%c1_195, %509, %c3_196, %c0_197, %c0_198], %512 {strides = array<i32>} : memref<2x16x4x8x128xf32, #tpu.memory_space<vmem>>, vector<1x1x1x8x128xf32>,
    %c4_i32 = arith.constant 4 : i32
    %c15_i32_199 = arith.constant 15 : i32
    %513 = arith.subi %c15_i32_199, %c4_i32 : i32
    %c0_200 = arith.constant 0 : index
    %514 = arith.index_cast %c4_i32 : i32 to index
    %c0_201 = arith.constant 0 : index
    %c0_202 = arith.constant 0 : index
    %c0_203 = arith.constant 0 : index
    %515 = vector.load %arg3[%c0_200, %514, %c0_201, %c0_202, %c0_203] : memref<1x16x4x8x128xf32, #tpu.memory_space<vmem>>, vector<1x1x4x8x128xf32>
    %516 = vector.shape_cast %515 : vector<1x1x4x8x128xf32> to vector<4x8x128xf32>
    %c0_204 = arith.constant 0 : index
    %517 = arith.index_cast %513 : i32 to index
    %c0_205 = arith.constant 0 : index
    %c0_206 = arith.constant 0 : index
    %c0_207 = arith.constant 0 : index
    %518 = vector.load %arg3[%c0_204, %517, %c0_205, %c0_206, %c0_207] : memref<1x16x4x8x128xf32, #tpu.memory_space<vmem>>, vector<1x1x4x8x128xf32>
    %519 = vector.shape_cast %518 : vector<1x1x4x8x128xf32> to vector<4x8x128xf32>
    %520 = vector.extract_strided_slice %516 {offsets = [0, 0, 0], sizes = [1, 8, 128], strides = [1, 1, 1]} : vector<4x8x128xf32> to vector<1x8x128xf32>
    %521 = vector.shape_cast %520 : vector<1x8x128xf32> to vector<8x128xf32>
    %522 = vector.broadcast %0 : f32 to vector<8x128xf32>
    %523 = arith.mulf %382, %522 : vector<8x128xf32>
    %524 = vector.broadcast %1 : f32 to vector<8x128xf32>
    %525 = arith.mulf %396, %524 : vector<8x128xf32>
    %526 = arith.addf %523, %525 : vector<8x128xf32>
    %527 = vector.broadcast %2 : f32 to vector<8x128xf32>
    %528 = arith.mulf %410, %527 : vector<8x128xf32>
    %529 = arith.addf %526, %528 : vector<8x128xf32>
    %530 = vector.broadcast %3 : f32 to vector<8x128xf32>
    %531 = arith.mulf %424, %530 : vector<8x128xf32>
    %532 = arith.addf %529, %531 : vector<8x128xf32>
    %533 = arith.addf %521, %532 : vector<8x128xf32>
    %534 = vector.extract_strided_slice %516 {offsets = [1, 0, 0], sizes = [1, 8, 128], strides = [1, 1, 1]} : vector<4x8x128xf32> to vector<1x8x128xf32>
    %535 = vector.shape_cast %534 : vector<1x8x128xf32> to vector<8x128xf32>
    %536 = vector.broadcast %4 : f32 to vector<8x128xf32>
    %537 = arith.mulf %382, %536 : vector<8x128xf32>
    %538 = vector.broadcast %5 : f32 to vector<8x128xf32>
    %539 = arith.mulf %396, %538 : vector<8x128xf32>
    %540 = arith.addf %537, %539 : vector<8x128xf32>
    %541 = vector.broadcast %6 : f32 to vector<8x128xf32>
    %542 = arith.mulf %410, %541 : vector<8x128xf32>
    %543 = arith.addf %540, %542 : vector<8x128xf32>
    %544 = vector.broadcast %7 : f32 to vector<8x128xf32>
    %545 = arith.mulf %424, %544 : vector<8x128xf32>
    %546 = arith.addf %543, %545 : vector<8x128xf32>
    %547 = arith.addf %535, %546 : vector<8x128xf32>
    %548 = vector.extract_strided_slice %516 {offsets = [2, 0, 0], sizes = [1, 8, 128], strides = [1, 1, 1]} : vector<4x8x128xf32> to vector<1x8x128xf32>
    %549 = vector.shape_cast %548 : vector<1x8x128xf32> to vector<8x128xf32>
    %550 = vector.broadcast %8 : f32 to vector<8x128xf32>
    %551 = arith.mulf %382, %550 : vector<8x128xf32>
    %552 = vector.broadcast %9 : f32 to vector<8x128xf32>
    %553 = arith.mulf %396, %552 : vector<8x128xf32>
    %554 = arith.addf %551, %553 : vector<8x128xf32>
    %555 = vector.broadcast %10 : f32 to vector<8x128xf32>
    %556 = arith.mulf %410, %555 : vector<8x128xf32>
    %557 = arith.addf %554, %556 : vector<8x128xf32>
    %558 = vector.broadcast %11 : f32 to vector<8x128xf32>
    %559 = arith.mulf %424, %558 : vector<8x128xf32>
    %560 = arith.addf %557, %559 : vector<8x128xf32>
    %561 = arith.addf %549, %560 : vector<8x128xf32>
    %562 = vector.extract_strided_slice %516 {offsets = [3, 0, 0], sizes = [1, 8, 128], strides = [1, 1, 1]} : vector<4x8x128xf32> to vector<1x8x128xf32>
    %563 = vector.shape_cast %562 : vector<1x8x128xf32> to vector<8x128xf32>
    %564 = vector.broadcast %12 : f32 to vector<8x128xf32>
    %565 = arith.mulf %382, %564 : vector<8x128xf32>
    %566 = vector.broadcast %13 : f32 to vector<8x128xf32>
    %567 = arith.mulf %396, %566 : vector<8x128xf32>
    %568 = arith.addf %565, %567 : vector<8x128xf32>
    %569 = vector.broadcast %14 : f32 to vector<8x128xf32>
    %570 = arith.mulf %410, %569 : vector<8x128xf32>
    %571 = arith.addf %568, %570 : vector<8x128xf32>
    %572 = vector.broadcast %15 : f32 to vector<8x128xf32>
    %573 = arith.mulf %424, %572 : vector<8x128xf32>
    %574 = arith.addf %571, %573 : vector<8x128xf32>
    %575 = arith.addf %563, %574 : vector<8x128xf32>
    %576 = vector.extract_strided_slice %519 {offsets = [0, 0, 0], sizes = [1, 8, 128], strides = [1, 1, 1]} : vector<4x8x128xf32> to vector<1x8x128xf32>
    %577 = vector.shape_cast %576 : vector<1x8x128xf32> to vector<8x128xf32>
    %578 = vector.broadcast %0 : f32 to vector<8x128xf32>
    %579 = arith.mulf %438, %578 : vector<8x128xf32>
    %580 = vector.broadcast %1 : f32 to vector<8x128xf32>
    %581 = arith.mulf %452, %580 : vector<8x128xf32>
    %582 = arith.addf %579, %581 : vector<8x128xf32>
    %583 = vector.broadcast %2 : f32 to vector<8x128xf32>
    %584 = arith.mulf %466, %583 : vector<8x128xf32>
    %585 = arith.addf %582, %584 : vector<8x128xf32>
    %586 = vector.broadcast %3 : f32 to vector<8x128xf32>
    %587 = arith.mulf %480, %586 : vector<8x128xf32>
    %588 = arith.addf %585, %587 : vector<8x128xf32>
    %589 = arith.addf %577, %588 : vector<8x128xf32>
    %590 = vector.extract_strided_slice %519 {offsets = [1, 0, 0], sizes = [1, 8, 128], strides = [1, 1, 1]} : vector<4x8x128xf32> to vector<1x8x128xf32>
    %591 = vector.shape_cast %590 : vector<1x8x128xf32> to vector<8x128xf32>
    %592 = vector.broadcast %4 : f32 to vector<8x128xf32>
    %593 = arith.mulf %438, %592 : vector<8x128xf32>
    %594 = vector.broadcast %5 : f32 to vector<8x128xf32>
    %595 = arith.mulf %452, %594 : vector<8x128xf32>
    %596 = arith.addf %593, %595 : vector<8x128xf32>
    %597 = vector.broadcast %6 : f32 to vector<8x128xf32>
    %598 = arith.mulf %466, %597 : vector<8x128xf32>
    %599 = arith.addf %596, %598 : vector<8x128xf32>
    %600 = vector.broadcast %7 : f32 to vector<8x128xf32>
    %601 = arith.mulf %480, %600 : vector<8x128xf32>
    %602 = arith.addf %599, %601 : vector<8x128xf32>
    %603 = arith.addf %591, %602 : vector<8x128xf32>
    %604 = vector.extract_strided_slice %519 {offsets = [2, 0, 0], sizes = [1, 8, 128], strides = [1, 1, 1]} : vector<4x8x128xf32> to vector<1x8x128xf32>
    %605 = vector.shape_cast %604 : vector<1x8x128xf32> to vector<8x128xf32>
    %606 = vector.broadcast %8 : f32 to vector<8x128xf32>
    %607 = arith.mulf %438, %606 : vector<8x128xf32>
    %608 = vector.broadcast %9 : f32 to vector<8x128xf32>
    %609 = arith.mulf %452, %608 : vector<8x128xf32>
    %610 = arith.addf %607, %609 : vector<8x128xf32>
    %611 = vector.broadcast %10 : f32 to vector<8x128xf32>
    %612 = arith.mulf %466, %611 : vector<8x128xf32>
    %613 = arith.addf %610, %612 : vector<8x128xf32>
    %614 = vector.broadcast %11 : f32 to vector<8x128xf32>
    %615 = arith.mulf %480, %614 : vector<8x128xf32>
    %616 = arith.addf %613, %615 : vector<8x128xf32>
    %617 = arith.addf %605, %616 : vector<8x128xf32>
    %618 = vector.extract_strided_slice %519 {offsets = [3, 0, 0], sizes = [1, 8, 128], strides = [1, 1, 1]} : vector<4x8x128xf32> to vector<1x8x128xf32>
    %619 = vector.shape_cast %618 : vector<1x8x128xf32> to vector<8x128xf32>
    %620 = vector.broadcast %12 : f32 to vector<8x128xf32>
    %621 = arith.mulf %438, %620 : vector<8x128xf32>
    %622 = vector.broadcast %13 : f32 to vector<8x128xf32>
    %623 = arith.mulf %452, %622 : vector<8x128xf32>
    %624 = arith.addf %621, %623 : vector<8x128xf32>
    %625 = vector.broadcast %14 : f32 to vector<8x128xf32>
    %626 = arith.mulf %466, %625 : vector<8x128xf32>
    %627 = arith.addf %624, %626 : vector<8x128xf32>
    %628 = vector.broadcast %15 : f32 to vector<8x128xf32>
    %629 = arith.mulf %480, %628 : vector<8x128xf32>
    %630 = arith.addf %627, %629 : vector<8x128xf32>
    %631 = arith.addf %619, %630 : vector<8x128xf32>
    %c0_208 = arith.constant 0 : index
    %632 = arith.index_cast %c4_i32 : i32 to index
    %c0_209 = arith.constant 0 : index
    %c0_210 = arith.constant 0 : index
    %c0_211 = arith.constant 0 : index
    %633 = vector.load %arg4[%c0_208, %632, %c0_209, %c0_210, %c0_211] : memref<2x16x4x8x128xf32, #tpu.memory_space<vmem>>, vector<1x1x1x8x128xf32>
    %634 = vector.shape_cast %633 : vector<1x1x1x8x128xf32> to vector<8x128xf32>
    %635 = vector.shape_cast %533 : vector<8x128xf32> to vector<1x1x1x8x128xf32>
    tpu.vector_store %arg4[%c0_208, %632, %c0_209, %c0_210, %c0_211], %635 {strides = array<i32>} : memref<2x16x4x8x128xf32, #tpu.memory_space<vmem>>, vector<1x1x1x8x128xf32>,
    %c1_212 = arith.constant 1 : index
    %636 = arith.index_cast %513 : i32 to index
    %c0_213 = arith.constant 0 : index
    %c0_214 = arith.constant 0 : index
    %c0_215 = arith.constant 0 : index
    %637 = vector.load %arg4[%c1_212, %636, %c0_213, %c0_214, %c0_215] : memref<2x16x4x8x128xf32, #tpu.memory_space<vmem>>, vector<1x1x1x8x128xf32>
    %638 = vector.shape_cast %637 : vector<1x1x1x8x128xf32> to vector<8x128xf32>
    %639 = vector.shape_cast %589 : vector<8x128xf32> to vector<1x1x1x8x128xf32>
    tpu.vector_store %arg4[%c1_212, %636, %c0_213, %c0_214, %c0_215], %639 {strides = array<i32>} : memref<2x16x4x8x128xf32, #tpu.memory_space<vmem>>, vector<1x1x1x8x128xf32>,
    %c0_216 = arith.constant 0 : index
    %640 = arith.index_cast %c4_i32 : i32 to index
    %c1_217 = arith.constant 1 : index
    %c0_218 = arith.constant 0 : index
    %c0_219 = arith.constant 0 : index
    %641 = vector.load %arg4[%c0_216, %640, %c1_217, %c0_218, %c0_219] : memref<2x16x4x8x128xf32, #tpu.memory_space<vmem>>, vector<1x1x1x8x128xf32>
    %642 = vector.shape_cast %641 : vector<1x1x1x8x128xf32> to vector<8x128xf32>
    %643 = vector.shape_cast %547 : vector<8x128xf32> to vector<1x1x1x8x128xf32>
    tpu.vector_store %arg4[%c0_216, %640, %c1_217, %c0_218, %c0_219], %643 {strides = array<i32>} : memref<2x16x4x8x128xf32, #tpu.memory_space<vmem>>, vector<1x1x1x8x128xf32>,
    %c1_220 = arith.constant 1 : index
    %644 = arith.index_cast %513 : i32 to index
    %c1_221 = arith.constant 1 : index
    %c0_222 = arith.constant 0 : index
    %c0_223 = arith.constant 0 : index
    %645 = vector.load %arg4[%c1_220, %644, %c1_221, %c0_222, %c0_223] : memref<2x16x4x8x128xf32, #tpu.memory_space<vmem>>, vector<1x1x1x8x128xf32>
    %646 = vector.shape_cast %645 : vector<1x1x1x8x128xf32> to vector<8x128xf32>
    %647 = vector.shape_cast %603 : vector<8x128xf32> to vector<1x1x1x8x128xf32>
    tpu.vector_store %arg4[%c1_220, %644, %c1_221, %c0_222, %c0_223], %647 {strides = array<i32>} : memref<2x16x4x8x128xf32, #tpu.memory_space<vmem>>, vector<1x1x1x8x128xf32>,
    %c0_224 = arith.constant 0 : index
    %648 = arith.index_cast %c4_i32 : i32 to index
    %c2_225 = arith.constant 2 : index
    %c0_226 = arith.constant 0 : index
    %c0_227 = arith.constant 0 : index
    %649 = vector.load %arg4[%c0_224, %648, %c2_225, %c0_226, %c0_227] : memref<2x16x4x8x128xf32, #tpu.memory_space<vmem>>, vector<1x1x1x8x128xf32>
    %650 = vector.shape_cast %649 : vector<1x1x1x8x128xf32> to vector<8x128xf32>
    %651 = vector.shape_cast %561 : vector<8x128xf32> to vector<1x1x1x8x128xf32>
    tpu.vector_store %arg4[%c0_224, %648, %c2_225, %c0_226, %c0_227], %651 {strides = array<i32>} : memref<2x16x4x8x128xf32, #tpu.memory_space<vmem>>, vector<1x1x1x8x128xf32>,
    %c1_228 = arith.constant 1 : index
    %652 = arith.index_cast %513 : i32 to index
    %c2_229 = arith.constant 2 : index
    %c0_230 = arith.constant 0 : index
    %c0_231 = arith.constant 0 : index
    %653 = vector.load %arg4[%c1_228, %652, %c2_229, %c0_230, %c0_231] : memref<2x16x4x8x128xf32, #tpu.memory_space<vmem>>, vector<1x1x1x8x128xf32>
    %654 = vector.shape_cast %653 : vector<1x1x1x8x128xf32> to vector<8x128xf32>
    %655 = vector.shape_cast %617 : vector<8x128xf32> to vector<1x1x1x8x128xf32>
    tpu.vector_store %arg4[%c1_228, %652, %c2_229, %c0_230, %c0_231], %655 {strides = array<i32>} : memref<2x16x4x8x128xf32, #tpu.memory_space<vmem>>, vector<1x1x1x8x128xf32>,
    %c0_232 = arith.constant 0 : index
    %656 = arith.index_cast %c4_i32 : i32 to index
    %c3_233 = arith.constant 3 : index
    %c0_234 = arith.constant 0 : index
    %c0_235 = arith.constant 0 : index
    %657 = vector.load %arg4[%c0_232, %656, %c3_233, %c0_234, %c0_235] : memref<2x16x4x8x128xf32, #tpu.memory_space<vmem>>, vector<1x1x1x8x128xf32>
    %658 = vector.shape_cast %657 : vector<1x1x1x8x128xf32> to vector<8x128xf32>
    %659 = vector.shape_cast %575 : vector<8x128xf32> to vector<1x1x1x8x128xf32>
    tpu.vector_store %arg4[%c0_232, %656, %c3_233, %c0_234, %c0_235], %659 {strides = array<i32>} : memref<2x16x4x8x128xf32, #tpu.memory_space<vmem>>, vector<1x1x1x8x128xf32>,
    %c1_236 = arith.constant 1 : index
    %660 = arith.index_cast %513 : i32 to index
    %c3_237 = arith.constant 3 : index
    %c0_238 = arith.constant 0 : index
    %c0_239 = arith.constant 0 : index
    %661 = vector.load %arg4[%c1_236, %660, %c3_237, %c0_238, %c0_239] : memref<2x16x4x8x128xf32, #tpu.memory_space<vmem>>, vector<1x1x1x8x128xf32>
    %662 = vector.shape_cast %661 : vector<1x1x1x8x128xf32> to vector<8x128xf32>
    %663 = vector.shape_cast %631 : vector<8x128xf32> to vector<1x1x1x8x128xf32>
    tpu.vector_store %arg4[%c1_236, %660, %c3_237, %c0_238, %c0_239], %663 {strides = array<i32>} : memref<2x16x4x8x128xf32, #tpu.memory_space<vmem>>, vector<1x1x1x8x128xf32>,
    %c5_i32 = arith.constant 5 : i32
    %c15_i32_240 = arith.constant 15 : i32
    %664 = arith.subi %c15_i32_240, %c5_i32 : i32
    %c0_241 = arith.constant 0 : index
    %665 = arith.index_cast %c5_i32 : i32 to index
    %c0_242 = arith.constant 0 : index
    %c0_243 = arith.constant 0 : index
    %c0_244 = arith.constant 0 : index
    %666 = vector.load %arg3[%c0_241, %665, %c0_242, %c0_243, %c0_244] : memref<1x16x4x8x128xf32, #tpu.memory_space<vmem>>, vector<1x1x4x8x128xf32>
    %667 = vector.shape_cast %666 : vector<1x1x4x8x128xf32> to vector<4x8x128xf32>
    %c0_245 = arith.constant 0 : index
    %668 = arith.index_cast %664 : i32 to index
    %c0_246 = arith.constant 0 : index
    %c0_247 = arith.constant 0 : index
    %c0_248 = arith.constant 0 : index
    %669 = vector.load %arg3[%c0_245, %668, %c0_246, %c0_247, %c0_248] : memref<1x16x4x8x128xf32, #tpu.memory_space<vmem>>, vector<1x1x4x8x128xf32>
    %670 = vector.shape_cast %669 : vector<1x1x4x8x128xf32> to vector<4x8x128xf32>
    %671 = vector.extract_strided_slice %667 {offsets = [0, 0, 0], sizes = [1, 8, 128], strides = [1, 1, 1]} : vector<4x8x128xf32> to vector<1x8x128xf32>
    %672 = vector.shape_cast %671 : vector<1x8x128xf32> to vector<8x128xf32>
    %673 = vector.broadcast %0 : f32 to vector<8x128xf32>
    %674 = arith.mulf %533, %673 : vector<8x128xf32>
    %675 = vector.broadcast %1 : f32 to vector<8x128xf32>
    %676 = arith.mulf %547, %675 : vector<8x128xf32>
    %677 = arith.addf %674, %676 : vector<8x128xf32>
    %678 = vector.broadcast %2 : f32 to vector<8x128xf32>
    %679 = arith.mulf %561, %678 : vector<8x128xf32>
    %680 = arith.addf %677, %679 : vector<8x128xf32>
    %681 = vector.broadcast %3 : f32 to vector<8x128xf32>
    %682 = arith.mulf %575, %681 : vector<8x128xf32>
    %683 = arith.addf %680, %682 : vector<8x128xf32>
    %684 = arith.addf %672, %683 : vector<8x128xf32>
    %685 = vector.extract_strided_slice %667 {offsets = [1, 0, 0], sizes = [1, 8, 128], strides = [1, 1, 1]} : vector<4x8x128xf32> to vector<1x8x128xf32>
    %686 = vector.shape_cast %685 : vector<1x8x128xf32> to vector<8x128xf32>
    %687 = vector.broadcast %4 : f32 to vector<8x128xf32>
    %688 = arith.mulf %533, %687 : vector<8x128xf32>
    %689 = vector.broadcast %5 : f32 to vector<8x128xf32>
    %690 = arith.mulf %547, %689 : vector<8x128xf32>
    %691 = arith.addf %688, %690 : vector<8x128xf32>
    %692 = vector.broadcast %6 : f32 to vector<8x128xf32>
    %693 = arith.mulf %561, %692 : vector<8x128xf32>
    %694 = arith.addf %691, %693 : vector<8x128xf32>
    %695 = vector.broadcast %7 : f32 to vector<8x128xf32>
    %696 = arith.mulf %575, %695 : vector<8x128xf32>
    %697 = arith.addf %694, %696 : vector<8x128xf32>
    %698 = arith.addf %686, %697 : vector<8x128xf32>
    %699 = vector.extract_strided_slice %667 {offsets = [2, 0, 0], sizes = [1, 8, 128], strides = [1, 1, 1]} : vector<4x8x128xf32> to vector<1x8x128xf32>
    %700 = vector.shape_cast %699 : vector<1x8x128xf32> to vector<8x128xf32>
    %701 = vector.broadcast %8 : f32 to vector<8x128xf32>
    %702 = arith.mulf %533, %701 : vector<8x128xf32>
    %703 = vector.broadcast %9 : f32 to vector<8x128xf32>
    %704 = arith.mulf %547, %703 : vector<8x128xf32>
    %705 = arith.addf %702, %704 : vector<8x128xf32>
    %706 = vector.broadcast %10 : f32 to vector<8x128xf32>
    %707 = arith.mulf %561, %706 : vector<8x128xf32>
    %708 = arith.addf %705, %707 : vector<8x128xf32>
    %709 = vector.broadcast %11 : f32 to vector<8x128xf32>
    %710 = arith.mulf %575, %709 : vector<8x128xf32>
    %711 = arith.addf %708, %710 : vector<8x128xf32>
    %712 = arith.addf %700, %711 : vector<8x128xf32>
    %713 = vector.extract_strided_slice %667 {offsets = [3, 0, 0], sizes = [1, 8, 128], strides = [1, 1, 1]} : vector<4x8x128xf32> to vector<1x8x128xf32>
    %714 = vector.shape_cast %713 : vector<1x8x128xf32> to vector<8x128xf32>
    %715 = vector.broadcast %12 : f32 to vector<8x128xf32>
    %716 = arith.mulf %533, %715 : vector<8x128xf32>
    %717 = vector.broadcast %13 : f32 to vector<8x128xf32>
    %718 = arith.mulf %547, %717 : vector<8x128xf32>
    %719 = arith.addf %716, %718 : vector<8x128xf32>
    %720 = vector.broadcast %14 : f32 to vector<8x128xf32>
    %721 = arith.mulf %561, %720 : vector<8x128xf32>
    %722 = arith.addf %719, %721 : vector<8x128xf32>
    %723 = vector.broadcast %15 : f32 to vector<8x128xf32>
    %724 = arith.mulf %575, %723 : vector<8x128xf32>
    %725 = arith.addf %722, %724 : vector<8x128xf32>
    %726 = arith.addf %714, %725 : vector<8x128xf32>
    %727 = vector.extract_strided_slice %670 {offsets = [0, 0, 0], sizes = [1, 8, 128], strides = [1, 1, 1]} : vector<4x8x128xf32> to vector<1x8x128xf32>
    %728 = vector.shape_cast %727 : vector<1x8x128xf32> to vector<8x128xf32>
    %729 = vector.broadcast %0 : f32 to vector<8x128xf32>
    %730 = arith.mulf %589, %729 : vector<8x128xf32>
    %731 = vector.broadcast %1 : f32 to vector<8x128xf32>
    %732 = arith.mulf %603, %731 : vector<8x128xf32>
    %733 = arith.addf %730, %732 : vector<8x128xf32>
    %734 = vector.broadcast %2 : f32 to vector<8x128xf32>
    %735 = arith.mulf %617, %734 : vector<8x128xf32>
    %736 = arith.addf %733, %735 : vector<8x128xf32>
    %737 = vector.broadcast %3 : f32 to vector<8x128xf32>
    %738 = arith.mulf %631, %737 : vector<8x128xf32>
    %739 = arith.addf %736, %738 : vector<8x128xf32>
    %740 = arith.addf %728, %739 : vector<8x128xf32>
    %741 = vector.extract_strided_slice %670 {offsets = [1, 0, 0], sizes = [1, 8, 128], strides = [1, 1, 1]} : vector<4x8x128xf32> to vector<1x8x128xf32>
    %742 = vector.shape_cast %741 : vector<1x8x128xf32> to vector<8x128xf32>
    %743 = vector.broadcast %4 : f32 to vector<8x128xf32>
    %744 = arith.mulf %589, %743 : vector<8x128xf32>
    %745 = vector.broadcast %5 : f32 to vector<8x128xf32>
    %746 = arith.mulf %603, %745 : vector<8x128xf32>
    %747 = arith.addf %744, %746 : vector<8x128xf32>
    %748 = vector.broadcast %6 : f32 to vector<8x128xf32>
    %749 = arith.mulf %617, %748 : vector<8x128xf32>
    %750 = arith.addf %747, %749 : vector<8x128xf32>
    %751 = vector.broadcast %7 : f32 to vector<8x128xf32>
    %752 = arith.mulf %631, %751 : vector<8x128xf32>
    %753 = arith.addf %750, %752 : vector<8x128xf32>
    %754 = arith.addf %742, %753 : vector<8x128xf32>
    %755 = vector.extract_strided_slice %670 {offsets = [2, 0, 0], sizes = [1, 8, 128], strides = [1, 1, 1]} : vector<4x8x128xf32> to vector<1x8x128xf32>
    %756 = vector.shape_cast %755 : vector<1x8x128xf32> to vector<8x128xf32>
    %757 = vector.broadcast %8 : f32 to vector<8x128xf32>
    %758 = arith.mulf %589, %757 : vector<8x128xf32>
    %759 = vector.broadcast %9 : f32 to vector<8x128xf32>
    %760 = arith.mulf %603, %759 : vector<8x128xf32>
    %761 = arith.addf %758, %760 : vector<8x128xf32>
    %762 = vector.broadcast %10 : f32 to vector<8x128xf32>
    %763 = arith.mulf %617, %762 : vector<8x128xf32>
    %764 = arith.addf %761, %763 : vector<8x128xf32>
    %765 = vector.broadcast %11 : f32 to vector<8x128xf32>
    %766 = arith.mulf %631, %765 : vector<8x128xf32>
    %767 = arith.addf %764, %766 : vector<8x128xf32>
    %768 = arith.addf %756, %767 : vector<8x128xf32>
    %769 = vector.extract_strided_slice %670 {offsets = [3, 0, 0], sizes = [1, 8, 128], strides = [1, 1, 1]} : vector<4x8x128xf32> to vector<1x8x128xf32>
    %770 = vector.shape_cast %769 : vector<1x8x128xf32> to vector<8x128xf32>
    %771 = vector.broadcast %12 : f32 to vector<8x128xf32>
    %772 = arith.mulf %589, %771 : vector<8x128xf32>
    %773 = vector.broadcast %13 : f32 to vector<8x128xf32>
    %774 = arith.mulf %603, %773 : vector<8x128xf32>
    %775 = arith.addf %772, %774 : vector<8x128xf32>
    %776 = vector.broadcast %14 : f32 to vector<8x128xf32>
    %777 = arith.mulf %617, %776 : vector<8x128xf32>
    %778 = arith.addf %775, %777 : vector<8x128xf32>
    %779 = vector.broadcast %15 : f32 to vector<8x128xf32>
    %780 = arith.mulf %631, %779 : vector<8x128xf32>
    %781 = arith.addf %778, %780 : vector<8x128xf32>
    %782 = arith.addf %770, %781 : vector<8x128xf32>
    %c0_249 = arith.constant 0 : index
    %783 = arith.index_cast %c5_i32 : i32 to index
    %c0_250 = arith.constant 0 : index
    %c0_251 = arith.constant 0 : index
    %c0_252 = arith.constant 0 : index
    %784 = vector.load %arg4[%c0_249, %783, %c0_250, %c0_251, %c0_252] : memref<2x16x4x8x128xf32, #tpu.memory_space<vmem>>, vector<1x1x1x8x128xf32>
    %785 = vector.shape_cast %784 : vector<1x1x1x8x128xf32> to vector<8x128xf32>
    %786 = vector.shape_cast %684 : vector<8x128xf32> to vector<1x1x1x8x128xf32>
    tpu.vector_store %arg4[%c0_249, %783, %c0_250, %c0_251, %c0_252], %786 {strides = array<i32>} : memref<2x16x4x8x128xf32, #tpu.memory_space<vmem>>, vector<1x1x1x8x128xf32>,
    %c1_253 = arith.constant 1 : index
    %787 = arith.index_cast %664 : i32 to index
    %c0_254 = arith.constant 0 : index
    %c0_255 = arith.constant 0 : index
    %c0_256 = arith.constant 0 : index
    %788 = vector.load %arg4[%c1_253, %787, %c0_254, %c0_255, %c0_256] : memref<2x16x4x8x128xf32, #tpu.memory_space<vmem>>, vector<1x1x1x8x128xf32>
    %789 = vector.shape_cast %788 : vector<1x1x1x8x128xf32> to vector<8x128xf32>
    %790 = vector.shape_cast %740 : vector<8x128xf32> to vector<1x1x1x8x128xf32>
    tpu.vector_store %arg4[%c1_253, %787, %c0_254, %c0_255, %c0_256], %790 {strides = array<i32>} : memref<2x16x4x8x128xf32, #tpu.memory_space<vmem>>, vector<1x1x1x8x128xf32>,
    %c0_257 = arith.constant 0 : index
    %791 = arith.index_cast %c5_i32 : i32 to index
    %c1_258 = arith.constant 1 : index
    %c0_259 = arith.constant 0 : index
    %c0_260 = arith.constant 0 : index
    %792 = vector.load %arg4[%c0_257, %791, %c1_258, %c0_259, %c0_260] : memref<2x16x4x8x128xf32, #tpu.memory_space<vmem>>, vector<1x1x1x8x128xf32>
    %793 = vector.shape_cast %792 : vector<1x1x1x8x128xf32> to vector<8x128xf32>
    %794 = vector.shape_cast %698 : vector<8x128xf32> to vector<1x1x1x8x128xf32>
    tpu.vector_store %arg4[%c0_257, %791, %c1_258, %c0_259, %c0_260], %794 {strides = array<i32>} : memref<2x16x4x8x128xf32, #tpu.memory_space<vmem>>, vector<1x1x1x8x128xf32>,
    %c1_261 = arith.constant 1 : index
    %795 = arith.index_cast %664 : i32 to index
    %c1_262 = arith.constant 1 : index
    %c0_263 = arith.constant 0 : index
    %c0_264 = arith.constant 0 : index
    %796 = vector.load %arg4[%c1_261, %795, %c1_262, %c0_263, %c0_264] : memref<2x16x4x8x128xf32, #tpu.memory_space<vmem>>, vector<1x1x1x8x128xf32>
    %797 = vector.shape_cast %796 : vector<1x1x1x8x128xf32> to vector<8x128xf32>
    %798 = vector.shape_cast %754 : vector<8x128xf32> to vector<1x1x1x8x128xf32>
    tpu.vector_store %arg4[%c1_261, %795, %c1_262, %c0_263, %c0_264], %798 {strides = array<i32>} : memref<2x16x4x8x128xf32, #tpu.memory_space<vmem>>, vector<1x1x1x8x128xf32>,
    %c0_265 = arith.constant 0 : index
    %799 = arith.index_cast %c5_i32 : i32 to index
    %c2_266 = arith.constant 2 : index
    %c0_267 = arith.constant 0 : index
    %c0_268 = arith.constant 0 : index
    %800 = vector.load %arg4[%c0_265, %799, %c2_266, %c0_267, %c0_268] : memref<2x16x4x8x128xf32, #tpu.memory_space<vmem>>, vector<1x1x1x8x128xf32>
    %801 = vector.shape_cast %800 : vector<1x1x1x8x128xf32> to vector<8x128xf32>
    %802 = vector.shape_cast %712 : vector<8x128xf32> to vector<1x1x1x8x128xf32>
    tpu.vector_store %arg4[%c0_265, %799, %c2_266, %c0_267, %c0_268], %802 {strides = array<i32>} : memref<2x16x4x8x128xf32, #tpu.memory_space<vmem>>, vector<1x1x1x8x128xf32>,
    %c1_269 = arith.constant 1 : index
    %803 = arith.index_cast %664 : i32 to index
    %c2_270 = arith.constant 2 : index
    %c0_271 = arith.constant 0 : index
    %c0_272 = arith.constant 0 : index
    %804 = vector.load %arg4[%c1_269, %803, %c2_270, %c0_271, %c0_272] : memref<2x16x4x8x128xf32, #tpu.memory_space<vmem>>, vector<1x1x1x8x128xf32>
    %805 = vector.shape_cast %804 : vector<1x1x1x8x128xf32> to vector<8x128xf32>
    %806 = vector.shape_cast %768 : vector<8x128xf32> to vector<1x1x1x8x128xf32>
    tpu.vector_store %arg4[%c1_269, %803, %c2_270, %c0_271, %c0_272], %806 {strides = array<i32>} : memref<2x16x4x8x128xf32, #tpu.memory_space<vmem>>, vector<1x1x1x8x128xf32>,
    %c0_273 = arith.constant 0 : index
    %807 = arith.index_cast %c5_i32 : i32 to index
    %c3_274 = arith.constant 3 : index
    %c0_275 = arith.constant 0 : index
    %c0_276 = arith.constant 0 : index
    %808 = vector.load %arg4[%c0_273, %807, %c3_274, %c0_275, %c0_276] : memref<2x16x4x8x128xf32, #tpu.memory_space<vmem>>, vector<1x1x1x8x128xf32>
    %809 = vector.shape_cast %808 : vector<1x1x1x8x128xf32> to vector<8x128xf32>
    %810 = vector.shape_cast %726 : vector<8x128xf32> to vector<1x1x1x8x128xf32>
    tpu.vector_store %arg4[%c0_273, %807, %c3_274, %c0_275, %c0_276], %810 {strides = array<i32>} : memref<2x16x4x8x128xf32, #tpu.memory_space<vmem>>, vector<1x1x1x8x128xf32>,
    %c1_277 = arith.constant 1 : index
    %811 = arith.index_cast %664 : i32 to index
    %c3_278 = arith.constant 3 : index
    %c0_279 = arith.constant 0 : index
    %c0_280 = arith.constant 0 : index
    %812 = vector.load %arg4[%c1_277, %811, %c3_278, %c0_279, %c0_280] : memref<2x16x4x8x128xf32, #tpu.memory_space<vmem>>, vector<1x1x1x8x128xf32>
    %813 = vector.shape_cast %812 : vector<1x1x1x8x128xf32> to vector<8x128xf32>
    %814 = vector.shape_cast %782 : vector<8x128xf32> to vector<1x1x1x8x128xf32>
    tpu.vector_store %arg4[%c1_277, %811, %c3_278, %c0_279, %c0_280], %814 {strides = array<i32>} : memref<2x16x4x8x128xf32, #tpu.memory_space<vmem>>, vector<1x1x1x8x128xf32>,
    %c6_i32 = arith.constant 6 : i32
    %c15_i32_281 = arith.constant 15 : i32
    %815 = arith.subi %c15_i32_281, %c6_i32 : i32
    %c0_282 = arith.constant 0 : index
    %816 = arith.index_cast %c6_i32 : i32 to index
    %c0_283 = arith.constant 0 : index
    %c0_284 = arith.constant 0 : index
    %c0_285 = arith.constant 0 : index
    %817 = vector.load %arg3[%c0_282, %816, %c0_283, %c0_284, %c0_285] : memref<1x16x4x8x128xf32, #tpu.memory_space<vmem>>, vector<1x1x4x8x128xf32>
    %818 = vector.shape_cast %817 : vector<1x1x4x8x128xf32> to vector<4x8x128xf32>
    %c0_286 = arith.constant 0 : index
    %819 = arith.index_cast %815 : i32 to index
    %c0_287 = arith.constant 0 : index
    %c0_288 = arith.constant 0 : index
    %c0_289 = arith.constant 0 : index
    %820 = vector.load %arg3[%c0_286, %819, %c0_287, %c0_288, %c0_289] : memref<1x16x4x8x128xf32, #tpu.memory_space<vmem>>, vector<1x1x4x8x128xf32>
    %821 = vector.shape_cast %820 : vector<1x1x4x8x128xf32> to vector<4x8x128xf32>
    %822 = vector.extract_strided_slice %818 {offsets = [0, 0, 0], sizes = [1, 8, 128], strides = [1, 1, 1]} : vector<4x8x128xf32> to vector<1x8x128xf32>
    %823 = vector.shape_cast %822 : vector<1x8x128xf32> to vector<8x128xf32>
    %824 = vector.broadcast %0 : f32 to vector<8x128xf32>
    %825 = arith.mulf %684, %824 : vector<8x128xf32>
    %826 = vector.broadcast %1 : f32 to vector<8x128xf32>
    %827 = arith.mulf %698, %826 : vector<8x128xf32>
    %828 = arith.addf %825, %827 : vector<8x128xf32>
    %829 = vector.broadcast %2 : f32 to vector<8x128xf32>
    %830 = arith.mulf %712, %829 : vector<8x128xf32>
    %831 = arith.addf %828, %830 : vector<8x128xf32>
    %832 = vector.broadcast %3 : f32 to vector<8x128xf32>
    %833 = arith.mulf %726, %832 : vector<8x128xf32>
    %834 = arith.addf %831, %833 : vector<8x128xf32>
    %835 = arith.addf %823, %834 : vector<8x128xf32>
    %836 = vector.extract_strided_slice %818 {offsets = [1, 0, 0], sizes = [1, 8, 128], strides = [1, 1, 1]} : vector<4x8x128xf32> to vector<1x8x128xf32>
    %837 = vector.shape_cast %836 : vector<1x8x128xf32> to vector<8x128xf32>
    %838 = vector.broadcast %4 : f32 to vector<8x128xf32>
    %839 = arith.mulf %684, %838 : vector<8x128xf32>
    %840 = vector.broadcast %5 : f32 to vector<8x128xf32>
    %841 = arith.mulf %698, %840 : vector<8x128xf32>
    %842 = arith.addf %839, %841 : vector<8x128xf32>
    %843 = vector.broadcast %6 : f32 to vector<8x128xf32>
    %844 = arith.mulf %712, %843 : vector<8x128xf32>
    %845 = arith.addf %842, %844 : vector<8x128xf32>
    %846 = vector.broadcast %7 : f32 to vector<8x128xf32>
    %847 = arith.mulf %726, %846 : vector<8x128xf32>
    %848 = arith.addf %845, %847 : vector<8x128xf32>
    %849 = arith.addf %837, %848 : vector<8x128xf32>
    %850 = vector.extract_strided_slice %818 {offsets = [2, 0, 0], sizes = [1, 8, 128], strides = [1, 1, 1]} : vector<4x8x128xf32> to vector<1x8x128xf32>
    %851 = vector.shape_cast %850 : vector<1x8x128xf32> to vector<8x128xf32>
    %852 = vector.broadcast %8 : f32 to vector<8x128xf32>
    %853 = arith.mulf %684, %852 : vector<8x128xf32>
    %854 = vector.broadcast %9 : f32 to vector<8x128xf32>
    %855 = arith.mulf %698, %854 : vector<8x128xf32>
    %856 = arith.addf %853, %855 : vector<8x128xf32>
    %857 = vector.broadcast %10 : f32 to vector<8x128xf32>
    %858 = arith.mulf %712, %857 : vector<8x128xf32>
    %859 = arith.addf %856, %858 : vector<8x128xf32>
    %860 = vector.broadcast %11 : f32 to vector<8x128xf32>
    %861 = arith.mulf %726, %860 : vector<8x128xf32>
    %862 = arith.addf %859, %861 : vector<8x128xf32>
    %863 = arith.addf %851, %862 : vector<8x128xf32>
    %864 = vector.extract_strided_slice %818 {offsets = [3, 0, 0], sizes = [1, 8, 128], strides = [1, 1, 1]} : vector<4x8x128xf32> to vector<1x8x128xf32>
    %865 = vector.shape_cast %864 : vector<1x8x128xf32> to vector<8x128xf32>
    %866 = vector.broadcast %12 : f32 to vector<8x128xf32>
    %867 = arith.mulf %684, %866 : vector<8x128xf32>
    %868 = vector.broadcast %13 : f32 to vector<8x128xf32>
    %869 = arith.mulf %698, %868 : vector<8x128xf32>
    %870 = arith.addf %867, %869 : vector<8x128xf32>
    %871 = vector.broadcast %14 : f32 to vector<8x128xf32>
    %872 = arith.mulf %712, %871 : vector<8x128xf32>
    %873 = arith.addf %870, %872 : vector<8x128xf32>
    %874 = vector.broadcast %15 : f32 to vector<8x128xf32>
    %875 = arith.mulf %726, %874 : vector<8x128xf32>
    %876 = arith.addf %873, %875 : vector<8x128xf32>
    %877 = arith.addf %865, %876 : vector<8x128xf32>
    %878 = vector.extract_strided_slice %821 {offsets = [0, 0, 0], sizes = [1, 8, 128], strides = [1, 1, 1]} : vector<4x8x128xf32> to vector<1x8x128xf32>
    %879 = vector.shape_cast %878 : vector<1x8x128xf32> to vector<8x128xf32>
    %880 = vector.broadcast %0 : f32 to vector<8x128xf32>
    %881 = arith.mulf %740, %880 : vector<8x128xf32>
    %882 = vector.broadcast %1 : f32 to vector<8x128xf32>
    %883 = arith.mulf %754, %882 : vector<8x128xf32>
    %884 = arith.addf %881, %883 : vector<8x128xf32>
    %885 = vector.broadcast %2 : f32 to vector<8x128xf32>
    %886 = arith.mulf %768, %885 : vector<8x128xf32>
    %887 = arith.addf %884, %886 : vector<8x128xf32>
    %888 = vector.broadcast %3 : f32 to vector<8x128xf32>
    %889 = arith.mulf %782, %888 : vector<8x128xf32>
    %890 = arith.addf %887, %889 : vector<8x128xf32>
    %891 = arith.addf %879, %890 : vector<8x128xf32>
    %892 = vector.extract_strided_slice %821 {offsets = [1, 0, 0], sizes = [1, 8, 128], strides = [1, 1, 1]} : vector<4x8x128xf32> to vector<1x8x128xf32>
    %893 = vector.shape_cast %892 : vector<1x8x128xf32> to vector<8x128xf32>
    %894 = vector.broadcast %4 : f32 to vector<8x128xf32>
    %895 = arith.mulf %740, %894 : vector<8x128xf32>
    %896 = vector.broadcast %5 : f32 to vector<8x128xf32>
    %897 = arith.mulf %754, %896 : vector<8x128xf32>
    %898 = arith.addf %895, %897 : vector<8x128xf32>
    %899 = vector.broadcast %6 : f32 to vector<8x128xf32>
    %900 = arith.mulf %768, %899 : vector<8x128xf32>
    %901 = arith.addf %898, %900 : vector<8x128xf32>
    %902 = vector.broadcast %7 : f32 to vector<8x128xf32>
    %903 = arith.mulf %782, %902 : vector<8x128xf32>
    %904 = arith.addf %901, %903 : vector<8x128xf32>
    %905 = arith.addf %893, %904 : vector<8x128xf32>
    %906 = vector.extract_strided_slice %821 {offsets = [2, 0, 0], sizes = [1, 8, 128], strides = [1, 1, 1]} : vector<4x8x128xf32> to vector<1x8x128xf32>
    %907 = vector.shape_cast %906 : vector<1x8x128xf32> to vector<8x128xf32>
    %908 = vector.broadcast %8 : f32 to vector<8x128xf32>
    %909 = arith.mulf %740, %908 : vector<8x128xf32>
    %910 = vector.broadcast %9 : f32 to vector<8x128xf32>
    %911 = arith.mulf %754, %910 : vector<8x128xf32>
    %912 = arith.addf %909, %911 : vector<8x128xf32>
    %913 = vector.broadcast %10 : f32 to vector<8x128xf32>
    %914 = arith.mulf %768, %913 : vector<8x128xf32>
    %915 = arith.addf %912, %914 : vector<8x128xf32>
    %916 = vector.broadcast %11 : f32 to vector<8x128xf32>
    %917 = arith.mulf %782, %916 : vector<8x128xf32>
    %918 = arith.addf %915, %917 : vector<8x128xf32>
    %919 = arith.addf %907, %918 : vector<8x128xf32>
    %920 = vector.extract_strided_slice %821 {offsets = [3, 0, 0], sizes = [1, 8, 128], strides = [1, 1, 1]} : vector<4x8x128xf32> to vector<1x8x128xf32>
    %921 = vector.shape_cast %920 : vector<1x8x128xf32> to vector<8x128xf32>
    %922 = vector.broadcast %12 : f32 to vector<8x128xf32>
    %923 = arith.mulf %740, %922 : vector<8x128xf32>
    %924 = vector.broadcast %13 : f32 to vector<8x128xf32>
    %925 = arith.mulf %754, %924 : vector<8x128xf32>
    %926 = arith.addf %923, %925 : vector<8x128xf32>
    %927 = vector.broadcast %14 : f32 to vector<8x128xf32>
    %928 = arith.mulf %768, %927 : vector<8x128xf32>
    %929 = arith.addf %926, %928 : vector<8x128xf32>
    %930 = vector.broadcast %15 : f32 to vector<8x128xf32>
    %931 = arith.mulf %782, %930 : vector<8x128xf32>
    %932 = arith.addf %929, %931 : vector<8x128xf32>
    %933 = arith.addf %921, %932 : vector<8x128xf32>
    %c0_290 = arith.constant 0 : index
    %934 = arith.index_cast %c6_i32 : i32 to index
    %c0_291 = arith.constant 0 : index
    %c0_292 = arith.constant 0 : index
    %c0_293 = arith.constant 0 : index
    %935 = vector.load %arg4[%c0_290, %934, %c0_291, %c0_292, %c0_293] : memref<2x16x4x8x128xf32, #tpu.memory_space<vmem>>, vector<1x1x1x8x128xf32>
    %936 = vector.shape_cast %935 : vector<1x1x1x8x128xf32> to vector<8x128xf32>
    %937 = vector.shape_cast %835 : vector<8x128xf32> to vector<1x1x1x8x128xf32>
    tpu.vector_store %arg4[%c0_290, %934, %c0_291, %c0_292, %c0_293], %937 {strides = array<i32>} : memref<2x16x4x8x128xf32, #tpu.memory_space<vmem>>, vector<1x1x1x8x128xf32>,
    %c1_294 = arith.constant 1 : index
    %938 = arith.index_cast %815 : i32 to index
    %c0_295 = arith.constant 0 : index
    %c0_296 = arith.constant 0 : index
    %c0_297 = arith.constant 0 : index
    %939 = vector.load %arg4[%c1_294, %938, %c0_295, %c0_296, %c0_297] : memref<2x16x4x8x128xf32, #tpu.memory_space<vmem>>, vector<1x1x1x8x128xf32>
    %940 = vector.shape_cast %939 : vector<1x1x1x8x128xf32> to vector<8x128xf32>
    %941 = vector.shape_cast %891 : vector<8x128xf32> to vector<1x1x1x8x128xf32>
    tpu.vector_store %arg4[%c1_294, %938, %c0_295, %c0_296, %c0_297], %941 {strides = array<i32>} : memref<2x16x4x8x128xf32, #tpu.memory_space<vmem>>, vector<1x1x1x8x128xf32>,
    %c0_298 = arith.constant 0 : index
    %942 = arith.index_cast %c6_i32 : i32 to index
    %c1_299 = arith.constant 1 : index
    %c0_300 = arith.constant 0 : index
    %c0_301 = arith.constant 0 : index
    %943 = vector.load %arg4[%c0_298, %942, %c1_299, %c0_300, %c0_301] : memref<2x16x4x8x128xf32, #tpu.memory_space<vmem>>, vector<1x1x1x8x128xf32>
    %944 = vector.shape_cast %943 : vector<1x1x1x8x128xf32> to vector<8x128xf32>
    %945 = vector.shape_cast %849 : vector<8x128xf32> to vector<1x1x1x8x128xf32>
    tpu.vector_store %arg4[%c0_298, %942, %c1_299, %c0_300, %c0_301], %945 {strides = array<i32>} : memref<2x16x4x8x128xf32, #tpu.memory_space<vmem>>, vector<1x1x1x8x128xf32>,
    %c1_302 = arith.constant 1 : index
    %946 = arith.index_cast %815 : i32 to index
    %c1_303 = arith.constant 1 : index
    %c0_304 = arith.constant 0 : index
    %c0_305 = arith.constant 0 : index
    %947 = vector.load %arg4[%c1_302, %946, %c1_303, %c0_304, %c0_305] : memref<2x16x4x8x128xf32, #tpu.memory_space<vmem>>, vector<1x1x1x8x128xf32>
    %948 = vector.shape_cast %947 : vector<1x1x1x8x128xf32> to vector<8x128xf32>
    %949 = vector.shape_cast %905 : vector<8x128xf32> to vector<1x1x1x8x128xf32>
    tpu.vector_store %arg4[%c1_302, %946, %c1_303, %c0_304, %c0_305], %949 {strides = array<i32>} : memref<2x16x4x8x128xf32, #tpu.memory_space<vmem>>, vector<1x1x1x8x128xf32>,
    %c0_306 = arith.constant 0 : index
    %950 = arith.index_cast %c6_i32 : i32 to index
    %c2_307 = arith.constant 2 : index
    %c0_308 = arith.constant 0 : index
    %c0_309 = arith.constant 0 : index
    %951 = vector.load %arg4[%c0_306, %950, %c2_307, %c0_308, %c0_309] : memref<2x16x4x8x128xf32, #tpu.memory_space<vmem>>, vector<1x1x1x8x128xf32>
    %952 = vector.shape_cast %951 : vector<1x1x1x8x128xf32> to vector<8x128xf32>
    %953 = vector.shape_cast %863 : vector<8x128xf32> to vector<1x1x1x8x128xf32>
    tpu.vector_store %arg4[%c0_306, %950, %c2_307, %c0_308, %c0_309], %953 {strides = array<i32>} : memref<2x16x4x8x128xf32, #tpu.memory_space<vmem>>, vector<1x1x1x8x128xf32>,
    %c1_310 = arith.constant 1 : index
    %954 = arith.index_cast %815 : i32 to index
    %c2_311 = arith.constant 2 : index
    %c0_312 = arith.constant 0 : index
    %c0_313 = arith.constant 0 : index
    %955 = vector.load %arg4[%c1_310, %954, %c2_311, %c0_312, %c0_313] : memref<2x16x4x8x128xf32, #tpu.memory_space<vmem>>, vector<1x1x1x8x128xf32>
    %956 = vector.shape_cast %955 : vector<1x1x1x8x128xf32> to vector<8x128xf32>
    %957 = vector.shape_cast %919 : vector<8x128xf32> to vector<1x1x1x8x128xf32>
    tpu.vector_store %arg4[%c1_310, %954, %c2_311, %c0_312, %c0_313], %957 {strides = array<i32>} : memref<2x16x4x8x128xf32, #tpu.memory_space<vmem>>, vector<1x1x1x8x128xf32>,
    %c0_314 = arith.constant 0 : index
    %958 = arith.index_cast %c6_i32 : i32 to index
    %c3_315 = arith.constant 3 : index
    %c0_316 = arith.constant 0 : index
    %c0_317 = arith.constant 0 : index
    %959 = vector.load %arg4[%c0_314, %958, %c3_315, %c0_316, %c0_317] : memref<2x16x4x8x128xf32, #tpu.memory_space<vmem>>, vector<1x1x1x8x128xf32>
    %960 = vector.shape_cast %959 : vector<1x1x1x8x128xf32> to vector<8x128xf32>
    %961 = vector.shape_cast %877 : vector<8x128xf32> to vector<1x1x1x8x128xf32>
    tpu.vector_store %arg4[%c0_314, %958, %c3_315, %c0_316, %c0_317], %961 {strides = array<i32>} : memref<2x16x4x8x128xf32, #tpu.memory_space<vmem>>, vector<1x1x1x8x128xf32>,
    %c1_318 = arith.constant 1 : index
    %962 = arith.index_cast %815 : i32 to index
    %c3_319 = arith.constant 3 : index
    %c0_320 = arith.constant 0 : index
    %c0_321 = arith.constant 0 : index
    %963 = vector.load %arg4[%c1_318, %962, %c3_319, %c0_320, %c0_321] : memref<2x16x4x8x128xf32, #tpu.memory_space<vmem>>, vector<1x1x1x8x128xf32>
    %964 = vector.shape_cast %963 : vector<1x1x1x8x128xf32> to vector<8x128xf32>
    %965 = vector.shape_cast %933 : vector<8x128xf32> to vector<1x1x1x8x128xf32>
    tpu.vector_store %arg4[%c1_318, %962, %c3_319, %c0_320, %c0_321], %965 {strides = array<i32>} : memref<2x16x4x8x128xf32, #tpu.memory_space<vmem>>, vector<1x1x1x8x128xf32>,
    %c7_i32 = arith.constant 7 : i32
    %c15_i32_322 = arith.constant 15 : i32
    %966 = arith.subi %c15_i32_322, %c7_i32 : i32
    %c0_323 = arith.constant 0 : index
    %967 = arith.index_cast %c7_i32 : i32 to index
    %c0_324 = arith.constant 0 : index
    %c0_325 = arith.constant 0 : index
    %c0_326 = arith.constant 0 : index
    %968 = vector.load %arg3[%c0_323, %967, %c0_324, %c0_325, %c0_326] : memref<1x16x4x8x128xf32, #tpu.memory_space<vmem>>, vector<1x1x4x8x128xf32>
    %969 = vector.shape_cast %968 : vector<1x1x4x8x128xf32> to vector<4x8x128xf32>
    %c0_327 = arith.constant 0 : index
    %970 = arith.index_cast %966 : i32 to index
    %c0_328 = arith.constant 0 : index
    %c0_329 = arith.constant 0 : index
    %c0_330 = arith.constant 0 : index
    %971 = vector.load %arg3[%c0_327, %970, %c0_328, %c0_329, %c0_330] : memref<1x16x4x8x128xf32, #tpu.memory_space<vmem>>, vector<1x1x4x8x128xf32>
    %972 = vector.shape_cast %971 : vector<1x1x4x8x128xf32> to vector<4x8x128xf32>
    %973 = vector.extract_strided_slice %969 {offsets = [0, 0, 0], sizes = [1, 8, 128], strides = [1, 1, 1]} : vector<4x8x128xf32> to vector<1x8x128xf32>
    %974 = vector.shape_cast %973 : vector<1x8x128xf32> to vector<8x128xf32>
    %975 = vector.broadcast %0 : f32 to vector<8x128xf32>
    %976 = arith.mulf %835, %975 : vector<8x128xf32>
    %977 = vector.broadcast %1 : f32 to vector<8x128xf32>
    %978 = arith.mulf %849, %977 : vector<8x128xf32>
    %979 = arith.addf %976, %978 : vector<8x128xf32>
    %980 = vector.broadcast %2 : f32 to vector<8x128xf32>
    %981 = arith.mulf %863, %980 : vector<8x128xf32>
    %982 = arith.addf %979, %981 : vector<8x128xf32>
    %983 = vector.broadcast %3 : f32 to vector<8x128xf32>
    %984 = arith.mulf %877, %983 : vector<8x128xf32>
    %985 = arith.addf %982, %984 : vector<8x128xf32>
    %986 = arith.addf %974, %985 : vector<8x128xf32>
    %987 = vector.extract_strided_slice %969 {offsets = [1, 0, 0], sizes = [1, 8, 128], strides = [1, 1, 1]} : vector<4x8x128xf32> to vector<1x8x128xf32>
    %988 = vector.shape_cast %987 : vector<1x8x128xf32> to vector<8x128xf32>
    %989 = vector.broadcast %4 : f32 to vector<8x128xf32>
    %990 = arith.mulf %835, %989 : vector<8x128xf32>
    %991 = vector.broadcast %5 : f32 to vector<8x128xf32>
    %992 = arith.mulf %849, %991 : vector<8x128xf32>
    %993 = arith.addf %990, %992 : vector<8x128xf32>
    %994 = vector.broadcast %6 : f32 to vector<8x128xf32>
    %995 = arith.mulf %863, %994 : vector<8x128xf32>
    %996 = arith.addf %993, %995 : vector<8x128xf32>
    %997 = vector.broadcast %7 : f32 to vector<8x128xf32>
    %998 = arith.mulf %877, %997 : vector<8x128xf32>
    %999 = arith.addf %996, %998 : vector<8x128xf32>
    %1000 = arith.addf %988, %999 : vector<8x128xf32>
    %1001 = vector.extract_strided_slice %969 {offsets = [2, 0, 0], sizes = [1, 8, 128], strides = [1, 1, 1]} : vector<4x8x128xf32> to vector<1x8x128xf32>
    %1002 = vector.shape_cast %1001 : vector<1x8x128xf32> to vector<8x128xf32>
    %1003 = vector.broadcast %8 : f32 to vector<8x128xf32>
    %1004 = arith.mulf %835, %1003 : vector<8x128xf32>
    %1005 = vector.broadcast %9 : f32 to vector<8x128xf32>
    %1006 = arith.mulf %849, %1005 : vector<8x128xf32>
    %1007 = arith.addf %1004, %1006 : vector<8x128xf32>
    %1008 = vector.broadcast %10 : f32 to vector<8x128xf32>
    %1009 = arith.mulf %863, %1008 : vector<8x128xf32>
    %1010 = arith.addf %1007, %1009 : vector<8x128xf32>
    %1011 = vector.broadcast %11 : f32 to vector<8x128xf32>
    %1012 = arith.mulf %877, %1011 : vector<8x128xf32>
    %1013 = arith.addf %1010, %1012 : vector<8x128xf32>
    %1014 = arith.addf %1002, %1013 : vector<8x128xf32>
    %1015 = vector.extract_strided_slice %969 {offsets = [3, 0, 0], sizes = [1, 8, 128], strides = [1, 1, 1]} : vector<4x8x128xf32> to vector<1x8x128xf32>
    %1016 = vector.shape_cast %1015 : vector<1x8x128xf32> to vector<8x128xf32>
    %1017 = vector.broadcast %12 : f32 to vector<8x128xf32>
    %1018 = arith.mulf %835, %1017 : vector<8x128xf32>
    %1019 = vector.broadcast %13 : f32 to vector<8x128xf32>
    %1020 = arith.mulf %849, %1019 : vector<8x128xf32>
    %1021 = arith.addf %1018, %1020 : vector<8x128xf32>
    %1022 = vector.broadcast %14 : f32 to vector<8x128xf32>
    %1023 = arith.mulf %863, %1022 : vector<8x128xf32>
    %1024 = arith.addf %1021, %1023 : vector<8x128xf32>
    %1025 = vector.broadcast %15 : f32 to vector<8x128xf32>
    %1026 = arith.mulf %877, %1025 : vector<8x128xf32>
    %1027 = arith.addf %1024, %1026 : vector<8x128xf32>
    %1028 = arith.addf %1016, %1027 : vector<8x128xf32>
    %1029 = vector.extract_strided_slice %972 {offsets = [0, 0, 0], sizes = [1, 8, 128], strides = [1, 1, 1]} : vector<4x8x128xf32> to vector<1x8x128xf32>
    %1030 = vector.shape_cast %1029 : vector<1x8x128xf32> to vector<8x128xf32>
    %1031 = vector.broadcast %0 : f32 to vector<8x128xf32>
    %1032 = arith.mulf %891, %1031 : vector<8x128xf32>
    %1033 = vector.broadcast %1 : f32 to vector<8x128xf32>
    %1034 = arith.mulf %905, %1033 : vector<8x128xf32>
    %1035 = arith.addf %1032, %1034 : vector<8x128xf32>
    %1036 = vector.broadcast %2 : f32 to vector<8x128xf32>
    %1037 = arith.mulf %919, %1036 : vector<8x128xf32>
    %1038 = arith.addf %1035, %1037 : vector<8x128xf32>
    %1039 = vector.broadcast %3 : f32 to vector<8x128xf32>
    %1040 = arith.mulf %933, %1039 : vector<8x128xf32>
    %1041 = arith.addf %1038, %1040 : vector<8x128xf32>
    %1042 = arith.addf %1030, %1041 : vector<8x128xf32>
    %1043 = vector.extract_strided_slice %972 {offsets = [1, 0, 0], sizes = [1, 8, 128], strides = [1, 1, 1]} : vector<4x8x128xf32> to vector<1x8x128xf32>
    %1044 = vector.shape_cast %1043 : vector<1x8x128xf32> to vector<8x128xf32>
    %1045 = vector.broadcast %4 : f32 to vector<8x128xf32>
    %1046 = arith.mulf %891, %1045 : vector<8x128xf32>
    %1047 = vector.broadcast %5 : f32 to vector<8x128xf32>
    %1048 = arith.mulf %905, %1047 : vector<8x128xf32>
    %1049 = arith.addf %1046, %1048 : vector<8x128xf32>
    %1050 = vector.broadcast %6 : f32 to vector<8x128xf32>
    %1051 = arith.mulf %919, %1050 : vector<8x128xf32>
    %1052 = arith.addf %1049, %1051 : vector<8x128xf32>
    %1053 = vector.broadcast %7 : f32 to vector<8x128xf32>
    %1054 = arith.mulf %933, %1053 : vector<8x128xf32>
    %1055 = arith.addf %1052, %1054 : vector<8x128xf32>
    %1056 = arith.addf %1044, %1055 : vector<8x128xf32>
    %1057 = vector.extract_strided_slice %972 {offsets = [2, 0, 0], sizes = [1, 8, 128], strides = [1, 1, 1]} : vector<4x8x128xf32> to vector<1x8x128xf32>
    %1058 = vector.shape_cast %1057 : vector<1x8x128xf32> to vector<8x128xf32>
    %1059 = vector.broadcast %8 : f32 to vector<8x128xf32>
    %1060 = arith.mulf %891, %1059 : vector<8x128xf32>
    %1061 = vector.broadcast %9 : f32 to vector<8x128xf32>
    %1062 = arith.mulf %905, %1061 : vector<8x128xf32>
    %1063 = arith.addf %1060, %1062 : vector<8x128xf32>
    %1064 = vector.broadcast %10 : f32 to vector<8x128xf32>
    %1065 = arith.mulf %919, %1064 : vector<8x128xf32>
    %1066 = arith.addf %1063, %1065 : vector<8x128xf32>
    %1067 = vector.broadcast %11 : f32 to vector<8x128xf32>
    %1068 = arith.mulf %933, %1067 : vector<8x128xf32>
    %1069 = arith.addf %1066, %1068 : vector<8x128xf32>
    %1070 = arith.addf %1058, %1069 : vector<8x128xf32>
    %1071 = vector.extract_strided_slice %972 {offsets = [3, 0, 0], sizes = [1, 8, 128], strides = [1, 1, 1]} : vector<4x8x128xf32> to vector<1x8x128xf32>
    %1072 = vector.shape_cast %1071 : vector<1x8x128xf32> to vector<8x128xf32>
    %1073 = vector.broadcast %12 : f32 to vector<8x128xf32>
    %1074 = arith.mulf %891, %1073 : vector<8x128xf32>
    %1075 = vector.broadcast %13 : f32 to vector<8x128xf32>
    %1076 = arith.mulf %905, %1075 : vector<8x128xf32>
    %1077 = arith.addf %1074, %1076 : vector<8x128xf32>
    %1078 = vector.broadcast %14 : f32 to vector<8x128xf32>
    %1079 = arith.mulf %919, %1078 : vector<8x128xf32>
    %1080 = arith.addf %1077, %1079 : vector<8x128xf32>
    %1081 = vector.broadcast %15 : f32 to vector<8x128xf32>
    %1082 = arith.mulf %933, %1081 : vector<8x128xf32>
    %1083 = arith.addf %1080, %1082 : vector<8x128xf32>
    %1084 = arith.addf %1072, %1083 : vector<8x128xf32>
    %c0_331 = arith.constant 0 : index
    %1085 = arith.index_cast %c7_i32 : i32 to index
    %c0_332 = arith.constant 0 : index
    %c0_333 = arith.constant 0 : index
    %c0_334 = arith.constant 0 : index
    %1086 = vector.load %arg4[%c0_331, %1085, %c0_332, %c0_333, %c0_334] : memref<2x16x4x8x128xf32, #tpu.memory_space<vmem>>, vector<1x1x1x8x128xf32>
    %1087 = vector.shape_cast %1086 : vector<1x1x1x8x128xf32> to vector<8x128xf32>
    %1088 = vector.shape_cast %986 : vector<8x128xf32> to vector<1x1x1x8x128xf32>
    tpu.vector_store %arg4[%c0_331, %1085, %c0_332, %c0_333, %c0_334], %1088 {strides = array<i32>} : memref<2x16x4x8x128xf32, #tpu.memory_space<vmem>>, vector<1x1x1x8x128xf32>,
    %c1_335 = arith.constant 1 : index
    %1089 = arith.index_cast %966 : i32 to index
    %c0_336 = arith.constant 0 : index
    %c0_337 = arith.constant 0 : index
    %c0_338 = arith.constant 0 : index
    %1090 = vector.load %arg4[%c1_335, %1089, %c0_336, %c0_337, %c0_338] : memref<2x16x4x8x128xf32, #tpu.memory_space<vmem>>, vector<1x1x1x8x128xf32>
    %1091 = vector.shape_cast %1090 : vector<1x1x1x8x128xf32> to vector<8x128xf32>
    %1092 = vector.shape_cast %1042 : vector<8x128xf32> to vector<1x1x1x8x128xf32>
    tpu.vector_store %arg4[%c1_335, %1089, %c0_336, %c0_337, %c0_338], %1092 {strides = array<i32>} : memref<2x16x4x8x128xf32, #tpu.memory_space<vmem>>, vector<1x1x1x8x128xf32>,
    %c0_339 = arith.constant 0 : index
    %1093 = arith.index_cast %c7_i32 : i32 to index
    %c1_340 = arith.constant 1 : index
    %c0_341 = arith.constant 0 : index
    %c0_342 = arith.constant 0 : index
    %1094 = vector.load %arg4[%c0_339, %1093, %c1_340, %c0_341, %c0_342] : memref<2x16x4x8x128xf32, #tpu.memory_space<vmem>>, vector<1x1x1x8x128xf32>
    %1095 = vector.shape_cast %1094 : vector<1x1x1x8x128xf32> to vector<8x128xf32>
    %1096 = vector.shape_cast %1000 : vector<8x128xf32> to vector<1x1x1x8x128xf32>
    tpu.vector_store %arg4[%c0_339, %1093, %c1_340, %c0_341, %c0_342], %1096 {strides = array<i32>} : memref<2x16x4x8x128xf32, #tpu.memory_space<vmem>>, vector<1x1x1x8x128xf32>,
    %c1_343 = arith.constant 1 : index
    %1097 = arith.index_cast %966 : i32 to index
    %c1_344 = arith.constant 1 : index
    %c0_345 = arith.constant 0 : index
    %c0_346 = arith.constant 0 : index
    %1098 = vector.load %arg4[%c1_343, %1097, %c1_344, %c0_345, %c0_346] : memref<2x16x4x8x128xf32, #tpu.memory_space<vmem>>, vector<1x1x1x8x128xf32>
    %1099 = vector.shape_cast %1098 : vector<1x1x1x8x128xf32> to vector<8x128xf32>
    %1100 = vector.shape_cast %1056 : vector<8x128xf32> to vector<1x1x1x8x128xf32>
    tpu.vector_store %arg4[%c1_343, %1097, %c1_344, %c0_345, %c0_346], %1100 {strides = array<i32>} : memref<2x16x4x8x128xf32, #tpu.memory_space<vmem>>, vector<1x1x1x8x128xf32>,
    %c0_347 = arith.constant 0 : index
    %1101 = arith.index_cast %c7_i32 : i32 to index
    %c2_348 = arith.constant 2 : index
    %c0_349 = arith.constant 0 : index
    %c0_350 = arith.constant 0 : index
    %1102 = vector.load %arg4[%c0_347, %1101, %c2_348, %c0_349, %c0_350] : memref<2x16x4x8x128xf32, #tpu.memory_space<vmem>>, vector<1x1x1x8x128xf32>
    %1103 = vector.shape_cast %1102 : vector<1x1x1x8x128xf32> to vector<8x128xf32>
    %1104 = vector.shape_cast %1014 : vector<8x128xf32> to vector<1x1x1x8x128xf32>
    tpu.vector_store %arg4[%c0_347, %1101, %c2_348, %c0_349, %c0_350], %1104 {strides = array<i32>} : memref<2x16x4x8x128xf32, #tpu.memory_space<vmem>>, vector<1x1x1x8x128xf32>,
    %c1_351 = arith.constant 1 : index
    %1105 = arith.index_cast %966 : i32 to index
    %c2_352 = arith.constant 2 : index
    %c0_353 = arith.constant 0 : index
    %c0_354 = arith.constant 0 : index
    %1106 = vector.load %arg4[%c1_351, %1105, %c2_352, %c0_353, %c0_354] : memref<2x16x4x8x128xf32, #tpu.memory_space<vmem>>, vector<1x1x1x8x128xf32>
    %1107 = vector.shape_cast %1106 : vector<1x1x1x8x128xf32> to vector<8x128xf32>
    %1108 = vector.shape_cast %1070 : vector<8x128xf32> to vector<1x1x1x8x128xf32>
    tpu.vector_store %arg4[%c1_351, %1105, %c2_352, %c0_353, %c0_354], %1108 {strides = array<i32>} : memref<2x16x4x8x128xf32, #tpu.memory_space<vmem>>, vector<1x1x1x8x128xf32>,
    %c0_355 = arith.constant 0 : index
    %1109 = arith.index_cast %c7_i32 : i32 to index
    %c3_356 = arith.constant 3 : index
    %c0_357 = arith.constant 0 : index
    %c0_358 = arith.constant 0 : index
    %1110 = vector.load %arg4[%c0_355, %1109, %c3_356, %c0_357, %c0_358] : memref<2x16x4x8x128xf32, #tpu.memory_space<vmem>>, vector<1x1x1x8x128xf32>
    %1111 = vector.shape_cast %1110 : vector<1x1x1x8x128xf32> to vector<8x128xf32>
    %1112 = vector.shape_cast %1028 : vector<8x128xf32> to vector<1x1x1x8x128xf32>
    tpu.vector_store %arg4[%c0_355, %1109, %c3_356, %c0_357, %c0_358], %1112 {strides = array<i32>} : memref<2x16x4x8x128xf32, #tpu.memory_space<vmem>>, vector<1x1x1x8x128xf32>,
    %c1_359 = arith.constant 1 : index
    %1113 = arith.index_cast %966 : i32 to index
    %c3_360 = arith.constant 3 : index
    %c0_361 = arith.constant 0 : index
    %c0_362 = arith.constant 0 : index
    %1114 = vector.load %arg4[%c1_359, %1113, %c3_360, %c0_361, %c0_362] : memref<2x16x4x8x128xf32, #tpu.memory_space<vmem>>, vector<1x1x1x8x128xf32>
    %1115 = vector.shape_cast %1114 : vector<1x1x1x8x128xf32> to vector<8x128xf32>
    %1116 = vector.shape_cast %1084 : vector<8x128xf32> to vector<1x1x1x8x128xf32>
    tpu.vector_store %arg4[%c1_359, %1113, %c3_360, %c0_361, %c0_362], %1116 {strides = array<i32>} : memref<2x16x4x8x128xf32, #tpu.memory_space<vmem>>, vector<1x1x1x8x128xf32>,
    %c8_i32 = arith.constant 8 : i32
    %c15_i32_363 = arith.constant 15 : i32
    %1117 = arith.subi %c15_i32_363, %c8_i32 : i32
    %c0_364 = arith.constant 0 : index
    %1118 = arith.index_cast %c8_i32 : i32 to index
    %c0_365 = arith.constant 0 : index
    %c0_366 = arith.constant 0 : index
    %c0_367 = arith.constant 0 : index
    %1119 = vector.load %arg3[%c0_364, %1118, %c0_365, %c0_366, %c0_367] : memref<1x16x4x8x128xf32, #tpu.memory_space<vmem>>, vector<1x1x4x8x128xf32>
    %1120 = vector.shape_cast %1119 : vector<1x1x4x8x128xf32> to vector<4x8x128xf32>
    %c0_368 = arith.constant 0 : index
    %1121 = arith.index_cast %1117 : i32 to index
    %c0_369 = arith.constant 0 : index
    %c0_370 = arith.constant 0 : index
    %c0_371 = arith.constant 0 : index
    %1122 = vector.load %arg3[%c0_368, %1121, %c0_369, %c0_370, %c0_371] : memref<1x16x4x8x128xf32, #tpu.memory_space<vmem>>, vector<1x1x4x8x128xf32>
    %1123 = vector.shape_cast %1122 : vector<1x1x4x8x128xf32> to vector<4x8x128xf32>
    %1124 = vector.extract_strided_slice %1120 {offsets = [0, 0, 0], sizes = [1, 8, 128], strides = [1, 1, 1]} : vector<4x8x128xf32> to vector<1x8x128xf32>
    %1125 = vector.shape_cast %1124 : vector<1x8x128xf32> to vector<8x128xf32>
    %1126 = vector.broadcast %0 : f32 to vector<8x128xf32>
    %1127 = arith.mulf %986, %1126 : vector<8x128xf32>
    %1128 = vector.broadcast %1 : f32 to vector<8x128xf32>
    %1129 = arith.mulf %1000, %1128 : vector<8x128xf32>
    %1130 = arith.addf %1127, %1129 : vector<8x128xf32>
    %1131 = vector.broadcast %2 : f32 to vector<8x128xf32>
    %1132 = arith.mulf %1014, %1131 : vector<8x128xf32>
    %1133 = arith.addf %1130, %1132 : vector<8x128xf32>
    %1134 = vector.broadcast %3 : f32 to vector<8x128xf32>
    %1135 = arith.mulf %1028, %1134 : vector<8x128xf32>
    %1136 = arith.addf %1133, %1135 : vector<8x128xf32>
    %1137 = arith.addf %1125, %1136 : vector<8x128xf32>
    %1138 = vector.extract_strided_slice %1120 {offsets = [1, 0, 0], sizes = [1, 8, 128], strides = [1, 1, 1]} : vector<4x8x128xf32> to vector<1x8x128xf32>
    %1139 = vector.shape_cast %1138 : vector<1x8x128xf32> to vector<8x128xf32>
    %1140 = vector.broadcast %4 : f32 to vector<8x128xf32>
    %1141 = arith.mulf %986, %1140 : vector<8x128xf32>
    %1142 = vector.broadcast %5 : f32 to vector<8x128xf32>
    %1143 = arith.mulf %1000, %1142 : vector<8x128xf32>
    %1144 = arith.addf %1141, %1143 : vector<8x128xf32>
    %1145 = vector.broadcast %6 : f32 to vector<8x128xf32>
    %1146 = arith.mulf %1014, %1145 : vector<8x128xf32>
    %1147 = arith.addf %1144, %1146 : vector<8x128xf32>
    %1148 = vector.broadcast %7 : f32 to vector<8x128xf32>
    %1149 = arith.mulf %1028, %1148 : vector<8x128xf32>
    %1150 = arith.addf %1147, %1149 : vector<8x128xf32>
    %1151 = arith.addf %1139, %1150 : vector<8x128xf32>
    %1152 = vector.extract_strided_slice %1120 {offsets = [2, 0, 0], sizes = [1, 8, 128], strides = [1, 1, 1]} : vector<4x8x128xf32> to vector<1x8x128xf32>
    %1153 = vector.shape_cast %1152 : vector<1x8x128xf32> to vector<8x128xf32>
    %1154 = vector.broadcast %8 : f32 to vector<8x128xf32>
    %1155 = arith.mulf %986, %1154 : vector<8x128xf32>
    %1156 = vector.broadcast %9 : f32 to vector<8x128xf32>
    %1157 = arith.mulf %1000, %1156 : vector<8x128xf32>
    %1158 = arith.addf %1155, %1157 : vector<8x128xf32>
    %1159 = vector.broadcast %10 : f32 to vector<8x128xf32>
    %1160 = arith.mulf %1014, %1159 : vector<8x128xf32>
    %1161 = arith.addf %1158, %1160 : vector<8x128xf32>
    %1162 = vector.broadcast %11 : f32 to vector<8x128xf32>
    %1163 = arith.mulf %1028, %1162 : vector<8x128xf32>
    %1164 = arith.addf %1161, %1163 : vector<8x128xf32>
    %1165 = arith.addf %1153, %1164 : vector<8x128xf32>
    %1166 = vector.extract_strided_slice %1120 {offsets = [3, 0, 0], sizes = [1, 8, 128], strides = [1, 1, 1]} : vector<4x8x128xf32> to vector<1x8x128xf32>
    %1167 = vector.shape_cast %1166 : vector<1x8x128xf32> to vector<8x128xf32>
    %1168 = vector.broadcast %12 : f32 to vector<8x128xf32>
    %1169 = arith.mulf %986, %1168 : vector<8x128xf32>
    %1170 = vector.broadcast %13 : f32 to vector<8x128xf32>
    %1171 = arith.mulf %1000, %1170 : vector<8x128xf32>
    %1172 = arith.addf %1169, %1171 : vector<8x128xf32>
    %1173 = vector.broadcast %14 : f32 to vector<8x128xf32>
    %1174 = arith.mulf %1014, %1173 : vector<8x128xf32>
    %1175 = arith.addf %1172, %1174 : vector<8x128xf32>
    %1176 = vector.broadcast %15 : f32 to vector<8x128xf32>
    %1177 = arith.mulf %1028, %1176 : vector<8x128xf32>
    %1178 = arith.addf %1175, %1177 : vector<8x128xf32>
    %1179 = arith.addf %1167, %1178 : vector<8x128xf32>
    %1180 = vector.extract_strided_slice %1123 {offsets = [0, 0, 0], sizes = [1, 8, 128], strides = [1, 1, 1]} : vector<4x8x128xf32> to vector<1x8x128xf32>
    %1181 = vector.shape_cast %1180 : vector<1x8x128xf32> to vector<8x128xf32>
    %1182 = vector.broadcast %0 : f32 to vector<8x128xf32>
    %1183 = arith.mulf %1042, %1182 : vector<8x128xf32>
    %1184 = vector.broadcast %1 : f32 to vector<8x128xf32>
    %1185 = arith.mulf %1056, %1184 : vector<8x128xf32>
    %1186 = arith.addf %1183, %1185 : vector<8x128xf32>
    %1187 = vector.broadcast %2 : f32 to vector<8x128xf32>
    %1188 = arith.mulf %1070, %1187 : vector<8x128xf32>
    %1189 = arith.addf %1186, %1188 : vector<8x128xf32>
    %1190 = vector.broadcast %3 : f32 to vector<8x128xf32>
    %1191 = arith.mulf %1084, %1190 : vector<8x128xf32>
    %1192 = arith.addf %1189, %1191 : vector<8x128xf32>
    %1193 = arith.addf %1181, %1192 : vector<8x128xf32>
    %1194 = vector.extract_strided_slice %1123 {offsets = [1, 0, 0], sizes = [1, 8, 128], strides = [1, 1, 1]} : vector<4x8x128xf32> to vector<1x8x128xf32>
    %1195 = vector.shape_cast %1194 : vector<1x8x128xf32> to vector<8x128xf32>
    %1196 = vector.broadcast %4 : f32 to vector<8x128xf32>
    %1197 = arith.mulf %1042, %1196 : vector<8x128xf32>
    %1198 = vector.broadcast %5 : f32 to vector<8x128xf32>
    %1199 = arith.mulf %1056, %1198 : vector<8x128xf32>
    %1200 = arith.addf %1197, %1199 : vector<8x128xf32>
    %1201 = vector.broadcast %6 : f32 to vector<8x128xf32>
    %1202 = arith.mulf %1070, %1201 : vector<8x128xf32>
    %1203 = arith.addf %1200, %1202 : vector<8x128xf32>
    %1204 = vector.broadcast %7 : f32 to vector<8x128xf32>
    %1205 = arith.mulf %1084, %1204 : vector<8x128xf32>
    %1206 = arith.addf %1203, %1205 : vector<8x128xf32>
    %1207 = arith.addf %1195, %1206 : vector<8x128xf32>
    %1208 = vector.extract_strided_slice %1123 {offsets = [2, 0, 0], sizes = [1, 8, 128], strides = [1, 1, 1]} : vector<4x8x128xf32> to vector<1x8x128xf32>
    %1209 = vector.shape_cast %1208 : vector<1x8x128xf32> to vector<8x128xf32>
    %1210 = vector.broadcast %8 : f32 to vector<8x128xf32>
    %1211 = arith.mulf %1042, %1210 : vector<8x128xf32>
    %1212 = vector.broadcast %9 : f32 to vector<8x128xf32>
    %1213 = arith.mulf %1056, %1212 : vector<8x128xf32>
    %1214 = arith.addf %1211, %1213 : vector<8x128xf32>
    %1215 = vector.broadcast %10 : f32 to vector<8x128xf32>
    %1216 = arith.mulf %1070, %1215 : vector<8x128xf32>
    %1217 = arith.addf %1214, %1216 : vector<8x128xf32>
    %1218 = vector.broadcast %11 : f32 to vector<8x128xf32>
    %1219 = arith.mulf %1084, %1218 : vector<8x128xf32>
    %1220 = arith.addf %1217, %1219 : vector<8x128xf32>
    %1221 = arith.addf %1209, %1220 : vector<8x128xf32>
    %1222 = vector.extract_strided_slice %1123 {offsets = [3, 0, 0], sizes = [1, 8, 128], strides = [1, 1, 1]} : vector<4x8x128xf32> to vector<1x8x128xf32>
    %1223 = vector.shape_cast %1222 : vector<1x8x128xf32> to vector<8x128xf32>
    %1224 = vector.broadcast %12 : f32 to vector<8x128xf32>
    %1225 = arith.mulf %1042, %1224 : vector<8x128xf32>
    %1226 = vector.broadcast %13 : f32 to vector<8x128xf32>
    %1227 = arith.mulf %1056, %1226 : vector<8x128xf32>
    %1228 = arith.addf %1225, %1227 : vector<8x128xf32>
    %1229 = vector.broadcast %14 : f32 to vector<8x128xf32>
    %1230 = arith.mulf %1070, %1229 : vector<8x128xf32>
    %1231 = arith.addf %1228, %1230 : vector<8x128xf32>
    %1232 = vector.broadcast %15 : f32 to vector<8x128xf32>
    %1233 = arith.mulf %1084, %1232 : vector<8x128xf32>
    %1234 = arith.addf %1231, %1233 : vector<8x128xf32>
    %1235 = arith.addf %1223, %1234 : vector<8x128xf32>
    %c0_372 = arith.constant 0 : index
    %1236 = arith.index_cast %c8_i32 : i32 to index
    %c0_373 = arith.constant 0 : index
    %c0_374 = arith.constant 0 : index
    %c0_375 = arith.constant 0 : index
    %1237 = vector.load %arg4[%c0_372, %1236, %c0_373, %c0_374, %c0_375] : memref<2x16x4x8x128xf32, #tpu.memory_space<vmem>>, vector<1x1x1x8x128xf32>
    %1238 = vector.shape_cast %1237 : vector<1x1x1x8x128xf32> to vector<8x128xf32>
    %1239 = vector.shape_cast %1137 : vector<8x128xf32> to vector<1x1x1x8x128xf32>
    tpu.vector_store %arg4[%c0_372, %1236, %c0_373, %c0_374, %c0_375], %1239 {strides = array<i32>} : memref<2x16x4x8x128xf32, #tpu.memory_space<vmem>>, vector<1x1x1x8x128xf32>,
    %c1_376 = arith.constant 1 : index
    %1240 = arith.index_cast %1117 : i32 to index
    %c0_377 = arith.constant 0 : index
    %c0_378 = arith.constant 0 : index
    %c0_379 = arith.constant 0 : index
    %1241 = vector.load %arg4[%c1_376, %1240, %c0_377, %c0_378, %c0_379] : memref<2x16x4x8x128xf32, #tpu.memory_space<vmem>>, vector<1x1x1x8x128xf32>
    %1242 = vector.shape_cast %1241 : vector<1x1x1x8x128xf32> to vector<8x128xf32>
    %1243 = vector.shape_cast %1193 : vector<8x128xf32> to vector<1x1x1x8x128xf32>
    tpu.vector_store %arg4[%c1_376, %1240, %c0_377, %c0_378, %c0_379], %1243 {strides = array<i32>} : memref<2x16x4x8x128xf32, #tpu.memory_space<vmem>>, vector<1x1x1x8x128xf32>,
    %c0_380 = arith.constant 0 : index
    %1244 = arith.index_cast %c8_i32 : i32 to index
    %c1_381 = arith.constant 1 : index
    %c0_382 = arith.constant 0 : index
    %c0_383 = arith.constant 0 : index
    %1245 = vector.load %arg4[%c0_380, %1244, %c1_381, %c0_382, %c0_383] : memref<2x16x4x8x128xf32, #tpu.memory_space<vmem>>, vector<1x1x1x8x128xf32>
    %1246 = vector.shape_cast %1245 : vector<1x1x1x8x128xf32> to vector<8x128xf32>
    %1247 = vector.shape_cast %1151 : vector<8x128xf32> to vector<1x1x1x8x128xf32>
    tpu.vector_store %arg4[%c0_380, %1244, %c1_381, %c0_382, %c0_383], %1247 {strides = array<i32>} : memref<2x16x4x8x128xf32, #tpu.memory_space<vmem>>, vector<1x1x1x8x128xf32>,
    %c1_384 = arith.constant 1 : index
    %1248 = arith.index_cast %1117 : i32 to index
    %c1_385 = arith.constant 1 : index
    %c0_386 = arith.constant 0 : index
    %c0_387 = arith.constant 0 : index
    %1249 = vector.load %arg4[%c1_384, %1248, %c1_385, %c0_386, %c0_387] : memref<2x16x4x8x128xf32, #tpu.memory_space<vmem>>, vector<1x1x1x8x128xf32>
    %1250 = vector.shape_cast %1249 : vector<1x1x1x8x128xf32> to vector<8x128xf32>
    %1251 = vector.shape_cast %1207 : vector<8x128xf32> to vector<1x1x1x8x128xf32>
    tpu.vector_store %arg4[%c1_384, %1248, %c1_385, %c0_386, %c0_387], %1251 {strides = array<i32>} : memref<2x16x4x8x128xf32, #tpu.memory_space<vmem>>, vector<1x1x1x8x128xf32>,
    %c0_388 = arith.constant 0 : index
    %1252 = arith.index_cast %c8_i32 : i32 to index
    %c2_389 = arith.constant 2 : index
    %c0_390 = arith.constant 0 : index
    %c0_391 = arith.constant 0 : index
    %1253 = vector.load %arg4[%c0_388, %1252, %c2_389, %c0_390, %c0_391] : memref<2x16x4x8x128xf32, #tpu.memory_space<vmem>>, vector<1x1x1x8x128xf32>
    %1254 = vector.shape_cast %1253 : vector<1x1x1x8x128xf32> to vector<8x128xf32>
    %1255 = vector.shape_cast %1165 : vector<8x128xf32> to vector<1x1x1x8x128xf32>
    tpu.vector_store %arg4[%c0_388, %1252, %c2_389, %c0_390, %c0_391], %1255 {strides = array<i32>} : memref<2x16x4x8x128xf32, #tpu.memory_space<vmem>>, vector<1x1x1x8x128xf32>,
    %c1_392 = arith.constant 1 : index
    %1256 = arith.index_cast %1117 : i32 to index
    %c2_393 = arith.constant 2 : index
    %c0_394 = arith.constant 0 : index
    %c0_395 = arith.constant 0 : index
    %1257 = vector.load %arg4[%c1_392, %1256, %c2_393, %c0_394, %c0_395] : memref<2x16x4x8x128xf32, #tpu.memory_space<vmem>>, vector<1x1x1x8x128xf32>
    %1258 = vector.shape_cast %1257 : vector<1x1x1x8x128xf32> to vector<8x128xf32>
    %1259 = vector.shape_cast %1221 : vector<8x128xf32> to vector<1x1x1x8x128xf32>
    tpu.vector_store %arg4[%c1_392, %1256, %c2_393, %c0_394, %c0_395], %1259 {strides = array<i32>} : memref<2x16x4x8x128xf32, #tpu.memory_space<vmem>>, vector<1x1x1x8x128xf32>,
    %c0_396 = arith.constant 0 : index
    %1260 = arith.index_cast %c8_i32 : i32 to index
    %c3_397 = arith.constant 3 : index
    %c0_398 = arith.constant 0 : index
    %c0_399 = arith.constant 0 : index
    %1261 = vector.load %arg4[%c0_396, %1260, %c3_397, %c0_398, %c0_399] : memref<2x16x4x8x128xf32, #tpu.memory_space<vmem>>, vector<1x1x1x8x128xf32>
    %1262 = vector.shape_cast %1261 : vector<1x1x1x8x128xf32> to vector<8x128xf32>
    %1263 = vector.shape_cast %1179 : vector<8x128xf32> to vector<1x1x1x8x128xf32>
    tpu.vector_store %arg4[%c0_396, %1260, %c3_397, %c0_398, %c0_399], %1263 {strides = array<i32>} : memref<2x16x4x8x128xf32, #tpu.memory_space<vmem>>, vector<1x1x1x8x128xf32>,
    %c1_400 = arith.constant 1 : index
    %1264 = arith.index_cast %1117 : i32 to index
    %c3_401 = arith.constant 3 : index
    %c0_402 = arith.constant 0 : index
    %c0_403 = arith.constant 0 : index
    %1265 = vector.load %arg4[%c1_400, %1264, %c3_401, %c0_402, %c0_403] : memref<2x16x4x8x128xf32, #tpu.memory_space<vmem>>, vector<1x1x1x8x128xf32>
    %1266 = vector.shape_cast %1265 : vector<1x1x1x8x128xf32> to vector<8x128xf32>
    %1267 = vector.shape_cast %1235 : vector<8x128xf32> to vector<1x1x1x8x128xf32>
    tpu.vector_store %arg4[%c1_400, %1264, %c3_401, %c0_402, %c0_403], %1267 {strides = array<i32>} : memref<2x16x4x8x128xf32, #tpu.memory_space<vmem>>, vector<1x1x1x8x128xf32>,
    %c9_i32 = arith.constant 9 : i32
    %c15_i32_404 = arith.constant 15 : i32
    %1268 = arith.subi %c15_i32_404, %c9_i32 : i32
    %c0_405 = arith.constant 0 : index
    %1269 = arith.index_cast %c9_i32 : i32 to index
    %c0_406 = arith.constant 0 : index
    %c0_407 = arith.constant 0 : index
    %c0_408 = arith.constant 0 : index
    %1270 = vector.load %arg3[%c0_405, %1269, %c0_406, %c0_407, %c0_408] : memref<1x16x4x8x128xf32, #tpu.memory_space<vmem>>, vector<1x1x4x8x128xf32>
    %1271 = vector.shape_cast %1270 : vector<1x1x4x8x128xf32> to vector<4x8x128xf32>
    %c0_409 = arith.constant 0 : index
    %1272 = arith.index_cast %1268 : i32 to index
    %c0_410 = arith.constant 0 : index
    %c0_411 = arith.constant 0 : index
    %c0_412 = arith.constant 0 : index
    %1273 = vector.load %arg3[%c0_409, %1272, %c0_410, %c0_411, %c0_412] : memref<1x16x4x8x128xf32, #tpu.memory_space<vmem>>, vector<1x1x4x8x128xf32>
    %1274 = vector.shape_cast %1273 : vector<1x1x4x8x128xf32> to vector<4x8x128xf32>
    %1275 = vector.extract_strided_slice %1271 {offsets = [0, 0, 0], sizes = [1, 8, 128], strides = [1, 1, 1]} : vector<4x8x128xf32> to vector<1x8x128xf32>
    %1276 = vector.shape_cast %1275 : vector<1x8x128xf32> to vector<8x128xf32>
    %1277 = vector.broadcast %0 : f32 to vector<8x128xf32>
    %1278 = arith.mulf %1137, %1277 : vector<8x128xf32>
    %1279 = vector.broadcast %1 : f32 to vector<8x128xf32>
    %1280 = arith.mulf %1151, %1279 : vector<8x128xf32>
    %1281 = arith.addf %1278, %1280 : vector<8x128xf32>
    %1282 = vector.broadcast %2 : f32 to vector<8x128xf32>
    %1283 = arith.mulf %1165, %1282 : vector<8x128xf32>
    %1284 = arith.addf %1281, %1283 : vector<8x128xf32>
    %1285 = vector.broadcast %3 : f32 to vector<8x128xf32>
    %1286 = arith.mulf %1179, %1285 : vector<8x128xf32>
    %1287 = arith.addf %1284, %1286 : vector<8x128xf32>
    %1288 = arith.addf %1276, %1287 : vector<8x128xf32>
    %1289 = vector.extract_strided_slice %1271 {offsets = [1, 0, 0], sizes = [1, 8, 128], strides = [1, 1, 1]} : vector<4x8x128xf32> to vector<1x8x128xf32>
    %1290 = vector.shape_cast %1289 : vector<1x8x128xf32> to vector<8x128xf32>
    %1291 = vector.broadcast %4 : f32 to vector<8x128xf32>
    %1292 = arith.mulf %1137, %1291 : vector<8x128xf32>
    %1293 = vector.broadcast %5 : f32 to vector<8x128xf32>
    %1294 = arith.mulf %1151, %1293 : vector<8x128xf32>
    %1295 = arith.addf %1292, %1294 : vector<8x128xf32>
    %1296 = vector.broadcast %6 : f32 to vector<8x128xf32>
    %1297 = arith.mulf %1165, %1296 : vector<8x128xf32>
    %1298 = arith.addf %1295, %1297 : vector<8x128xf32>
    %1299 = vector.broadcast %7 : f32 to vector<8x128xf32>
    %1300 = arith.mulf %1179, %1299 : vector<8x128xf32>
    %1301 = arith.addf %1298, %1300 : vector<8x128xf32>
    %1302 = arith.addf %1290, %1301 : vector<8x128xf32>
    %1303 = vector.extract_strided_slice %1271 {offsets = [2, 0, 0], sizes = [1, 8, 128], strides = [1, 1, 1]} : vector<4x8x128xf32> to vector<1x8x128xf32>
    %1304 = vector.shape_cast %1303 : vector<1x8x128xf32> to vector<8x128xf32>
    %1305 = vector.broadcast %8 : f32 to vector<8x128xf32>
    %1306 = arith.mulf %1137, %1305 : vector<8x128xf32>
    %1307 = vector.broadcast %9 : f32 to vector<8x128xf32>
    %1308 = arith.mulf %1151, %1307 : vector<8x128xf32>
    %1309 = arith.addf %1306, %1308 : vector<8x128xf32>
    %1310 = vector.broadcast %10 : f32 to vector<8x128xf32>
    %1311 = arith.mulf %1165, %1310 : vector<8x128xf32>
    %1312 = arith.addf %1309, %1311 : vector<8x128xf32>
    %1313 = vector.broadcast %11 : f32 to vector<8x128xf32>
    %1314 = arith.mulf %1179, %1313 : vector<8x128xf32>
    %1315 = arith.addf %1312, %1314 : vector<8x128xf32>
    %1316 = arith.addf %1304, %1315 : vector<8x128xf32>
    %1317 = vector.extract_strided_slice %1271 {offsets = [3, 0, 0], sizes = [1, 8, 128], strides = [1, 1, 1]} : vector<4x8x128xf32> to vector<1x8x128xf32>
    %1318 = vector.shape_cast %1317 : vector<1x8x128xf32> to vector<8x128xf32>
    %1319 = vector.broadcast %12 : f32 to vector<8x128xf32>
    %1320 = arith.mulf %1137, %1319 : vector<8x128xf32>
    %1321 = vector.broadcast %13 : f32 to vector<8x128xf32>
    %1322 = arith.mulf %1151, %1321 : vector<8x128xf32>
    %1323 = arith.addf %1320, %1322 : vector<8x128xf32>
    %1324 = vector.broadcast %14 : f32 to vector<8x128xf32>
    %1325 = arith.mulf %1165, %1324 : vector<8x128xf32>
    %1326 = arith.addf %1323, %1325 : vector<8x128xf32>
    %1327 = vector.broadcast %15 : f32 to vector<8x128xf32>
    %1328 = arith.mulf %1179, %1327 : vector<8x128xf32>
    %1329 = arith.addf %1326, %1328 : vector<8x128xf32>
    %1330 = arith.addf %1318, %1329 : vector<8x128xf32>
    %1331 = vector.extract_strided_slice %1274 {offsets = [0, 0, 0], sizes = [1, 8, 128], strides = [1, 1, 1]} : vector<4x8x128xf32> to vector<1x8x128xf32>
    %1332 = vector.shape_cast %1331 : vector<1x8x128xf32> to vector<8x128xf32>
    %1333 = vector.broadcast %0 : f32 to vector<8x128xf32>
    %1334 = arith.mulf %1193, %1333 : vector<8x128xf32>
    %1335 = vector.broadcast %1 : f32 to vector<8x128xf32>
    %1336 = arith.mulf %1207, %1335 : vector<8x128xf32>
    %1337 = arith.addf %1334, %1336 : vector<8x128xf32>
    %1338 = vector.broadcast %2 : f32 to vector<8x128xf32>
    %1339 = arith.mulf %1221, %1338 : vector<8x128xf32>
    %1340 = arith.addf %1337, %1339 : vector<8x128xf32>
    %1341 = vector.broadcast %3 : f32 to vector<8x128xf32>
    %1342 = arith.mulf %1235, %1341 : vector<8x128xf32>
    %1343 = arith.addf %1340, %1342 : vector<8x128xf32>
    %1344 = arith.addf %1332, %1343 : vector<8x128xf32>
    %1345 = vector.extract_strided_slice %1274 {offsets = [1, 0, 0], sizes = [1, 8, 128], strides = [1, 1, 1]} : vector<4x8x128xf32> to vector<1x8x128xf32>
    %1346 = vector.shape_cast %1345 : vector<1x8x128xf32> to vector<8x128xf32>
    %1347 = vector.broadcast %4 : f32 to vector<8x128xf32>
    %1348 = arith.mulf %1193, %1347 : vector<8x128xf32>
    %1349 = vector.broadcast %5 : f32 to vector<8x128xf32>
    %1350 = arith.mulf %1207, %1349 : vector<8x128xf32>
    %1351 = arith.addf %1348, %1350 : vector<8x128xf32>
    %1352 = vector.broadcast %6 : f32 to vector<8x128xf32>
    %1353 = arith.mulf %1221, %1352 : vector<8x128xf32>
    %1354 = arith.addf %1351, %1353 : vector<8x128xf32>
    %1355 = vector.broadcast %7 : f32 to vector<8x128xf32>
    %1356 = arith.mulf %1235, %1355 : vector<8x128xf32>
    %1357 = arith.addf %1354, %1356 : vector<8x128xf32>
    %1358 = arith.addf %1346, %1357 : vector<8x128xf32>
    %1359 = vector.extract_strided_slice %1274 {offsets = [2, 0, 0], sizes = [1, 8, 128], strides = [1, 1, 1]} : vector<4x8x128xf32> to vector<1x8x128xf32>
    %1360 = vector.shape_cast %1359 : vector<1x8x128xf32> to vector<8x128xf32>
    %1361 = vector.broadcast %8 : f32 to vector<8x128xf32>
    %1362 = arith.mulf %1193, %1361 : vector<8x128xf32>
    %1363 = vector.broadcast %9 : f32 to vector<8x128xf32>
    %1364 = arith.mulf %1207, %1363 : vector<8x128xf32>
    %1365 = arith.addf %1362, %1364 : vector<8x128xf32>
    %1366 = vector.broadcast %10 : f32 to vector<8x128xf32>
    %1367 = arith.mulf %1221, %1366 : vector<8x128xf32>
    %1368 = arith.addf %1365, %1367 : vector<8x128xf32>
    %1369 = vector.broadcast %11 : f32 to vector<8x128xf32>
    %1370 = arith.mulf %1235, %1369 : vector<8x128xf32>
    %1371 = arith.addf %1368, %1370 : vector<8x128xf32>
    %1372 = arith.addf %1360, %1371 : vector<8x128xf32>
    %1373 = vector.extract_strided_slice %1274 {offsets = [3, 0, 0], sizes = [1, 8, 128], strides = [1, 1, 1]} : vector<4x8x128xf32> to vector<1x8x128xf32>
    %1374 = vector.shape_cast %1373 : vector<1x8x128xf32> to vector<8x128xf32>
    %1375 = vector.broadcast %12 : f32 to vector<8x128xf32>
    %1376 = arith.mulf %1193, %1375 : vector<8x128xf32>
    %1377 = vector.broadcast %13 : f32 to vector<8x128xf32>
    %1378 = arith.mulf %1207, %1377 : vector<8x128xf32>
    %1379 = arith.addf %1376, %1378 : vector<8x128xf32>
    %1380 = vector.broadcast %14 : f32 to vector<8x128xf32>
    %1381 = arith.mulf %1221, %1380 : vector<8x128xf32>
    %1382 = arith.addf %1379, %1381 : vector<8x128xf32>
    %1383 = vector.broadcast %15 : f32 to vector<8x128xf32>
    %1384 = arith.mulf %1235, %1383 : vector<8x128xf32>
    %1385 = arith.addf %1382, %1384 : vector<8x128xf32>
    %1386 = arith.addf %1374, %1385 : vector<8x128xf32>
    %c0_413 = arith.constant 0 : index
    %1387 = arith.index_cast %c9_i32 : i32 to index
    %c0_414 = arith.constant 0 : index
    %c0_415 = arith.constant 0 : index
    %c0_416 = arith.constant 0 : index
    %1388 = vector.load %arg4[%c0_413, %1387, %c0_414, %c0_415, %c0_416] : memref<2x16x4x8x128xf32, #tpu.memory_space<vmem>>, vector<1x1x1x8x128xf32>
    %1389 = vector.shape_cast %1388 : vector<1x1x1x8x128xf32> to vector<8x128xf32>
    %1390 = vector.shape_cast %1288 : vector<8x128xf32> to vector<1x1x1x8x128xf32>
    tpu.vector_store %arg4[%c0_413, %1387, %c0_414, %c0_415, %c0_416], %1390 {strides = array<i32>} : memref<2x16x4x8x128xf32, #tpu.memory_space<vmem>>, vector<1x1x1x8x128xf32>,
    %c1_417 = arith.constant 1 : index
    %1391 = arith.index_cast %1268 : i32 to index
    %c0_418 = arith.constant 0 : index
    %c0_419 = arith.constant 0 : index
    %c0_420 = arith.constant 0 : index
    %1392 = vector.load %arg4[%c1_417, %1391, %c0_418, %c0_419, %c0_420] : memref<2x16x4x8x128xf32, #tpu.memory_space<vmem>>, vector<1x1x1x8x128xf32>
    %1393 = vector.shape_cast %1392 : vector<1x1x1x8x128xf32> to vector<8x128xf32>
    %1394 = vector.shape_cast %1344 : vector<8x128xf32> to vector<1x1x1x8x128xf32>
    tpu.vector_store %arg4[%c1_417, %1391, %c0_418, %c0_419, %c0_420], %1394 {strides = array<i32>} : memref<2x16x4x8x128xf32, #tpu.memory_space<vmem>>, vector<1x1x1x8x128xf32>,
    %c0_421 = arith.constant 0 : index
    %1395 = arith.index_cast %c9_i32 : i32 to index
    %c1_422 = arith.constant 1 : index
    %c0_423 = arith.constant 0 : index
    %c0_424 = arith.constant 0 : index
    %1396 = vector.load %arg4[%c0_421, %1395, %c1_422, %c0_423, %c0_424] : memref<2x16x4x8x128xf32, #tpu.memory_space<vmem>>, vector<1x1x1x8x128xf32>
    %1397 = vector.shape_cast %1396 : vector<1x1x1x8x128xf32> to vector<8x128xf32>
    %1398 = vector.shape_cast %1302 : vector<8x128xf32> to vector<1x1x1x8x128xf32>
    tpu.vector_store %arg4[%c0_421, %1395, %c1_422, %c0_423, %c0_424], %1398 {strides = array<i32>} : memref<2x16x4x8x128xf32, #tpu.memory_space<vmem>>, vector<1x1x1x8x128xf32>,
    %c1_425 = arith.constant 1 : index
    %1399 = arith.index_cast %1268 : i32 to index
    %c1_426 = arith.constant 1 : index
    %c0_427 = arith.constant 0 : index
    %c0_428 = arith.constant 0 : index
    %1400 = vector.load %arg4[%c1_425, %1399, %c1_426, %c0_427, %c0_428] : memref<2x16x4x8x128xf32, #tpu.memory_space<vmem>>, vector<1x1x1x8x128xf32>
    %1401 = vector.shape_cast %1400 : vector<1x1x1x8x128xf32> to vector<8x128xf32>
    %1402 = vector.shape_cast %1358 : vector<8x128xf32> to vector<1x1x1x8x128xf32>
    tpu.vector_store %arg4[%c1_425, %1399, %c1_426, %c0_427, %c0_428], %1402 {strides = array<i32>} : memref<2x16x4x8x128xf32, #tpu.memory_space<vmem>>, vector<1x1x1x8x128xf32>,
    %c0_429 = arith.constant 0 : index
    %1403 = arith.index_cast %c9_i32 : i32 to index
    %c2_430 = arith.constant 2 : index
    %c0_431 = arith.constant 0 : index
    %c0_432 = arith.constant 0 : index
    %1404 = vector.load %arg4[%c0_429, %1403, %c2_430, %c0_431, %c0_432] : memref<2x16x4x8x128xf32, #tpu.memory_space<vmem>>, vector<1x1x1x8x128xf32>
    %1405 = vector.shape_cast %1404 : vector<1x1x1x8x128xf32> to vector<8x128xf32>
    %1406 = vector.shape_cast %1316 : vector<8x128xf32> to vector<1x1x1x8x128xf32>
    tpu.vector_store %arg4[%c0_429, %1403, %c2_430, %c0_431, %c0_432], %1406 {strides = array<i32>} : memref<2x16x4x8x128xf32, #tpu.memory_space<vmem>>, vector<1x1x1x8x128xf32>,
    %c1_433 = arith.constant 1 : index
    %1407 = arith.index_cast %1268 : i32 to index
    %c2_434 = arith.constant 2 : index
    %c0_435 = arith.constant 0 : index
    %c0_436 = arith.constant 0 : index
    %1408 = vector.load %arg4[%c1_433, %1407, %c2_434, %c0_435, %c0_436] : memref<2x16x4x8x128xf32, #tpu.memory_space<vmem>>, vector<1x1x1x8x128xf32>
    %1409 = vector.shape_cast %1408 : vector<1x1x1x8x128xf32> to vector<8x128xf32>
    %1410 = vector.shape_cast %1372 : vector<8x128xf32> to vector<1x1x1x8x128xf32>
    tpu.vector_store %arg4[%c1_433, %1407, %c2_434, %c0_435, %c0_436], %1410 {strides = array<i32>} : memref<2x16x4x8x128xf32, #tpu.memory_space<vmem>>, vector<1x1x1x8x128xf32>,
    %c0_437 = arith.constant 0 : index
    %1411 = arith.index_cast %c9_i32 : i32 to index
    %c3_438 = arith.constant 3 : index
    %c0_439 = arith.constant 0 : index
    %c0_440 = arith.constant 0 : index
    %1412 = vector.load %arg4[%c0_437, %1411, %c3_438, %c0_439, %c0_440] : memref<2x16x4x8x128xf32, #tpu.memory_space<vmem>>, vector<1x1x1x8x128xf32>
    %1413 = vector.shape_cast %1412 : vector<1x1x1x8x128xf32> to vector<8x128xf32>
    %1414 = vector.shape_cast %1330 : vector<8x128xf32> to vector<1x1x1x8x128xf32>
    tpu.vector_store %arg4[%c0_437, %1411, %c3_438, %c0_439, %c0_440], %1414 {strides = array<i32>} : memref<2x16x4x8x128xf32, #tpu.memory_space<vmem>>, vector<1x1x1x8x128xf32>,
    %c1_441 = arith.constant 1 : index
    %1415 = arith.index_cast %1268 : i32 to index
    %c3_442 = arith.constant 3 : index
    %c0_443 = arith.constant 0 : index
    %c0_444 = arith.constant 0 : index
    %1416 = vector.load %arg4[%c1_441, %1415, %c3_442, %c0_443, %c0_444] : memref<2x16x4x8x128xf32, #tpu.memory_space<vmem>>, vector<1x1x1x8x128xf32>
    %1417 = vector.shape_cast %1416 : vector<1x1x1x8x128xf32> to vector<8x128xf32>
    %1418 = vector.shape_cast %1386 : vector<8x128xf32> to vector<1x1x1x8x128xf32>
    tpu.vector_store %arg4[%c1_441, %1415, %c3_442, %c0_443, %c0_444], %1418 {strides = array<i32>} : memref<2x16x4x8x128xf32, #tpu.memory_space<vmem>>, vector<1x1x1x8x128xf32>,
    %c10_i32 = arith.constant 10 : i32
    %c15_i32_445 = arith.constant 15 : i32
    %1419 = arith.subi %c15_i32_445, %c10_i32 : i32
    %c0_446 = arith.constant 0 : index
    %1420 = arith.index_cast %c10_i32 : i32 to index
    %c0_447 = arith.constant 0 : index
    %c0_448 = arith.constant 0 : index
    %c0_449 = arith.constant 0 : index
    %1421 = vector.load %arg3[%c0_446, %1420, %c0_447, %c0_448, %c0_449] : memref<1x16x4x8x128xf32, #tpu.memory_space<vmem>>, vector<1x1x4x8x128xf32>
    %1422 = vector.shape_cast %1421 : vector<1x1x4x8x128xf32> to vector<4x8x128xf32>
    %c0_450 = arith.constant 0 : index
    %1423 = arith.index_cast %1419 : i32 to index
    %c0_451 = arith.constant 0 : index
    %c0_452 = arith.constant 0 : index
    %c0_453 = arith.constant 0 : index
    %1424 = vector.load %arg3[%c0_450, %1423, %c0_451, %c0_452, %c0_453] : memref<1x16x4x8x128xf32, #tpu.memory_space<vmem>>, vector<1x1x4x8x128xf32>
    %1425 = vector.shape_cast %1424 : vector<1x1x4x8x128xf32> to vector<4x8x128xf32>
    %1426 = vector.extract_strided_slice %1422 {offsets = [0, 0, 0], sizes = [1, 8, 128], strides = [1, 1, 1]} : vector<4x8x128xf32> to vector<1x8x128xf32>
    %1427 = vector.shape_cast %1426 : vector<1x8x128xf32> to vector<8x128xf32>
    %1428 = vector.broadcast %0 : f32 to vector<8x128xf32>
    %1429 = arith.mulf %1288, %1428 : vector<8x128xf32>
    %1430 = vector.broadcast %1 : f32 to vector<8x128xf32>
    %1431 = arith.mulf %1302, %1430 : vector<8x128xf32>
    %1432 = arith.addf %1429, %1431 : vector<8x128xf32>
    %1433 = vector.broadcast %2 : f32 to vector<8x128xf32>
    %1434 = arith.mulf %1316, %1433 : vector<8x128xf32>
    %1435 = arith.addf %1432, %1434 : vector<8x128xf32>
    %1436 = vector.broadcast %3 : f32 to vector<8x128xf32>
    %1437 = arith.mulf %1330, %1436 : vector<8x128xf32>
    %1438 = arith.addf %1435, %1437 : vector<8x128xf32>
    %1439 = arith.addf %1427, %1438 : vector<8x128xf32>
    %1440 = vector.extract_strided_slice %1422 {offsets = [1, 0, 0], sizes = [1, 8, 128], strides = [1, 1, 1]} : vector<4x8x128xf32> to vector<1x8x128xf32>
    %1441 = vector.shape_cast %1440 : vector<1x8x128xf32> to vector<8x128xf32>
    %1442 = vector.broadcast %4 : f32 to vector<8x128xf32>
    %1443 = arith.mulf %1288, %1442 : vector<8x128xf32>
    %1444 = vector.broadcast %5 : f32 to vector<8x128xf32>
    %1445 = arith.mulf %1302, %1444 : vector<8x128xf32>
    %1446 = arith.addf %1443, %1445 : vector<8x128xf32>
    %1447 = vector.broadcast %6 : f32 to vector<8x128xf32>
    %1448 = arith.mulf %1316, %1447 : vector<8x128xf32>
    %1449 = arith.addf %1446, %1448 : vector<8x128xf32>
    %1450 = vector.broadcast %7 : f32 to vector<8x128xf32>
    %1451 = arith.mulf %1330, %1450 : vector<8x128xf32>
    %1452 = arith.addf %1449, %1451 : vector<8x128xf32>
    %1453 = arith.addf %1441, %1452 : vector<8x128xf32>
    %1454 = vector.extract_strided_slice %1422 {offsets = [2, 0, 0], sizes = [1, 8, 128], strides = [1, 1, 1]} : vector<4x8x128xf32> to vector<1x8x128xf32>
    %1455 = vector.shape_cast %1454 : vector<1x8x128xf32> to vector<8x128xf32>
    %1456 = vector.broadcast %8 : f32 to vector<8x128xf32>
    %1457 = arith.mulf %1288, %1456 : vector<8x128xf32>
    %1458 = vector.broadcast %9 : f32 to vector<8x128xf32>
    %1459 = arith.mulf %1302, %1458 : vector<8x128xf32>
    %1460 = arith.addf %1457, %1459 : vector<8x128xf32>
    %1461 = vector.broadcast %10 : f32 to vector<8x128xf32>
    %1462 = arith.mulf %1316, %1461 : vector<8x128xf32>
    %1463 = arith.addf %1460, %1462 : vector<8x128xf32>
    %1464 = vector.broadcast %11 : f32 to vector<8x128xf32>
    %1465 = arith.mulf %1330, %1464 : vector<8x128xf32>
    %1466 = arith.addf %1463, %1465 : vector<8x128xf32>
    %1467 = arith.addf %1455, %1466 : vector<8x128xf32>
    %1468 = vector.extract_strided_slice %1422 {offsets = [3, 0, 0], sizes = [1, 8, 128], strides = [1, 1, 1]} : vector<4x8x128xf32> to vector<1x8x128xf32>
    %1469 = vector.shape_cast %1468 : vector<1x8x128xf32> to vector<8x128xf32>
    %1470 = vector.broadcast %12 : f32 to vector<8x128xf32>
    %1471 = arith.mulf %1288, %1470 : vector<8x128xf32>
    %1472 = vector.broadcast %13 : f32 to vector<8x128xf32>
    %1473 = arith.mulf %1302, %1472 : vector<8x128xf32>
    %1474 = arith.addf %1471, %1473 : vector<8x128xf32>
    %1475 = vector.broadcast %14 : f32 to vector<8x128xf32>
    %1476 = arith.mulf %1316, %1475 : vector<8x128xf32>
    %1477 = arith.addf %1474, %1476 : vector<8x128xf32>
    %1478 = vector.broadcast %15 : f32 to vector<8x128xf32>
    %1479 = arith.mulf %1330, %1478 : vector<8x128xf32>
    %1480 = arith.addf %1477, %1479 : vector<8x128xf32>
    %1481 = arith.addf %1469, %1480 : vector<8x128xf32>
    %1482 = vector.extract_strided_slice %1425 {offsets = [0, 0, 0], sizes = [1, 8, 128], strides = [1, 1, 1]} : vector<4x8x128xf32> to vector<1x8x128xf32>
    %1483 = vector.shape_cast %1482 : vector<1x8x128xf32> to vector<8x128xf32>
    %1484 = vector.broadcast %0 : f32 to vector<8x128xf32>
    %1485 = arith.mulf %1344, %1484 : vector<8x128xf32>
    %1486 = vector.broadcast %1 : f32 to vector<8x128xf32>
    %1487 = arith.mulf %1358, %1486 : vector<8x128xf32>
    %1488 = arith.addf %1485, %1487 : vector<8x128xf32>
    %1489 = vector.broadcast %2 : f32 to vector<8x128xf32>
    %1490 = arith.mulf %1372, %1489 : vector<8x128xf32>
    %1491 = arith.addf %1488, %1490 : vector<8x128xf32>
    %1492 = vector.broadcast %3 : f32 to vector<8x128xf32>
    %1493 = arith.mulf %1386, %1492 : vector<8x128xf32>
    %1494 = arith.addf %1491, %1493 : vector<8x128xf32>
    %1495 = arith.addf %1483, %1494 : vector<8x128xf32>
    %1496 = vector.extract_strided_slice %1425 {offsets = [1, 0, 0], sizes = [1, 8, 128], strides = [1, 1, 1]} : vector<4x8x128xf32> to vector<1x8x128xf32>
    %1497 = vector.shape_cast %1496 : vector<1x8x128xf32> to vector<8x128xf32>
    %1498 = vector.broadcast %4 : f32 to vector<8x128xf32>
    %1499 = arith.mulf %1344, %1498 : vector<8x128xf32>
    %1500 = vector.broadcast %5 : f32 to vector<8x128xf32>
    %1501 = arith.mulf %1358, %1500 : vector<8x128xf32>
    %1502 = arith.addf %1499, %1501 : vector<8x128xf32>
    %1503 = vector.broadcast %6 : f32 to vector<8x128xf32>
    %1504 = arith.mulf %1372, %1503 : vector<8x128xf32>
    %1505 = arith.addf %1502, %1504 : vector<8x128xf32>
    %1506 = vector.broadcast %7 : f32 to vector<8x128xf32>
    %1507 = arith.mulf %1386, %1506 : vector<8x128xf32>
    %1508 = arith.addf %1505, %1507 : vector<8x128xf32>
    %1509 = arith.addf %1497, %1508 : vector<8x128xf32>
    %1510 = vector.extract_strided_slice %1425 {offsets = [2, 0, 0], sizes = [1, 8, 128], strides = [1, 1, 1]} : vector<4x8x128xf32> to vector<1x8x128xf32>
    %1511 = vector.shape_cast %1510 : vector<1x8x128xf32> to vector<8x128xf32>
    %1512 = vector.broadcast %8 : f32 to vector<8x128xf32>
    %1513 = arith.mulf %1344, %1512 : vector<8x128xf32>
    %1514 = vector.broadcast %9 : f32 to vector<8x128xf32>
    %1515 = arith.mulf %1358, %1514 : vector<8x128xf32>
    %1516 = arith.addf %1513, %1515 : vector<8x128xf32>
    %1517 = vector.broadcast %10 : f32 to vector<8x128xf32>
    %1518 = arith.mulf %1372, %1517 : vector<8x128xf32>
    %1519 = arith.addf %1516, %1518 : vector<8x128xf32>
    %1520 = vector.broadcast %11 : f32 to vector<8x128xf32>
    %1521 = arith.mulf %1386, %1520 : vector<8x128xf32>
    %1522 = arith.addf %1519, %1521 : vector<8x128xf32>
    %1523 = arith.addf %1511, %1522 : vector<8x128xf32>
    %1524 = vector.extract_strided_slice %1425 {offsets = [3, 0, 0], sizes = [1, 8, 128], strides = [1, 1, 1]} : vector<4x8x128xf32> to vector<1x8x128xf32>
    %1525 = vector.shape_cast %1524 : vector<1x8x128xf32> to vector<8x128xf32>
    %1526 = vector.broadcast %12 : f32 to vector<8x128xf32>
    %1527 = arith.mulf %1344, %1526 : vector<8x128xf32>
    %1528 = vector.broadcast %13 : f32 to vector<8x128xf32>
    %1529 = arith.mulf %1358, %1528 : vector<8x128xf32>
    %1530 = arith.addf %1527, %1529 : vector<8x128xf32>
    %1531 = vector.broadcast %14 : f32 to vector<8x128xf32>
    %1532 = arith.mulf %1372, %1531 : vector<8x128xf32>
    %1533 = arith.addf %1530, %1532 : vector<8x128xf32>
    %1534 = vector.broadcast %15 : f32 to vector<8x128xf32>
    %1535 = arith.mulf %1386, %1534 : vector<8x128xf32>
    %1536 = arith.addf %1533, %1535 : vector<8x128xf32>
    %1537 = arith.addf %1525, %1536 : vector<8x128xf32>
    %c0_454 = arith.constant 0 : index
    %1538 = arith.index_cast %c10_i32 : i32 to index
    %c0_455 = arith.constant 0 : index
    %c0_456 = arith.constant 0 : index
    %c0_457 = arith.constant 0 : index
    %1539 = vector.load %arg4[%c0_454, %1538, %c0_455, %c0_456, %c0_457] : memref<2x16x4x8x128xf32, #tpu.memory_space<vmem>>, vector<1x1x1x8x128xf32>
    %1540 = vector.shape_cast %1539 : vector<1x1x1x8x128xf32> to vector<8x128xf32>
    %1541 = vector.shape_cast %1439 : vector<8x128xf32> to vector<1x1x1x8x128xf32>
    tpu.vector_store %arg4[%c0_454, %1538, %c0_455, %c0_456, %c0_457], %1541 {strides = array<i32>} : memref<2x16x4x8x128xf32, #tpu.memory_space<vmem>>, vector<1x1x1x8x128xf32>,
    %c1_458 = arith.constant 1 : index
    %1542 = arith.index_cast %1419 : i32 to index
    %c0_459 = arith.constant 0 : index
    %c0_460 = arith.constant 0 : index
    %c0_461 = arith.constant 0 : index
    %1543 = vector.load %arg4[%c1_458, %1542, %c0_459, %c0_460, %c0_461] : memref<2x16x4x8x128xf32, #tpu.memory_space<vmem>>, vector<1x1x1x8x128xf32>
    %1544 = vector.shape_cast %1543 : vector<1x1x1x8x128xf32> to vector<8x128xf32>
    %1545 = vector.shape_cast %1495 : vector<8x128xf32> to vector<1x1x1x8x128xf32>
    tpu.vector_store %arg4[%c1_458, %1542, %c0_459, %c0_460, %c0_461], %1545 {strides = array<i32>} : memref<2x16x4x8x128xf32, #tpu.memory_space<vmem>>, vector<1x1x1x8x128xf32>,
    %c0_462 = arith.constant 0 : index
    %1546 = arith.index_cast %c10_i32 : i32 to index
    %c1_463 = arith.constant 1 : index
    %c0_464 = arith.constant 0 : index
    %c0_465 = arith.constant 0 : index
    %1547 = vector.load %arg4[%c0_462, %1546, %c1_463, %c0_464, %c0_465] : memref<2x16x4x8x128xf32, #tpu.memory_space<vmem>>, vector<1x1x1x8x128xf32>
    %1548 = vector.shape_cast %1547 : vector<1x1x1x8x128xf32> to vector<8x128xf32>
    %1549 = vector.shape_cast %1453 : vector<8x128xf32> to vector<1x1x1x8x128xf32>
    tpu.vector_store %arg4[%c0_462, %1546, %c1_463, %c0_464, %c0_465], %1549 {strides = array<i32>} : memref<2x16x4x8x128xf32, #tpu.memory_space<vmem>>, vector<1x1x1x8x128xf32>,
    %c1_466 = arith.constant 1 : index
    %1550 = arith.index_cast %1419 : i32 to index
    %c1_467 = arith.constant 1 : index
    %c0_468 = arith.constant 0 : index
    %c0_469 = arith.constant 0 : index
    %1551 = vector.load %arg4[%c1_466, %1550, %c1_467, %c0_468, %c0_469] : memref<2x16x4x8x128xf32, #tpu.memory_space<vmem>>, vector<1x1x1x8x128xf32>
    %1552 = vector.shape_cast %1551 : vector<1x1x1x8x128xf32> to vector<8x128xf32>
    %1553 = vector.shape_cast %1509 : vector<8x128xf32> to vector<1x1x1x8x128xf32>
    tpu.vector_store %arg4[%c1_466, %1550, %c1_467, %c0_468, %c0_469], %1553 {strides = array<i32>} : memref<2x16x4x8x128xf32, #tpu.memory_space<vmem>>, vector<1x1x1x8x128xf32>,
    %c0_470 = arith.constant 0 : index
    %1554 = arith.index_cast %c10_i32 : i32 to index
    %c2_471 = arith.constant 2 : index
    %c0_472 = arith.constant 0 : index
    %c0_473 = arith.constant 0 : index
    %1555 = vector.load %arg4[%c0_470, %1554, %c2_471, %c0_472, %c0_473] : memref<2x16x4x8x128xf32, #tpu.memory_space<vmem>>, vector<1x1x1x8x128xf32>
    %1556 = vector.shape_cast %1555 : vector<1x1x1x8x128xf32> to vector<8x128xf32>
    %1557 = vector.shape_cast %1467 : vector<8x128xf32> to vector<1x1x1x8x128xf32>
    tpu.vector_store %arg4[%c0_470, %1554, %c2_471, %c0_472, %c0_473], %1557 {strides = array<i32>} : memref<2x16x4x8x128xf32, #tpu.memory_space<vmem>>, vector<1x1x1x8x128xf32>,
    %c1_474 = arith.constant 1 : index
    %1558 = arith.index_cast %1419 : i32 to index
    %c2_475 = arith.constant 2 : index
    %c0_476 = arith.constant 0 : index
    %c0_477 = arith.constant 0 : index
    %1559 = vector.load %arg4[%c1_474, %1558, %c2_475, %c0_476, %c0_477] : memref<2x16x4x8x128xf32, #tpu.memory_space<vmem>>, vector<1x1x1x8x128xf32>
    %1560 = vector.shape_cast %1559 : vector<1x1x1x8x128xf32> to vector<8x128xf32>
    %1561 = vector.shape_cast %1523 : vector<8x128xf32> to vector<1x1x1x8x128xf32>
    tpu.vector_store %arg4[%c1_474, %1558, %c2_475, %c0_476, %c0_477], %1561 {strides = array<i32>} : memref<2x16x4x8x128xf32, #tpu.memory_space<vmem>>, vector<1x1x1x8x128xf32>,
    %c0_478 = arith.constant 0 : index
    %1562 = arith.index_cast %c10_i32 : i32 to index
    %c3_479 = arith.constant 3 : index
    %c0_480 = arith.constant 0 : index
    %c0_481 = arith.constant 0 : index
    %1563 = vector.load %arg4[%c0_478, %1562, %c3_479, %c0_480, %c0_481] : memref<2x16x4x8x128xf32, #tpu.memory_space<vmem>>, vector<1x1x1x8x128xf32>
    %1564 = vector.shape_cast %1563 : vector<1x1x1x8x128xf32> to vector<8x128xf32>
    %1565 = vector.shape_cast %1481 : vector<8x128xf32> to vector<1x1x1x8x128xf32>
    tpu.vector_store %arg4[%c0_478, %1562, %c3_479, %c0_480, %c0_481], %1565 {strides = array<i32>} : memref<2x16x4x8x128xf32, #tpu.memory_space<vmem>>, vector<1x1x1x8x128xf32>,
    %c1_482 = arith.constant 1 : index
    %1566 = arith.index_cast %1419 : i32 to index
    %c3_483 = arith.constant 3 : index
    %c0_484 = arith.constant 0 : index
    %c0_485 = arith.constant 0 : index
    %1567 = vector.load %arg4[%c1_482, %1566, %c3_483, %c0_484, %c0_485] : memref<2x16x4x8x128xf32, #tpu.memory_space<vmem>>, vector<1x1x1x8x128xf32>
    %1568 = vector.shape_cast %1567 : vector<1x1x1x8x128xf32> to vector<8x128xf32>
    %1569 = vector.shape_cast %1537 : vector<8x128xf32> to vector<1x1x1x8x128xf32>
    tpu.vector_store %arg4[%c1_482, %1566, %c3_483, %c0_484, %c0_485], %1569 {strides = array<i32>} : memref<2x16x4x8x128xf32, #tpu.memory_space<vmem>>, vector<1x1x1x8x128xf32>,
    %c11_i32 = arith.constant 11 : i32
    %c15_i32_486 = arith.constant 15 : i32
    %1570 = arith.subi %c15_i32_486, %c11_i32 : i32
    %c0_487 = arith.constant 0 : index
    %1571 = arith.index_cast %c11_i32 : i32 to index
    %c0_488 = arith.constant 0 : index
    %c0_489 = arith.constant 0 : index
    %c0_490 = arith.constant 0 : index
    %1572 = vector.load %arg3[%c0_487, %1571, %c0_488, %c0_489, %c0_490] : memref<1x16x4x8x128xf32, #tpu.memory_space<vmem>>, vector<1x1x4x8x128xf32>
    %1573 = vector.shape_cast %1572 : vector<1x1x4x8x128xf32> to vector<4x8x128xf32>
    %c0_491 = arith.constant 0 : index
    %1574 = arith.index_cast %1570 : i32 to index
    %c0_492 = arith.constant 0 : index
    %c0_493 = arith.constant 0 : index
    %c0_494 = arith.constant 0 : index
    %1575 = vector.load %arg3[%c0_491, %1574, %c0_492, %c0_493, %c0_494] : memref<1x16x4x8x128xf32, #tpu.memory_space<vmem>>, vector<1x1x4x8x128xf32>
    %1576 = vector.shape_cast %1575 : vector<1x1x4x8x128xf32> to vector<4x8x128xf32>
    %1577 = vector.extract_strided_slice %1573 {offsets = [0, 0, 0], sizes = [1, 8, 128], strides = [1, 1, 1]} : vector<4x8x128xf32> to vector<1x8x128xf32>
    %1578 = vector.shape_cast %1577 : vector<1x8x128xf32> to vector<8x128xf32>
    %1579 = vector.broadcast %0 : f32 to vector<8x128xf32>
    %1580 = arith.mulf %1439, %1579 : vector<8x128xf32>
    %1581 = vector.broadcast %1 : f32 to vector<8x128xf32>
    %1582 = arith.mulf %1453, %1581 : vector<8x128xf32>
    %1583 = arith.addf %1580, %1582 : vector<8x128xf32>
    %1584 = vector.broadcast %2 : f32 to vector<8x128xf32>
    %1585 = arith.mulf %1467, %1584 : vector<8x128xf32>
    %1586 = arith.addf %1583, %1585 : vector<8x128xf32>
    %1587 = vector.broadcast %3 : f32 to vector<8x128xf32>
    %1588 = arith.mulf %1481, %1587 : vector<8x128xf32>
    %1589 = arith.addf %1586, %1588 : vector<8x128xf32>
    %1590 = arith.addf %1578, %1589 : vector<8x128xf32>
    %1591 = vector.extract_strided_slice %1573 {offsets = [1, 0, 0], sizes = [1, 8, 128], strides = [1, 1, 1]} : vector<4x8x128xf32> to vector<1x8x128xf32>
    %1592 = vector.shape_cast %1591 : vector<1x8x128xf32> to vector<8x128xf32>
    %1593 = vector.broadcast %4 : f32 to vector<8x128xf32>
    %1594 = arith.mulf %1439, %1593 : vector<8x128xf32>
    %1595 = vector.broadcast %5 : f32 to vector<8x128xf32>
    %1596 = arith.mulf %1453, %1595 : vector<8x128xf32>
    %1597 = arith.addf %1594, %1596 : vector<8x128xf32>
    %1598 = vector.broadcast %6 : f32 to vector<8x128xf32>
    %1599 = arith.mulf %1467, %1598 : vector<8x128xf32>
    %1600 = arith.addf %1597, %1599 : vector<8x128xf32>
    %1601 = vector.broadcast %7 : f32 to vector<8x128xf32>
    %1602 = arith.mulf %1481, %1601 : vector<8x128xf32>
    %1603 = arith.addf %1600, %1602 : vector<8x128xf32>
    %1604 = arith.addf %1592, %1603 : vector<8x128xf32>
    %1605 = vector.extract_strided_slice %1573 {offsets = [2, 0, 0], sizes = [1, 8, 128], strides = [1, 1, 1]} : vector<4x8x128xf32> to vector<1x8x128xf32>
    %1606 = vector.shape_cast %1605 : vector<1x8x128xf32> to vector<8x128xf32>
    %1607 = vector.broadcast %8 : f32 to vector<8x128xf32>
    %1608 = arith.mulf %1439, %1607 : vector<8x128xf32>
    %1609 = vector.broadcast %9 : f32 to vector<8x128xf32>
    %1610 = arith.mulf %1453, %1609 : vector<8x128xf32>
    %1611 = arith.addf %1608, %1610 : vector<8x128xf32>
    %1612 = vector.broadcast %10 : f32 to vector<8x128xf32>
    %1613 = arith.mulf %1467, %1612 : vector<8x128xf32>
    %1614 = arith.addf %1611, %1613 : vector<8x128xf32>
    %1615 = vector.broadcast %11 : f32 to vector<8x128xf32>
    %1616 = arith.mulf %1481, %1615 : vector<8x128xf32>
    %1617 = arith.addf %1614, %1616 : vector<8x128xf32>
    %1618 = arith.addf %1606, %1617 : vector<8x128xf32>
    %1619 = vector.extract_strided_slice %1573 {offsets = [3, 0, 0], sizes = [1, 8, 128], strides = [1, 1, 1]} : vector<4x8x128xf32> to vector<1x8x128xf32>
    %1620 = vector.shape_cast %1619 : vector<1x8x128xf32> to vector<8x128xf32>
    %1621 = vector.broadcast %12 : f32 to vector<8x128xf32>
    %1622 = arith.mulf %1439, %1621 : vector<8x128xf32>
    %1623 = vector.broadcast %13 : f32 to vector<8x128xf32>
    %1624 = arith.mulf %1453, %1623 : vector<8x128xf32>
    %1625 = arith.addf %1622, %1624 : vector<8x128xf32>
    %1626 = vector.broadcast %14 : f32 to vector<8x128xf32>
    %1627 = arith.mulf %1467, %1626 : vector<8x128xf32>
    %1628 = arith.addf %1625, %1627 : vector<8x128xf32>
    %1629 = vector.broadcast %15 : f32 to vector<8x128xf32>
    %1630 = arith.mulf %1481, %1629 : vector<8x128xf32>
    %1631 = arith.addf %1628, %1630 : vector<8x128xf32>
    %1632 = arith.addf %1620, %1631 : vector<8x128xf32>
    %1633 = vector.extract_strided_slice %1576 {offsets = [0, 0, 0], sizes = [1, 8, 128], strides = [1, 1, 1]} : vector<4x8x128xf32> to vector<1x8x128xf32>
    %1634 = vector.shape_cast %1633 : vector<1x8x128xf32> to vector<8x128xf32>
    %1635 = vector.broadcast %0 : f32 to vector<8x128xf32>
    %1636 = arith.mulf %1495, %1635 : vector<8x128xf32>
    %1637 = vector.broadcast %1 : f32 to vector<8x128xf32>
    %1638 = arith.mulf %1509, %1637 : vector<8x128xf32>
    %1639 = arith.addf %1636, %1638 : vector<8x128xf32>
    %1640 = vector.broadcast %2 : f32 to vector<8x128xf32>
    %1641 = arith.mulf %1523, %1640 : vector<8x128xf32>
    %1642 = arith.addf %1639, %1641 : vector<8x128xf32>
    %1643 = vector.broadcast %3 : f32 to vector<8x128xf32>
    %1644 = arith.mulf %1537, %1643 : vector<8x128xf32>
    %1645 = arith.addf %1642, %1644 : vector<8x128xf32>
    %1646 = arith.addf %1634, %1645 : vector<8x128xf32>
    %1647 = vector.extract_strided_slice %1576 {offsets = [1, 0, 0], sizes = [1, 8, 128], strides = [1, 1, 1]} : vector<4x8x128xf32> to vector<1x8x128xf32>
    %1648 = vector.shape_cast %1647 : vector<1x8x128xf32> to vector<8x128xf32>
    %1649 = vector.broadcast %4 : f32 to vector<8x128xf32>
    %1650 = arith.mulf %1495, %1649 : vector<8x128xf32>
    %1651 = vector.broadcast %5 : f32 to vector<8x128xf32>
    %1652 = arith.mulf %1509, %1651 : vector<8x128xf32>
    %1653 = arith.addf %1650, %1652 : vector<8x128xf32>
    %1654 = vector.broadcast %6 : f32 to vector<8x128xf32>
    %1655 = arith.mulf %1523, %1654 : vector<8x128xf32>
    %1656 = arith.addf %1653, %1655 : vector<8x128xf32>
    %1657 = vector.broadcast %7 : f32 to vector<8x128xf32>
    %1658 = arith.mulf %1537, %1657 : vector<8x128xf32>
    %1659 = arith.addf %1656, %1658 : vector<8x128xf32>
    %1660 = arith.addf %1648, %1659 : vector<8x128xf32>
    %1661 = vector.extract_strided_slice %1576 {offsets = [2, 0, 0], sizes = [1, 8, 128], strides = [1, 1, 1]} : vector<4x8x128xf32> to vector<1x8x128xf32>
    %1662 = vector.shape_cast %1661 : vector<1x8x128xf32> to vector<8x128xf32>
    %1663 = vector.broadcast %8 : f32 to vector<8x128xf32>
    %1664 = arith.mulf %1495, %1663 : vector<8x128xf32>
    %1665 = vector.broadcast %9 : f32 to vector<8x128xf32>
    %1666 = arith.mulf %1509, %1665 : vector<8x128xf32>
    %1667 = arith.addf %1664, %1666 : vector<8x128xf32>
    %1668 = vector.broadcast %10 : f32 to vector<8x128xf32>
    %1669 = arith.mulf %1523, %1668 : vector<8x128xf32>
    %1670 = arith.addf %1667, %1669 : vector<8x128xf32>
    %1671 = vector.broadcast %11 : f32 to vector<8x128xf32>
    %1672 = arith.mulf %1537, %1671 : vector<8x128xf32>
    %1673 = arith.addf %1670, %1672 : vector<8x128xf32>
    %1674 = arith.addf %1662, %1673 : vector<8x128xf32>
    %1675 = vector.extract_strided_slice %1576 {offsets = [3, 0, 0], sizes = [1, 8, 128], strides = [1, 1, 1]} : vector<4x8x128xf32> to vector<1x8x128xf32>
    %1676 = vector.shape_cast %1675 : vector<1x8x128xf32> to vector<8x128xf32>
    %1677 = vector.broadcast %12 : f32 to vector<8x128xf32>
    %1678 = arith.mulf %1495, %1677 : vector<8x128xf32>
    %1679 = vector.broadcast %13 : f32 to vector<8x128xf32>
    %1680 = arith.mulf %1509, %1679 : vector<8x128xf32>
    %1681 = arith.addf %1678, %1680 : vector<8x128xf32>
    %1682 = vector.broadcast %14 : f32 to vector<8x128xf32>
    %1683 = arith.mulf %1523, %1682 : vector<8x128xf32>
    %1684 = arith.addf %1681, %1683 : vector<8x128xf32>
    %1685 = vector.broadcast %15 : f32 to vector<8x128xf32>
    %1686 = arith.mulf %1537, %1685 : vector<8x128xf32>
    %1687 = arith.addf %1684, %1686 : vector<8x128xf32>
    %1688 = arith.addf %1676, %1687 : vector<8x128xf32>
    %c0_495 = arith.constant 0 : index
    %1689 = arith.index_cast %c11_i32 : i32 to index
    %c0_496 = arith.constant 0 : index
    %c0_497 = arith.constant 0 : index
    %c0_498 = arith.constant 0 : index
    %1690 = vector.load %arg4[%c0_495, %1689, %c0_496, %c0_497, %c0_498] : memref<2x16x4x8x128xf32, #tpu.memory_space<vmem>>, vector<1x1x1x8x128xf32>
    %1691 = vector.shape_cast %1690 : vector<1x1x1x8x128xf32> to vector<8x128xf32>
    %1692 = vector.shape_cast %1590 : vector<8x128xf32> to vector<1x1x1x8x128xf32>
    tpu.vector_store %arg4[%c0_495, %1689, %c0_496, %c0_497, %c0_498], %1692 {strides = array<i32>} : memref<2x16x4x8x128xf32, #tpu.memory_space<vmem>>, vector<1x1x1x8x128xf32>,
    %c1_499 = arith.constant 1 : index
    %1693 = arith.index_cast %1570 : i32 to index
    %c0_500 = arith.constant 0 : index
    %c0_501 = arith.constant 0 : index
    %c0_502 = arith.constant 0 : index
    %1694 = vector.load %arg4[%c1_499, %1693, %c0_500, %c0_501, %c0_502] : memref<2x16x4x8x128xf32, #tpu.memory_space<vmem>>, vector<1x1x1x8x128xf32>
    %1695 = vector.shape_cast %1694 : vector<1x1x1x8x128xf32> to vector<8x128xf32>
    %1696 = vector.shape_cast %1646 : vector<8x128xf32> to vector<1x1x1x8x128xf32>
    tpu.vector_store %arg4[%c1_499, %1693, %c0_500, %c0_501, %c0_502], %1696 {strides = array<i32>} : memref<2x16x4x8x128xf32, #tpu.memory_space<vmem>>, vector<1x1x1x8x128xf32>,
    %c0_503 = arith.constant 0 : index
    %1697 = arith.index_cast %c11_i32 : i32 to index
    %c1_504 = arith.constant 1 : index
    %c0_505 = arith.constant 0 : index
    %c0_506 = arith.constant 0 : index
    %1698 = vector.load %arg4[%c0_503, %1697, %c1_504, %c0_505, %c0_506] : memref<2x16x4x8x128xf32, #tpu.memory_space<vmem>>, vector<1x1x1x8x128xf32>
    %1699 = vector.shape_cast %1698 : vector<1x1x1x8x128xf32> to vector<8x128xf32>
    %1700 = vector.shape_cast %1604 : vector<8x128xf32> to vector<1x1x1x8x128xf32>
    tpu.vector_store %arg4[%c0_503, %1697, %c1_504, %c0_505, %c0_506], %1700 {strides = array<i32>} : memref<2x16x4x8x128xf32, #tpu.memory_space<vmem>>, vector<1x1x1x8x128xf32>,
    %c1_507 = arith.constant 1 : index
    %1701 = arith.index_cast %1570 : i32 to index
    %c1_508 = arith.constant 1 : index
    %c0_509 = arith.constant 0 : index
    %c0_510 = arith.constant 0 : index
    %1702 = vector.load %arg4[%c1_507, %1701, %c1_508, %c0_509, %c0_510] : memref<2x16x4x8x128xf32, #tpu.memory_space<vmem>>, vector<1x1x1x8x128xf32>
    %1703 = vector.shape_cast %1702 : vector<1x1x1x8x128xf32> to vector<8x128xf32>
    %1704 = vector.shape_cast %1660 : vector<8x128xf32> to vector<1x1x1x8x128xf32>
    tpu.vector_store %arg4[%c1_507, %1701, %c1_508, %c0_509, %c0_510], %1704 {strides = array<i32>} : memref<2x16x4x8x128xf32, #tpu.memory_space<vmem>>, vector<1x1x1x8x128xf32>,
    %c0_511 = arith.constant 0 : index
    %1705 = arith.index_cast %c11_i32 : i32 to index
    %c2_512 = arith.constant 2 : index
    %c0_513 = arith.constant 0 : index
    %c0_514 = arith.constant 0 : index
    %1706 = vector.load %arg4[%c0_511, %1705, %c2_512, %c0_513, %c0_514] : memref<2x16x4x8x128xf32, #tpu.memory_space<vmem>>, vector<1x1x1x8x128xf32>
    %1707 = vector.shape_cast %1706 : vector<1x1x1x8x128xf32> to vector<8x128xf32>
    %1708 = vector.shape_cast %1618 : vector<8x128xf32> to vector<1x1x1x8x128xf32>
    tpu.vector_store %arg4[%c0_511, %1705, %c2_512, %c0_513, %c0_514], %1708 {strides = array<i32>} : memref<2x16x4x8x128xf32, #tpu.memory_space<vmem>>, vector<1x1x1x8x128xf32>,
    %c1_515 = arith.constant 1 : index
    %1709 = arith.index_cast %1570 : i32 to index
    %c2_516 = arith.constant 2 : index
    %c0_517 = arith.constant 0 : index
    %c0_518 = arith.constant 0 : index
    %1710 = vector.load %arg4[%c1_515, %1709, %c2_516, %c0_517, %c0_518] : memref<2x16x4x8x128xf32, #tpu.memory_space<vmem>>, vector<1x1x1x8x128xf32>
    %1711 = vector.shape_cast %1710 : vector<1x1x1x8x128xf32> to vector<8x128xf32>
    %1712 = vector.shape_cast %1674 : vector<8x128xf32> to vector<1x1x1x8x128xf32>
    tpu.vector_store %arg4[%c1_515, %1709, %c2_516, %c0_517, %c0_518], %1712 {strides = array<i32>} : memref<2x16x4x8x128xf32, #tpu.memory_space<vmem>>, vector<1x1x1x8x128xf32>,
    %c0_519 = arith.constant 0 : index
    %1713 = arith.index_cast %c11_i32 : i32 to index
    %c3_520 = arith.constant 3 : index
    %c0_521 = arith.constant 0 : index
    %c0_522 = arith.constant 0 : index
    %1714 = vector.load %arg4[%c0_519, %1713, %c3_520, %c0_521, %c0_522] : memref<2x16x4x8x128xf32, #tpu.memory_space<vmem>>, vector<1x1x1x8x128xf32>
    %1715 = vector.shape_cast %1714 : vector<1x1x1x8x128xf32> to vector<8x128xf32>
    %1716 = vector.shape_cast %1632 : vector<8x128xf32> to vector<1x1x1x8x128xf32>
    tpu.vector_store %arg4[%c0_519, %1713, %c3_520, %c0_521, %c0_522], %1716 {strides = array<i32>} : memref<2x16x4x8x128xf32, #tpu.memory_space<vmem>>, vector<1x1x1x8x128xf32>,
    %c1_523 = arith.constant 1 : index
    %1717 = arith.index_cast %1570 : i32 to index
    %c3_524 = arith.constant 3 : index
    %c0_525 = arith.constant 0 : index
    %c0_526 = arith.constant 0 : index
    %1718 = vector.load %arg4[%c1_523, %1717, %c3_524, %c0_525, %c0_526] : memref<2x16x4x8x128xf32, #tpu.memory_space<vmem>>, vector<1x1x1x8x128xf32>
    %1719 = vector.shape_cast %1718 : vector<1x1x1x8x128xf32> to vector<8x128xf32>
    %1720 = vector.shape_cast %1688 : vector<8x128xf32> to vector<1x1x1x8x128xf32>
    tpu.vector_store %arg4[%c1_523, %1717, %c3_524, %c0_525, %c0_526], %1720 {strides = array<i32>} : memref<2x16x4x8x128xf32, #tpu.memory_space<vmem>>, vector<1x1x1x8x128xf32>,
    %c12_i32 = arith.constant 12 : i32
    %c15_i32_527 = arith.constant 15 : i32
    %1721 = arith.subi %c15_i32_527, %c12_i32 : i32
    %c0_528 = arith.constant 0 : index
    %1722 = arith.index_cast %c12_i32 : i32 to index
    %c0_529 = arith.constant 0 : index
    %c0_530 = arith.constant 0 : index
    %c0_531 = arith.constant 0 : index
    %1723 = vector.load %arg3[%c0_528, %1722, %c0_529, %c0_530, %c0_531] : memref<1x16x4x8x128xf32, #tpu.memory_space<vmem>>, vector<1x1x4x8x128xf32>
    %1724 = vector.shape_cast %1723 : vector<1x1x4x8x128xf32> to vector<4x8x128xf32>
    %c0_532 = arith.constant 0 : index
    %1725 = arith.index_cast %1721 : i32 to index
    %c0_533 = arith.constant 0 : index
    %c0_534 = arith.constant 0 : index
    %c0_535 = arith.constant 0 : index
    %1726 = vector.load %arg3[%c0_532, %1725, %c0_533, %c0_534, %c0_535] : memref<1x16x4x8x128xf32, #tpu.memory_space<vmem>>, vector<1x1x4x8x128xf32>
    %1727 = vector.shape_cast %1726 : vector<1x1x4x8x128xf32> to vector<4x8x128xf32>
    %1728 = vector.extract_strided_slice %1724 {offsets = [0, 0, 0], sizes = [1, 8, 128], strides = [1, 1, 1]} : vector<4x8x128xf32> to vector<1x8x128xf32>
    %1729 = vector.shape_cast %1728 : vector<1x8x128xf32> to vector<8x128xf32>
    %1730 = vector.broadcast %0 : f32 to vector<8x128xf32>
    %1731 = arith.mulf %1590, %1730 : vector<8x128xf32>
    %1732 = vector.broadcast %1 : f32 to vector<8x128xf32>
    %1733 = arith.mulf %1604, %1732 : vector<8x128xf32>
    %1734 = arith.addf %1731, %1733 : vector<8x128xf32>
    %1735 = vector.broadcast %2 : f32 to vector<8x128xf32>
    %1736 = arith.mulf %1618, %1735 : vector<8x128xf32>
    %1737 = arith.addf %1734, %1736 : vector<8x128xf32>
    %1738 = vector.broadcast %3 : f32 to vector<8x128xf32>
    %1739 = arith.mulf %1632, %1738 : vector<8x128xf32>
    %1740 = arith.addf %1737, %1739 : vector<8x128xf32>
    %1741 = arith.addf %1729, %1740 : vector<8x128xf32>
    %1742 = vector.extract_strided_slice %1724 {offsets = [1, 0, 0], sizes = [1, 8, 128], strides = [1, 1, 1]} : vector<4x8x128xf32> to vector<1x8x128xf32>
    %1743 = vector.shape_cast %1742 : vector<1x8x128xf32> to vector<8x128xf32>
    %1744 = vector.broadcast %4 : f32 to vector<8x128xf32>
    %1745 = arith.mulf %1590, %1744 : vector<8x128xf32>
    %1746 = vector.broadcast %5 : f32 to vector<8x128xf32>
    %1747 = arith.mulf %1604, %1746 : vector<8x128xf32>
    %1748 = arith.addf %1745, %1747 : vector<8x128xf32>
    %1749 = vector.broadcast %6 : f32 to vector<8x128xf32>
    %1750 = arith.mulf %1618, %1749 : vector<8x128xf32>
    %1751 = arith.addf %1748, %1750 : vector<8x128xf32>
    %1752 = vector.broadcast %7 : f32 to vector<8x128xf32>
    %1753 = arith.mulf %1632, %1752 : vector<8x128xf32>
    %1754 = arith.addf %1751, %1753 : vector<8x128xf32>
    %1755 = arith.addf %1743, %1754 : vector<8x128xf32>
    %1756 = vector.extract_strided_slice %1724 {offsets = [2, 0, 0], sizes = [1, 8, 128], strides = [1, 1, 1]} : vector<4x8x128xf32> to vector<1x8x128xf32>
    %1757 = vector.shape_cast %1756 : vector<1x8x128xf32> to vector<8x128xf32>
    %1758 = vector.broadcast %8 : f32 to vector<8x128xf32>
    %1759 = arith.mulf %1590, %1758 : vector<8x128xf32>
    %1760 = vector.broadcast %9 : f32 to vector<8x128xf32>
    %1761 = arith.mulf %1604, %1760 : vector<8x128xf32>
    %1762 = arith.addf %1759, %1761 : vector<8x128xf32>
    %1763 = vector.broadcast %10 : f32 to vector<8x128xf32>
    %1764 = arith.mulf %1618, %1763 : vector<8x128xf32>
    %1765 = arith.addf %1762, %1764 : vector<8x128xf32>
    %1766 = vector.broadcast %11 : f32 to vector<8x128xf32>
    %1767 = arith.mulf %1632, %1766 : vector<8x128xf32>
    %1768 = arith.addf %1765, %1767 : vector<8x128xf32>
    %1769 = arith.addf %1757, %1768 : vector<8x128xf32>
    %1770 = vector.extract_strided_slice %1724 {offsets = [3, 0, 0], sizes = [1, 8, 128], strides = [1, 1, 1]} : vector<4x8x128xf32> to vector<1x8x128xf32>
    %1771 = vector.shape_cast %1770 : vector<1x8x128xf32> to vector<8x128xf32>
    %1772 = vector.broadcast %12 : f32 to vector<8x128xf32>
    %1773 = arith.mulf %1590, %1772 : vector<8x128xf32>
    %1774 = vector.broadcast %13 : f32 to vector<8x128xf32>
    %1775 = arith.mulf %1604, %1774 : vector<8x128xf32>
    %1776 = arith.addf %1773, %1775 : vector<8x128xf32>
    %1777 = vector.broadcast %14 : f32 to vector<8x128xf32>
    %1778 = arith.mulf %1618, %1777 : vector<8x128xf32>
    %1779 = arith.addf %1776, %1778 : vector<8x128xf32>
    %1780 = vector.broadcast %15 : f32 to vector<8x128xf32>
    %1781 = arith.mulf %1632, %1780 : vector<8x128xf32>
    %1782 = arith.addf %1779, %1781 : vector<8x128xf32>
    %1783 = arith.addf %1771, %1782 : vector<8x128xf32>
    %1784 = vector.extract_strided_slice %1727 {offsets = [0, 0, 0], sizes = [1, 8, 128], strides = [1, 1, 1]} : vector<4x8x128xf32> to vector<1x8x128xf32>
    %1785 = vector.shape_cast %1784 : vector<1x8x128xf32> to vector<8x128xf32>
    %1786 = vector.broadcast %0 : f32 to vector<8x128xf32>
    %1787 = arith.mulf %1646, %1786 : vector<8x128xf32>
    %1788 = vector.broadcast %1 : f32 to vector<8x128xf32>
    %1789 = arith.mulf %1660, %1788 : vector<8x128xf32>
    %1790 = arith.addf %1787, %1789 : vector<8x128xf32>
    %1791 = vector.broadcast %2 : f32 to vector<8x128xf32>
    %1792 = arith.mulf %1674, %1791 : vector<8x128xf32>
    %1793 = arith.addf %1790, %1792 : vector<8x128xf32>
    %1794 = vector.broadcast %3 : f32 to vector<8x128xf32>
    %1795 = arith.mulf %1688, %1794 : vector<8x128xf32>
    %1796 = arith.addf %1793, %1795 : vector<8x128xf32>
    %1797 = arith.addf %1785, %1796 : vector<8x128xf32>
    %1798 = vector.extract_strided_slice %1727 {offsets = [1, 0, 0], sizes = [1, 8, 128], strides = [1, 1, 1]} : vector<4x8x128xf32> to vector<1x8x128xf32>
    %1799 = vector.shape_cast %1798 : vector<1x8x128xf32> to vector<8x128xf32>
    %1800 = vector.broadcast %4 : f32 to vector<8x128xf32>
    %1801 = arith.mulf %1646, %1800 : vector<8x128xf32>
    %1802 = vector.broadcast %5 : f32 to vector<8x128xf32>
    %1803 = arith.mulf %1660, %1802 : vector<8x128xf32>
    %1804 = arith.addf %1801, %1803 : vector<8x128xf32>
    %1805 = vector.broadcast %6 : f32 to vector<8x128xf32>
    %1806 = arith.mulf %1674, %1805 : vector<8x128xf32>
    %1807 = arith.addf %1804, %1806 : vector<8x128xf32>
    %1808 = vector.broadcast %7 : f32 to vector<8x128xf32>
    %1809 = arith.mulf %1688, %1808 : vector<8x128xf32>
    %1810 = arith.addf %1807, %1809 : vector<8x128xf32>
    %1811 = arith.addf %1799, %1810 : vector<8x128xf32>
    %1812 = vector.extract_strided_slice %1727 {offsets = [2, 0, 0], sizes = [1, 8, 128], strides = [1, 1, 1]} : vector<4x8x128xf32> to vector<1x8x128xf32>
    %1813 = vector.shape_cast %1812 : vector<1x8x128xf32> to vector<8x128xf32>
    %1814 = vector.broadcast %8 : f32 to vector<8x128xf32>
    %1815 = arith.mulf %1646, %1814 : vector<8x128xf32>
    %1816 = vector.broadcast %9 : f32 to vector<8x128xf32>
    %1817 = arith.mulf %1660, %1816 : vector<8x128xf32>
    %1818 = arith.addf %1815, %1817 : vector<8x128xf32>
    %1819 = vector.broadcast %10 : f32 to vector<8x128xf32>
    %1820 = arith.mulf %1674, %1819 : vector<8x128xf32>
    %1821 = arith.addf %1818, %1820 : vector<8x128xf32>
    %1822 = vector.broadcast %11 : f32 to vector<8x128xf32>
    %1823 = arith.mulf %1688, %1822 : vector<8x128xf32>
    %1824 = arith.addf %1821, %1823 : vector<8x128xf32>
    %1825 = arith.addf %1813, %1824 : vector<8x128xf32>
    %1826 = vector.extract_strided_slice %1727 {offsets = [3, 0, 0], sizes = [1, 8, 128], strides = [1, 1, 1]} : vector<4x8x128xf32> to vector<1x8x128xf32>
    %1827 = vector.shape_cast %1826 : vector<1x8x128xf32> to vector<8x128xf32>
    %1828 = vector.broadcast %12 : f32 to vector<8x128xf32>
    %1829 = arith.mulf %1646, %1828 : vector<8x128xf32>
    %1830 = vector.broadcast %13 : f32 to vector<8x128xf32>
    %1831 = arith.mulf %1660, %1830 : vector<8x128xf32>
    %1832 = arith.addf %1829, %1831 : vector<8x128xf32>
    %1833 = vector.broadcast %14 : f32 to vector<8x128xf32>
    %1834 = arith.mulf %1674, %1833 : vector<8x128xf32>
    %1835 = arith.addf %1832, %1834 : vector<8x128xf32>
    %1836 = vector.broadcast %15 : f32 to vector<8x128xf32>
    %1837 = arith.mulf %1688, %1836 : vector<8x128xf32>
    %1838 = arith.addf %1835, %1837 : vector<8x128xf32>
    %1839 = arith.addf %1827, %1838 : vector<8x128xf32>
    %c0_536 = arith.constant 0 : index
    %1840 = arith.index_cast %c12_i32 : i32 to index
    %c0_537 = arith.constant 0 : index
    %c0_538 = arith.constant 0 : index
    %c0_539 = arith.constant 0 : index
    %1841 = vector.load %arg4[%c0_536, %1840, %c0_537, %c0_538, %c0_539] : memref<2x16x4x8x128xf32, #tpu.memory_space<vmem>>, vector<1x1x1x8x128xf32>
    %1842 = vector.shape_cast %1841 : vector<1x1x1x8x128xf32> to vector<8x128xf32>
    %1843 = vector.shape_cast %1741 : vector<8x128xf32> to vector<1x1x1x8x128xf32>
    tpu.vector_store %arg4[%c0_536, %1840, %c0_537, %c0_538, %c0_539], %1843 {strides = array<i32>} : memref<2x16x4x8x128xf32, #tpu.memory_space<vmem>>, vector<1x1x1x8x128xf32>,
    %c1_540 = arith.constant 1 : index
    %1844 = arith.index_cast %1721 : i32 to index
    %c0_541 = arith.constant 0 : index
    %c0_542 = arith.constant 0 : index
    %c0_543 = arith.constant 0 : index
    %1845 = vector.load %arg4[%c1_540, %1844, %c0_541, %c0_542, %c0_543] : memref<2x16x4x8x128xf32, #tpu.memory_space<vmem>>, vector<1x1x1x8x128xf32>
    %1846 = vector.shape_cast %1845 : vector<1x1x1x8x128xf32> to vector<8x128xf32>
    %1847 = vector.shape_cast %1797 : vector<8x128xf32> to vector<1x1x1x8x128xf32>
    tpu.vector_store %arg4[%c1_540, %1844, %c0_541, %c0_542, %c0_543], %1847 {strides = array<i32>} : memref<2x16x4x8x128xf32, #tpu.memory_space<vmem>>, vector<1x1x1x8x128xf32>,
    %c0_544 = arith.constant 0 : index
    %1848 = arith.index_cast %c12_i32 : i32 to index
    %c1_545 = arith.constant 1 : index
    %c0_546 = arith.constant 0 : index
    %c0_547 = arith.constant 0 : index
    %1849 = vector.load %arg4[%c0_544, %1848, %c1_545, %c0_546, %c0_547] : memref<2x16x4x8x128xf32, #tpu.memory_space<vmem>>, vector<1x1x1x8x128xf32>
    %1850 = vector.shape_cast %1849 : vector<1x1x1x8x128xf32> to vector<8x128xf32>
    %1851 = vector.shape_cast %1755 : vector<8x128xf32> to vector<1x1x1x8x128xf32>
    tpu.vector_store %arg4[%c0_544, %1848, %c1_545, %c0_546, %c0_547], %1851 {strides = array<i32>} : memref<2x16x4x8x128xf32, #tpu.memory_space<vmem>>, vector<1x1x1x8x128xf32>,
    %c1_548 = arith.constant 1 : index
    %1852 = arith.index_cast %1721 : i32 to index
    %c1_549 = arith.constant 1 : index
    %c0_550 = arith.constant 0 : index
    %c0_551 = arith.constant 0 : index
    %1853 = vector.load %arg4[%c1_548, %1852, %c1_549, %c0_550, %c0_551] : memref<2x16x4x8x128xf32, #tpu.memory_space<vmem>>, vector<1x1x1x8x128xf32>
    %1854 = vector.shape_cast %1853 : vector<1x1x1x8x128xf32> to vector<8x128xf32>
    %1855 = vector.shape_cast %1811 : vector<8x128xf32> to vector<1x1x1x8x128xf32>
    tpu.vector_store %arg4[%c1_548, %1852, %c1_549, %c0_550, %c0_551], %1855 {strides = array<i32>} : memref<2x16x4x8x128xf32, #tpu.memory_space<vmem>>, vector<1x1x1x8x128xf32>,
    %c0_552 = arith.constant 0 : index
    %1856 = arith.index_cast %c12_i32 : i32 to index
    %c2_553 = arith.constant 2 : index
    %c0_554 = arith.constant 0 : index
    %c0_555 = arith.constant 0 : index
    %1857 = vector.load %arg4[%c0_552, %1856, %c2_553, %c0_554, %c0_555] : memref<2x16x4x8x128xf32, #tpu.memory_space<vmem>>, vector<1x1x1x8x128xf32>
    %1858 = vector.shape_cast %1857 : vector<1x1x1x8x128xf32> to vector<8x128xf32>
    %1859 = vector.shape_cast %1769 : vector<8x128xf32> to vector<1x1x1x8x128xf32>
    tpu.vector_store %arg4[%c0_552, %1856, %c2_553, %c0_554, %c0_555], %1859 {strides = array<i32>} : memref<2x16x4x8x128xf32, #tpu.memory_space<vmem>>, vector<1x1x1x8x128xf32>,
    %c1_556 = arith.constant 1 : index
    %1860 = arith.index_cast %1721 : i32 to index
    %c2_557 = arith.constant 2 : index
    %c0_558 = arith.constant 0 : index
    %c0_559 = arith.constant 0 : index
    %1861 = vector.load %arg4[%c1_556, %1860, %c2_557, %c0_558, %c0_559] : memref<2x16x4x8x128xf32, #tpu.memory_space<vmem>>, vector<1x1x1x8x128xf32>
    %1862 = vector.shape_cast %1861 : vector<1x1x1x8x128xf32> to vector<8x128xf32>
    %1863 = vector.shape_cast %1825 : vector<8x128xf32> to vector<1x1x1x8x128xf32>
    tpu.vector_store %arg4[%c1_556, %1860, %c2_557, %c0_558, %c0_559], %1863 {strides = array<i32>} : memref<2x16x4x8x128xf32, #tpu.memory_space<vmem>>, vector<1x1x1x8x128xf32>,
    %c0_560 = arith.constant 0 : index
    %1864 = arith.index_cast %c12_i32 : i32 to index
    %c3_561 = arith.constant 3 : index
    %c0_562 = arith.constant 0 : index
    %c0_563 = arith.constant 0 : index
    %1865 = vector.load %arg4[%c0_560, %1864, %c3_561, %c0_562, %c0_563] : memref<2x16x4x8x128xf32, #tpu.memory_space<vmem>>, vector<1x1x1x8x128xf32>
    %1866 = vector.shape_cast %1865 : vector<1x1x1x8x128xf32> to vector<8x128xf32>
    %1867 = vector.shape_cast %1783 : vector<8x128xf32> to vector<1x1x1x8x128xf32>
    tpu.vector_store %arg4[%c0_560, %1864, %c3_561, %c0_562, %c0_563], %1867 {strides = array<i32>} : memref<2x16x4x8x128xf32, #tpu.memory_space<vmem>>, vector<1x1x1x8x128xf32>,
    %c1_564 = arith.constant 1 : index
    %1868 = arith.index_cast %1721 : i32 to index
    %c3_565 = arith.constant 3 : index
    %c0_566 = arith.constant 0 : index
    %c0_567 = arith.constant 0 : index
    %1869 = vector.load %arg4[%c1_564, %1868, %c3_565, %c0_566, %c0_567] : memref<2x16x4x8x128xf32, #tpu.memory_space<vmem>>, vector<1x1x1x8x128xf32>
    %1870 = vector.shape_cast %1869 : vector<1x1x1x8x128xf32> to vector<8x128xf32>
    %1871 = vector.shape_cast %1839 : vector<8x128xf32> to vector<1x1x1x8x128xf32>
    tpu.vector_store %arg4[%c1_564, %1868, %c3_565, %c0_566, %c0_567], %1871 {strides = array<i32>} : memref<2x16x4x8x128xf32, #tpu.memory_space<vmem>>, vector<1x1x1x8x128xf32>,
    %c13_i32 = arith.constant 13 : i32
    %c15_i32_568 = arith.constant 15 : i32
    %1872 = arith.subi %c15_i32_568, %c13_i32 : i32
    %c0_569 = arith.constant 0 : index
    %1873 = arith.index_cast %c13_i32 : i32 to index
    %c0_570 = arith.constant 0 : index
    %c0_571 = arith.constant 0 : index
    %c0_572 = arith.constant 0 : index
    %1874 = vector.load %arg3[%c0_569, %1873, %c0_570, %c0_571, %c0_572] : memref<1x16x4x8x128xf32, #tpu.memory_space<vmem>>, vector<1x1x4x8x128xf32>
    %1875 = vector.shape_cast %1874 : vector<1x1x4x8x128xf32> to vector<4x8x128xf32>
    %c0_573 = arith.constant 0 : index
    %1876 = arith.index_cast %1872 : i32 to index
    %c0_574 = arith.constant 0 : index
    %c0_575 = arith.constant 0 : index
    %c0_576 = arith.constant 0 : index
    %1877 = vector.load %arg3[%c0_573, %1876, %c0_574, %c0_575, %c0_576] : memref<1x16x4x8x128xf32, #tpu.memory_space<vmem>>, vector<1x1x4x8x128xf32>
    %1878 = vector.shape_cast %1877 : vector<1x1x4x8x128xf32> to vector<4x8x128xf32>
    %1879 = vector.extract_strided_slice %1875 {offsets = [0, 0, 0], sizes = [1, 8, 128], strides = [1, 1, 1]} : vector<4x8x128xf32> to vector<1x8x128xf32>
    %1880 = vector.shape_cast %1879 : vector<1x8x128xf32> to vector<8x128xf32>
    %1881 = vector.broadcast %0 : f32 to vector<8x128xf32>
    %1882 = arith.mulf %1741, %1881 : vector<8x128xf32>
    %1883 = vector.broadcast %1 : f32 to vector<8x128xf32>
    %1884 = arith.mulf %1755, %1883 : vector<8x128xf32>
    %1885 = arith.addf %1882, %1884 : vector<8x128xf32>
    %1886 = vector.broadcast %2 : f32 to vector<8x128xf32>
    %1887 = arith.mulf %1769, %1886 : vector<8x128xf32>
    %1888 = arith.addf %1885, %1887 : vector<8x128xf32>
    %1889 = vector.broadcast %3 : f32 to vector<8x128xf32>
    %1890 = arith.mulf %1783, %1889 : vector<8x128xf32>
    %1891 = arith.addf %1888, %1890 : vector<8x128xf32>
    %1892 = arith.addf %1880, %1891 : vector<8x128xf32>
    %1893 = vector.extract_strided_slice %1875 {offsets = [1, 0, 0], sizes = [1, 8, 128], strides = [1, 1, 1]} : vector<4x8x128xf32> to vector<1x8x128xf32>
    %1894 = vector.shape_cast %1893 : vector<1x8x128xf32> to vector<8x128xf32>
    %1895 = vector.broadcast %4 : f32 to vector<8x128xf32>
    %1896 = arith.mulf %1741, %1895 : vector<8x128xf32>
    %1897 = vector.broadcast %5 : f32 to vector<8x128xf32>
    %1898 = arith.mulf %1755, %1897 : vector<8x128xf32>
    %1899 = arith.addf %1896, %1898 : vector<8x128xf32>
    %1900 = vector.broadcast %6 : f32 to vector<8x128xf32>
    %1901 = arith.mulf %1769, %1900 : vector<8x128xf32>
    %1902 = arith.addf %1899, %1901 : vector<8x128xf32>
    %1903 = vector.broadcast %7 : f32 to vector<8x128xf32>
    %1904 = arith.mulf %1783, %1903 : vector<8x128xf32>
    %1905 = arith.addf %1902, %1904 : vector<8x128xf32>
    %1906 = arith.addf %1894, %1905 : vector<8x128xf32>
    %1907 = vector.extract_strided_slice %1875 {offsets = [2, 0, 0], sizes = [1, 8, 128], strides = [1, 1, 1]} : vector<4x8x128xf32> to vector<1x8x128xf32>
    %1908 = vector.shape_cast %1907 : vector<1x8x128xf32> to vector<8x128xf32>
    %1909 = vector.broadcast %8 : f32 to vector<8x128xf32>
    %1910 = arith.mulf %1741, %1909 : vector<8x128xf32>
    %1911 = vector.broadcast %9 : f32 to vector<8x128xf32>
    %1912 = arith.mulf %1755, %1911 : vector<8x128xf32>
    %1913 = arith.addf %1910, %1912 : vector<8x128xf32>
    %1914 = vector.broadcast %10 : f32 to vector<8x128xf32>
    %1915 = arith.mulf %1769, %1914 : vector<8x128xf32>
    %1916 = arith.addf %1913, %1915 : vector<8x128xf32>
    %1917 = vector.broadcast %11 : f32 to vector<8x128xf32>
    %1918 = arith.mulf %1783, %1917 : vector<8x128xf32>
    %1919 = arith.addf %1916, %1918 : vector<8x128xf32>
    %1920 = arith.addf %1908, %1919 : vector<8x128xf32>
    %1921 = vector.extract_strided_slice %1875 {offsets = [3, 0, 0], sizes = [1, 8, 128], strides = [1, 1, 1]} : vector<4x8x128xf32> to vector<1x8x128xf32>
    %1922 = vector.shape_cast %1921 : vector<1x8x128xf32> to vector<8x128xf32>
    %1923 = vector.broadcast %12 : f32 to vector<8x128xf32>
    %1924 = arith.mulf %1741, %1923 : vector<8x128xf32>
    %1925 = vector.broadcast %13 : f32 to vector<8x128xf32>
    %1926 = arith.mulf %1755, %1925 : vector<8x128xf32>
    %1927 = arith.addf %1924, %1926 : vector<8x128xf32>
    %1928 = vector.broadcast %14 : f32 to vector<8x128xf32>
    %1929 = arith.mulf %1769, %1928 : vector<8x128xf32>
    %1930 = arith.addf %1927, %1929 : vector<8x128xf32>
    %1931 = vector.broadcast %15 : f32 to vector<8x128xf32>
    %1932 = arith.mulf %1783, %1931 : vector<8x128xf32>
    %1933 = arith.addf %1930, %1932 : vector<8x128xf32>
    %1934 = arith.addf %1922, %1933 : vector<8x128xf32>
    %1935 = vector.extract_strided_slice %1878 {offsets = [0, 0, 0], sizes = [1, 8, 128], strides = [1, 1, 1]} : vector<4x8x128xf32> to vector<1x8x128xf32>
    %1936 = vector.shape_cast %1935 : vector<1x8x128xf32> to vector<8x128xf32>
    %1937 = vector.broadcast %0 : f32 to vector<8x128xf32>
    %1938 = arith.mulf %1797, %1937 : vector<8x128xf32>
    %1939 = vector.broadcast %1 : f32 to vector<8x128xf32>
    %1940 = arith.mulf %1811, %1939 : vector<8x128xf32>
    %1941 = arith.addf %1938, %1940 : vector<8x128xf32>
    %1942 = vector.broadcast %2 : f32 to vector<8x128xf32>
    %1943 = arith.mulf %1825, %1942 : vector<8x128xf32>
    %1944 = arith.addf %1941, %1943 : vector<8x128xf32>
    %1945 = vector.broadcast %3 : f32 to vector<8x128xf32>
    %1946 = arith.mulf %1839, %1945 : vector<8x128xf32>
    %1947 = arith.addf %1944, %1946 : vector<8x128xf32>
    %1948 = arith.addf %1936, %1947 : vector<8x128xf32>
    %1949 = vector.extract_strided_slice %1878 {offsets = [1, 0, 0], sizes = [1, 8, 128], strides = [1, 1, 1]} : vector<4x8x128xf32> to vector<1x8x128xf32>
    %1950 = vector.shape_cast %1949 : vector<1x8x128xf32> to vector<8x128xf32>
    %1951 = vector.broadcast %4 : f32 to vector<8x128xf32>
    %1952 = arith.mulf %1797, %1951 : vector<8x128xf32>
    %1953 = vector.broadcast %5 : f32 to vector<8x128xf32>
    %1954 = arith.mulf %1811, %1953 : vector<8x128xf32>
    %1955 = arith.addf %1952, %1954 : vector<8x128xf32>
    %1956 = vector.broadcast %6 : f32 to vector<8x128xf32>
    %1957 = arith.mulf %1825, %1956 : vector<8x128xf32>
    %1958 = arith.addf %1955, %1957 : vector<8x128xf32>
    %1959 = vector.broadcast %7 : f32 to vector<8x128xf32>
    %1960 = arith.mulf %1839, %1959 : vector<8x128xf32>
    %1961 = arith.addf %1958, %1960 : vector<8x128xf32>
    %1962 = arith.addf %1950, %1961 : vector<8x128xf32>
    %1963 = vector.extract_strided_slice %1878 {offsets = [2, 0, 0], sizes = [1, 8, 128], strides = [1, 1, 1]} : vector<4x8x128xf32> to vector<1x8x128xf32>
    %1964 = vector.shape_cast %1963 : vector<1x8x128xf32> to vector<8x128xf32>
    %1965 = vector.broadcast %8 : f32 to vector<8x128xf32>
    %1966 = arith.mulf %1797, %1965 : vector<8x128xf32>
    %1967 = vector.broadcast %9 : f32 to vector<8x128xf32>
    %1968 = arith.mulf %1811, %1967 : vector<8x128xf32>
    %1969 = arith.addf %1966, %1968 : vector<8x128xf32>
    %1970 = vector.broadcast %10 : f32 to vector<8x128xf32>
    %1971 = arith.mulf %1825, %1970 : vector<8x128xf32>
    %1972 = arith.addf %1969, %1971 : vector<8x128xf32>
    %1973 = vector.broadcast %11 : f32 to vector<8x128xf32>
    %1974 = arith.mulf %1839, %1973 : vector<8x128xf32>
    %1975 = arith.addf %1972, %1974 : vector<8x128xf32>
    %1976 = arith.addf %1964, %1975 : vector<8x128xf32>
    %1977 = vector.extract_strided_slice %1878 {offsets = [3, 0, 0], sizes = [1, 8, 128], strides = [1, 1, 1]} : vector<4x8x128xf32> to vector<1x8x128xf32>
    %1978 = vector.shape_cast %1977 : vector<1x8x128xf32> to vector<8x128xf32>
    %1979 = vector.broadcast %12 : f32 to vector<8x128xf32>
    %1980 = arith.mulf %1797, %1979 : vector<8x128xf32>
    %1981 = vector.broadcast %13 : f32 to vector<8x128xf32>
    %1982 = arith.mulf %1811, %1981 : vector<8x128xf32>
    %1983 = arith.addf %1980, %1982 : vector<8x128xf32>
    %1984 = vector.broadcast %14 : f32 to vector<8x128xf32>
    %1985 = arith.mulf %1825, %1984 : vector<8x128xf32>
    %1986 = arith.addf %1983, %1985 : vector<8x128xf32>
    %1987 = vector.broadcast %15 : f32 to vector<8x128xf32>
    %1988 = arith.mulf %1839, %1987 : vector<8x128xf32>
    %1989 = arith.addf %1986, %1988 : vector<8x128xf32>
    %1990 = arith.addf %1978, %1989 : vector<8x128xf32>
    %c0_577 = arith.constant 0 : index
    %1991 = arith.index_cast %c13_i32 : i32 to index
    %c0_578 = arith.constant 0 : index
    %c0_579 = arith.constant 0 : index
    %c0_580 = arith.constant 0 : index
    %1992 = vector.load %arg4[%c0_577, %1991, %c0_578, %c0_579, %c0_580] : memref<2x16x4x8x128xf32, #tpu.memory_space<vmem>>, vector<1x1x1x8x128xf32>
    %1993 = vector.shape_cast %1992 : vector<1x1x1x8x128xf32> to vector<8x128xf32>
    %1994 = vector.shape_cast %1892 : vector<8x128xf32> to vector<1x1x1x8x128xf32>
    tpu.vector_store %arg4[%c0_577, %1991, %c0_578, %c0_579, %c0_580], %1994 {strides = array<i32>} : memref<2x16x4x8x128xf32, #tpu.memory_space<vmem>>, vector<1x1x1x8x128xf32>,
    %c1_581 = arith.constant 1 : index
    %1995 = arith.index_cast %1872 : i32 to index
    %c0_582 = arith.constant 0 : index
    %c0_583 = arith.constant 0 : index
    %c0_584 = arith.constant 0 : index
    %1996 = vector.load %arg4[%c1_581, %1995, %c0_582, %c0_583, %c0_584] : memref<2x16x4x8x128xf32, #tpu.memory_space<vmem>>, vector<1x1x1x8x128xf32>
    %1997 = vector.shape_cast %1996 : vector<1x1x1x8x128xf32> to vector<8x128xf32>
    %1998 = vector.shape_cast %1948 : vector<8x128xf32> to vector<1x1x1x8x128xf32>
    tpu.vector_store %arg4[%c1_581, %1995, %c0_582, %c0_583, %c0_584], %1998 {strides = array<i32>} : memref<2x16x4x8x128xf32, #tpu.memory_space<vmem>>, vector<1x1x1x8x128xf32>,
    %c0_585 = arith.constant 0 : index
    %1999 = arith.index_cast %c13_i32 : i32 to index
    %c1_586 = arith.constant 1 : index
    %c0_587 = arith.constant 0 : index
    %c0_588 = arith.constant 0 : index
    %2000 = vector.load %arg4[%c0_585, %1999, %c1_586, %c0_587, %c0_588] : memref<2x16x4x8x128xf32, #tpu.memory_space<vmem>>, vector<1x1x1x8x128xf32>
    %2001 = vector.shape_cast %2000 : vector<1x1x1x8x128xf32> to vector<8x128xf32>
    %2002 = vector.shape_cast %1906 : vector<8x128xf32> to vector<1x1x1x8x128xf32>
    tpu.vector_store %arg4[%c0_585, %1999, %c1_586, %c0_587, %c0_588], %2002 {strides = array<i32>} : memref<2x16x4x8x128xf32, #tpu.memory_space<vmem>>, vector<1x1x1x8x128xf32>,
    %c1_589 = arith.constant 1 : index
    %2003 = arith.index_cast %1872 : i32 to index
    %c1_590 = arith.constant 1 : index
    %c0_591 = arith.constant 0 : index
    %c0_592 = arith.constant 0 : index
    %2004 = vector.load %arg4[%c1_589, %2003, %c1_590, %c0_591, %c0_592] : memref<2x16x4x8x128xf32, #tpu.memory_space<vmem>>, vector<1x1x1x8x128xf32>
    %2005 = vector.shape_cast %2004 : vector<1x1x1x8x128xf32> to vector<8x128xf32>
    %2006 = vector.shape_cast %1962 : vector<8x128xf32> to vector<1x1x1x8x128xf32>
    tpu.vector_store %arg4[%c1_589, %2003, %c1_590, %c0_591, %c0_592], %2006 {strides = array<i32>} : memref<2x16x4x8x128xf32, #tpu.memory_space<vmem>>, vector<1x1x1x8x128xf32>,
    %c0_593 = arith.constant 0 : index
    %2007 = arith.index_cast %c13_i32 : i32 to index
    %c2_594 = arith.constant 2 : index
    %c0_595 = arith.constant 0 : index
    %c0_596 = arith.constant 0 : index
    %2008 = vector.load %arg4[%c0_593, %2007, %c2_594, %c0_595, %c0_596] : memref<2x16x4x8x128xf32, #tpu.memory_space<vmem>>, vector<1x1x1x8x128xf32>
    %2009 = vector.shape_cast %2008 : vector<1x1x1x8x128xf32> to vector<8x128xf32>
    %2010 = vector.shape_cast %1920 : vector<8x128xf32> to vector<1x1x1x8x128xf32>
    tpu.vector_store %arg4[%c0_593, %2007, %c2_594, %c0_595, %c0_596], %2010 {strides = array<i32>} : memref<2x16x4x8x128xf32, #tpu.memory_space<vmem>>, vector<1x1x1x8x128xf32>,
    %c1_597 = arith.constant 1 : index
    %2011 = arith.index_cast %1872 : i32 to index
    %c2_598 = arith.constant 2 : index
    %c0_599 = arith.constant 0 : index
    %c0_600 = arith.constant 0 : index
    %2012 = vector.load %arg4[%c1_597, %2011, %c2_598, %c0_599, %c0_600] : memref<2x16x4x8x128xf32, #tpu.memory_space<vmem>>, vector<1x1x1x8x128xf32>
    %2013 = vector.shape_cast %2012 : vector<1x1x1x8x128xf32> to vector<8x128xf32>
    %2014 = vector.shape_cast %1976 : vector<8x128xf32> to vector<1x1x1x8x128xf32>
    tpu.vector_store %arg4[%c1_597, %2011, %c2_598, %c0_599, %c0_600], %2014 {strides = array<i32>} : memref<2x16x4x8x128xf32, #tpu.memory_space<vmem>>, vector<1x1x1x8x128xf32>,
    %c0_601 = arith.constant 0 : index
    %2015 = arith.index_cast %c13_i32 : i32 to index
    %c3_602 = arith.constant 3 : index
    %c0_603 = arith.constant 0 : index
    %c0_604 = arith.constant 0 : index
    %2016 = vector.load %arg4[%c0_601, %2015, %c3_602, %c0_603, %c0_604] : memref<2x16x4x8x128xf32, #tpu.memory_space<vmem>>, vector<1x1x1x8x128xf32>
    %2017 = vector.shape_cast %2016 : vector<1x1x1x8x128xf32> to vector<8x128xf32>
    %2018 = vector.shape_cast %1934 : vector<8x128xf32> to vector<1x1x1x8x128xf32>
    tpu.vector_store %arg4[%c0_601, %2015, %c3_602, %c0_603, %c0_604], %2018 {strides = array<i32>} : memref<2x16x4x8x128xf32, #tpu.memory_space<vmem>>, vector<1x1x1x8x128xf32>,
    %c1_605 = arith.constant 1 : index
    %2019 = arith.index_cast %1872 : i32 to index
    %c3_606 = arith.constant 3 : index
    %c0_607 = arith.constant 0 : index
    %c0_608 = arith.constant 0 : index
    %2020 = vector.load %arg4[%c1_605, %2019, %c3_606, %c0_607, %c0_608] : memref<2x16x4x8x128xf32, #tpu.memory_space<vmem>>, vector<1x1x1x8x128xf32>
    %2021 = vector.shape_cast %2020 : vector<1x1x1x8x128xf32> to vector<8x128xf32>
    %2022 = vector.shape_cast %1990 : vector<8x128xf32> to vector<1x1x1x8x128xf32>
    tpu.vector_store %arg4[%c1_605, %2019, %c3_606, %c0_607, %c0_608], %2022 {strides = array<i32>} : memref<2x16x4x8x128xf32, #tpu.memory_space<vmem>>, vector<1x1x1x8x128xf32>,
    %c14_i32 = arith.constant 14 : i32
    %c15_i32_609 = arith.constant 15 : i32
    %2023 = arith.subi %c15_i32_609, %c14_i32 : i32
    %c0_610 = arith.constant 0 : index
    %2024 = arith.index_cast %c14_i32 : i32 to index
    %c0_611 = arith.constant 0 : index
    %c0_612 = arith.constant 0 : index
    %c0_613 = arith.constant 0 : index
    %2025 = vector.load %arg3[%c0_610, %2024, %c0_611, %c0_612, %c0_613] : memref<1x16x4x8x128xf32, #tpu.memory_space<vmem>>, vector<1x1x4x8x128xf32>
    %2026 = vector.shape_cast %2025 : vector<1x1x4x8x128xf32> to vector<4x8x128xf32>
    %c0_614 = arith.constant 0 : index
    %2027 = arith.index_cast %2023 : i32 to index
    %c0_615 = arith.constant 0 : index
    %c0_616 = arith.constant 0 : index
    %c0_617 = arith.constant 0 : index
    %2028 = vector.load %arg3[%c0_614, %2027, %c0_615, %c0_616, %c0_617] : memref<1x16x4x8x128xf32, #tpu.memory_space<vmem>>, vector<1x1x4x8x128xf32>
    %2029 = vector.shape_cast %2028 : vector<1x1x4x8x128xf32> to vector<4x8x128xf32>
    %2030 = vector.extract_strided_slice %2026 {offsets = [0, 0, 0], sizes = [1, 8, 128], strides = [1, 1, 1]} : vector<4x8x128xf32> to vector<1x8x128xf32>
    %2031 = vector.shape_cast %2030 : vector<1x8x128xf32> to vector<8x128xf32>
    %2032 = vector.broadcast %0 : f32 to vector<8x128xf32>
    %2033 = arith.mulf %1892, %2032 : vector<8x128xf32>
    %2034 = vector.broadcast %1 : f32 to vector<8x128xf32>
    %2035 = arith.mulf %1906, %2034 : vector<8x128xf32>
    %2036 = arith.addf %2033, %2035 : vector<8x128xf32>
    %2037 = vector.broadcast %2 : f32 to vector<8x128xf32>
    %2038 = arith.mulf %1920, %2037 : vector<8x128xf32>
    %2039 = arith.addf %2036, %2038 : vector<8x128xf32>
    %2040 = vector.broadcast %3 : f32 to vector<8x128xf32>
    %2041 = arith.mulf %1934, %2040 : vector<8x128xf32>
    %2042 = arith.addf %2039, %2041 : vector<8x128xf32>
    %2043 = arith.addf %2031, %2042 : vector<8x128xf32>
    %2044 = vector.extract_strided_slice %2026 {offsets = [1, 0, 0], sizes = [1, 8, 128], strides = [1, 1, 1]} : vector<4x8x128xf32> to vector<1x8x128xf32>
    %2045 = vector.shape_cast %2044 : vector<1x8x128xf32> to vector<8x128xf32>
    %2046 = vector.broadcast %4 : f32 to vector<8x128xf32>
    %2047 = arith.mulf %1892, %2046 : vector<8x128xf32>
    %2048 = vector.broadcast %5 : f32 to vector<8x128xf32>
    %2049 = arith.mulf %1906, %2048 : vector<8x128xf32>
    %2050 = arith.addf %2047, %2049 : vector<8x128xf32>
    %2051 = vector.broadcast %6 : f32 to vector<8x128xf32>
    %2052 = arith.mulf %1920, %2051 : vector<8x128xf32>
    %2053 = arith.addf %2050, %2052 : vector<8x128xf32>
    %2054 = vector.broadcast %7 : f32 to vector<8x128xf32>
    %2055 = arith.mulf %1934, %2054 : vector<8x128xf32>
    %2056 = arith.addf %2053, %2055 : vector<8x128xf32>
    %2057 = arith.addf %2045, %2056 : vector<8x128xf32>
    %2058 = vector.extract_strided_slice %2026 {offsets = [2, 0, 0], sizes = [1, 8, 128], strides = [1, 1, 1]} : vector<4x8x128xf32> to vector<1x8x128xf32>
    %2059 = vector.shape_cast %2058 : vector<1x8x128xf32> to vector<8x128xf32>
    %2060 = vector.broadcast %8 : f32 to vector<8x128xf32>
    %2061 = arith.mulf %1892, %2060 : vector<8x128xf32>
    %2062 = vector.broadcast %9 : f32 to vector<8x128xf32>
    %2063 = arith.mulf %1906, %2062 : vector<8x128xf32>
    %2064 = arith.addf %2061, %2063 : vector<8x128xf32>
    %2065 = vector.broadcast %10 : f32 to vector<8x128xf32>
    %2066 = arith.mulf %1920, %2065 : vector<8x128xf32>
    %2067 = arith.addf %2064, %2066 : vector<8x128xf32>
    %2068 = vector.broadcast %11 : f32 to vector<8x128xf32>
    %2069 = arith.mulf %1934, %2068 : vector<8x128xf32>
    %2070 = arith.addf %2067, %2069 : vector<8x128xf32>
    %2071 = arith.addf %2059, %2070 : vector<8x128xf32>
    %2072 = vector.extract_strided_slice %2026 {offsets = [3, 0, 0], sizes = [1, 8, 128], strides = [1, 1, 1]} : vector<4x8x128xf32> to vector<1x8x128xf32>
    %2073 = vector.shape_cast %2072 : vector<1x8x128xf32> to vector<8x128xf32>
    %2074 = vector.broadcast %12 : f32 to vector<8x128xf32>
    %2075 = arith.mulf %1892, %2074 : vector<8x128xf32>
    %2076 = vector.broadcast %13 : f32 to vector<8x128xf32>
    %2077 = arith.mulf %1906, %2076 : vector<8x128xf32>
    %2078 = arith.addf %2075, %2077 : vector<8x128xf32>
    %2079 = vector.broadcast %14 : f32 to vector<8x128xf32>
    %2080 = arith.mulf %1920, %2079 : vector<8x128xf32>
    %2081 = arith.addf %2078, %2080 : vector<8x128xf32>
    %2082 = vector.broadcast %15 : f32 to vector<8x128xf32>
    %2083 = arith.mulf %1934, %2082 : vector<8x128xf32>
    %2084 = arith.addf %2081, %2083 : vector<8x128xf32>
    %2085 = arith.addf %2073, %2084 : vector<8x128xf32>
    %2086 = vector.extract_strided_slice %2029 {offsets = [0, 0, 0], sizes = [1, 8, 128], strides = [1, 1, 1]} : vector<4x8x128xf32> to vector<1x8x128xf32>
    %2087 = vector.shape_cast %2086 : vector<1x8x128xf32> to vector<8x128xf32>
    %2088 = vector.broadcast %0 : f32 to vector<8x128xf32>
    %2089 = arith.mulf %1948, %2088 : vector<8x128xf32>
    %2090 = vector.broadcast %1 : f32 to vector<8x128xf32>
    %2091 = arith.mulf %1962, %2090 : vector<8x128xf32>
    %2092 = arith.addf %2089, %2091 : vector<8x128xf32>
    %2093 = vector.broadcast %2 : f32 to vector<8x128xf32>
    %2094 = arith.mulf %1976, %2093 : vector<8x128xf32>
    %2095 = arith.addf %2092, %2094 : vector<8x128xf32>
    %2096 = vector.broadcast %3 : f32 to vector<8x128xf32>
    %2097 = arith.mulf %1990, %2096 : vector<8x128xf32>
    %2098 = arith.addf %2095, %2097 : vector<8x128xf32>
    %2099 = arith.addf %2087, %2098 : vector<8x128xf32>
    %2100 = vector.extract_strided_slice %2029 {offsets = [1, 0, 0], sizes = [1, 8, 128], strides = [1, 1, 1]} : vector<4x8x128xf32> to vector<1x8x128xf32>
    %2101 = vector.shape_cast %2100 : vector<1x8x128xf32> to vector<8x128xf32>
    %2102 = vector.broadcast %4 : f32 to vector<8x128xf32>
    %2103 = arith.mulf %1948, %2102 : vector<8x128xf32>
    %2104 = vector.broadcast %5 : f32 to vector<8x128xf32>
    %2105 = arith.mulf %1962, %2104 : vector<8x128xf32>
    %2106 = arith.addf %2103, %2105 : vector<8x128xf32>
    %2107 = vector.broadcast %6 : f32 to vector<8x128xf32>
    %2108 = arith.mulf %1976, %2107 : vector<8x128xf32>
    %2109 = arith.addf %2106, %2108 : vector<8x128xf32>
    %2110 = vector.broadcast %7 : f32 to vector<8x128xf32>
    %2111 = arith.mulf %1990, %2110 : vector<8x128xf32>
    %2112 = arith.addf %2109, %2111 : vector<8x128xf32>
    %2113 = arith.addf %2101, %2112 : vector<8x128xf32>
    %2114 = vector.extract_strided_slice %2029 {offsets = [2, 0, 0], sizes = [1, 8, 128], strides = [1, 1, 1]} : vector<4x8x128xf32> to vector<1x8x128xf32>
    %2115 = vector.shape_cast %2114 : vector<1x8x128xf32> to vector<8x128xf32>
    %2116 = vector.broadcast %8 : f32 to vector<8x128xf32>
    %2117 = arith.mulf %1948, %2116 : vector<8x128xf32>
    %2118 = vector.broadcast %9 : f32 to vector<8x128xf32>
    %2119 = arith.mulf %1962, %2118 : vector<8x128xf32>
    %2120 = arith.addf %2117, %2119 : vector<8x128xf32>
    %2121 = vector.broadcast %10 : f32 to vector<8x128xf32>
    %2122 = arith.mulf %1976, %2121 : vector<8x128xf32>
    %2123 = arith.addf %2120, %2122 : vector<8x128xf32>
    %2124 = vector.broadcast %11 : f32 to vector<8x128xf32>
    %2125 = arith.mulf %1990, %2124 : vector<8x128xf32>
    %2126 = arith.addf %2123, %2125 : vector<8x128xf32>
    %2127 = arith.addf %2115, %2126 : vector<8x128xf32>
    %2128 = vector.extract_strided_slice %2029 {offsets = [3, 0, 0], sizes = [1, 8, 128], strides = [1, 1, 1]} : vector<4x8x128xf32> to vector<1x8x128xf32>
    %2129 = vector.shape_cast %2128 : vector<1x8x128xf32> to vector<8x128xf32>
    %2130 = vector.broadcast %12 : f32 to vector<8x128xf32>
    %2131 = arith.mulf %1948, %2130 : vector<8x128xf32>
    %2132 = vector.broadcast %13 : f32 to vector<8x128xf32>
    %2133 = arith.mulf %1962, %2132 : vector<8x128xf32>
    %2134 = arith.addf %2131, %2133 : vector<8x128xf32>
    %2135 = vector.broadcast %14 : f32 to vector<8x128xf32>
    %2136 = arith.mulf %1976, %2135 : vector<8x128xf32>
    %2137 = arith.addf %2134, %2136 : vector<8x128xf32>
    %2138 = vector.broadcast %15 : f32 to vector<8x128xf32>
    %2139 = arith.mulf %1990, %2138 : vector<8x128xf32>
    %2140 = arith.addf %2137, %2139 : vector<8x128xf32>
    %2141 = arith.addf %2129, %2140 : vector<8x128xf32>
    %c0_618 = arith.constant 0 : index
    %2142 = arith.index_cast %c14_i32 : i32 to index
    %c0_619 = arith.constant 0 : index
    %c0_620 = arith.constant 0 : index
    %c0_621 = arith.constant 0 : index
    %2143 = vector.load %arg4[%c0_618, %2142, %c0_619, %c0_620, %c0_621] : memref<2x16x4x8x128xf32, #tpu.memory_space<vmem>>, vector<1x1x1x8x128xf32>
    %2144 = vector.shape_cast %2143 : vector<1x1x1x8x128xf32> to vector<8x128xf32>
    %2145 = vector.shape_cast %2043 : vector<8x128xf32> to vector<1x1x1x8x128xf32>
    tpu.vector_store %arg4[%c0_618, %2142, %c0_619, %c0_620, %c0_621], %2145 {strides = array<i32>} : memref<2x16x4x8x128xf32, #tpu.memory_space<vmem>>, vector<1x1x1x8x128xf32>,
    %c1_622 = arith.constant 1 : index
    %2146 = arith.index_cast %2023 : i32 to index
    %c0_623 = arith.constant 0 : index
    %c0_624 = arith.constant 0 : index
    %c0_625 = arith.constant 0 : index
    %2147 = vector.load %arg4[%c1_622, %2146, %c0_623, %c0_624, %c0_625] : memref<2x16x4x8x128xf32, #tpu.memory_space<vmem>>, vector<1x1x1x8x128xf32>
    %2148 = vector.shape_cast %2147 : vector<1x1x1x8x128xf32> to vector<8x128xf32>
    %2149 = vector.shape_cast %2099 : vector<8x128xf32> to vector<1x1x1x8x128xf32>
    tpu.vector_store %arg4[%c1_622, %2146, %c0_623, %c0_624, %c0_625], %2149 {strides = array<i32>} : memref<2x16x4x8x128xf32, #tpu.memory_space<vmem>>, vector<1x1x1x8x128xf32>,
    %c0_626 = arith.constant 0 : index
    %2150 = arith.index_cast %c14_i32 : i32 to index
    %c1_627 = arith.constant 1 : index
    %c0_628 = arith.constant 0 : index
    %c0_629 = arith.constant 0 : index
    %2151 = vector.load %arg4[%c0_626, %2150, %c1_627, %c0_628, %c0_629] : memref<2x16x4x8x128xf32, #tpu.memory_space<vmem>>, vector<1x1x1x8x128xf32>
    %2152 = vector.shape_cast %2151 : vector<1x1x1x8x128xf32> to vector<8x128xf32>
    %2153 = vector.shape_cast %2057 : vector<8x128xf32> to vector<1x1x1x8x128xf32>
    tpu.vector_store %arg4[%c0_626, %2150, %c1_627, %c0_628, %c0_629], %2153 {strides = array<i32>} : memref<2x16x4x8x128xf32, #tpu.memory_space<vmem>>, vector<1x1x1x8x128xf32>,
    %c1_630 = arith.constant 1 : index
    %2154 = arith.index_cast %2023 : i32 to index
    %c1_631 = arith.constant 1 : index
    %c0_632 = arith.constant 0 : index
    %c0_633 = arith.constant 0 : index
    %2155 = vector.load %arg4[%c1_630, %2154, %c1_631, %c0_632, %c0_633] : memref<2x16x4x8x128xf32, #tpu.memory_space<vmem>>, vector<1x1x1x8x128xf32>
    %2156 = vector.shape_cast %2155 : vector<1x1x1x8x128xf32> to vector<8x128xf32>
    %2157 = vector.shape_cast %2113 : vector<8x128xf32> to vector<1x1x1x8x128xf32>
    tpu.vector_store %arg4[%c1_630, %2154, %c1_631, %c0_632, %c0_633], %2157 {strides = array<i32>} : memref<2x16x4x8x128xf32, #tpu.memory_space<vmem>>, vector<1x1x1x8x128xf32>,
    %c0_634 = arith.constant 0 : index
    %2158 = arith.index_cast %c14_i32 : i32 to index
    %c2_635 = arith.constant 2 : index
    %c0_636 = arith.constant 0 : index
    %c0_637 = arith.constant 0 : index
    %2159 = vector.load %arg4[%c0_634, %2158, %c2_635, %c0_636, %c0_637] : memref<2x16x4x8x128xf32, #tpu.memory_space<vmem>>, vector<1x1x1x8x128xf32>
    %2160 = vector.shape_cast %2159 : vector<1x1x1x8x128xf32> to vector<8x128xf32>
    %2161 = vector.shape_cast %2071 : vector<8x128xf32> to vector<1x1x1x8x128xf32>
    tpu.vector_store %arg4[%c0_634, %2158, %c2_635, %c0_636, %c0_637], %2161 {strides = array<i32>} : memref<2x16x4x8x128xf32, #tpu.memory_space<vmem>>, vector<1x1x1x8x128xf32>,
    %c1_638 = arith.constant 1 : index
    %2162 = arith.index_cast %2023 : i32 to index
    %c2_639 = arith.constant 2 : index
    %c0_640 = arith.constant 0 : index
    %c0_641 = arith.constant 0 : index
    %2163 = vector.load %arg4[%c1_638, %2162, %c2_639, %c0_640, %c0_641] : memref<2x16x4x8x128xf32, #tpu.memory_space<vmem>>, vector<1x1x1x8x128xf32>
    %2164 = vector.shape_cast %2163 : vector<1x1x1x8x128xf32> to vector<8x128xf32>
    %2165 = vector.shape_cast %2127 : vector<8x128xf32> to vector<1x1x1x8x128xf32>
    tpu.vector_store %arg4[%c1_638, %2162, %c2_639, %c0_640, %c0_641], %2165 {strides = array<i32>} : memref<2x16x4x8x128xf32, #tpu.memory_space<vmem>>, vector<1x1x1x8x128xf32>,
    %c0_642 = arith.constant 0 : index
    %2166 = arith.index_cast %c14_i32 : i32 to index
    %c3_643 = arith.constant 3 : index
    %c0_644 = arith.constant 0 : index
    %c0_645 = arith.constant 0 : index
    %2167 = vector.load %arg4[%c0_642, %2166, %c3_643, %c0_644, %c0_645] : memref<2x16x4x8x128xf32, #tpu.memory_space<vmem>>, vector<1x1x1x8x128xf32>
    %2168 = vector.shape_cast %2167 : vector<1x1x1x8x128xf32> to vector<8x128xf32>
    %2169 = vector.shape_cast %2085 : vector<8x128xf32> to vector<1x1x1x8x128xf32>
    tpu.vector_store %arg4[%c0_642, %2166, %c3_643, %c0_644, %c0_645], %2169 {strides = array<i32>} : memref<2x16x4x8x128xf32, #tpu.memory_space<vmem>>, vector<1x1x1x8x128xf32>,
    %c1_646 = arith.constant 1 : index
    %2170 = arith.index_cast %2023 : i32 to index
    %c3_647 = arith.constant 3 : index
    %c0_648 = arith.constant 0 : index
    %c0_649 = arith.constant 0 : index
    %2171 = vector.load %arg4[%c1_646, %2170, %c3_647, %c0_648, %c0_649] : memref<2x16x4x8x128xf32, #tpu.memory_space<vmem>>, vector<1x1x1x8x128xf32>
    %2172 = vector.shape_cast %2171 : vector<1x1x1x8x128xf32> to vector<8x128xf32>
    %2173 = vector.shape_cast %2141 : vector<8x128xf32> to vector<1x1x1x8x128xf32>
    tpu.vector_store %arg4[%c1_646, %2170, %c3_647, %c0_648, %c0_649], %2173 {strides = array<i32>} : memref<2x16x4x8x128xf32, #tpu.memory_space<vmem>>, vector<1x1x1x8x128xf32>,
    %c15_i32_650 = arith.constant 15 : i32
    %c15_i32_651 = arith.constant 15 : i32
    %2174 = arith.subi %c15_i32_651, %c15_i32_650 : i32
    %c0_652 = arith.constant 0 : index
    %2175 = arith.index_cast %c15_i32_650 : i32 to index
    %c0_653 = arith.constant 0 : index
    %c0_654 = arith.constant 0 : index
    %c0_655 = arith.constant 0 : index
    %2176 = vector.load %arg3[%c0_652, %2175, %c0_653, %c0_654, %c0_655] : memref<1x16x4x8x128xf32, #tpu.memory_space<vmem>>, vector<1x1x4x8x128xf32>
    %2177 = vector.shape_cast %2176 : vector<1x1x4x8x128xf32> to vector<4x8x128xf32>
    %c0_656 = arith.constant 0 : index
    %2178 = arith.index_cast %2174 : i32 to index
    %c0_657 = arith.constant 0 : index
    %c0_658 = arith.constant 0 : index
    %c0_659 = arith.constant 0 : index
    %2179 = vector.load %arg3[%c0_656, %2178, %c0_657, %c0_658, %c0_659] : memref<1x16x4x8x128xf32, #tpu.memory_space<vmem>>, vector<1x1x4x8x128xf32>
    %2180 = vector.shape_cast %2179 : vector<1x1x4x8x128xf32> to vector<4x8x128xf32>
    %2181 = vector.extract_strided_slice %2177 {offsets = [0, 0, 0], sizes = [1, 8, 128], strides = [1, 1, 1]} : vector<4x8x128xf32> to vector<1x8x128xf32>
    %2182 = vector.shape_cast %2181 : vector<1x8x128xf32> to vector<8x128xf32>
    %2183 = vector.broadcast %0 : f32 to vector<8x128xf32>
    %2184 = arith.mulf %2043, %2183 : vector<8x128xf32>
    %2185 = vector.broadcast %1 : f32 to vector<8x128xf32>
    %2186 = arith.mulf %2057, %2185 : vector<8x128xf32>
    %2187 = arith.addf %2184, %2186 : vector<8x128xf32>
    %2188 = vector.broadcast %2 : f32 to vector<8x128xf32>
    %2189 = arith.mulf %2071, %2188 : vector<8x128xf32>
    %2190 = arith.addf %2187, %2189 : vector<8x128xf32>
    %2191 = vector.broadcast %3 : f32 to vector<8x128xf32>
    %2192 = arith.mulf %2085, %2191 : vector<8x128xf32>
    %2193 = arith.addf %2190, %2192 : vector<8x128xf32>
    %2194 = arith.addf %2182, %2193 : vector<8x128xf32>
    %2195 = vector.extract_strided_slice %2177 {offsets = [1, 0, 0], sizes = [1, 8, 128], strides = [1, 1, 1]} : vector<4x8x128xf32> to vector<1x8x128xf32>
    %2196 = vector.shape_cast %2195 : vector<1x8x128xf32> to vector<8x128xf32>
    %2197 = vector.broadcast %4 : f32 to vector<8x128xf32>
    %2198 = arith.mulf %2043, %2197 : vector<8x128xf32>
    %2199 = vector.broadcast %5 : f32 to vector<8x128xf32>
    %2200 = arith.mulf %2057, %2199 : vector<8x128xf32>
    %2201 = arith.addf %2198, %2200 : vector<8x128xf32>
    %2202 = vector.broadcast %6 : f32 to vector<8x128xf32>
    %2203 = arith.mulf %2071, %2202 : vector<8x128xf32>
    %2204 = arith.addf %2201, %2203 : vector<8x128xf32>
    %2205 = vector.broadcast %7 : f32 to vector<8x128xf32>
    %2206 = arith.mulf %2085, %2205 : vector<8x128xf32>
    %2207 = arith.addf %2204, %2206 : vector<8x128xf32>
    %2208 = arith.addf %2196, %2207 : vector<8x128xf32>
    %2209 = vector.extract_strided_slice %2177 {offsets = [2, 0, 0], sizes = [1, 8, 128], strides = [1, 1, 1]} : vector<4x8x128xf32> to vector<1x8x128xf32>
    %2210 = vector.shape_cast %2209 : vector<1x8x128xf32> to vector<8x128xf32>
    %2211 = vector.broadcast %8 : f32 to vector<8x128xf32>
    %2212 = arith.mulf %2043, %2211 : vector<8x128xf32>
    %2213 = vector.broadcast %9 : f32 to vector<8x128xf32>
    %2214 = arith.mulf %2057, %2213 : vector<8x128xf32>
    %2215 = arith.addf %2212, %2214 : vector<8x128xf32>
    %2216 = vector.broadcast %10 : f32 to vector<8x128xf32>
    %2217 = arith.mulf %2071, %2216 : vector<8x128xf32>
    %2218 = arith.addf %2215, %2217 : vector<8x128xf32>
    %2219 = vector.broadcast %11 : f32 to vector<8x128xf32>
    %2220 = arith.mulf %2085, %2219 : vector<8x128xf32>
    %2221 = arith.addf %2218, %2220 : vector<8x128xf32>
    %2222 = arith.addf %2210, %2221 : vector<8x128xf32>
    %2223 = vector.extract_strided_slice %2177 {offsets = [3, 0, 0], sizes = [1, 8, 128], strides = [1, 1, 1]} : vector<4x8x128xf32> to vector<1x8x128xf32>
    %2224 = vector.shape_cast %2223 : vector<1x8x128xf32> to vector<8x128xf32>
    %2225 = vector.broadcast %12 : f32 to vector<8x128xf32>
    %2226 = arith.mulf %2043, %2225 : vector<8x128xf32>
    %2227 = vector.broadcast %13 : f32 to vector<8x128xf32>
    %2228 = arith.mulf %2057, %2227 : vector<8x128xf32>
    %2229 = arith.addf %2226, %2228 : vector<8x128xf32>
    %2230 = vector.broadcast %14 : f32 to vector<8x128xf32>
    %2231 = arith.mulf %2071, %2230 : vector<8x128xf32>
    %2232 = arith.addf %2229, %2231 : vector<8x128xf32>
    %2233 = vector.broadcast %15 : f32 to vector<8x128xf32>
    %2234 = arith.mulf %2085, %2233 : vector<8x128xf32>
    %2235 = arith.addf %2232, %2234 : vector<8x128xf32>
    %2236 = arith.addf %2224, %2235 : vector<8x128xf32>
    %2237 = vector.extract_strided_slice %2180 {offsets = [0, 0, 0], sizes = [1, 8, 128], strides = [1, 1, 1]} : vector<4x8x128xf32> to vector<1x8x128xf32>
    %2238 = vector.shape_cast %2237 : vector<1x8x128xf32> to vector<8x128xf32>
    %2239 = vector.broadcast %0 : f32 to vector<8x128xf32>
    %2240 = arith.mulf %2099, %2239 : vector<8x128xf32>
    %2241 = vector.broadcast %1 : f32 to vector<8x128xf32>
    %2242 = arith.mulf %2113, %2241 : vector<8x128xf32>
    %2243 = arith.addf %2240, %2242 : vector<8x128xf32>
    %2244 = vector.broadcast %2 : f32 to vector<8x128xf32>
    %2245 = arith.mulf %2127, %2244 : vector<8x128xf32>
    %2246 = arith.addf %2243, %2245 : vector<8x128xf32>
    %2247 = vector.broadcast %3 : f32 to vector<8x128xf32>
    %2248 = arith.mulf %2141, %2247 : vector<8x128xf32>
    %2249 = arith.addf %2246, %2248 : vector<8x128xf32>
    %2250 = arith.addf %2238, %2249 : vector<8x128xf32>
    %2251 = vector.extract_strided_slice %2180 {offsets = [1, 0, 0], sizes = [1, 8, 128], strides = [1, 1, 1]} : vector<4x8x128xf32> to vector<1x8x128xf32>
    %2252 = vector.shape_cast %2251 : vector<1x8x128xf32> to vector<8x128xf32>
    %2253 = vector.broadcast %4 : f32 to vector<8x128xf32>
    %2254 = arith.mulf %2099, %2253 : vector<8x128xf32>
    %2255 = vector.broadcast %5 : f32 to vector<8x128xf32>
    %2256 = arith.mulf %2113, %2255 : vector<8x128xf32>
    %2257 = arith.addf %2254, %2256 : vector<8x128xf32>
    %2258 = vector.broadcast %6 : f32 to vector<8x128xf32>
    %2259 = arith.mulf %2127, %2258 : vector<8x128xf32>
    %2260 = arith.addf %2257, %2259 : vector<8x128xf32>
    %2261 = vector.broadcast %7 : f32 to vector<8x128xf32>
    %2262 = arith.mulf %2141, %2261 : vector<8x128xf32>
    %2263 = arith.addf %2260, %2262 : vector<8x128xf32>
    %2264 = arith.addf %2252, %2263 : vector<8x128xf32>
    %2265 = vector.extract_strided_slice %2180 {offsets = [2, 0, 0], sizes = [1, 8, 128], strides = [1, 1, 1]} : vector<4x8x128xf32> to vector<1x8x128xf32>
    %2266 = vector.shape_cast %2265 : vector<1x8x128xf32> to vector<8x128xf32>
    %2267 = vector.broadcast %8 : f32 to vector<8x128xf32>
    %2268 = arith.mulf %2099, %2267 : vector<8x128xf32>
    %2269 = vector.broadcast %9 : f32 to vector<8x128xf32>
    %2270 = arith.mulf %2113, %2269 : vector<8x128xf32>
    %2271 = arith.addf %2268, %2270 : vector<8x128xf32>
    %2272 = vector.broadcast %10 : f32 to vector<8x128xf32>
    %2273 = arith.mulf %2127, %2272 : vector<8x128xf32>
    %2274 = arith.addf %2271, %2273 : vector<8x128xf32>
    %2275 = vector.broadcast %11 : f32 to vector<8x128xf32>
    %2276 = arith.mulf %2141, %2275 : vector<8x128xf32>
    %2277 = arith.addf %2274, %2276 : vector<8x128xf32>
    %2278 = arith.addf %2266, %2277 : vector<8x128xf32>
    %2279 = vector.extract_strided_slice %2180 {offsets = [3, 0, 0], sizes = [1, 8, 128], strides = [1, 1, 1]} : vector<4x8x128xf32> to vector<1x8x128xf32>
    %2280 = vector.shape_cast %2279 : vector<1x8x128xf32> to vector<8x128xf32>
    %2281 = vector.broadcast %12 : f32 to vector<8x128xf32>
    %2282 = arith.mulf %2099, %2281 : vector<8x128xf32>
    %2283 = vector.broadcast %13 : f32 to vector<8x128xf32>
    %2284 = arith.mulf %2113, %2283 : vector<8x128xf32>
    %2285 = arith.addf %2282, %2284 : vector<8x128xf32>
    %2286 = vector.broadcast %14 : f32 to vector<8x128xf32>
    %2287 = arith.mulf %2127, %2286 : vector<8x128xf32>
    %2288 = arith.addf %2285, %2287 : vector<8x128xf32>
    %2289 = vector.broadcast %15 : f32 to vector<8x128xf32>
    %2290 = arith.mulf %2141, %2289 : vector<8x128xf32>
    %2291 = arith.addf %2288, %2290 : vector<8x128xf32>
    %2292 = arith.addf %2280, %2291 : vector<8x128xf32>
    %c0_660 = arith.constant 0 : index
    %2293 = arith.index_cast %c15_i32_650 : i32 to index
    %c0_661 = arith.constant 0 : index
    %c0_662 = arith.constant 0 : index
    %c0_663 = arith.constant 0 : index
    %2294 = vector.load %arg4[%c0_660, %2293, %c0_661, %c0_662, %c0_663] : memref<2x16x4x8x128xf32, #tpu.memory_space<vmem>>, vector<1x1x1x8x128xf32>
    %2295 = vector.shape_cast %2294 : vector<1x1x1x8x128xf32> to vector<8x128xf32>
    %2296 = vector.shape_cast %2194 : vector<8x128xf32> to vector<1x1x1x8x128xf32>
    tpu.vector_store %arg4[%c0_660, %2293, %c0_661, %c0_662, %c0_663], %2296 {strides = array<i32>} : memref<2x16x4x8x128xf32, #tpu.memory_space<vmem>>, vector<1x1x1x8x128xf32>,
    %c1_664 = arith.constant 1 : index
    %2297 = arith.index_cast %2174 : i32 to index
    %c0_665 = arith.constant 0 : index
    %c0_666 = arith.constant 0 : index
    %c0_667 = arith.constant 0 : index
    %2298 = vector.load %arg4[%c1_664, %2297, %c0_665, %c0_666, %c0_667] : memref<2x16x4x8x128xf32, #tpu.memory_space<vmem>>, vector<1x1x1x8x128xf32>
    %2299 = vector.shape_cast %2298 : vector<1x1x1x8x128xf32> to vector<8x128xf32>
    %2300 = vector.shape_cast %2250 : vector<8x128xf32> to vector<1x1x1x8x128xf32>
    tpu.vector_store %arg4[%c1_664, %2297, %c0_665, %c0_666, %c0_667], %2300 {strides = array<i32>} : memref<2x16x4x8x128xf32, #tpu.memory_space<vmem>>, vector<1x1x1x8x128xf32>,
    %c0_668 = arith.constant 0 : index
    %2301 = arith.index_cast %c15_i32_650 : i32 to index
    %c1_669 = arith.constant 1 : index
    %c0_670 = arith.constant 0 : index
    %c0_671 = arith.constant 0 : index
    %2302 = vector.load %arg4[%c0_668, %2301, %c1_669, %c0_670, %c0_671] : memref<2x16x4x8x128xf32, #tpu.memory_space<vmem>>, vector<1x1x1x8x128xf32>
    %2303 = vector.shape_cast %2302 : vector<1x1x1x8x128xf32> to vector<8x128xf32>
    %2304 = vector.shape_cast %2208 : vector<8x128xf32> to vector<1x1x1x8x128xf32>
    tpu.vector_store %arg4[%c0_668, %2301, %c1_669, %c0_670, %c0_671], %2304 {strides = array<i32>} : memref<2x16x4x8x128xf32, #tpu.memory_space<vmem>>, vector<1x1x1x8x128xf32>,
    %c1_672 = arith.constant 1 : index
    %2305 = arith.index_cast %2174 : i32 to index
    %c1_673 = arith.constant 1 : index
    %c0_674 = arith.constant 0 : index
    %c0_675 = arith.constant 0 : index
    %2306 = vector.load %arg4[%c1_672, %2305, %c1_673, %c0_674, %c0_675] : memref<2x16x4x8x128xf32, #tpu.memory_space<vmem>>, vector<1x1x1x8x128xf32>
    %2307 = vector.shape_cast %2306 : vector<1x1x1x8x128xf32> to vector<8x128xf32>
    %2308 = vector.shape_cast %2264 : vector<8x128xf32> to vector<1x1x1x8x128xf32>
    tpu.vector_store %arg4[%c1_672, %2305, %c1_673, %c0_674, %c0_675], %2308 {strides = array<i32>} : memref<2x16x4x8x128xf32, #tpu.memory_space<vmem>>, vector<1x1x1x8x128xf32>,
    %c0_676 = arith.constant 0 : index
    %2309 = arith.index_cast %c15_i32_650 : i32 to index
    %c2_677 = arith.constant 2 : index
    %c0_678 = arith.constant 0 : index
    %c0_679 = arith.constant 0 : index
    %2310 = vector.load %arg4[%c0_676, %2309, %c2_677, %c0_678, %c0_679] : memref<2x16x4x8x128xf32, #tpu.memory_space<vmem>>, vector<1x1x1x8x128xf32>
    %2311 = vector.shape_cast %2310 : vector<1x1x1x8x128xf32> to vector<8x128xf32>
    %2312 = vector.shape_cast %2222 : vector<8x128xf32> to vector<1x1x1x8x128xf32>
    tpu.vector_store %arg4[%c0_676, %2309, %c2_677, %c0_678, %c0_679], %2312 {strides = array<i32>} : memref<2x16x4x8x128xf32, #tpu.memory_space<vmem>>, vector<1x1x1x8x128xf32>,
    %c1_680 = arith.constant 1 : index
    %2313 = arith.index_cast %2174 : i32 to index
    %c2_681 = arith.constant 2 : index
    %c0_682 = arith.constant 0 : index
    %c0_683 = arith.constant 0 : index
    %2314 = vector.load %arg4[%c1_680, %2313, %c2_681, %c0_682, %c0_683] : memref<2x16x4x8x128xf32, #tpu.memory_space<vmem>>, vector<1x1x1x8x128xf32>
    %2315 = vector.shape_cast %2314 : vector<1x1x1x8x128xf32> to vector<8x128xf32>
    %2316 = vector.shape_cast %2278 : vector<8x128xf32> to vector<1x1x1x8x128xf32>
    tpu.vector_store %arg4[%c1_680, %2313, %c2_681, %c0_682, %c0_683], %2316 {strides = array<i32>} : memref<2x16x4x8x128xf32, #tpu.memory_space<vmem>>, vector<1x1x1x8x128xf32>,
    %c0_684 = arith.constant 0 : index
    %2317 = arith.index_cast %c15_i32_650 : i32 to index
    %c3_685 = arith.constant 3 : index
    %c0_686 = arith.constant 0 : index
    %c0_687 = arith.constant 0 : index
    %2318 = vector.load %arg4[%c0_684, %2317, %c3_685, %c0_686, %c0_687] : memref<2x16x4x8x128xf32, #tpu.memory_space<vmem>>, vector<1x1x1x8x128xf32>
    %2319 = vector.shape_cast %2318 : vector<1x1x1x8x128xf32> to vector<8x128xf32>
    %2320 = vector.shape_cast %2236 : vector<8x128xf32> to vector<1x1x1x8x128xf32>
    tpu.vector_store %arg4[%c0_684, %2317, %c3_685, %c0_686, %c0_687], %2320 {strides = array<i32>} : memref<2x16x4x8x128xf32, #tpu.memory_space<vmem>>, vector<1x1x1x8x128xf32>,
    %c1_688 = arith.constant 1 : index
    %2321 = arith.index_cast %2174 : i32 to index
    %c3_689 = arith.constant 3 : index
    %c0_690 = arith.constant 0 : index
    %c0_691 = arith.constant 0 : index
    %2322 = vector.load %arg4[%c1_688, %2321, %c3_689, %c0_690, %c0_691] : memref<2x16x4x8x128xf32, #tpu.memory_space<vmem>>, vector<1x1x1x8x128xf32>
    %2323 = vector.shape_cast %2322 : vector<1x1x1x8x128xf32> to vector<8x128xf32>
    %2324 = vector.shape_cast %2292 : vector<8x128xf32> to vector<1x1x1x8x128xf32>
    tpu.vector_store %arg4[%c1_688, %2321, %c3_689, %c0_690, %c0_691], %2324 {strides = array<i32>} : memref<2x16x4x8x128xf32, #tpu.memory_space<vmem>>, vector<1x1x1x8x128xf32>,
    %c15_i32_692 = arith.constant 15 : i32
    return
  }
  func.func @transform_0(%arg0: i32, %arg1: i32) -> (i32, i32) {
    %c0_i32 = arith.constant 0 : i32
    %c0_i32_0 = arith.constant 0 : i32
    %c0_i32_1 = arith.constant 0 : i32
    return %c0_i32, %c0_i32_0 : i32, i32
  }
  func.func @transform_1(%arg0: i32, %arg1: i32) -> (i32, i32, i32, i32, i32) {
    %c0_i32 = arith.constant 0 : i32
    %c0_i32_0 = arith.constant 0 : i32
    %c0_i32_1 = arith.constant 0 : i32
    %c0_i32_2 = arith.constant 0 : i32
    return %arg0, %c0_i32, %c0_i32_0, %c0_i32_1, %arg1 : i32, i32, i32, i32, i32
  }
  func.func @transform_2(%arg0: i32, %arg1: i32) -> (i32, i32, i32, i32, i32) {
    %c0_i32 = arith.constant 0 : i32
    %c0_i32_0 = arith.constant 0 : i32
    %c0_i32_1 = arith.constant 0 : i32
    %c0_i32_2 = arith.constant 0 : i32
    return %arg0, %c0_i32, %c0_i32_0, %c0_i32_1, %arg1 : i32, i32, i32, i32, i32
  }
}

</mosaic_0001>

<bundles_post_ra>
// kernel: recurrent_prop.1
= control target key start
LH: loop header
LB: loop body
LE: loop exit
PB: predicated region body
PF: predicated region fallthrough
CT: control target
= control target key end

     0   :  { %7 = vsyncpa [#allocation3], 0  ;;  %s2053_s9 = smov 0   ;;  %s2055_s10 = smov 0   ;;  %s3550_s0 = inlined_call_operand.vmem [shape: f32[4,4], index: 0, kind: input, shape index: {}]   ;;  %s3551_s1 = inlined_call_operand.vmem [shape: f32[2,16,4,8,128], index: 1, kind: input, shape index: {}]   ;;  %s3552_s2 = inlined_call_operand.vmem [shape: f32[4,16,4,8,128], index: 2, kind: output, shape index: {}]  }
   0x1   :  { %s2057_s11 = smov 0  }
   0x2 LB: > { %s1681_s12 = sadd.s32 4294967295, %s2035_s11   ;;  %s25_s13 = sadd.s32 1, %s2031_s10  ;;  %s2035_s11 = sphi %s2057_s11, %s13_s11   ;;  %s2031_s10 = sphi %s2055_s10, %s3569_s10   ;;  %s2027_s9 = sphi %s2053_s9, %s3568_s9  }
   0x3   : > { %p27_p0 = scmp.ge.s32.totalorder %s25_s13, 2  ;;  %p1683_p1 = scmp.ge.s32.totalorder %s2035_s11, 1 }
   0x4   : > { %p107_p2 = scmp.lt.s32.totalorder %s2035_s11, 3  ;;  %p1967_p4 = scmp.eq.s32.totalorder %s1681_s12, 0 }
   0x5   : > { %s3571_s13 = smov (%p27_p0, %s25_s13), 0  ;;  %s119_s16 = sshll.u32 %s3550_s0, 4  ;;  %s120_s16 = int_to_ptr.vmem [resolvable:$true] %s119_s16 }
   0x6   : > { %p108_p3 = pnand %p1683_p1, %p107_p2  ;;  %s2037_s17 = smov [#allocation2]  }
   0x8   : > { %p1963_p5 = pneg %p108_p3  ;;  %143 = sbr.rel (%p108_p3) target bundleno = 279 (0x117), region = 28 }
   0xa   : > { %p1964_p6 = pnand %p1967_p4, %p1963_p5 }
   0xc   : > { %1966 = dma.vmem_to_smem (!%p1964_p6), %s120_s16, 64, %s2037_s17, [#allocation3]  }
   0xd   : > { %2022 = dma.done.wait (%p1967_p4), [#allocation3], 64  }
   0xe   : > { %2024 = vsyncadd (%p1967_p4), [#allocation3], 4294967232 }
   0xf   : > { %150 = sfence }
  0x10   : > { %p174_p7 = scmp.lt.s32.totalorder %s2027_s9, 1  ;;  %s1690_s18 = sshll.u32 %s2027_s9, 1 }
  0x11   : > { %p183_p8 = scmp.lt.s32.totalorder %s1690_s18, 3  ;;  %s192_s19 = sld [smem:[#allocation2]] }
  0x12   : > { %s3573_s9 = smov (!%p174_p7, %s2027_s9), 1  ;;  %s1696_s21 = sld [smem:[#allocation2 + $0x1]] }
  0x13   : > { %s3575_s18 = smov (!%p183_p8, %s1690_s18), 3  ;;  %s1957_s20 = sshll.u32 %s3573_s9, 9 }
  0x14   : > { %s2078_s24 = scalar_lea.vmem %s3551_s1, %s1957_s20  ;;  %s1958_s25 = sshll.u32 %s3575_s18, 9 }
  0x15   : > { %s2083_s28 = scalar_lea.vmem %s3552_s2, %s1958_s25  ;;  %s1700_s29 = sld [smem:[#allocation2 + $0x2]]  ;;  %v208_v0 = vld [vmem:[%s2078_s24] sm:$0xff]  ;;  %v209_v2 = vld [vmem:[%s2078_s24 + $0x8] sm:$0xff]  ;;  %v210_v6 = vld [vmem:[%s2078_s24 + $0x10] sm:$0xff] }
  0x16   : > { %s1704_s30 = sld [smem:[#allocation2 + $0x3]]  ;;  %217 = vst [vmem:[%s2083_s28] sm:$0xff] %v208_v0  ;;  %v1708_v1 = vld [vmem:[%s2078_s24 + $0x1e0] sm:$0xff]  ;;  %v1709_v3 = vld [vmem:[%s2078_s24 + $0x1e8] sm:$0xff]  ;;  %v1710_v7 = vld [vmem:[%s2078_s24 + $0x1f0] sm:$0xff] }
  0x17   : > { %1712 = vst [vmem:[%s2083_s28 + $0x3e0] sm:$0xff] %v1708_v1  ;;  %s1693_s3 = sld [smem:[#allocation2 + $0x80]]  ;;  %v2092_v4 = vstv %s192_s19  ;;  %v2108_v9 = vld [vmem:[%s2078_s24 + $0x18] sm:$0xff] }
  0x18   : > { %s1697_s4 = sld [smem:[#allocation2 + $0x81]]  ;;  %1713 = vst [vmem:[%s2083_s28 + $0x8] sm:$0xff] %v209_v2  ;;  %v2094_v5 = vstv %s1696_s21  ;;  %v243_v10 = vmul.f32 %v2092_v4, %v208_v0  ;;  %v290_v13 = vmul.f32 %v1708_v1, %v2092_v4  ;;  %v2120_v14 = vld [vmem:[%s2078_s24 + $0x1f8] sm:$0xff] }
  0x19   : > { %s1701_s5 = sld [smem:[#allocation2 + $0x82]]  ;;  %1714 = vst [vmem:[%s2083_s28 + $0x3e8] sm:$0xff] %v1709_v3  ;;  %v255_v11 = vmul.f32 %v2094_v5, %v208_v0  ;;  %v298_v16 = vmul.f32 %v1708_v1, %v2094_v5 }
  0x1a   : > { %s2098_s6 = sld [smem:[#allocation2 + $0x83]]  ;;  %1715 = vst [vmem:[%s2083_s28 + $0x10] sm:$0xff] %v210_v6 }
  0x1b   : > { %v2102_v8 = vstv %s1700_s29  ;;  %s2104_s7 = sld [smem:[#allocation2 + $0x100]]  ;;  %1716 = vst [vmem:[%s2083_s28 + $0x3f0] sm:$0xff] %v1710_v7 }
  0x1c   : > { %v2112_v12 = vstv %s1704_s30  ;;  %s2115_s8 = sld [smem:[#allocation2 + $0x101]]  ;;  %1717 = vst [vmem:[%s2083_s28 + $0x18] sm:$0xff] %v2108_v9  ;;  %v267_v15 = vmul.f32 %v2102_v8, %v208_v0  ;;  %v306_v17 = vmul.f32 %v1708_v1, %v2102_v8 }
  0x1d   : > { %v2125_v18 = vstv %s1693_s3  ;;  %s2127_s9 = sld [smem:[#allocation2 + $0x102]]  ;;  %1718 = vst [vmem:[%s2083_s28 + $0x3f8] sm:$0xff] %v2120_v14  ;;  %v279_v19 = vmul.f32 %v2112_v12, %v208_v0  ;;  %v314_v23 = vmul.f32 %v1708_v1, %v2112_v12 }
  0x1e   : > { %v245_v20 = vmul.f32 %v2125_v18, %v209_v2  ;;  %v2133_v21 = vstv %s1697_s4  ;;  %v291_v22 = vmul.f32 %v1709_v3, %v2125_v18  ;;  %s1706_s12 = sld [smem:[#allocation2 + $0x103]] }
  0x1f   : > { %v257_v24 = vmul.f32 %v2133_v21, %v209_v2  ;;  %v2138_v25 = vstv %s1701_s5  ;;  %v299_v26 = vmul.f32 %v1709_v3, %v2133_v21  ;;  %s2141_s14 = sld [smem:[#allocation2 + $0x180]] }
  0x20   : > { %v246_v27 = vadd.f32 %v245_v20, %v243_v10  ;;  %v269_v28 = vmul.f32 %v2138_v25, %v209_v2  ;;  %v2145_v29 = vstv %s2098_s6  ;;  %v292_v30 = vadd.f32 %v291_v22, %v290_v13  ;;  %s2147_s15 = sld [smem:[#allocation2 + $0x181]]  ;;  %v1723_v13 = vld [vmem:[%s2078_s24 + $0x1c0] sm:$0xff] }
  0x21   : > { %v258_v31 = vadd.f32 %v257_v24, %v255_v11  ;;  %v281_v32 = vmul.f32 %v2145_v29, %v209_v2  ;;  %v300_v33 = vadd.f32 %v299_v26, %v298_v16  ;;  %v307_v34 = vmul.f32 %v1709_v3, %v2138_v25  ;;  %s2151_s16 = sld [smem:[#allocation2 + $0x182]]  ;;  %v1724_v16 = vld [vmem:[%s2078_s24 + $0x1c8] sm:$0xff]  ;;  %v1725_v24 = vld [vmem:[%s2078_s24 + $0x1d0] sm:$0xff] }
  0x22   : > { %v270_v35 = vadd.f32 %v269_v28, %v267_v15  ;;  %v315_v36 = vmul.f32 %v1709_v3, %v2145_v29  ;;  %v2155_v37 = vstv %s2104_s7  ;;  %v2158_v38 = vstv %s2115_s8  ;;  %s1707_s17 = sld [smem:[#allocation2 + $0x183]]  ;;  %v1719_v3 = vld [vmem:[%s2078_s24 + $0x20] sm:$0xff]  ;;  %v1720_v15 = vld [vmem:[%s2078_s24 + $0x28] sm:$0xff] }
  0x23   : > { %v282_v39 = vadd.f32 %v281_v32, %v279_v19  ;;  %v308_v40 = vadd.f32 %v307_v34, %v306_v17  ;;  %v248_v41 = vmul.f32 %v2155_v37, %v210_v6  ;;  %v260_v42 = vmul.f32 %v2158_v38, %v210_v6 }
  0x24   : > { %v316_v43 = vadd.f32 %v315_v36, %v314_v23  ;;  %v2163_v44 = vstv %s2127_s9  ;;  %v2165_v45 = vstv %s1706_s12  ;;  %v293_v46 = vmul.f32 %v1710_v7, %v2155_v37  ;;  %v1721_v23 = vld [vmem:[%s2078_s24 + $0x30] sm:$0xff] }
  0x25   : > { %v249_v47 = vadd.f32 %v248_v41, %v246_v27  ;;  %v261_v48 = vadd.f32 %v260_v42, %v258_v31  ;;  %v272_v49 = vmul.f32 %v2163_v44, %v210_v6  ;;  %v284_v50 = vmul.f32 %v2165_v45, %v210_v6  ;;  %v1726_v31 = vld [vmem:[%s2078_s24 + $0x1d8] sm:$0xff] }
  0x26   : > { %v294_v51 = vadd.f32 %v293_v46, %v292_v30  ;;  %v301_v52 = vmul.f32 %v1710_v7, %v2158_v38  ;;  %v309_v53 = vmul.f32 %v1710_v7, %v2163_v44  ;;  %v317_v54 = vmul.f32 %v1710_v7, %v2165_v45 }
  0x27   : > { %v273_v55 = vadd.f32 %v272_v49, %v270_v35  ;;  %v285_v56 = vadd.f32 %v284_v50, %v282_v39  ;;  %v2174_v57 = vstv %s2141_s14  ;;  %v2177_v58 = vstv %s2147_s15 }
  0x28   : > { %v302_v59 = vadd.f32 %v301_v52, %v300_v33  ;;  %v310_v60 = vadd.f32 %v309_v53, %v308_v40  ;;  %v318_v61 = vadd.f32 %v317_v54, %v316_v43  ;;  %v251_v62 = vmul.f32 %v2174_v57, %v2108_v9 }
  0x29   : > { %v263_v63 = vmul.f32 %v2177_v58, %v2108_v9  ;;  %v2184_v0 = vstv %s2151_s16  ;;  %v2186_v1 = vstv %s1707_s17  ;;  %v295_v2 = vmul.f32 %v2120_v14, %v2174_v57 }
  0x2a   : > { %v275_v6 = vmul.f32 %v2184_v0, %v2108_v9  ;;  %v287_v7 = vmul.f32 %v2186_v1, %v2108_v9  ;;  %v303_v10 = vmul.f32 %v2120_v14, %v2177_v58  ;;  %v311_v11 = vmul.f32 %v2120_v14, %v2184_v0  ;;  %v1722_v9 = vld [vmem:[%s2078_s24 + $0x38] sm:$0xff] }
  0x2b   : > { %v319_v17 = vmul.f32 %v2120_v14, %v2186_v1  ;;  %v252_v19 = vadd.f32 %v251_v62, %v249_v47  ;;  %v296_v20 = vadd.f32 %v295_v2, %v294_v51  ;;  %v264_v22 = vadd.f32 %v263_v63, %v261_v48 }
  0x2c   : > { %v304_v26 = vadd.f32 %v303_v10, %v302_v59  ;;  %v276_v27 = vadd.f32 %v275_v6, %v273_v55  ;;  %v312_v28 = vadd.f32 %v311_v11, %v310_v60  ;;  %v288_v30 = vadd.f32 %v287_v7, %v285_v56 }
  0x2d   : > { %v2208_v32 = vadd.f32 %v1719_v3, %v252_v19  ;;  %v2210_v33 = vadd.f32 %v1723_v13, %v296_v20  ;;  %v2212_v34 = vadd.f32 %v1720_v15, %v264_v22  ;;  %v320_v14 = vadd.f32 %v319_v17, %v318_v61  ;;  %v1735_v3 = vld [vmem:[%s2078_s24 + $0x40] sm:$0xff]  ;;  %v1736_v22 = vld [vmem:[%s2078_s24 + $0x48] sm:$0xff] }
  0x2e   : > { %v2214_v35 = vadd.f32 %v1724_v16, %v304_v26  ;;  %v2216_v36 = vadd.f32 %v1721_v23, %v276_v27  ;;  %v2218_v39 = vadd.f32 %v1725_v24, %v312_v28  ;;  %v2220_v40 = vadd.f32 %v1722_v9, %v288_v30  ;;  %v1739_v15 = vld [vmem:[%s2078_s24 + $0x1a0] sm:$0xff] }
  0x2f   : > { %1727 = vst [vmem:[%s2083_s28 + $0x20] sm:$0xff] %v2208_v32  ;;  %v2224_v41 = vadd.f32 %v1726_v31, %v320_v14  ;;  %v348_v42 = vmul.f32 %v2208_v32, %v2092_v4  ;;  %v349_v43 = vmul.f32 %v2212_v34, %v2125_v18  ;;  %v380_v46 = vmul.f32 %v2210_v33, %v2092_v4  ;;  %v1740_v14 = vld [vmem:[%s2078_s24 + $0x1a8] sm:$0xff] }
  0x30   : > { %1728 = vst [vmem:[%s2083_s28 + $0x3c0] sm:$0xff] %v2210_v33  ;;  %v351_v47 = vmul.f32 %v2216_v36, %v2155_v37  ;;  %v353_v48 = vmul.f32 %v2220_v40, %v2174_v57  ;;  %v381_v49 = vmul.f32 %v2214_v35, %v2125_v18  ;;  %v383_v50 = vmul.f32 %v2218_v39, %v2155_v37 }
  0x31   : > { %1729 = vst [vmem:[%s2083_s28 + $0x28] sm:$0xff] %v2212_v34  ;;  %v350_v51 = vadd.f32 %v349_v43, %v348_v42  ;;  %v385_v52 = vmul.f32 %v2224_v41, %v2174_v57  ;;  %v356_v53 = vmul.f32 %v2094_v5, %v2208_v32  ;;  %v357_v54 = vmul.f32 %v2212_v34, %v2133_v21 }
  0x32   : > { %1730 = vst [vmem:[%s2083_s28 + $0x3c8] sm:$0xff] %v2214_v35  ;;  %v382_v55 = vadd.f32 %v381_v49, %v380_v46  ;;  %v359_v56 = vmul.f32 %v2216_v36, %v2158_v38  ;;  %v361_v59 = vmul.f32 %v2220_v40, %v2177_v58  ;;  %v388_v60 = vmul.f32 %v2210_v33, %v2094_v5  ;;  %v1737_v49 = vld [vmem:[%s2078_s24 + $0x50] sm:$0xff] }
  0x33   : > { %1731 = vst [vmem:[%s2083_s28 + $0x30] sm:$0xff] %v2216_v36  ;;  %v352_v61 = vadd.f32 %v351_v47, %v350_v51  ;;  %v358_v62 = vadd.f32 %v357_v54, %v356_v53  ;;  %v389_v63 = vmul.f32 %v2214_v35, %v2133_v21  ;;  %v391_v2 = vmul.f32 %v2218_v39, %v2158_v38 }
  0x34   : > { %1732 = vst [vmem:[%s2083_s28 + $0x3d0] sm:$0xff] %v2218_v39  ;;  %v384_v6 = vadd.f32 %v383_v50, %v382_v55  ;;  %v393_v7 = vmul.f32 %v2224_v41, %v2177_v58  ;;  %v364_v10 = vmul.f32 %v2102_v8, %v2208_v32  ;;  %v365_v11 = vmul.f32 %v2138_v25, %v2212_v34 }
  0x35   : > { %1733 = vst [vmem:[%s2083_s28 + $0x38] sm:$0xff] %v2220_v40  ;;  %v354_v13 = vadd.f32 %v353_v48, %v352_v61  ;;  %v360_v16 = vadd.f32 %v359_v56, %v358_v62  ;;  %v390_v17 = vadd.f32 %v389_v63, %v388_v60  ;;  %v367_v19 = vmul.f32 %v2216_v36, %v2163_v44 }
  0x36   : > { %1734 = vst [vmem:[%s2083_s28 + $0x3d8] sm:$0xff] %v2224_v41  ;;  %v386_v20 = vadd.f32 %v385_v52, %v384_v6  ;;  %v366_v23 = vadd.f32 %v365_v11, %v364_v10  ;;  %v369_v24 = vmul.f32 %v2220_v40, %v2184_v0  ;;  %v396_v9 = vmul.f32 %v2210_v33, %v2102_v8  ;;  %v1738_v10 = vld [vmem:[%s2078_s24 + $0x58] sm:$0xff] }
  0x37   : > { %v2285_v26 = vadd.f32 %v1735_v3, %v354_v13  ;;  %v362_v27 = vadd.f32 %v361_v59, %v360_v16  ;;  %v392_v28 = vadd.f32 %v391_v2, %v390_v17  ;;  %v397_v30 = vmul.f32 %v2214_v35, %v2138_v25  ;;  %v1742_v17 = vld [vmem:[%s2078_s24 + $0x1b8] sm:$0xff] }
  0x38   : > { %v2289_v31 = vadd.f32 %v1739_v15, %v386_v20  ;;  %v368_v42 = vadd.f32 %v367_v19, %v366_v23  ;;  %v399_v43 = vmul.f32 %v2218_v39, %v2163_v44  ;;  %v401_v46 = vmul.f32 %v2224_v41, %v2184_v0 }
  0x39   : > { %1743 = vst [vmem:[%s2083_s28 + $0x40] sm:$0xff] %v2285_v26  ;;  %v2298_v47 = vadd.f32 %v1736_v22, %v362_v27  ;;  %v394_v48 = vadd.f32 %v393_v7, %v392_v28  ;;  %v398_v50 = vadd.f32 %v397_v30, %v396_v9  ;;  %v372_v51 = vmul.f32 %v2112_v12, %v2208_v32 }
  0x3a   : > { %1744 = vst [vmem:[%s2083_s28 + $0x3a0] sm:$0xff] %v2289_v31  ;;  %v370_v52 = vadd.f32 %v369_v24, %v368_v42  ;;  %v373_v53 = vmul.f32 %v2145_v29, %v2212_v34  ;;  %v375_v54 = vmul.f32 %v2165_v45, %v2216_v36  ;;  %v377_v55 = vmul.f32 %v2220_v40, %v2186_v1  ;;  %v1741_v34 = vld [vmem:[%s2078_s24 + $0x1b0] sm:$0xff] }
  0x3b   : > { %1745 = vst [vmem:[%s2083_s28 + $0x48] sm:$0xff] %v2298_v47  ;;  %v2313_v56 = vadd.f32 %v1740_v14, %v394_v48  ;;  %v400_v59 = vadd.f32 %v399_v43, %v398_v50  ;;  %v404_v32 = vmul.f32 %v2210_v33, %v2112_v12  ;;  %v405_v60 = vmul.f32 %v2214_v35, %v2145_v29 }
  0x3c   : > { %v2319_v61 = vadd.f32 %v1737_v49, %v370_v52  ;;  %v374_v36 = vadd.f32 %v373_v53, %v372_v51  ;;  %v407_v40 = vmul.f32 %v2218_v39, %v2165_v45  ;;  %v409_v62 = vmul.f32 %v2224_v41, %v2186_v1 }
  0x3d   : > { %1746 = vst [vmem:[%s2083_s28 + $0x3a8] sm:$0xff] %v2313_v56  ;;  %v402_v63 = vadd.f32 %v401_v46, %v400_v59  ;;  %v406_v2 = vadd.f32 %v405_v60, %v404_v32  ;;  %v438_v33 = vmul.f32 %v2285_v26, %v2092_v4  ;;  %v439_v35 = vmul.f32 %v2298_v47, %v2125_v18  ;;  %v1752_v59 = vld [vmem:[%s2078_s24 + $0x68] sm:$0xff] }
  0x3e   : > { %1747 = vst [vmem:[%s2083_s28 + $0x50] sm:$0xff] %v2319_v61  ;;  %v376_v3 = vadd.f32 %v375_v54, %v374_v36  ;;  %v441_v39 = vmul.f32 %v2319_v61, %v2155_v37  ;;  %v470_v41 = vmul.f32 %v2289_v31, %v2092_v4  ;;  %v471_v6 = vmul.f32 %v2313_v56, %v2125_v18  ;;  %v1751_v54 = vld [vmem:[%s2078_s24 + $0x60] sm:$0xff] }
  0x3f   : > { %v2340_v7 = vadd.f32 %v1741_v34, %v402_v63  ;;  %v408_v11 = vadd.f32 %v407_v40, %v406_v2  ;;  %v440_v13 = vadd.f32 %v439_v35, %v438_v33  ;;  %v446_v15 = vmul.f32 %v2285_v26, %v2094_v5  ;;  %v1755_v40 = vld [vmem:[%s2078_s24 + $0x180] sm:$0xff]  ;;  %v1756_v35 = vld [vmem:[%s2078_s24 + $0x188] sm:$0xff] }
  0x40   : > { %v378_v16 = vadd.f32 %v377_v55, %v376_v3  ;;  %v472_v19 = vadd.f32 %v471_v6, %v470_v41  ;;  %v447_v20 = vmul.f32 %v2298_v47, %v2133_v21  ;;  %v449_v22 = vmul.f32 %v2319_v61, %v2158_v38 }
  0x41   : > { %1748 = vst [vmem:[%s2083_s28 + $0x3b0] sm:$0xff] %v2340_v7  ;;  %v410_v23 = vadd.f32 %v409_v62, %v408_v11  ;;  %v442_v24 = vadd.f32 %v441_v39, %v440_v13  ;;  %v473_v9 = vmul.f32 %v2340_v7, %v2155_v37  ;;  %v478_v27 = vmul.f32 %v2289_v31, %v2094_v5  ;;  %v1753_v13 = vld [vmem:[%s2078_s24 + $0x70] sm:$0xff] }
  0x42   : > { %v379_v28 = vadd.f32 %v1738_v10, %v378_v16  ;;  %v448_v30 = vadd.f32 %v447_v20, %v446_v15  ;;  %v479_v14 = vmul.f32 %v2313_v56, %v2133_v21  ;;  %v481_v42 = vmul.f32 %v2340_v7, %v2158_v38 }
  0x43   : > { %v411_v43 = vadd.f32 %v1742_v17, %v410_v23  ;;  %v474_v46 = vadd.f32 %v473_v9, %v472_v19  ;;  %v454_v48 = vmul.f32 %v2285_v26, %v2102_v8  ;;  %v455_v49 = vmul.f32 %v2298_v47, %v2138_v25 }
  0x44   : > { %1749 = vst [vmem:[%s2083_s28 + $0x58] sm:$0xff] %v379_v28  ;;  %v443_v50 = vmul.f32 %v379_v28, %v2174_v57  ;;  %v450_v51 = vadd.f32 %v449_v22, %v448_v30  ;;  %v451_v52 = vmul.f32 %v379_v28, %v2177_v58  ;;  %v480_v53 = vadd.f32 %v479_v14, %v478_v27 }
  0x45   : > { %1750 = vst [vmem:[%s2083_s28 + $0x3b8] sm:$0xff] %v411_v43  ;;  %v475_v55 = vmul.f32 %v411_v43, %v2174_v57  ;;  %v483_v32 = vmul.f32 %v411_v43, %v2177_v58  ;;  %v456_v60 = vadd.f32 %v455_v49, %v454_v48  ;;  %v457_v34 = vmul.f32 %v2319_v61, %v2163_v44 }
  0x46   : > { %v444_v36 = vadd.f32 %v443_v50, %v442_v24  ;;  %v452_v62 = vadd.f32 %v451_v52, %v450_v51  ;;  %v482_v63 = vadd.f32 %v481_v42, %v480_v53  ;;  %v459_v2 = vmul.f32 %v379_v28, %v2184_v0  ;;  %v1754_v53 = vld [vmem:[%s2078_s24 + $0x78] sm:$0xff] }
  0x47   : > { %v476_v33 = vadd.f32 %v475_v55, %v474_v46  ;;  %v458_v3 = vadd.f32 %v457_v34, %v456_v60  ;;  %v486_v39 = vmul.f32 %v2289_v31, %v2102_v8  ;;  %v487_v41 = vmul.f32 %v2313_v56, %v2138_v25 }
  0x48   : > { %v2381_v6 = vadd.f32 %v1751_v54, %v444_v36  ;;  %v2383_v10 = vadd.f32 %v1752_v59, %v452_v62  ;;  %v484_v11 = vadd.f32 %v483_v32, %v482_v63  ;;  %v489_v15 = vmul.f32 %v2340_v7, %v2163_v44 }
  0x49   : > { %v2388_v16 = vadd.f32 %v1755_v40, %v476_v33  ;;  %v460_v17 = vadd.f32 %v459_v2, %v458_v3  ;;  %v488_v19 = vadd.f32 %v487_v41, %v486_v39  ;;  %v491_v20 = vmul.f32 %v411_v43, %v2184_v0  ;;  %v1758_v40 = vld [vmem:[%s2078_s24 + $0x198] sm:$0xff] }
  0x4a   : > { %1759 = vst [vmem:[%s2083_s28 + $0x60] sm:$0xff] %v2381_v6  ;;  %v2393_v22 = vadd.f32 %v1756_v35, %v484_v11  ;;  %v462_v23 = vmul.f32 %v2285_v26, %v2112_v12  ;;  %v463_v24 = vmul.f32 %v2298_v47, %v2145_v29  ;;  %v465_v9 = vmul.f32 %v2319_v61, %v2165_v45  ;;  %v1757_v26 = vld [vmem:[%s2078_s24 + $0x190] sm:$0xff] }
  0x4b   : > { %1760 = vst [vmem:[%s2083_s28 + $0x380] sm:$0xff] %v2388_v16  ;;  %v2403_v27 = vadd.f32 %v1753_v13, %v460_v17  ;;  %v490_v30 = vadd.f32 %v489_v15, %v488_v19  ;;  %v467_v14 = vmul.f32 %v379_v28, %v2186_v1  ;;  %v494_v42 = vmul.f32 %v2289_v31, %v2112_v12 }
  0x4c   : > { %1761 = vst [vmem:[%s2083_s28 + $0x68] sm:$0xff] %v2383_v10  ;;  %v464_v46 = vadd.f32 %v463_v24, %v462_v23  ;;  %v495_v47 = vmul.f32 %v2313_v56, %v2145_v29  ;;  %v497_v61 = vmul.f32 %v2340_v7, %v2165_v45  ;;  %v499_v48 = vmul.f32 %v411_v43, %v2186_v1 }
  0x4d   : > { %1762 = vst [vmem:[%s2083_s28 + $0x388] sm:$0xff] %v2393_v22  ;;  %v492_v49 = vadd.f32 %v491_v20, %v490_v30  ;;  %v528_v28 = vmul.f32 %v2381_v6, %v2092_v4  ;;  %v529_v31 = vmul.f32 %v2383_v10, %v2125_v18  ;;  %v531_v50 = vmul.f32 %v2403_v27, %v2155_v37  ;;  %v1768_v30 = vld [vmem:[%s2078_s24 + $0x88] sm:$0xff] }
  0x4e   : > { %1763 = vst [vmem:[%s2083_s28 + $0x70] sm:$0xff] %v2403_v27  ;;  %v466_v56 = vadd.f32 %v465_v9, %v464_v46  ;;  %v496_v7 = vadd.f32 %v495_v47, %v494_v42  ;;  %v560_v43 = vmul.f32 %v2388_v16, %v2092_v4  ;;  %v561_v51 = vmul.f32 %v2393_v22, %v2125_v18  ;;  %v1767_v9 = vld [vmem:[%s2078_s24 + $0x80] sm:$0xff] }
  0x4f   : > { %v2430_v52 = vadd.f32 %v1757_v26, %v492_v49  ;;  %v530_v54 = vadd.f32 %v529_v31, %v528_v28  ;;  %v536_v55 = vmul.f32 %v2381_v6, %v2094_v5  ;;  %v537_v59 = vmul.f32 %v2383_v10, %v2133_v21  ;;  %v1771_v28 = vld [vmem:[%s2078_s24 + $0x160] sm:$0xff] }
  0x50   : > { %v468_v32 = vadd.f32 %v467_v14, %v466_v56  ;;  %v498_v60 = vadd.f32 %v497_v61, %v496_v7  ;;  %v562_v34 = vadd.f32 %v561_v51, %v560_v43  ;;  %v539_v36 = vmul.f32 %v2403_v27, %v2158_v38 }
  0x51   : > { %1764 = vst [vmem:[%s2083_s28 + $0x390] sm:$0xff] %v2430_v52  ;;  %v532_v62 = vadd.f32 %v531_v50, %v530_v54  ;;  %v563_v63 = vmul.f32 %v2430_v52, %v2155_v37  ;;  %v538_v2 = vadd.f32 %v537_v59, %v536_v55  ;;  %v568_v33 = vmul.f32 %v2388_v16, %v2094_v5  ;;  %v1772_v54 = vld [vmem:[%s2078_s24 + $0x168] sm:$0xff]  ;;  %v1769_v55 = vld [vmem:[%s2078_s24 + $0x90] sm:$0xff] }
  0x52   : > { %v469_v35 = vadd.f32 %v1754_v53, %v468_v32  ;;  %v500_v3 = vadd.f32 %v499_v48, %v498_v60  ;;  %v569_v39 = vmul.f32 %v2393_v22, %v2133_v21  ;;  %v571_v41 = vmul.f32 %v2430_v52, %v2158_v38 }
  0x53   : > { %v564_v11 = vadd.f32 %v563_v63, %v562_v34  ;;  %v540_v13 = vadd.f32 %v539_v36, %v538_v2  ;;  %v544_v15 = vmul.f32 %v2381_v6, %v2102_v8  ;;  %v545_v17 = vmul.f32 %v2383_v10, %v2138_v25 }
  0x54   : > { %1765 = vst [vmem:[%s2083_s28 + $0x78] sm:$0xff] %v469_v35  ;;  %v501_v19 = vadd.f32 %v1758_v40, %v500_v3  ;;  %v533_v20 = vmul.f32 %v469_v35, %v2174_v57  ;;  %v541_v23 = vmul.f32 %v469_v35, %v2177_v58  ;;  %v570_v24 = vadd.f32 %v569_v39, %v568_v33 }
  0x55   : > { %v546_v14 = vadd.f32 %v545_v17, %v544_v15  ;;  %v547_v42 = vmul.f32 %v2403_v27, %v2163_v44  ;;  %v549_v26 = vmul.f32 %v469_v35, %v2184_v0  ;;  %v576_v46 = vmul.f32 %v2388_v16, %v2102_v8 }
  0x56   : > { %1766 = vst [vmem:[%s2083_s28 + $0x398] sm:$0xff] %v501_v19  ;;  %v534_v47 = vadd.f32 %v533_v20, %v532_v62  ;;  %v565_v61 = vmul.f32 %v501_v19, %v2174_v57  ;;  %v542_v48 = vadd.f32 %v541_v23, %v540_v13  ;;  %v572_v49 = vadd.f32 %v571_v41, %v570_v24  ;;  %v1773_v41 = vld [vmem:[%s2078_s24 + $0x170] sm:$0xff]  ;;  %v1770_v24 = vld [vmem:[%s2078_s24 + $0x98] sm:$0xff] }
  0x57   : > { %v573_v31 = vmul.f32 %v501_v19, %v2177_v58  ;;  %v548_v50 = vadd.f32 %v547_v42, %v546_v14  ;;  %v577_v56 = vmul.f32 %v2393_v22, %v2138_v25  ;;  %v579_v7 = vmul.f32 %v2430_v52, %v2163_v44 }
  0x58   : > { %v2472_v43 = vadd.f32 %v1767_v9, %v534_v47  ;;  %v566_v51 = vadd.f32 %v565_v61, %v564_v11  ;;  %v2474_v53 = vadd.f32 %v1768_v30, %v542_v48  ;;  %v581_v59 = vmul.f32 %v501_v19, %v2184_v0  ;;  %v1774_v61 = vld [vmem:[%s2078_s24 + $0x178] sm:$0xff] }
  0x59   : > { %v574_v32 = vadd.f32 %v573_v31, %v572_v49  ;;  %v550_v60 = vadd.f32 %v549_v26, %v548_v50  ;;  %v578_v34 = vadd.f32 %v577_v56, %v576_v46  ;;  %v552_v36 = vmul.f32 %v2381_v6, %v2112_v12 }
  0x5a   : > { %1775 = vst [vmem:[%s2083_s28 + $0x80] sm:$0xff] %v2472_v43  ;;  %v2483_v40 = vadd.f32 %v1771_v28, %v566_v51  ;;  %v553_v62 = vmul.f32 %v2383_v10, %v2145_v29  ;;  %v555_v63 = vmul.f32 %v2403_v27, %v2165_v45  ;;  %v557_v2 = vmul.f32 %v469_v35, %v2186_v1 }
  0x5b   : > { %1777 = vst [vmem:[%s2083_s28 + $0x88] sm:$0xff] %v2474_v53  ;;  %v2492_v33 = vadd.f32 %v1772_v54, %v574_v32  ;;  %v2494_v3 = vadd.f32 %v1769_v55, %v550_v60  ;;  %v580_v6 = vadd.f32 %v579_v7, %v578_v34  ;;  %v584_v39 = vmul.f32 %v2388_v16, %v2112_v12 }
  0x5c   : > { %1776 = vst [vmem:[%s2083_s28 + $0x360] sm:$0xff] %v2483_v40  ;;  %v554_v10 = vadd.f32 %v553_v62, %v552_v36  ;;  %v585_v27 = vmul.f32 %v2393_v22, %v2145_v29  ;;  %v587_v35 = vmul.f32 %v2430_v52, %v2165_v45  ;;  %v589_v11 = vmul.f32 %v501_v19, %v2186_v1 }
  0x5d   : > { %1778 = vst [vmem:[%s2083_s28 + $0x368] sm:$0xff] %v2492_v33  ;;  %v582_v13 = vadd.f32 %v581_v59, %v580_v6  ;;  %v618_v15 = vmul.f32 %v2472_v43, %v2092_v4  ;;  %v619_v16 = vmul.f32 %v2474_v53, %v2125_v18  ;;  %v621_v17 = vmul.f32 %v2494_v3, %v2155_v37 }
  0x5e   : > { %1779 = vst [vmem:[%s2083_s28 + $0x90] sm:$0xff] %v2494_v3  ;;  %v556_v22 = vadd.f32 %v555_v63, %v554_v10  ;;  %v586_v52 = vadd.f32 %v585_v27, %v584_v39  ;;  %v650_v19 = vmul.f32 %v2483_v40, %v2092_v4  ;;  %v651_v20 = vmul.f32 %v2492_v33, %v2125_v18  ;;  %v2548_v63 = vld [vmem:[%s2078_s24 + $0xa0] sm:$0xff] }
  0x5f   : > { %v2520_v23 = vadd.f32 %v1773_v41, %v582_v13  ;;  %v620_v9 = vadd.f32 %v619_v16, %v618_v15  ;;  %v626_v30 = vmul.f32 %v2472_v43, %v2094_v5  ;;  %v627_v14 = vmul.f32 %v2474_v53, %v2133_v21  ;;  %v2561_v15 = vld [vmem:[%s2078_s24 + $0x140] sm:$0xff] }
  0x60   : > { %v558_v42 = vadd.f32 %v557_v2, %v556_v22  ;;  %v588_v26 = vadd.f32 %v587_v35, %v586_v52  ;;  %v652_v46 = vadd.f32 %v651_v20, %v650_v19  ;;  %v629_v47 = vmul.f32 %v2494_v3, %v2158_v38  ;;  %v2551_v2 = vld [vmem:[%s2078_s24 + $0xa8] sm:$0xff] }
  0x61   : > { %1780 = vst [vmem:[%s2083_s28 + $0x370] sm:$0xff] %v2520_v23  ;;  %v622_v48 = vadd.f32 %v621_v17, %v620_v9  ;;  %v653_v49 = vmul.f32 %v2520_v23, %v2155_v37  ;;  %v628_v28 = vadd.f32 %v627_v14, %v626_v30  ;;  %v658_v31 = vmul.f32 %v2483_v40, %v2094_v5  ;;  %v2575_v9 = vld [vmem:[%s2078_s24 + $0x148] sm:$0xff]  ;;  %v2578_v30 = vld [vmem:[%s2078_s24 + $0xb0] sm:$0xff] }
  0x62   : > { %v559_v50 = vadd.f32 %v1770_v24, %v558_v42  ;;  %v590_v56 = vadd.f32 %v589_v11, %v588_v26  ;;  %v659_v7 = vmul.f32 %v2492_v33, %v2133_v21  ;;  %v661_v51 = vmul.f32 %v2520_v23, %v2158_v38  ;;  %3558 = vst [vmem:[#allocation5_spill] sm:$0xff] %v2551_v2 }
  0x63   : > { %v654_v54 = vadd.f32 %v653_v49, %v652_v46  ;;  %v630_v55 = vadd.f32 %v629_v47, %v628_v28  ;;  %v634_v59 = vmul.f32 %v2472_v43, %v2102_v8  ;;  %v635_v32 = vmul.f32 %v2474_v53, %v2138_v25  ;;  %3559 = vst [vmem:[#allocation6_spill] sm:$0xff] %v2578_v30 }
  0x64   : > { %1781 = vst [vmem:[%s2083_s28 + $0x98] sm:$0xff] %v559_v50  ;;  %v591_v60 = vadd.f32 %v1774_v61, %v590_v56  ;;  %v623_v34 = vmul.f32 %v559_v50, %v2174_v57  ;;  %v631_v36 = vmul.f32 %v559_v50, %v2177_v58  ;;  %v660_v62 = vadd.f32 %v659_v7, %v658_v31 }
  0x65   : > { %v636_v6 = vadd.f32 %v635_v32, %v634_v59  ;;  %v637_v39 = vmul.f32 %v2494_v3, %v2163_v44  ;;  %v639_v41 = vmul.f32 %v559_v50, %v2184_v0  ;;  %v666_v10 = vmul.f32 %v2483_v40, %v2102_v8 }
  0x66   : > { %1782 = vst [vmem:[%s2083_s28 + $0x378] sm:$0xff] %v591_v60  ;;  %v624_v27 = vadd.f32 %v623_v34, %v622_v48  ;;  %v655_v35 = vmul.f32 %v591_v60, %v2174_v57  ;;  %v632_v11 = vadd.f32 %v631_v36, %v630_v55  ;;  %v662_v13 = vadd.f32 %v661_v51, %v660_v62  ;;  %v2631_v62 = vld [vmem:[%s2078_s24 + $0xb8] sm:$0xff] }
  0x67   : > { %v663_v16 = vmul.f32 %v591_v60, %v2177_v58  ;;  %v638_v17 = vadd.f32 %v637_v39, %v636_v6  ;;  %v667_v22 = vmul.f32 %v2492_v33, %v2138_v25  ;;  %v669_v52 = vmul.f32 %v2520_v23, %v2163_v44  ;;  %3561 = vst [vmem:[#allocation8_spill] sm:$0xff] %v2631_v62 }
  0x68   : > { %v2569_v19 = vadd.f32 %v2548_v63, %v624_v27  ;;  %v656_v20 = vadd.f32 %v655_v35, %v654_v54  ;;  %v2572_v24 = vadd.f32 %v2551_v2, %v632_v11  ;;  %v671_v14 = vmul.f32 %v591_v60, %v2184_v0 }
  0x69   : > { %v664_v42 = vadd.f32 %v663_v16, %v662_v13  ;;  %v640_v26 = vadd.f32 %v639_v41, %v638_v17  ;;  %v668_v46 = vadd.f32 %v667_v22, %v666_v10  ;;  %v642_v47 = vmul.f32 %v2472_v43, %v2112_v12  ;;  %v2642_v13 = vld [vmem:[%s2078_s24 + $0x158] sm:$0xff] }
  0x6a   : > { %1791 = vst [vmem:[%s2083_s28 + $0xa0] sm:$0xff] %v2569_v19  ;;  %v2586_v61 = vadd.f32 %v2561_v15, %v656_v20  ;;  %v643_v48 = vmul.f32 %v2474_v53, %v2145_v29  ;;  %v645_v49 = vmul.f32 %v2494_v3, %v2165_v45  ;;  %v647_v28 = vmul.f32 %v559_v50, %v2186_v1  ;;  %v2606_v53 = vld [vmem:[%s2078_s24 + $0x150] sm:$0xff] }
  0x6b   : > { %1793 = vst [vmem:[%s2083_s28 + $0xa8] sm:$0xff] %v2572_v24  ;;  %v2596_v31 = vadd.f32 %v2575_v9, %v664_v42  ;;  %v2599_v43 = vadd.f32 %v2578_v30, %v640_v26  ;;  %v670_v56 = vadd.f32 %v669_v52, %v668_v46  ;;  %v674_v7 = vmul.f32 %v2483_v40, %v2112_v12 }
  0x6c   : > { %1792 = vst [vmem:[%s2083_s28 + $0x340] sm:$0xff] %v2586_v61  ;;  %v644_v3 = vadd.f32 %v643_v48, %v642_v47  ;;  %v675_v50 = vmul.f32 %v2492_v33, %v2145_v29  ;;  %v677_v51 = vmul.f32 %v2520_v23, %v2165_v45  ;;  %v679_v54 = vmul.f32 %v591_v60, %v2186_v1 }
  0x6d   : > { %3560 = vst [vmem:[#allocation7_spill] sm:$0xff] %v2606_v53  ;;  %v672_v55 = vadd.f32 %v671_v14, %v670_v56  ;;  %v708_v40 = vmul.f32 %v2569_v19, %v2092_v4  ;;  %v709_v59 = vmul.f32 %v2572_v24, %v2125_v18  ;;  %v711_v32 = vmul.f32 %v2599_v43, %v2155_v37 }
  0x6e   : > { %1794 = vst [vmem:[%s2083_s28 + $0x348] sm:$0xff] %v2596_v31  ;;  %v646_v33 = vadd.f32 %v645_v49, %v644_v3  ;;  %v676_v23 = vadd.f32 %v675_v50, %v674_v7  ;;  %v740_v60 = vmul.f32 %v2586_v61, %v2092_v4  ;;  %v741_v34 = vmul.f32 %v2596_v31, %v2125_v18  ;;  %v2662_v50 = vld [vmem:[%s2078_s24 + $0xc0] sm:$0xff] }
  0x6f   : > { %1795 = vst [vmem:[%s2083_s28 + $0xb0] sm:$0xff] %v2599_v43  ;;  %v2628_v36 = vadd.f32 %v2606_v53, %v672_v55  ;;  %v710_v6 = vadd.f32 %v709_v59, %v708_v40  ;;  %v716_v39 = vmul.f32 %v2569_v19, %v2094_v5  ;;  %v717_v41 = vmul.f32 %v2572_v24, %v2133_v21 }
  0x70   : > { %v648_v10 = vadd.f32 %v647_v28, %v646_v33  ;;  %v678_v27 = vadd.f32 %v677_v51, %v676_v23  ;;  %v742_v35 = vadd.f32 %v741_v34, %v740_v60  ;;  %v719_v11 = vmul.f32 %v2599_v43, %v2158_v38  ;;  %3562 = vst [vmem:[#allocation9_spill] sm:$0xff] %v2642_v13  ;;  %v2665_v51 = vld [vmem:[%s2078_s24 + $0xc8] sm:$0xff]  ;;  %v2675_v34 = vld [vmem:[%s2078_s24 + $0x120] sm:$0xff] }
  0x71   : > { %1796 = vst [vmem:[%s2083_s28 + $0x350] sm:$0xff] %v2628_v36  ;;  %v712_v16 = vadd.f32 %v711_v32, %v710_v6  ;;  %v743_v17 = vmul.f32 %v2628_v36, %v2155_v37  ;;  %v718_v22 = vadd.f32 %v717_v41, %v716_v39  ;;  %v748_v52 = vmul.f32 %v2586_v61, %v2094_v5 }
  0x72   : > { %v649_v20 = vadd.f32 %v2631_v62, %v648_v10  ;;  %v680_v14 = vadd.f32 %v679_v54, %v678_v27  ;;  %v749_v42 = vmul.f32 %v2596_v31, %v2133_v21  ;;  %v751_v26 = vmul.f32 %v2628_v36, %v2158_v38 }
  0x73   : > { %v744_v46 = vadd.f32 %v743_v17, %v742_v35  ;;  %v720_v47 = vadd.f32 %v719_v11, %v718_v22  ;;  %v724_v48 = vmul.f32 %v2569_v19, %v2102_v8  ;;  %v725_v49 = vmul.f32 %v2572_v24, %v2138_v25  ;;  %v2692_v17 = vld [vmem:[%s2078_s24 + $0xd0] sm:$0xff] }
  0x74   : > { %1797 = vst [vmem:[%s2083_s28 + $0xb8] sm:$0xff] %v649_v20  ;;  %v681_v28 = vadd.f32 %v2642_v13, %v680_v14  ;;  %v713_v56 = vmul.f32 %v649_v20, %v2174_v57  ;;  %v721_v7 = vmul.f32 %v649_v20, %v2177_v58  ;;  %v750_v3 = vadd.f32 %v749_v42, %v748_v52 }
  0x75   : > { %v726_v54 = vadd.f32 %v725_v49, %v724_v48  ;;  %v727_v55 = vmul.f32 %v2599_v43, %v2163_v44  ;;  %v729_v40 = vmul.f32 %v649_v20, %v2184_v0  ;;  %v756_v59 = vmul.f32 %v2586_v61, %v2102_v8 }
  0x76   : > { %1798 = vst [vmem:[%s2083_s28 + $0x358] sm:$0xff] %v681_v28  ;;  %v714_v32 = vadd.f32 %v713_v56, %v712_v16  ;;  %v745_v33 = vmul.f32 %v681_v28, %v2174_v57  ;;  %v722_v23 = vadd.f32 %v721_v7, %v720_v47  ;;  %v752_v60 = vadd.f32 %v751_v26, %v750_v3  ;;  %v2689_v16 = vld [vmem:[%s2078_s24 + $0x128] sm:$0xff] }
  0x77   : > { %v753_v6 = vmul.f32 %v681_v28, %v2177_v58  ;;  %v728_v39 = vadd.f32 %v727_v55, %v726_v54  ;;  %v757_v41 = vmul.f32 %v2596_v31, %v2138_v25  ;;  %v759_v10 = vmul.f32 %v2628_v36, %v2163_v44 }
  0x78   : > { %v2683_v27 = vadd.f32 %v2662_v50, %v714_v32  ;;  %v746_v35 = vadd.f32 %v745_v33, %v744_v46  ;;  %v2686_v11 = vadd.f32 %v2665_v51, %v722_v23  ;;  %v761_v22 = vmul.f32 %v681_v28, %v2184_v0 }
  0x79   : > { %v754_v52 = vadd.f32 %v753_v6, %v752_v60  ;;  %v730_v14 = vadd.f32 %v729_v40, %v728_v39  ;;  %v758_v42 = vadd.f32 %v757_v41, %v756_v59  ;;  %v732_v26 = vmul.f32 %v2569_v19, %v2112_v12  ;;  %v2745_v60 = vld [vmem:[%s2078_s24 + $0xd8] sm:$0xff] }
  0x7a   : > { %1807 = vst [vmem:[%s2083_s28 + $0xc0] sm:$0xff] %v2683_v27  ;;  %v2700_v46 = vadd.f32 %v2675_v34, %v746_v35  ;;  %v733_v47 = vmul.f32 %v2572_v24, %v2145_v29  ;;  %v735_v48 = vmul.f32 %v2599_v43, %v2165_v45  ;;  %v737_v49 = vmul.f32 %v649_v20, %v2186_v1  ;;  %v2720_v24 = vld [vmem:[%s2078_s24 + $0x130] sm:$0xff] }
  0x7b   : > { %1809 = vst [vmem:[%s2083_s28 + $0xc8] sm:$0xff] %v2686_v11  ;;  %v2710_v56 = vadd.f32 %v2689_v16, %v754_v52  ;;  %v2713_v19 = vadd.f32 %v2692_v17, %v730_v14  ;;  %v760_v7 = vadd.f32 %v759_v10, %v758_v42  ;;  %v764_v3 = vmul.f32 %v2586_v61, %v2112_v12  ;;  %v2756_v14 = vld [vmem:[%s2078_s24 + $0x138] sm:$0xff] }
  0x7c   : > { %1808 = vst [vmem:[%s2083_s28 + $0x320] sm:$0xff] %v2700_v46  ;;  %v734_v43 = vadd.f32 %v733_v47, %v732_v26  ;;  %v765_v20 = vmul.f32 %v2596_v31, %v2145_v29  ;;  %v767_v54 = vmul.f32 %v2628_v36, %v2165_v45  ;;  %v769_v55 = vmul.f32 %v681_v28, %v2186_v1 }
  0x7d   : > { %1810 = vst [vmem:[%s2083_s28 + $0x328] sm:$0xff] %v2710_v56  ;;  %v762_v40 = vadd.f32 %v761_v22, %v760_v7  ;;  %v798_v61 = vmul.f32 %v2683_v27, %v2092_v4  ;;  %v799_v59 = vmul.f32 %v2686_v11, %v2125_v18  ;;  %v801_v32 = vmul.f32 %v2713_v19, %v2155_v37 }
  0x7e   : > { %1811 = vst [vmem:[%s2083_s28 + $0xd0] sm:$0xff] %v2713_v19  ;;  %v736_v31 = vadd.f32 %v735_v48, %v734_v43  ;;  %v766_v36 = vadd.f32 %v765_v20, %v764_v3  ;;  %v830_v28 = vmul.f32 %v2700_v46, %v2092_v4  ;;  %v831_v33 = vmul.f32 %v2710_v56, %v2125_v18 }
  0x7f   : > { %v2742_v23 = vadd.f32 %v2720_v24, %v762_v40  ;;  %v800_v6 = vadd.f32 %v799_v59, %v798_v61  ;;  %v806_v39 = vmul.f32 %v2683_v27, %v2094_v5  ;;  %v807_v41 = vmul.f32 %v2686_v11, %v2133_v21 }
  0x80   : > { %v738_v10 = vadd.f32 %v737_v49, %v736_v31  ;;  %v768_v35 = vadd.f32 %v767_v54, %v766_v36  ;;  %v832_v22 = vadd.f32 %v831_v33, %v830_v28  ;;  %v809_v52 = vmul.f32 %v2713_v19, %v2158_v38  ;;  %v2776_v36 = vld [vmem:[%s2078_s24 + $0xe0] sm:$0xff]  ;;  %v2779_v28 = vld [vmem:[%s2078_s24 + $0xe8] sm:$0xff] }
  0x81   : > { %1812 = vst [vmem:[%s2083_s28 + $0x330] sm:$0xff] %v2742_v23  ;;  %v802_v42 = vadd.f32 %v801_v32, %v800_v6  ;;  %v833_v26 = vmul.f32 %v2742_v23, %v2155_v37  ;;  %v808_v47 = vadd.f32 %v807_v41, %v806_v39  ;;  %v838_v48 = vmul.f32 %v2700_v46, %v2094_v5 }
  0x82   : > { %v739_v49 = vadd.f32 %v2745_v60, %v738_v10  ;;  %v770_v7 = vadd.f32 %v769_v55, %v768_v35  ;;  %v839_v3 = vmul.f32 %v2710_v56, %v2133_v21  ;;  %v841_v43 = vmul.f32 %v2742_v23, %v2158_v38 }
  0x83   : > { %v834_v20 = vadd.f32 %v833_v26, %v832_v22  ;;  %v810_v54 = vadd.f32 %v809_v52, %v808_v47  ;;  %v814_v40 = vmul.f32 %v2683_v27, %v2102_v8  ;;  %v815_v61 = vmul.f32 %v2686_v11, %v2138_v25  ;;  %v2789_v26 = vld [vmem:[%s2078_s24 + $0x100] sm:$0xff] }
  0x84   : > { %1813 = vst [vmem:[%s2083_s28 + $0xd8] sm:$0xff] %v739_v49  ;;  %v771_v59 = vadd.f32 %v2756_v14, %v770_v7  ;;  %v803_v55 = vmul.f32 %v739_v49, %v2174_v57  ;;  %v811_v32 = vmul.f32 %v739_v49, %v2177_v58  ;;  %v840_v31 = vadd.f32 %v839_v3, %v838_v48 }
  0x85   : > { %v816_v33 = vadd.f32 %v815_v61, %v814_v40  ;;  %v817_v6 = vmul.f32 %v2713_v19, %v2163_v44  ;;  %v819_v39 = vmul.f32 %v739_v49, %v2184_v0  ;;  %v846_v41 = vmul.f32 %v2700_v46, %v2102_v8  ;;  %v2806_v61 = vld [vmem:[%s2078_s24 + $0xf0] sm:$0xff] }
  0x86   : > { %1814 = vst [vmem:[%s2083_s28 + $0x338] sm:$0xff] %v771_v59  ;;  %v804_v10 = vadd.f32 %v803_v55, %v802_v42  ;;  %v835_v35 = vmul.f32 %v771_v59, %v2174_v57  ;;  %v812_v22 = vadd.f32 %v811_v32, %v810_v54  ;;  %v842_v52 = vadd.f32 %v841_v43, %v840_v31  ;;  %v2803_v43 = vld [vmem:[%s2078_s24 + $0x108] sm:$0xff] }
  0x87   : > { %v843_v47 = vmul.f32 %v771_v59, %v2177_v58  ;;  %v818_v48 = vadd.f32 %v817_v6, %v816_v33  ;;  %v847_v7 = vmul.f32 %v2710_v56, %v2138_v25  ;;  %v849_v3 = vmul.f32 %v2742_v23, %v2163_v44 }
  0x88   : > { %v2797_v40 = vadd.f32 %v2776_v36, %v804_v10  ;;  %v836_v42 = vadd.f32 %v835_v35, %v834_v20  ;;  %v2800_v54 = vadd.f32 %v2779_v28, %v812_v22  ;;  %v851_v55 = vmul.f32 %v771_v59, %v2184_v0 }
  0x89   : > { %v844_v32 = vadd.f32 %v843_v47, %v842_v52  ;;  %v820_v31 = vadd.f32 %v819_v39, %v818_v48  ;;  %v848_v33 = vadd.f32 %v847_v7, %v846_v41  ;;  %v822_v6 = vmul.f32 %v2683_v27, %v2112_v12 }
  0x8a   : > { %1823 = vst [vmem:[%s2083_s28 + $0xe0] sm:$0xff] %v2797_v40  ;;  %v2814_v20 = vadd.f32 %v2789_v26, %v836_v42  ;;  %v823_v10 = vmul.f32 %v2686_v11, %v2145_v29  ;;  %v825_v35 = vmul.f32 %v2713_v19, %v2165_v45  ;;  %v827_v22 = vmul.f32 %v739_v49, %v2186_v1  ;;  %v2834_v11 = vld [vmem:[%s2078_s24 + $0x110] sm:$0xff] }
  0x8b   : > { %1825 = vst [vmem:[%s2083_s28 + $0xe8] sm:$0xff] %v2800_v54  ;;  %v2824_v39 = vadd.f32 %v2803_v43, %v844_v32  ;;  %v2827_v27 = vadd.f32 %v2806_v61, %v820_v31  ;;  %v850_v41 = vadd.f32 %v849_v3, %v848_v33  ;;  %v854_v52 = vmul.f32 %v2700_v46, %v2112_v12  ;;  %v2857_v31 = vld [vmem:[%s2078_s24 + $0xf8] sm:$0xff] }
  0x8c   : > { %1824 = vst [vmem:[%s2083_s28 + $0x300] sm:$0xff] %v2814_v20  ;;  %v824_v19 = vadd.f32 %v823_v10, %v822_v6  ;;  %v855_v49 = vmul.f32 %v2710_v56, %v2145_v29  ;;  %v857_v47 = vmul.f32 %v2742_v23, %v2165_v45  ;;  %v859_v48 = vmul.f32 %v771_v59, %v2186_v1 }
  0x8d   : > { %1826 = vst [vmem:[%s2083_s28 + $0x308] sm:$0xff] %v2824_v39  ;;  %v852_v7 = vadd.f32 %v851_v55, %v850_v41  ;;  %v886_v46 = vmul.f32 %v2797_v40, %v2092_v4  ;;  %v887_v3 = vmul.f32 %v2800_v54, %v2125_v18  ;;  %v889_v42 = vmul.f32 %v2827_v27, %v2155_v37 }
  0x8e   : > { %1827 = vst [vmem:[%s2083_s28 + $0xf0] sm:$0xff] %v2827_v27  ;;  %v826_v56 = vadd.f32 %v825_v35, %v824_v19  ;;  %v856_v23 = vadd.f32 %v855_v49, %v854_v52  ;;  %v918_v59 = vmul.f32 %v2814_v20, %v2092_v4  ;;  %v919_v55 = vmul.f32 %v2824_v39, %v2125_v18  ;;  %v2867_v49 = vld [vmem:[%s2078_s24 + $0x118] sm:$0xff] }
  0x8f   : > { %v853_v32 = vadd.f32 %v2834_v11, %v852_v7  ;;  %v888_v33 = vadd.f32 %v887_v3, %v886_v46  ;;  %v894_v6 = vmul.f32 %v2797_v40, %v2094_v5  ;;  %v895_v10 = vmul.f32 %v2800_v54, %v2133_v21 }
  0x90   : > { %v828_v41 = vadd.f32 %v827_v22, %v826_v56  ;;  %v858_v35 = vadd.f32 %v857_v47, %v856_v23  ;;  %v920_v52 = vadd.f32 %v919_v55, %v918_v59  ;;  %v897_v19 = vmul.f32 %v2827_v27, %v2158_v38 }
  0x91   : > { %1828 = vst [vmem:[%s2083_s28 + $0x310] sm:$0xff] %v853_v32  ;;  %v890_v7 = vadd.f32 %v889_v42, %v888_v33  ;;  %v921_v62 = vmul.f32 %v853_v32, %v2155_v37  ;;  %v896_v46 = vadd.f32 %v895_v10, %v894_v6  ;;  %v926_v3 = vmul.f32 %v2814_v20, %v2094_v5 }
  0x92   : > { %v829_v13 = vadd.f32 %v2857_v31, %v828_v41  ;;  %v860_v30 = vadd.f32 %v859_v48, %v858_v35  ;;  %v927_v22 = vmul.f32 %v2824_v39, %v2133_v21  ;;  %v929_v47 = vmul.f32 %v853_v32, %v2158_v38 }
  0x93   : > { %v922_v56 = vadd.f32 %v921_v62, %v920_v52  ;;  %v898_v23 = vadd.f32 %v897_v19, %v896_v46  ;;  %v902_v42 = vmul.f32 %v2797_v40, %v2102_v8  ;;  %v903_v59 = vmul.f32 %v2800_v54, %v2138_v25 }
  0x94   : > { %1829 = vst [vmem:[%s2083_s28 + $0xf8] sm:$0xff] %v829_v13  ;;  %v861_v55 = vadd.f32 %v2867_v49, %v860_v30  ;;  %v891_v33 = vmul.f32 %v829_v13, %v2174_v57  ;;  %v899_v48 = vmul.f32 %v829_v13, %v2177_v58  ;;  %v928_v6 = vadd.f32 %v927_v22, %v926_v3 }
  0x95   : > { %v904_v10 = vadd.f32 %v903_v59, %v902_v42  ;;  %v905_v41 = vmul.f32 %v2827_v27, %v2163_v44  ;;  %v907_v62 = vmul.f32 %v829_v13, %v2184_v0  ;;  %v934_v35 = vmul.f32 %v2814_v20, %v2102_v8 }
  0x96   : > { %1830 = vst [vmem:[%s2083_s28 + $0x318] sm:$0xff] %v861_v55  ;;  %v892_v52 = vadd.f32 %v891_v33, %v890_v7  ;;  %v923_v19 = vmul.f32 %v861_v55, %v2174_v57  ;;  %v900_v30 = vadd.f32 %v899_v48, %v898_v23  ;;  %v930_v46 = vadd.f32 %v929_v47, %v928_v6 }
  0x97   : > { %v931_v53 = vmul.f32 %v861_v55, %v2177_v58  ;;  %v906_v2 = vadd.f32 %v905_v41, %v904_v10  ;;  %v935_v3 = vmul.f32 %v2824_v39, %v2138_v25  ;;  %v937_v22 = vmul.f32 %v853_v32, %v2163_v44 }
  0x98   : > { %v2896_v42 = vadd.f32 %v2789_v26, %v892_v52  ;;  %v924_v59 = vadd.f32 %v923_v19, %v922_v56  ;;  %v2899_v7 = vadd.f32 %v2803_v43, %v900_v30  ;;  %v939_v23 = vmul.f32 %v861_v55, %v2184_v0 }
  0x99   : > { %v932_v47 = vadd.f32 %v931_v53, %v930_v46  ;;  %v908_v33 = vadd.f32 %v907_v62, %v906_v2  ;;  %v936_v48 = vadd.f32 %v935_v3, %v934_v35  ;;  %v910_v6 = vmul.f32 %v2797_v40, %v2112_v12 }
  0x9a   : > { %1839 = vst [vmem:[%s2083_s28 + $0x100] sm:$0xff] %v2896_v42  ;;  %v2907_v10 = vadd.f32 %v2776_v36, %v924_v59  ;;  %v911_v26 = vmul.f32 %v2800_v54, %v2145_v29  ;;  %v913_v43 = vmul.f32 %v2827_v27, %v2165_v45  ;;  %v915_v56 = vmul.f32 %v829_v13, %v2186_v1 }
  0x9b   : > { %1841 = vst [vmem:[%s2083_s28 + $0x108] sm:$0xff] %v2899_v7  ;;  %v2917_v2 = vadd.f32 %v2779_v28, %v932_v47  ;;  %v2920_v53 = vadd.f32 %v2834_v11, %v908_v33  ;;  %v938_v40 = vadd.f32 %v937_v22, %v936_v48  ;;  %v942_v36 = vmul.f32 %v2814_v20, %v2112_v12 }
  0x9c   : > { %1840 = vst [vmem:[%s2083_s28 + $0x2e0] sm:$0xff] %v2907_v10  ;;  %v912_v54 = vadd.f32 %v911_v26, %v910_v6  ;;  %v943_v27 = vmul.f32 %v2824_v39, %v2145_v29  ;;  %v945_v13 = vmul.f32 %v853_v32, %v2165_v45  ;;  %v947_v41 = vmul.f32 %v861_v55, %v2186_v1 }
  0x9d   : > { %1842 = vst [vmem:[%s2083_s28 + $0x2e8] sm:$0xff] %v2917_v2  ;;  %v940_v28 = vadd.f32 %v939_v23, %v938_v40  ;;  %v974_v11 = vmul.f32 %v2896_v42, %v2092_v4  ;;  %v975_v20 = vmul.f32 %v2899_v7, %v2125_v18  ;;  %v977_v62 = vmul.f32 %v2920_v53, %v2155_v37 }
  0x9e   : > { %1843 = vst [vmem:[%s2083_s28 + $0x110] sm:$0xff] %v2920_v53  ;;  %v914_v39 = vadd.f32 %v913_v43, %v912_v54  ;;  %v944_v35 = vadd.f32 %v943_v27, %v942_v36  ;;  %v1006_v32 = vmul.f32 %v2907_v10, %v2092_v4  ;;  %v1007_v55 = vmul.f32 %v2917_v2, %v2125_v18 }
  0x9f   : > { %v941_v52 = vadd.f32 %v2806_v61, %v940_v28  ;;  %v976_v19 = vadd.f32 %v975_v20, %v974_v11  ;;  %v982_v30 = vmul.f32 %v2896_v42, %v2094_v5  ;;  %v983_v46 = vmul.f32 %v2899_v7, %v2133_v21 }
  0xa0   : > { %v916_v3 = vadd.f32 %v915_v56, %v914_v39  ;;  %v946_v22 = vadd.f32 %v945_v13, %v944_v35  ;;  %v1008_v59 = vadd.f32 %v1007_v55, %v1006_v32  ;;  %v985_v23 = vmul.f32 %v2920_v53, %v2158_v38 }
  0xa1   : > { %1844 = vst [vmem:[%s2083_s28 + $0x2f0] sm:$0xff] %v941_v52  ;;  %v978_v47 = vadd.f32 %v977_v62, %v976_v19  ;;  %v1009_v33 = vmul.f32 %v941_v52, %v2155_v37  ;;  %v984_v48 = vadd.f32 %v983_v46, %v982_v30  ;;  %v1014_v61 = vmul.f32 %v2907_v10, %v2094_v5 }
  0xa2   : > { %v917_v6 = vadd.f32 %v2867_v49, %v916_v3  ;;  %v948_v26 = vadd.f32 %v947_v41, %v946_v22  ;;  %v1015_v43 = vmul.f32 %v2917_v2, %v2133_v21  ;;  %v1017_v56 = vmul.f32 %v941_v52, %v2158_v38 }
  0xa3   : > { %v1010_v40 = vadd.f32 %v1009_v33, %v1008_v59  ;;  %v986_v36 = vadd.f32 %v985_v23, %v984_v48  ;;  %v990_v54 = vmul.f32 %v2896_v42, %v2102_v8  ;;  %v991_v27 = vmul.f32 %v2899_v7, %v2138_v25 }
  0xa4   : > { %1845 = vst [vmem:[%s2083_s28 + $0x118] sm:$0xff] %v917_v6  ;;  %v949_v13 = vadd.f32 %v2857_v31, %v948_v26  ;;  %v979_v49 = vmul.f32 %v917_v6, %v2174_v57  ;;  %v987_v41 = vmul.f32 %v917_v6, %v2177_v58  ;;  %v1016_v28 = vadd.f32 %v1015_v43, %v1014_v61 }
  0xa5   : > { %v992_v11 = vadd.f32 %v991_v27, %v990_v54  ;;  %v993_v20 = vmul.f32 %v2920_v53, %v2163_v44  ;;  %v995_v62 = vmul.f32 %v917_v6, %v2184_v0  ;;  %v1022_v39 = vmul.f32 %v2907_v10, %v2102_v8 }
  0xa6   : > { %1846 = vst [vmem:[%s2083_s28 + $0x2f8] sm:$0xff] %v949_v13  ;;  %v980_v35 = vadd.f32 %v979_v49, %v978_v47  ;;  %v1011_v32 = vmul.f32 %v949_v13, %v2174_v57  ;;  %v988_v31 = vadd.f32 %v987_v41, %v986_v36  ;;  %v1018_v55 = vadd.f32 %v1017_v56, %v1016_v28 }
  0xa7   : > { %v1019_v19 = vmul.f32 %v949_v13, %v2177_v58  ;;  %v994_v30 = vadd.f32 %v993_v20, %v992_v11  ;;  %v1023_v46 = vmul.f32 %v2917_v2, %v2138_v25  ;;  %v1025_v3 = vmul.f32 %v941_v52, %v2163_v44 }
  0xa8   : > { %v2979_v22 = vadd.f32 %v2675_v34, %v980_v35  ;;  %v1012_v59 = vadd.f32 %v1011_v32, %v1010_v40  ;;  %v2982_v23 = vadd.f32 %v2689_v16, %v988_v31  ;;  %v1027_v47 = vmul.f32 %v949_v13, %v2184_v0 }
  0xa9   : > { %v1020_v33 = vadd.f32 %v1019_v19, %v1018_v55  ;;  %v996_v48 = vadd.f32 %v995_v62, %v994_v30  ;;  %v1024_v61 = vadd.f32 %v1023_v46, %v1022_v39  ;;  %v998_v26 = vmul.f32 %v2896_v42, %v2112_v12 }
  0xaa   : > { %1855 = vst [vmem:[%s2083_s28 + $0x120] sm:$0xff] %v2979_v22  ;;  %v2990_v43 = vadd.f32 %v2662_v50, %v1012_v59  ;;  %v999_v34 = vmul.f32 %v2899_v7, %v2145_v29  ;;  %v1001_v16 = vmul.f32 %v2920_v53, %v2165_v45  ;;  %v1003_v56 = vmul.f32 %v917_v6, %v2186_v1 }
  0xab   : > { %1857 = vst [vmem:[%s2083_s28 + $0x128] sm:$0xff] %v2982_v23  ;;  %v3000_v40 = vadd.f32 %v2665_v51, %v1020_v33  ;;  %v3003_v42 = vadd.f32 %v2720_v24, %v996_v48  ;;  %v1026_v36 = vadd.f32 %v1025_v3, %v1024_v61  ;;  %v1030_v50 = vmul.f32 %v2907_v10, %v2112_v12 }
  0xac   : > { %1856 = vst [vmem:[%s2083_s28 + $0x2c0] sm:$0xff] %v2990_v43  ;;  %v1000_v7 = vadd.f32 %v999_v34, %v998_v26  ;;  %v1031_v53 = vmul.f32 %v2917_v2, %v2145_v29  ;;  %v1033_v6 = vmul.f32 %v941_v52, %v2165_v45  ;;  %v1035_v54 = vmul.f32 %v949_v13, %v2186_v1 }
  0xad   : > { %1858 = vst [vmem:[%s2083_s28 + $0x2c8] sm:$0xff] %v3000_v40  ;;  %v1028_v51 = vadd.f32 %v1027_v47, %v1026_v36  ;;  %v1062_v24 = vmul.f32 %v2979_v22, %v2092_v4  ;;  %v1063_v10 = vmul.f32 %v2982_v23, %v2125_v18  ;;  %v1065_v27 = vmul.f32 %v3003_v42, %v2155_v37 }
  0xae   : > { %1859 = vst [vmem:[%s2083_s28 + $0x130] sm:$0xff] %v3003_v42  ;;  %v1002_v2 = vadd.f32 %v1001_v16, %v1000_v7  ;;  %v1032_v49 = vadd.f32 %v1031_v53, %v1030_v50  ;;  %v1094_v52 = vmul.f32 %v2990_v43, %v2092_v4  ;;  %v1095_v13 = vmul.f32 %v3000_v40, %v2125_v18 }
  0xaf   : > { %v1029_v41 = vadd.f32 %v2692_v17, %v1028_v51  ;;  %v1064_v28 = vadd.f32 %v1063_v10, %v1062_v24  ;;  %v1070_v11 = vmul.f32 %v2979_v22, %v2094_v5  ;;  %v1071_v20 = vmul.f32 %v2982_v23, %v2133_v21 }
  0xb0   : > { %v1004_v62 = vadd.f32 %v1003_v56, %v1002_v2  ;;  %v1034_v39 = vadd.f32 %v1033_v6, %v1032_v49  ;;  %v1096_v35 = vadd.f32 %v1095_v13, %v1094_v52  ;;  %v1073_v32 = vmul.f32 %v3003_v42, %v2158_v38 }
  0xb1   : > { %1860 = vst [vmem:[%s2083_s28 + $0x2d0] sm:$0xff] %v1029_v41  ;;  %v1066_v31 = vadd.f32 %v1065_v27, %v1064_v28  ;;  %v1097_v55 = vmul.f32 %v1029_v41, %v2155_v37  ;;  %v1072_v19 = vadd.f32 %v1071_v20, %v1070_v11  ;;  %v1102_v17 = vmul.f32 %v2990_v43, %v2094_v5 }
  0xb2   : > { %v1005_v30 = vadd.f32 %v2756_v14, %v1004_v62  ;;  %v1036_v46 = vadd.f32 %v1035_v54, %v1034_v39  ;;  %v1103_v3 = vmul.f32 %v3000_v40, %v2133_v21  ;;  %v1105_v59 = vmul.f32 %v1029_v41, %v2158_v38 }
  0xb3   : > { %v1098_v47 = vadd.f32 %v1097_v55, %v1096_v35  ;;  %v1074_v33 = vadd.f32 %v1073_v32, %v1072_v19  ;;  %v1078_v48 = vmul.f32 %v2979_v22, %v2102_v8  ;;  %v1079_v61 = vmul.f32 %v2982_v23, %v2138_v25  ;;  %v3563_v32 = vld [vmem:[#allocation5_spill] sm:$0xff] }
  0xb4   : > { %1861 = vst [vmem:[%s2083_s28 + $0x138] sm:$0xff] %v1005_v30  ;;  %v1037_v26 = vadd.f32 %v2745_v60, %v1036_v46  ;;  %v1067_v14 = vmul.f32 %v1005_v30, %v2174_v57  ;;  %v1075_v34 = vmul.f32 %v1005_v30, %v2177_v58  ;;  %v1104_v16 = vadd.f32 %v1103_v3, %v1102_v17 }
  0xb5   : > { %v1080_v56 = vadd.f32 %v1079_v61, %v1078_v48  ;;  %v1081_v36 = vmul.f32 %v3003_v42, %v2163_v44  ;;  %v1083_v50 = vmul.f32 %v1005_v30, %v2184_v0  ;;  %v1110_v7 = vmul.f32 %v2990_v43, %v2102_v8  ;;  %v3565_v48 = vld [vmem:[#allocation6_spill] sm:$0xff] }
  0xb6   : > { %1862 = vst [vmem:[%s2083_s28 + $0x2d8] sm:$0xff] %v1037_v26  ;;  %v1068_v53 = vadd.f32 %v1067_v14, %v1066_v31  ;;  %v1099_v6 = vmul.f32 %v1037_v26, %v2174_v57  ;;  %v1076_v60 = vadd.f32 %v1075_v34, %v1074_v33  ;;  %v1106_v54 = vadd.f32 %v1105_v59, %v1104_v16 }
  0xb7   : > { %v1107_v51 = vmul.f32 %v1037_v26, %v2177_v58  ;;  %v1082_v24 = vadd.f32 %v1081_v36, %v1080_v56  ;;  %v1111_v10 = vmul.f32 %v3000_v40, %v2138_v25  ;;  %v1113_v27 = vmul.f32 %v1029_v41, %v2163_v44 }
  0xb8   : > { %v3062_v2 = vadd.f32 %v2561_v15, %v1068_v53  ;;  %v1100_v49 = vadd.f32 %v1099_v6, %v1098_v47  ;;  %v3065_v52 = vadd.f32 %v2575_v9, %v1076_v60  ;;  %v1115_v13 = vmul.f32 %v1037_v26, %v2184_v0 }
  0xb9   : > { %v1108_v28 = vadd.f32 %v1107_v51, %v1106_v54  ;;  %v1084_v11 = vadd.f32 %v1083_v50, %v1082_v24  ;;  %v1112_v20 = vadd.f32 %v1111_v10, %v1110_v7  ;;  %v1086_v62 = vmul.f32 %v2979_v22, %v2112_v12  ;;  %v3564_v22 = vld [vmem:[#allocation7_spill] sm:$0xff]  ;;  %v3566_v54 = vld [vmem:[#allocation9_spill] sm:$0xff] }
  0xba   : > { %1871 = vst [vmem:[%s2083_s28 + $0x140] sm:$0xff] %v3062_v2  ;;  %v3073_v39 = vadd.f32 %v2548_v63, %v1100_v49  ;;  %v1087_v15 = vmul.f32 %v2982_v23, %v2145_v29  ;;  %v1089_v9 = vmul.f32 %v3003_v42, %v2165_v45  ;;  %v1091_v35 = vmul.f32 %v1005_v30, %v2186_v1 }
  0xbb   : > { %1873 = vst [vmem:[%s2083_s28 + $0x148] sm:$0xff] %v3065_v52  ;;  %v3083_v31 = vadd.f32 %v3563_v32, %v1108_v28  ;;  %v3086_v55 = vadd.f32 %v3564_v22, %v1084_v11  ;;  %v1114_v19 = vadd.f32 %v1113_v27, %v1112_v20  ;;  %v1118_v63 = vmul.f32 %v2990_v43, %v2112_v12  ;;  %v3567_v20 = vld [vmem:[#allocation8_spill] sm:$0xff]  ;;  %v1879_v32 = vld [vmem:[%s2078_s24 + $0x160] sm:$0xff]  ;;  %v1880_v22 = vld [vmem:[%s2078_s24 + $0x168] sm:$0xff] }
  0xbc   : > { %1872 = vst [vmem:[%s2083_s28 + $0x2a0] sm:$0xff] %v3073_v39  ;;  %v1088_v23 = vadd.f32 %v1087_v15, %v1086_v62  ;;  %v1119_v42 = vmul.f32 %v3000_v40, %v2145_v29  ;;  %v1121_v17 = vmul.f32 %v1029_v41, %v2165_v45  ;;  %v1123_v30 = vmul.f32 %v1037_v26, %v2186_v1 }
  0xbd   : > { %1874 = vst [vmem:[%s2083_s28 + $0x2a8] sm:$0xff] %v3083_v31  ;;  %v1116_v46 = vadd.f32 %v1115_v13, %v1114_v19  ;;  %v1150_v3 = vmul.f32 %v3062_v2, %v2092_v4  ;;  %v1151_v43 = vmul.f32 %v3065_v52, %v2125_v18  ;;  %v1153_v59 = vmul.f32 %v3086_v55, %v2155_v37 }
  0xbe   : > { %1875 = vst [vmem:[%s2083_s28 + $0x150] sm:$0xff] %v3086_v55  ;;  %v1090_v40 = vadd.f32 %v1089_v9, %v1088_v23  ;;  %v1120_v47 = vadd.f32 %v1119_v42, %v1118_v63  ;;  %v1182_v41 = vmul.f32 %v3073_v39, %v2092_v4  ;;  %v1183_v33 = vmul.f32 %v3083_v31, %v2125_v18 }
  0xbf   : > { %v3111_v61 = vadd.f32 %v3565_v48, %v1116_v46  ;;  %v1152_v26 = vadd.f32 %v1151_v43, %v1150_v3  ;;  %v1158_v14 = vmul.f32 %v3062_v2, %v2094_v5  ;;  %v1159_v34 = vmul.f32 %v3065_v52, %v2133_v21  ;;  %v1883_v43 = vld [vmem:[%s2078_s24 + $0x80] sm:$0xff] }
  0xc0   : > { %v1092_v16 = vadd.f32 %v1091_v35, %v1090_v40  ;;  %v1122_v56 = vadd.f32 %v1121_v17, %v1120_v47  ;;  %v1184_v36 = vadd.f32 %v1183_v33, %v1182_v41  ;;  %v1161_v50 = vmul.f32 %v3086_v55, %v2158_v38 }
  0xc1   : > { %1876 = vst [vmem:[%s2083_s28 + $0x2b0] sm:$0xff] %v3111_v61  ;;  %v1154_v7 = vadd.f32 %v1153_v59, %v1152_v26  ;;  %v1185_v53 = vmul.f32 %v3111_v61, %v2155_v37  ;;  %v1160_v6 = vadd.f32 %v1159_v34, %v1158_v14  ;;  %v1190_v60 = vmul.f32 %v3073_v39, %v2094_v5  ;;  %v1884_v14 = vld [vmem:[%s2078_s24 + $0x88] sm:$0xff]  ;;  %v1881_v34 = vld [vmem:[%s2078_s24 + $0x170] sm:$0xff] }
  0xc2   : > { %v1093_v51 = vadd.f32 %v3566_v54, %v1092_v16  ;;  %v1124_v24 = vadd.f32 %v1123_v30, %v1122_v56  ;;  %v1191_v10 = vmul.f32 %v3083_v31, %v2133_v21  ;;  %v1193_v27 = vmul.f32 %v3111_v61, %v2158_v38 }
  0xc3   : > { %v1186_v49 = vadd.f32 %v1185_v53, %v1184_v36  ;;  %v1162_v13 = vadd.f32 %v1161_v50, %v1160_v6  ;;  %v1166_v28 = vmul.f32 %v3062_v2, %v2102_v8  ;;  %v1167_v11 = vmul.f32 %v3065_v52, %v2138_v25 }
  0xc4   : > { %1877 = vst [vmem:[%s2083_s28 + $0x158] sm:$0xff] %v1093_v51  ;;  %v1125_v62 = vadd.f32 %v3567_v20, %v1124_v24  ;;  %v1155_v15 = vmul.f32 %v1093_v51, %v2174_v57  ;;  %v1163_v9 = vmul.f32 %v1093_v51, %v2177_v58  ;;  %v1192_v35 = vadd.f32 %v1191_v10, %v1190_v60 }
  0xc5   : > { %v1168_v19 = vadd.f32 %v1167_v11, %v1166_v28  ;;  %v1169_v63 = vmul.f32 %v3086_v55, %v2163_v44  ;;  %v1171_v23 = vmul.f32 %v1093_v51, %v2184_v0  ;;  %v1198_v42 = vmul.f32 %v3073_v39, %v2102_v8 }
  0xc6   : > { %1878 = vst [vmem:[%s2083_s28 + $0x2b8] sm:$0xff] %v1125_v62  ;;  %v1156_v17 = vadd.f32 %v1155_v15, %v1154_v7  ;;  %v1187_v30 = vmul.f32 %v1125_v62, %v2174_v57  ;;  %v1164_v46 = vadd.f32 %v1163_v9, %v1162_v13  ;;  %v1194_v3 = vadd.f32 %v1193_v27, %v1192_v35  ;;  %v1882_v35 = vld [vmem:[%s2078_s24 + $0x178] sm:$0xff] }
  0xc7   : > { %v1195_v59 = vmul.f32 %v1125_v62, %v2177_v58  ;;  %v1170_v40 = vadd.f32 %v1169_v63, %v1168_v19  ;;  %v1199_v47 = vmul.f32 %v3083_v31, %v2138_v25  ;;  %v1201_v41 = vmul.f32 %v3111_v61, %v2163_v44 }
  0xc8   : > { %v3153_v33 = vadd.f32 %v1879_v32, %v1156_v17  ;;  %v1188_v48 = vadd.f32 %v1187_v30, %v1186_v49  ;;  %v3155_v26 = vadd.f32 %v1880_v22, %v1164_v46  ;;  %v1203_v16 = vmul.f32 %v1125_v62, %v2184_v0  ;;  %v1885_v49 = vld [vmem:[%s2078_s24 + $0x90] sm:$0xff]  ;;  %v1886_v30 = vld [vmem:[%s2078_s24 + $0x98] sm:$0xff] }
  0xc9   : > { %v1196_v56 = vadd.f32 %v1195_v59, %v1194_v3  ;;  %v1172_v36 = vadd.f32 %v1171_v23, %v1170_v40  ;;  %v1200_v50 = vadd.f32 %v1199_v47, %v1198_v42  ;;  %v1174_v7 = vmul.f32 %v3062_v2, %v2112_v12 }
  0xca   : > { %1887 = vst [vmem:[%s2083_s28 + $0x160] sm:$0xff] %v3153_v33  ;;  %v3164_v53 = vadd.f32 %v1883_v43, %v1188_v48  ;;  %v1175_v6 = vmul.f32 %v3065_v52, %v2145_v29  ;;  %v1177_v60 = vmul.f32 %v3086_v55, %v2165_v45  ;;  %v1179_v54 = vmul.f32 %v1093_v51, %v2186_v1 }
  0xcb   : > { %1889 = vst [vmem:[%s2083_s28 + $0x168] sm:$0xff] %v3155_v26  ;;  %v3173_v24 = vadd.f32 %v1884_v14, %v1196_v56  ;;  %v3175_v10 = vadd.f32 %v1881_v34, %v1172_v36  ;;  %v1202_v2 = vadd.f32 %v1201_v41, %v1200_v50  ;;  %v1206_v27 = vmul.f32 %v3073_v39, %v2112_v12 }
  0xcc   : > { %1888 = vst [vmem:[%s2083_s28 + $0x280] sm:$0xff] %v3164_v53  ;;  %v1176_v52 = vadd.f32 %v1175_v6, %v1174_v7  ;;  %v1207_v55 = vmul.f32 %v3083_v31, %v2145_v29  ;;  %v1209_v51 = vmul.f32 %v3111_v61, %v2165_v45  ;;  %v1211_v13 = vmul.f32 %v1125_v62, %v2186_v1 }
  0xcd   : > { %1890 = vst [vmem:[%s2083_s28 + $0x288] sm:$0xff] %v3173_v24  ;;  %v1204_v28 = vadd.f32 %v1203_v16, %v1202_v2  ;;  %v1238_v11 = vmul.f32 %v3153_v33, %v2092_v4  ;;  %v1239_v39 = vmul.f32 %v3155_v26, %v2125_v18  ;;  %v1241_v20 = vmul.f32 %v3175_v10, %v2155_v37 }
  0xce   : > { %1891 = vst [vmem:[%s2083_s28 + $0x170] sm:$0xff] %v3175_v10  ;;  %v1178_v31 = vadd.f32 %v1177_v60, %v1176_v52  ;;  %v1208_v61 = vadd.f32 %v1207_v55, %v1206_v27  ;;  %v1270_v62 = vmul.f32 %v3164_v53, %v2092_v4  ;;  %v1271_v15 = vmul.f32 %v3173_v24, %v2125_v18  ;;  %v1895_v60 = vld [vmem:[%s2078_s24 + $0x180] sm:$0xff] }
  0xcf   : > { %v3201_v9 = vadd.f32 %v1885_v49, %v1204_v28  ;;  %v1240_v32 = vadd.f32 %v1239_v39, %v1238_v11  ;;  %v1246_v22 = vmul.f32 %v3153_v33, %v2094_v5  ;;  %v1247_v19 = vmul.f32 %v3155_v26, %v2133_v21  ;;  %v1899_v11 = vld [vmem:[%s2078_s24 + $0x60] sm:$0xff] }
  0xd0   : > { %v1180_v63 = vadd.f32 %v1179_v54, %v1178_v31  ;;  %v1210_v23 = vadd.f32 %v1209_v51, %v1208_v61  ;;  %v1272_v42 = vadd.f32 %v1271_v15, %v1270_v62  ;;  %v1249_v17 = vmul.f32 %v3175_v10, %v2158_v38  ;;  %v1896_v54 = vld [vmem:[%s2078_s24 + $0x188] sm:$0xff] }
  0xd1   : > { %1892 = vst [vmem:[%s2083_s28 + $0x290] sm:$0xff] %v3201_v9  ;;  %v1242_v46 = vadd.f32 %v1241_v20, %v1240_v32  ;;  %v1273_v3 = vmul.f32 %v3201_v9, %v2155_v37  ;;  %v1248_v43 = vadd.f32 %v1247_v19, %v1246_v22  ;;  %v1278_v59 = vmul.f32 %v3164_v53, %v2094_v5  ;;  %v1900_v32 = vld [vmem:[%s2078_s24 + $0x68] sm:$0xff]  ;;  %v1897_v22 = vld [vmem:[%s2078_s24 + $0x190] sm:$0xff] }
  0xd2   : > { %v1181_v40 = vadd.f32 %v1882_v35, %v1180_v63  ;;  %v1212_v47 = vadd.f32 %v1211_v13, %v1210_v23  ;;  %v1279_v41 = vmul.f32 %v3173_v24, %v2133_v21  ;;  %v1281_v48 = vmul.f32 %v3201_v9, %v2158_v38 }
  0xd3   : > { %v1274_v14 = vadd.f32 %v1273_v3, %v1272_v42  ;;  %v1250_v34 = vadd.f32 %v1249_v17, %v1248_v43  ;;  %v1254_v16 = vmul.f32 %v3153_v33, %v2102_v8  ;;  %v1255_v56 = vmul.f32 %v3155_v26, %v2138_v25 }
  0xd4   : > { %1893 = vst [vmem:[%s2083_s28 + $0x178] sm:$0xff] %v1181_v40  ;;  %v1213_v36 = vadd.f32 %v1886_v30, %v1212_v47  ;;  %v1243_v50 = vmul.f32 %v1181_v40, %v2174_v57  ;;  %v1251_v7 = vmul.f32 %v1181_v40, %v2177_v58  ;;  %v1280_v6 = vadd.f32 %v1279_v41, %v1278_v59 }
  0xd5   : > { %v1256_v2 = vadd.f32 %v1255_v56, %v1254_v16  ;;  %v1257_v27 = vmul.f32 %v3175_v10, %v2163_v44  ;;  %v1259_v49 = vmul.f32 %v1181_v40, %v2184_v0  ;;  %v1286_v52 = vmul.f32 %v3164_v53, %v2102_v8 }
  0xd6   : > { %1894 = vst [vmem:[%s2083_s28 + $0x298] sm:$0xff] %v1213_v36  ;;  %v1244_v55 = vadd.f32 %v1243_v50, %v1242_v46  ;;  %v1275_v51 = vmul.f32 %v1213_v36, %v2174_v57  ;;  %v1252_v13 = vadd.f32 %v1251_v7, %v1250_v34  ;;  %v1282_v28 = vadd.f32 %v1281_v48, %v1280_v6  ;;  %v1901_v48 = vld [vmem:[%s2078_s24 + $0x70] sm:$0xff]  ;;  %v1898_v6 = vld [vmem:[%s2078_s24 + $0x198] sm:$0xff] }
  0xd7   : > { %v1283_v39 = vmul.f32 %v1213_v36, %v2177_v58  ;;  %v1258_v20 = vadd.f32 %v1257_v27, %v1256_v2  ;;  %v1287_v31 = vmul.f32 %v3173_v24, %v2138_v25  ;;  %v1289_v61 = vmul.f32 %v3201_v9, %v2163_v44 }
  0xd8   : > { %v3243_v62 = vadd.f32 %v1895_v60, %v1244_v55  ;;  %v1276_v15 = vadd.f32 %v1275_v51, %v1274_v14  ;;  %v3245_v35 = vadd.f32 %v1896_v54, %v1252_v13  ;;  %v1291_v19 = vmul.f32 %v1213_v36, %v2184_v0  ;;  %v1902_v51 = vld [vmem:[%s2078_s24 + $0x78] sm:$0xff] }
  0xd9   : > { %v1284_v63 = vadd.f32 %v1283_v39, %v1282_v28  ;;  %v1260_v23 = vadd.f32 %v1259_v49, %v1258_v20  ;;  %v1288_v42 = vadd.f32 %v1287_v31, %v1286_v52  ;;  %v1262_v17 = vmul.f32 %v3153_v33, %v2112_v12 }
  0xda   : > { %1903 = vst [vmem:[%s2083_s28 + $0x180] sm:$0xff] %v3243_v62  ;;  %v3254_v30 = vadd.f32 %v1899_v11, %v1276_v15  ;;  %v1263_v46 = vmul.f32 %v3155_v26, %v2145_v29  ;;  %v1265_v3 = vmul.f32 %v3175_v10, %v2165_v45  ;;  %v1267_v43 = vmul.f32 %v1181_v40, %v2186_v1 }
  0xdb   : > { %1905 = vst [vmem:[%s2083_s28 + $0x188] sm:$0xff] %v3245_v35  ;;  %v3263_v59 = vadd.f32 %v1900_v32, %v1284_v63  ;;  %v3265_v47 = vadd.f32 %v1897_v22, %v1260_v23  ;;  %v1290_v33 = vadd.f32 %v1289_v61, %v1288_v42  ;;  %v1294_v41 = vmul.f32 %v3164_v53, %v2112_v12 }
  0xdc   : > { %1904 = vst [vmem:[%s2083_s28 + $0x260] sm:$0xff] %v3254_v30  ;;  %v1264_v26 = vadd.f32 %v1263_v46, %v1262_v17  ;;  %v1295_v10 = vmul.f32 %v3173_v24, %v2145_v29  ;;  %v1297_v40 = vmul.f32 %v3201_v9, %v2165_v45  ;;  %v1299_v14 = vmul.f32 %v1213_v36, %v2186_v1 }
  0xdd   : > { %1906 = vst [vmem:[%s2083_s28 + $0x268] sm:$0xff] %v3263_v59  ;;  %v1292_v34 = vadd.f32 %v1291_v19, %v1290_v33  ;;  %v1326_v16 = vmul.f32 %v3243_v62, %v2092_v4  ;;  %v1327_v53 = vmul.f32 %v3245_v35, %v2125_v18  ;;  %v1329_v56 = vmul.f32 %v3265_v47, %v2155_v37 }
  0xde   : > { %1907 = vst [vmem:[%s2083_s28 + $0x190] sm:$0xff] %v3265_v47  ;;  %v1266_v24 = vadd.f32 %v1265_v3, %v1264_v26  ;;  %v1296_v9 = vadd.f32 %v1295_v10, %v1294_v41  ;;  %v1358_v36 = vmul.f32 %v3254_v30, %v2092_v4  ;;  %v1359_v50 = vmul.f32 %v3263_v59, %v2125_v18  ;;  %v1911_v3 = vld [vmem:[%s2078_s24 + $0x1a0] sm:$0xff] }
  0xdf   : > { %v3291_v7 = vadd.f32 %v1901_v48, %v1292_v34  ;;  %v1328_v60 = vadd.f32 %v1327_v53, %v1326_v16  ;;  %v1334_v54 = vmul.f32 %v3243_v62, %v2094_v5  ;;  %v1335_v2 = vmul.f32 %v3245_v35, %v2133_v21  ;;  %v1915_v16 = vld [vmem:[%s2078_s24 + $0x40] sm:$0xff] }
  0xe0   : > { %v1268_v27 = vadd.f32 %v1267_v43, %v1266_v24  ;;  %v1298_v49 = vadd.f32 %v1297_v40, %v1296_v9  ;;  %v1360_v52 = vadd.f32 %v1359_v50, %v1358_v36  ;;  %v1337_v55 = vmul.f32 %v3265_v47, %v2158_v38  ;;  %v1912_v43 = vld [vmem:[%s2078_s24 + $0x1a8] sm:$0xff] }
  0xe1   : > { %1908 = vst [vmem:[%s2083_s28 + $0x270] sm:$0xff] %v3291_v7  ;;  %v1330_v13 = vadd.f32 %v1329_v56, %v1328_v60  ;;  %v1361_v28 = vmul.f32 %v3291_v7, %v2155_v37  ;;  %v1336_v11 = vadd.f32 %v1335_v2, %v1334_v54  ;;  %v1366_v39 = vmul.f32 %v3254_v30, %v2094_v5  ;;  %v1916_v60 = vld [vmem:[%s2078_s24 + $0x48] sm:$0xff]  ;;  %v1913_v54 = vld [vmem:[%s2078_s24 + $0x1b0] sm:$0xff] }
  0xe2   : > { %v1269_v20 = vadd.f32 %v1898_v6, %v1268_v27  ;;  %v1300_v31 = vadd.f32 %v1299_v14, %v1298_v49  ;;  %v1367_v61 = vmul.f32 %v3263_v59, %v2133_v21  ;;  %v1369_v15 = vmul.f32 %v3291_v7, %v2158_v38 }
  0xe3   : > { %v1362_v32 = vadd.f32 %v1361_v28, %v1360_v52  ;;  %v1338_v22 = vadd.f32 %v1337_v55, %v1336_v11  ;;  %v1342_v19 = vmul.f32 %v3243_v62, %v2102_v8  ;;  %v1343_v63 = vmul.f32 %v3245_v35, %v2138_v25 }
  0xe4   : > { %1909 = vst [vmem:[%s2083_s28 + $0x198] sm:$0xff] %v1269_v20  ;;  %v1301_v23 = vadd.f32 %v1902_v51, %v1300_v31  ;;  %v1331_v42 = vmul.f32 %v1269_v20, %v2174_v57  ;;  %v1339_v17 = vmul.f32 %v1269_v20, %v2177_v58  ;;  %v1368_v46 = vadd.f32 %v1367_v61, %v1366_v39 }
  0xe5   : > { %v1344_v33 = vadd.f32 %v1343_v63, %v1342_v19  ;;  %v1345_v41 = vmul.f32 %v3265_v47, %v2163_v44  ;;  %v1347_v48 = vmul.f32 %v1269_v20, %v2184_v0  ;;  %v1374_v26 = vmul.f32 %v3254_v30, %v2102_v8 }
  0xe6   : > { %1910 = vst [vmem:[%s2083_s28 + $0x278] sm:$0xff] %v1301_v23  ;;  %v1332_v10 = vadd.f32 %v1331_v42, %v1330_v13  ;;  %v1363_v40 = vmul.f32 %v1301_v23, %v2174_v57  ;;  %v1340_v14 = vadd.f32 %v1339_v17, %v1338_v22  ;;  %v1370_v34 = vadd.f32 %v1369_v15, %v1368_v46  ;;  %v1917_v15 = vld [vmem:[%s2078_s24 + $0x50] sm:$0xff]  ;;  %v1914_v46 = vld [vmem:[%s2078_s24 + $0x1b8] sm:$0xff] }
  0xe7   : > { %v1371_v53 = vmul.f32 %v1301_v23, %v2177_v58  ;;  %v1346_v56 = vadd.f32 %v1345_v41, %v1344_v33  ;;  %v1375_v24 = vmul.f32 %v3263_v59, %v2138_v25  ;;  %v1377_v9 = vmul.f32 %v3291_v7, %v2163_v44 }
  0xe8   : > { %v3333_v36 = vadd.f32 %v1911_v3, %v1332_v10  ;;  %v1364_v50 = vadd.f32 %v1363_v40, %v1362_v32  ;;  %v3335_v6 = vadd.f32 %v1912_v43, %v1340_v14  ;;  %v1379_v2 = vmul.f32 %v1301_v23, %v2184_v0  ;;  %v1918_v40 = vld [vmem:[%s2078_s24 + $0x58] sm:$0xff] }
  0xe9   : > { %v1372_v27 = vadd.f32 %v1371_v53, %v1370_v34  ;;  %v1348_v49 = vadd.f32 %v1347_v48, %v1346_v56  ;;  %v1376_v52 = vadd.f32 %v1375_v24, %v1374_v26  ;;  %v1350_v55 = vmul.f32 %v3243_v62, %v2112_v12 }
  0xea   : > { %1919 = vst [vmem:[%s2083_s28 + $0x1a0] sm:$0xff] %v3333_v36  ;;  %v3344_v51 = vadd.f32 %v1915_v16, %v1364_v50  ;;  %v1351_v13 = vmul.f32 %v3245_v35, %v2145_v29  ;;  %v1353_v28 = vmul.f32 %v3265_v47, %v2165_v45  ;;  %v1355_v11 = vmul.f32 %v1269_v20, %v2186_v1 }
  0xeb   : > { %1921 = vst [vmem:[%s2083_s28 + $0x1a8] sm:$0xff] %v3335_v6  ;;  %v3353_v39 = vadd.f32 %v1916_v60, %v1372_v27  ;;  %v3355_v31 = vadd.f32 %v1913_v54, %v1348_v49  ;;  %v1378_v62 = vadd.f32 %v1377_v9, %v1376_v52  ;;  %v1382_v61 = vmul.f32 %v3254_v30, %v2112_v12 }
  0xec   : > { %1920 = vst [vmem:[%s2083_s28 + $0x240] sm:$0xff] %v3344_v51  ;;  %v1352_v35 = vadd.f32 %v1351_v13, %v1350_v55  ;;  %v1383_v47 = vmul.f32 %v3263_v59, %v2145_v29  ;;  %v1385_v20 = vmul.f32 %v3291_v7, %v2165_v45  ;;  %v1387_v32 = vmul.f32 %v1301_v23, %v2186_v1 }
  0xed   : > { %1922 = vst [vmem:[%s2083_s28 + $0x248] sm:$0xff] %v3353_v39  ;;  %v1380_v22 = vadd.f32 %v1379_v2, %v1378_v62  ;;  %v1414_v19 = vmul.f32 %v3333_v36, %v2092_v4  ;;  %v1415_v30 = vmul.f32 %v3335_v6, %v2125_v18  ;;  %v1417_v63 = vmul.f32 %v3355_v31, %v2155_v37 }
  0xee   : > { %1923 = vst [vmem:[%s2083_s28 + $0x1b0] sm:$0xff] %v3355_v31  ;;  %v1354_v59 = vadd.f32 %v1353_v28, %v1352_v35  ;;  %v1384_v7 = vadd.f32 %v1383_v47, %v1382_v61  ;;  %v1446_v23 = vmul.f32 %v3344_v51, %v2092_v4  ;;  %v1447_v42 = vmul.f32 %v3353_v39, %v2125_v18  ;;  %v1927_v28 = vld [vmem:[%s2078_s24 + $0x1c0] sm:$0xff] }
  0xef   : > { %v3381_v17 = vadd.f32 %v1917_v15, %v1380_v22  ;;  %v1416_v3 = vadd.f32 %v1415_v30, %v1414_v19  ;;  %v1422_v43 = vmul.f32 %v3333_v36, %v2094_v5  ;;  %v1423_v33 = vmul.f32 %v3335_v6, %v2133_v21  ;;  %v1931_v19 = vld [vmem:[%s2078_s24 + $0x20] sm:$0xff] }
  0xf0   : > { %v1356_v41 = vadd.f32 %v1355_v11, %v1354_v59  ;;  %v1386_v48 = vadd.f32 %v1385_v20, %v1384_v7  ;;  %v1448_v26 = vadd.f32 %v1447_v42, %v1446_v23  ;;  %v1425_v10 = vmul.f32 %v3355_v31, %v2158_v38  ;;  %v1928_v11 = vld [vmem:[%s2078_s24 + $0x1c8] sm:$0xff] }
  0xf1   : > { %1924 = vst [vmem:[%s2083_s28 + $0x250] sm:$0xff] %v3381_v17  ;;  %v1418_v14 = vadd.f32 %v1417_v63, %v1416_v3  ;;  %v1449_v34 = vmul.f32 %v3381_v17, %v2155_v37  ;;  %v1424_v16 = vadd.f32 %v1423_v33, %v1422_v43  ;;  %v1454_v53 = vmul.f32 %v3344_v51, %v2094_v5  ;;  %v1932_v3 = vld [vmem:[%s2078_s24 + $0x28] sm:$0xff]  ;;  %v1929_v43 = vld [vmem:[%s2078_s24 + $0x1d0] sm:$0xff] }
  0xf2   : > { %v1357_v56 = vadd.f32 %v1914_v46, %v1356_v41  ;;  %v1388_v24 = vadd.f32 %v1387_v32, %v1386_v48  ;;  %v1455_v9 = vmul.f32 %v3353_v39, %v2133_v21  ;;  %v1457_v50 = vmul.f32 %v3381_v17, %v2158_v38 }
  0xf3   : > { %v1450_v60 = vadd.f32 %v1449_v34, %v1448_v26  ;;  %v1426_v54 = vadd.f32 %v1425_v10, %v1424_v16  ;;  %v1430_v2 = vmul.f32 %v3333_v36, %v2102_v8  ;;  %v1431_v27 = vmul.f32 %v3335_v6, %v2138_v25 }
  0xf4   : > { %1925 = vst [vmem:[%s2083_s28 + $0x1b8] sm:$0xff] %v1357_v56  ;;  %v1389_v49 = vadd.f32 %v1918_v40, %v1388_v24  ;;  %v1419_v52 = vmul.f32 %v1357_v56, %v2174_v57  ;;  %v1427_v55 = vmul.f32 %v1357_v56, %v2177_v58  ;;  %v1456_v13 = vadd.f32 %v1455_v9, %v1454_v53 }
  0xf5   : > { %v1432_v62 = vadd.f32 %v1431_v27, %v1430_v2  ;;  %v1433_v61 = vmul.f32 %v3355_v31, %v2163_v44  ;;  %v1435_v15 = vmul.f32 %v1357_v56, %v2184_v0  ;;  %v1462_v35 = vmul.f32 %v3344_v51, %v2102_v8 }
  0xf6   : > { %1926 = vst [vmem:[%s2083_s28 + $0x258] sm:$0xff] %v1389_v49  ;;  %v1420_v47 = vadd.f32 %v1419_v52, %v1418_v14  ;;  %v1451_v20 = vmul.f32 %v1389_v49, %v2174_v57  ;;  %v1428_v32 = vadd.f32 %v1427_v55, %v1426_v54  ;;  %v1458_v22 = vadd.f32 %v1457_v50, %v1456_v13  ;;  %v1933_v50 = vld [vmem:[%s2078_s24 + $0x30] sm:$0xff]  ;;  %v1930_v13 = vld [vmem:[%s2078_s24 + $0x1d8] sm:$0xff] }
  0xf7   : > { %v1459_v30 = vmul.f32 %v1389_v49, %v2177_v58  ;;  %v1434_v63 = vadd.f32 %v1433_v61, %v1432_v62  ;;  %v1463_v59 = vmul.f32 %v3353_v39, %v2138_v25  ;;  %v1465_v7 = vmul.f32 %v3381_v17, %v2163_v44 }
  0xf8   : > { %v3423_v23 = vadd.f32 %v1927_v28, %v1420_v47  ;;  %v1452_v42 = vadd.f32 %v1451_v20, %v1450_v60  ;;  %v3425_v46 = vadd.f32 %v1928_v11, %v1428_v32  ;;  %v1467_v33 = vmul.f32 %v1389_v49, %v2184_v0 }
  0xf9   : > { %v1460_v41 = vadd.f32 %v1459_v30, %v1458_v22  ;;  %v1436_v48 = vadd.f32 %v1435_v15, %v1434_v63  ;;  %v1464_v26 = vadd.f32 %v1463_v59, %v1462_v35  ;;  %v1438_v10 = vmul.f32 %v3333_v36, %v2112_v12 }
  0xfa   : > { %1935 = vst [vmem:[%s2083_s28 + $0x1c0] sm:$0xff] %v3423_v23  ;;  %v3434_v40 = vadd.f32 %v1931_v19, %v1452_v42  ;;  %v1439_v14 = vmul.f32 %v3335_v6, %v2145_v29  ;;  %v1441_v34 = vmul.f32 %v3355_v31, %v2165_v45  ;;  %v1443_v16 = vmul.f32 %v1357_v56, %v2186_v1 }
  0xfb   : > { %1937 = vst [vmem:[%s2083_s28 + $0x1c8] sm:$0xff] %v3425_v46  ;;  %v3443_v53 = vadd.f32 %v1932_v3, %v1460_v41  ;;  %v3445_v24 = vadd.f32 %v1929_v43, %v1436_v48  ;;  %v1466_v36 = vadd.f32 %v1465_v7, %v1464_v26  ;;  %v1470_v9 = vmul.f32 %v3344_v51, %v2112_v12  ;;  %v1943_v41 = vld [vmem:[%s2078_s24 + $0x1e0] sm:$0xff]  ;;  %v1944_v48 = vld [vmem:[%s2078_s24 + $0x1e8] sm:$0xff] }
  0xfc   : > { %1936 = vst [vmem:[%s2083_s28 + $0x220] sm:$0xff] %v3434_v40  ;;  %v1440_v6 = vadd.f32 %v1439_v14, %v1438_v10  ;;  %v1471_v31 = vmul.f32 %v3353_v39, %v2145_v29  ;;  %v1473_v56 = vmul.f32 %v3381_v17, %v2165_v45  ;;  %v1475_v60 = vmul.f32 %v1389_v49, %v2186_v1 }
  0xfd   : > { %1938 = vst [vmem:[%s2083_s28 + $0x228] sm:$0xff] %v3443_v53  ;;  %v1468_v54 = vadd.f32 %v1467_v33, %v1466_v36  ;;  %v1502_v2 = vmul.f32 %v3423_v23, %v2092_v4  ;;  %v1503_v51 = vmul.f32 %v3425_v46, %v2125_v18  ;;  %v1505_v27 = vmul.f32 %v3445_v24, %v2155_v37 }
  0xfe   : > { %1939 = vst [vmem:[%s2083_s28 + $0x1d0] sm:$0xff] %v3445_v24  ;;  %v1442_v39 = vadd.f32 %v1441_v34, %v1440_v6  ;;  %v1472_v17 = vadd.f32 %v1471_v31, %v1470_v9  ;;  %v1534_v49 = vmul.f32 %v3434_v40, %v2092_v4  ;;  %v1535_v52 = vmul.f32 %v3443_v53, %v2125_v18  ;;  %v1934_v18 = vld [vmem:[%s2078_s24 + $0x38] sm:$0xff] }
  0xff   : > { %v3471_v55 = vadd.f32 %v1933_v50, %v1468_v54  ;;  %v1504_v28 = vadd.f32 %v1503_v51, %v1502_v2  ;;  %v1510_v11 = vmul.f32 %v3423_v23, %v2094_v5  ;;  %v1511_v62 = vmul.f32 %v3425_v46, %v2133_v21  ;;  %v1498_v50 = vld [vmem:[%s2078_s24] sm:$0xff]  ;;  %v1499_v51 = vld [vmem:[%s2078_s24 + $0x8] sm:$0xff] }
 0x100   : > { %v1444_v61 = vadd.f32 %v1443_v16, %v1442_v39  ;;  %v1474_v15 = vadd.f32 %v1473_v56, %v1472_v17  ;;  %v1536_v35 = vadd.f32 %v1535_v52, %v1534_v49  ;;  %v1513_v4 = vmul.f32 %v3445_v24, %v2158_v38 }
 0x101   : > { %1940 = vst [vmem:[%s2083_s28 + $0x230] sm:$0xff] %v3471_v55  ;;  %v1506_v47 = vadd.f32 %v1505_v27, %v1504_v28  ;;  %v1537_v20 = vmul.f32 %v3471_v55, %v2155_v37  ;;  %v1512_v32 = vadd.f32 %v1511_v62, %v1510_v11  ;;  %v1542_v22 = vmul.f32 %v3434_v40, %v2094_v5 }
 0x102   : > { %v1445_v19 = vadd.f32 %v1930_v13, %v1444_v61  ;;  %v1476_v30 = vadd.f32 %v1475_v60, %v1474_v15  ;;  %v1543_v63 = vmul.f32 %v3443_v53, %v2133_v21  ;;  %v1545_v59 = vmul.f32 %v3471_v55, %v2158_v38 }
 0x103   : > { %v1538_v7 = vadd.f32 %v1537_v20, %v1536_v35  ;;  %v1514_v42 = vadd.f32 %v1513_v4, %v1512_v32  ;;  %v1518_v37 = vmul.f32 %v3423_v23, %v2102_v8  ;;  %v1519_v3 = vmul.f32 %v3425_v46, %v2138_v25  ;;  %v1501_v32 = vld [vmem:[%s2078_s24 + $0x18] sm:$0xff] }
 0x104   : > { %1941 = vst [vmem:[%s2083_s28 + $0x1d8] sm:$0xff] %v1445_v19  ;;  %v1477_v5 = vadd.f32 %v1934_v18, %v1476_v30  ;;  %v1507_v43 = vmul.f32 %v1445_v19, %v2174_v57  ;;  %v1515_v33 = vmul.f32 %v1445_v19, %v2177_v58  ;;  %v1544_v21 = vadd.f32 %v1543_v63, %v1542_v22  ;;  %v1946_v18 = vld [vmem:[%s2078_s24 + $0x1f8] sm:$0xff] }
 0x105   : > { %v1520_v38 = vadd.f32 %v1519_v3, %v1518_v37  ;;  %v1521_v26 = vmul.f32 %v3445_v24, %v2163_v44  ;;  %v1523_v10 = vmul.f32 %v1445_v19, %v2184_v0  ;;  %v1550_v14 = vmul.f32 %v3434_v40, %v2102_v8 }
 0x106   : > { %1942 = vst [vmem:[%s2083_s28 + $0x238] sm:$0xff] %v1477_v5  ;;  %v1508_v34 = vadd.f32 %v1507_v43, %v1506_v47  ;;  %v1539_v16 = vmul.f32 %v1477_v5, %v2174_v57  ;;  %v1516_v36 = vadd.f32 %v1515_v33, %v1514_v42  ;;  %v1546_v9 = vadd.f32 %v1545_v59, %v1544_v21  ;;  %v1945_v57 = vld [vmem:[%s2078_s24 + $0x1f0] sm:$0xff] }
 0x107   : > { %v1547_v6 = vmul.f32 %v1477_v5, %v2177_v58  ;;  %v1522_v31 = vadd.f32 %v1521_v26, %v1520_v38  ;;  %v1551_v56 = vmul.f32 %v3443_v53, %v2138_v25  ;;  %v1553_v60 = vmul.f32 %v3471_v55, %v2163_v44 }
 0x108   : > { %v1509_v54 = vadd.f32 %v1943_v41, %v1508_v34  ;;  %v1540_v8 = vadd.f32 %v1539_v16, %v1538_v7  ;;  %v1517_v2 = vadd.f32 %v1944_v48, %v1516_v36  ;;  %v1555_v27 = vmul.f32 %v1477_v5, %v2184_v0 }
 0x109   : > { %v1548_v39 = vadd.f32 %v1547_v6, %v1546_v9  ;;  %v1524_v17 = vadd.f32 %v1523_v10, %v1522_v31  ;;  %v1552_v58 = vadd.f32 %v1551_v56, %v1550_v14  ;;  %v1526_v49 = vmul.f32 %v3423_v23, %v2112_v12  ;;  %v1500_v23 = vld [vmem:[%s2078_s24 + $0x10] sm:$0xff] }
 0x10a   : > { %1947 = vst [vmem:[%s2083_s28 + $0x1e0] sm:$0xff] %v1509_v54  ;;  %v1541_v25 = vadd.f32 %v1540_v8, %v1498_v50  ;;  %v1527_v44 = vmul.f32 %v3425_v46, %v2145_v29  ;;  %v1529_v52 = vmul.f32 %v3445_v24, %v2165_v45  ;;  %v1558_v11 = vmul.f32 %v3434_v40, %v2112_v12 }
 0x10b   : > { %1949 = vst [vmem:[%s2083_s28 + $0x1e8] sm:$0xff] %v1517_v2  ;;  %v1549_v13 = vadd.f32 %v1548_v39, %v1499_v51  ;;  %v1525_v28 = vadd.f32 %v1945_v57, %v1524_v17  ;;  %v1554_v0 = vadd.f32 %v1553_v60, %v1552_v58  ;;  %v1531_v61 = vmul.f32 %v1445_v19, %v2186_v1 }
 0x10c   : > { %1948 = vst [vmem:[%s2083_s28 + $0x200] sm:$0xff] %v1541_v25  ;;  %v1528_v62 = vadd.f32 %v1527_v44, %v1526_v49  ;;  %v1559_v46 = vmul.f32 %v3443_v53, %v2145_v29  ;;  %v1561_v24 = vmul.f32 %v3471_v55, %v2165_v45  ;;  %v1563_v40 = vmul.f32 %v1477_v5, %v2186_v1 }
 0x10d   : > { %1950 = vst [vmem:[%s2083_s28 + $0x208] sm:$0xff] %v1549_v13  ;;  %v1556_v15 = vadd.f32 %v1555_v27, %v1554_v0 }
 0x10e   : > { %1951 = vst [vmem:[%s2083_s28 + $0x1f0] sm:$0xff] %v1525_v28  ;;  %v1530_v35 = vadd.f32 %v1529_v52, %v1528_v62  ;;  %v1560_v12 = vadd.f32 %v1559_v46, %v1558_v11 }
 0x10f   : > { %v1557_v4 = vadd.f32 %v1556_v15, %v1500_v23 }
 0x110   : > { %v1532_v47 = vadd.f32 %v1531_v61, %v1530_v35  ;;  %v1562_v20 = vadd.f32 %v1561_v24, %v1560_v12 }
 0x111   : > { %1952 = vst [vmem:[%s2083_s28 + $0x210] sm:$0xff] %v1557_v4 }
 0x112   : > { %v1533_v22 = vadd.f32 %v1946_v18, %v1532_v47  ;;  %v1564_v29 = vadd.f32 %v1563_v40, %v1562_v20 }
 0x114   : > { %1953 = vst [vmem:[%s2083_s28 + $0x1f8] sm:$0xff] %v1533_v22  ;;  %v1565_v53 = vadd.f32 %v1564_v29, %v1501_v32 }
 0x116   : > { %1954 = vst [vmem:[%s2083_s28 + $0x218] sm:$0xff] %v1565_v53 }
 0x117 PF: > { %s13_s11 = sadd.s32 1, %s2035_s11   ;;  %s3568_s9 = smov %s2031_s10 }
 0x118   : > { %p10_p9 = scmp.ge.s32.totalorder %s13_s11, 4   ;;  %s3569_s10 = smov %s3571_s13 }
 0x11a   :  { %12 = sbr.rel (!%p10_p9) target bundleno = 2 (0x2), region = 205 }
 0x11f   :  { %1612 = vsyncpa [#allocation3], 1 }
 0x120   :  { %1614 = vsyncpa [#allocation3 + $0x1], 1 }

</bundles_post_ra>
